<compile_context>
chip_gen: v7x
topology: tpu7x:2x2x1
jax: 0.10.0
libtpu: 0.0.40
codegen_flags: <defaults>
</compile_context>

<pallas_src>
import functools

import jax
import jax.numpy as jnp
import numpy as np
from jax.experimental import pallas as pl
from jax.experimental.pallas import tpu as pltpu


def _round_up(v, m):
    return (v + m - 1) // m * m


@functools.lru_cache(maxsize=None)
def _probe_roll_mode():
    """Determine pltpu.roll's shift convention with a tiny probe kernel.

    Returns "jnp" if pltpu.roll matches jnp.roll (out[i] = in[i - shift]), "neg" if it is
    the opposite convention, or None (fall back to plain slices) if roll is unusable.
    """
    try:
        x = jnp.arange(8 * 128, dtype=jnp.float32).reshape(8, 128)

        def probe_kernel(x_ref, o_ref):
            o_ref[...] = pltpu.roll(x_ref[...], shift=1, axis=1)

        y = pl.pallas_call(
            probe_kernel, out_shape=jax.ShapeDtypeStruct((8, 128), jnp.float32))(x)
        y = np.asarray(jax.block_until_ready(y))
        if np.array_equal(y, np.asarray(jnp.roll(x, 1, axis=1))):
            return "jnp"
        if np.array_equal(y, np.asarray(jnp.roll(x, -1, axis=1))):
            return "neg"
        return None
    except Exception:
        return None


# ----------------------------------------------------------------------------
# Fused WN kernel: all layers for one batch element in one grid step.
# ----------------------------------------------------------------------------
def _wn_fused_kernel(*refs, H, K, T, n_layers, dilations, pad, has_g, roll_mode):
    if has_g:
        (xp_ref, mask_ref, g_ref, cond_w_ref,
         in_w_ref, in_b_ref, rs_w_ref, rs_b_ref, out_ref, xp_s) = refs
    else:
        (xp_ref, mask_ref,
         in_w_ref, in_b_ref, rs_w_ref, rs_b_ref, out_ref, xp_s) = refs

    Tpad = T + 2 * pad
    c = (K - 1) // 2

    # Residual (incl. conv zero-padding) lives in VMEM scratch; only the 128-aligned
    # (H, T) center is rewritten per layer. The pads are written once and stay zero.
    xp_s[...] = xp_ref[0].astype(jnp.float32)

    # ---- hoisted loop invariants (review: broadcasts / casts / cond matmul) ----------
    mask_h = jnp.broadcast_to(mask_ref[0].astype(jnp.float32), (H, T))   # (H, T)
    in_b = in_b_ref[...]                                                  # (2H, L) f32
    rs_b = rs_b_ref[...]                                                  # (2H, L) f32
    skip = jnp.zeros((H, T), jnp.float32)
    if has_g:
        # ONE (2H*L, Gin) x (Gin, T) MXU call instead of L small per-layer matmuls.
        cond_all = jnp.dot(cond_w_ref[...], g_ref[0],
                           preferred_element_type=jnp.float32)            # (2H*L, T) f32

    # Statically unrolled: n_layers is small and tap shifts become compile-time consts.
    # TODO(synk): for production L=16 consider lax.fori_loop + SMEM shift table if the
    # unroll spills vregs.
    for l in range(n_layers):
        d = dilations[l]
        xp = xp_s[...]                                                    # (H, Tpad) f32

        # Dilated conv as ONE stacked matmul: taps[k][:, t] = x[:, t + (k-c)*d].
        taps = []
        for k in range(K):
            s = (k - c) * d
            assert abs(s) <= pad, "tap offset exceeds zero padding (roll would wrap data)"
            if s == 0 or roll_mode is None:
                taps.append(xp[:, pad + s: pad + s + T])
            else:
                sh = ((-s) if roll_mode == "jnp" else s) % Tpad
                # XLU rotate + lane-aligned center slice; wrapped lanes land in the pads.
                taps.append(pltpu.roll(xp, shift=sh, axis=1)[:, pad:pad + T])
        center = taps[c]
        xs = jnp.concatenate(taps, axis=0).astype(jnp.bfloat16)           # (K*H, T)

        x_in = jnp.dot(in_w_ref[l], xs, preferred_element_type=jnp.float32)
        x_in = x_in + in_b[:, l:l + 1]                                    # (2H, T)
        if has_g:
            x_in = x_in + cond_all[2 * H * l: 2 * H * (l + 1)]

        # fused add + tanh/sigmoid gate (EUP)
        acts = jnp.tanh(x_in[:H]) * jax.nn.sigmoid(x_in[H:])              # (H, T)
        # TODO(synk): dropout (p_dropout > 0) not implemented; module default 0 -> identity.

        # 1x1 res/skip conv (last layer's H-channel conv packed into rows [H:2H]).
        rs = jnp.dot(rs_w_ref[l], acts.astype(jnp.bfloat16),
                     preferred_element_type=jnp.float32) + rs_b[:, l:l + 1]
        skip = skip + rs[H:]
        if l < n_layers - 1:
            # In-place, lane-aligned store of the residual center only.
            xp_s[:, pad:pad + T] = (center + rs[:H]) * mask_h

    out_ref[0] = (skip * mask_h).astype(out_ref.dtype)


def wn_forward(packed, x, x_mask, g=None, *, hidden_channels, kernel_size,
               dilation_rate, n_layers, gin_channels):
    assert kernel_size % 2 == 1
    B, H, T = x.shape
    K, L = kernel_size, n_layers
    dilations = tuple(dilation_rate ** i for i in range(L))
    max_pad = (K - 1) // 2 * dilations[-1]
    has_g = (g is not None) and (gin_channels != 0)

    # Lane-dense time axis; conv padding rounded up to 128 so the center is lane-aligned.
    Tl = _round_up(T, 128)
    pad = _round_up(max_pad, 128)
    Tpad = Tl + 2 * pad

    x_l = jnp.pad(x.astype(jnp.float32), ((0, 0), (0, 0), (0, Tl - T)))
    xp = jnp.pad(x_l, ((0, 0), (0, 0), (pad, pad)))        # conv 'same' zero padding
    mask_l = jnp.pad(x_mask.astype(jnp.float32), ((0, 0), (0, 0), (0, Tl - T)))

    roll_mode = _probe_roll_mode()

    kernel = functools.partial(
        _wn_fused_kernel, H=H, K=K, T=Tl, n_layers=L, dilations=dilations,
        pad=pad, has_g=has_g, roll_mode=roll_mode)

    # cond bias only applies when g is given (matches the torch module); fold into in_b.
    in_b_arg = (packed["in_b"] + packed["cond_b"]) if has_g else packed["in_b"]

    def run(single_buffer_weights):
        def wspec(shape):
            # Grid-invariant weights: single-buffer them (double-buffering the same block
            # every grid step only doubles their VMEM footprint).
            index_map = lambda b: (0,) * len(shape)
            if single_buffer_weights and hasattr(pl, "Buffered"):
                try:
                    return pl.BlockSpec(shape, index_map, pipeline_mode=pl.Buffered(1))
                except TypeError:
                    pass
            return pl.BlockSpec(shape, index_map)

        in_specs = [
            pl.BlockSpec((1, H, Tpad), lambda b: (b, 0, 0)),
            pl.BlockSpec((1, 1, Tl), lambda b: (b, 0, 0)),
        ]
        args = [xp, mask_l]
        if has_g:
            Gin = g.shape[1]
            g_l = jnp.pad(g.astype(jnp.bfloat16), ((0, 0), (0, 0), (0, Tl - T)))
            in_specs += [
                pl.BlockSpec((1, Gin, Tl), lambda b: (b, 0, 0)),
                wspec((2 * H * L, Gin)),
            ]
            args += [g_l, packed["cond_w"]]
        in_specs += [
            wspec((L, 2 * H, K * H)),
            wspec((2 * H, L)),
            wspec((L, 2 * H, H)),
            wspec((2 * H, L)),
        ]
        args += [packed["in_w"], in_b_arg, packed["rs_w"], packed["rs_b"]]

        # TODO(synk): add a time-tiling grid axis (and B==1 megacore split on v7x) for
        # very long sequences; full-T blocks are fine at these shapes.
        return pl.pallas_call(
            kernel,
            out_shape=jax.ShapeDtypeStruct((B, H, Tl), x.dtype),
            grid=(B,),
            in_specs=in_specs,
            out_specs=pl.BlockSpec((1, H, Tl), lambda b: (b, 0, 0)),
            scratch_shapes=[pltpu.VMEM((H, Tpad), jnp.float32)],
            compiler_params=pltpu.CompilerParams(
                dimension_semantics=("parallel",)),
        )(*args)

    try:
        out = run(True)
    except Exception:
        out = run(False)   # fall back to default (double-buffered) weight specs
    return out[:, :, :T]


# ----------------------------------------------------------------------------
# Parameters: weight_norm folded in at init (conv layout), then packed for the kernel.
# ----------------------------------------------------------------------------
def _weight_norm(v, g):
    # PyTorch weight_norm(dim=0): w = g * v / ||v||, norm over all dims except 0.
    norm = jnp.sqrt(jnp.sum(v * v, axis=tuple(range(1, v.ndim)), keepdims=True))
    g = g.reshape((-1,) + (1,) * (v.ndim - 1))
    return v * (g / norm)


def init_wn_params(key, hidden_channels, kernel_size, dilation_rate, n_layers,
                   gin_channels):
    H, K = hidden_channels, kernel_size
    keys = jax.random.split(key, 4 * n_layers + 2)
    params = {"in_w": [], "in_b": [], "rs_w": [], "rs_b": []}
    ki = 0
    if gin_channels != 0:
        v = 0.1 * jax.random.normal(keys[ki], (2 * H * n_layers, gin_channels, 1)); ki += 1
        gg = 1.0 + 0.01 * jax.random.normal(keys[ki], (2 * H * n_layers,)); ki += 1
        params["cond_w"] = _weight_norm(v, gg)                     # (2H*L, Gin, 1)
        params["cond_b"] = jnp.zeros((2 * H * n_layers,), jnp.float32)
    for i in range(n_layers):
        v = 0.1 * jax.random.normal(keys[ki], (2 * H, H, K)); ki += 1
        gg = 1.0 + 0.01 * jax.random.normal(keys[ki], (2 * H,)); ki += 1
        params["in_w"].append(_weight_norm(v, gg))                 # (2H, H, K)
        params["in_b"].append(0.01 * jnp.arange(2 * H, dtype=jnp.float32))
        Crs = 2 * H if i < n_layers - 1 else H
        v = 0.1 * jax.random.normal(keys[ki], (Crs, H, 1)); ki += 1
        gg = 1.0 + 0.01 * jax.random.normal(keys[ki], (Crs,)); ki += 1
        params["rs_w"].append(_weight_norm(v, gg))                 # (Crs, H, 1)
        params["rs_b"].append(0.01 * jnp.arange(Crs, dtype=jnp.float32))
    return params


def pack_wn_params(params, *, hidden_channels, kernel_size, n_layers, gin_channels):
    """Stack per-layer weights (leading L dim, K folded into the contraction), pad the
    last layer's res/skip conv into the skip half, ship bf16 MXU operands, and pack all
    biases as compact (2H, L) f32 (no lane-padded (.,1) blocks)."""
    H, K, L = hidden_channels, kernel_size, n_layers
    in_w = jnp.stack([jnp.transpose(w, (0, 2, 1)).reshape(2 * H, K * H)   # (2H, K*H)
                      for w in params["in_w"]])
    in_b = jnp.stack(params["in_b"], axis=1)                              # (2H, L)
    rs_w_list, rs_b_list = [], []
    for i in range(L):
        w = params["rs_w"][i][:, :, 0]                                    # (Crs, H)
        b = params["rs_b"][i]
        if i == L - 1:   # last layer: only skip outputs; pack into rows [H:2H]
            w = jnp.concatenate([jnp.zeros((H, H), w.dtype), w], axis=0)
            b = jnp.concatenate([jnp.zeros((H,), b.dtype), b], axis=0)
        rs_w_list.append(w)
        rs_b_list.append(b)
    packed = {
        "in_w": in_w.astype(jnp.bfloat16),                                # (L, 2H, K*H)
        "in_b": in_b.astype(jnp.float32),                                 # (2H, L)
        "rs_w": jnp.stack(rs_w_list).astype(jnp.bfloat16),                # (L, 2H, H)
        "rs_b": jnp.stack(rs_b_list, axis=1).astype(jnp.float32),         # (2H, L)
    }
    if gin_channels != 0:
        packed["cond_w"] = params["cond_w"][:, :, 0].astype(jnp.bfloat16)  # (2H*L, Gin)
        packed["cond_b"] = params["cond_b"].reshape(L, 2 * H).T.astype(jnp.float32)
    return packed


# ----------------------------------------------------------------------------
# Pure-JAX reference (same bf16-operand / f32-accumulation numerics).
# ----------------------------------------------------------------------------
def _conv1d_ref(x, w, b, dilation, padding):
    out = jax.lax.conv_general_dilated(
        x.astype(jnp.bfloat16), w.astype(jnp.bfloat16),
        window_strides=(1,), padding=[(padding, padding)],
        rhs_dilation=(dilation,), dimension_numbers=("NCH", "OIH", "NCH"),
        preferred_element_type=jnp.float32)
    return out + b[None, :, None]


def wn_forward_ref(params, x, x_mask, g=None, *, hidden_channels, kernel_size,
                   dilation_rate, n_layers, gin_channels):
    H = hidden_channels
    output = jnp.zeros_like(x)
    g_all = None
    if g is not None and gin_channels != 0:
        g_all = _conv1d_ref(g, params["cond_w"], params["cond_b"], 1, 0)
    for i in range(n_layers):
        dilation = dilation_rate ** i
        padding = (kernel_size * dilation - dilation) // 2
        x_in = _conv1d_ref(x, params["in_w"][i], params["in_b"][i], dilation, padding)
        if g_all is not None:
            z = x_in + g_all[:, i * 2 * H:(i + 1) * 2 * H, :]
        else:
            z = x_in
        acts = jnp.tanh(z[:, :H]) * jax.nn.sigmoid(z[:, H:])
        rs = _conv1d_ref(acts, params["rs_w"][i], params["rs_b"][i], 1, 0)
        if i < n_layers - 1:
            x = (x + rs[:, :H]) * x_mask
            output = output + rs[:, H:]
        else:
            output = output + rs
    return output * x_mask


# ----------------------------------------------------------------------------
if __name__ == "__main__":
    hidden_channels = 32
    kernel_size = 3
    dilation_rate = 2
    n_layers = 4
    gin_channels = 16
    B, T = 2, 160   # T deliberately not a multiple of 128 to exercise lane padding

    key = jax.random.PRNGKey(0)
    kx, kg, kp = jax.random.split(key, 3)
    x = jax.random.normal(kx, (B, hidden_channels, T), jnp.float32)
    g = jax.random.normal(kg, (B, gin_channels, T), jnp.float32)
    # mask: first batch fully valid, second has last quarter masked out
    x_mask = jnp.ones((B, 1, T), jnp.float32)
    x_mask = x_mask.at[1, 0, 3 * T // 4:].set(0.0)

    cfg = dict(hidden_channels=hidden_channels, kernel_size=kernel_size,
               dilation_rate=dilation_rate, n_layers=n_layers,
               gin_channels=gin_channels)

    params = init_wn_params(kp, hidden_channels, kernel_size, dilation_rate,
                            n_layers, gin_channels)
    packed = pack_wn_params(params, hidden_channels=hidden_channels,
                            kernel_size=kernel_size, n_layers=n_layers,
                            gin_channels=gin_channels)

    # Conditioned path (g provided)
    out = jax.block_until_ready(wn_forward(packed, x, x_mask, g, **cfg))
    ref = wn_forward_ref(params, x, x_mask, g, **cfg)
    np.testing.assert_allclose(np.asarray(out), np.asarray(ref), rtol=2e-3, atol=2e-3)

    # Unconditioned path (g=None -> separate compiled variant, no g/cond_w DMA)
    out_nc = jax.block_until_ready(wn_forward(packed, x, x_mask, None, **cfg))
    ref_nc = wn_forward_ref(params, x, x_mask, None, **cfg)
    np.testing.assert_allclose(np.asarray(out_nc), np.asarray(ref_nc), rtol=2e-3, atol=2e-3)

    print("KERNEL_OK")
</pallas_src>

<mosaic_0001>
module attributes {stable_mosaic.version = 11 : i64} {
  func.func @probe_kernel(%arg0: memref<8x128xf32, #tpu.memory_space<vmem>>, %arg1: memref<8x128xf32, #tpu.memory_space<vmem>>) attributes {dimension_semantics = [], scalar_prefetch = 0 : i64, scratch_operands = 0 : i64, tpu.core_type = #tpu.core_type<tc>} {
    %c0 = arith.constant 0 : index
    %c0_0 = arith.constant 0 : index
    %0 = vector.load %arg0[%c0, %c0_0] : memref<8x128xf32, #tpu.memory_space<vmem>>, vector<8x128xf32>
    %c1_i32 = arith.constant 1 : i32
    %1 = tpu.dynamic_rotate %0 by %c1_i32 dim 1 : vector<8x128xf32>, i32 -> vector<8x128xf32>
    %c0_1 = arith.constant 0 : index
    %c0_2 = arith.constant 0 : index
    %2 = vector.load %arg1[%c0_1, %c0_2] : memref<8x128xf32, #tpu.memory_space<vmem>>, vector<8x128xf32>
    tpu.vector_store %arg1[%c0_1, %c0_2], %1 {strides = array<i32>} : memref<8x128xf32, #tpu.memory_space<vmem>>, vector<8x128xf32>,
    return
  }
}

module attributes {stable_mosaic.version = 11 : i64} {
  func.func @_wn_fused_kernel(%arg0: i32, %arg1: memref<1x32x512xf32, #tpu.memory_space<vmem>>, %arg2: memref<1x1x256xf32, #tpu.memory_space<vmem>>, %arg3: memref<1x16x256xbf16, #tpu.memory_space<vmem>>, %arg4: memref<256x16xbf16, #tpu.memory_space<vmem>>, %arg5: memref<4x64x96xbf16, #tpu.memory_space<vmem>>, %arg6: memref<64x4xf32, #tpu.memory_space<vmem>>, %arg7: memref<4x64x32xbf16, #tpu.memory_space<vmem>>, %arg8: memref<64x4xf32, #tpu.memory_space<vmem>>, %arg9: memref<1x32x256xf32, #tpu.memory_space<vmem>>, %arg10: memref<32x512xf32, #tpu.memory_space<vmem>>) attributes {dimension_semantics = [#tpu.dimension_semantics<parallel>], iteration_bounds = array<i64: 2>, scalar_prefetch = 0 : i64, scratch_operands = 1 : i64, tpu.core_type = #tpu.core_type<tc>, window_params = [{transform_indices = @transform_0, window_bounds = array<i64: 1, 32, 512>}, {transform_indices = @transform_1, window_bounds = array<i64: 1, 1, 256>}, {transform_indices = @transform_2, window_bounds = array<i64: 1, 16, 256>}, {pipeline_mode = #tpu.pipeline_mode<synchronous>, transform_indices = @transform_3, window_bounds = array<i64: 256, 16>}, {pipeline_mode = #tpu.pipeline_mode<synchronous>, transform_indices = @transform_4, window_bounds = array<i64: 4, 64, 96>}, {pipeline_mode = #tpu.pipeline_mode<synchronous>, transform_indices = @transform_5, window_bounds = array<i64: 64, 4>}, {pipeline_mode = #tpu.pipeline_mode<synchronous>, transform_indices = @transform_6, window_bounds = array<i64: 4, 64, 32>}, {pipeline_mode = #tpu.pipeline_mode<synchronous>, transform_indices = @transform_7, window_bounds = array<i64: 64, 4>}, {transform_indices = @transform_8, window_bounds = array<i64: 1, 32, 256>}]} {
    %c0 = arith.constant 0 : index
    %c0_0 = arith.constant 0 : index
    %c0_1 = arith.constant 0 : index
    %0 = vector.load %arg1[%c0, %c0_0, %c0_1] : memref<1x32x512xf32, #tpu.memory_space<vmem>>, vector<1x32x512xf32>
    %1 = vector.shape_cast %0 : vector<1x32x512xf32> to vector<32x512xf32>
    %c0_2 = arith.constant 0 : index
    %c0_3 = arith.constant 0 : index
    %2 = vector.load %arg10[%c0_2, %c0_3] : memref<32x512xf32, #tpu.memory_space<vmem>>, vector<32x512xf32>
    tpu.vector_store %arg10[%c0_2, %c0_3], %1 {strides = array<i32>} : memref<32x512xf32, #tpu.memory_space<vmem>>, vector<32x512xf32>,
    %c0_4 = arith.constant 0 : index
    %c0_5 = arith.constant 0 : index
    %c0_6 = arith.constant 0 : index
    %3 = vector.load %arg2[%c0_4, %c0_5, %c0_6] : memref<1x1x256xf32, #tpu.memory_space<vmem>>, vector<1x1x256xf32>
    %4 = vector.shape_cast %3 : vector<1x1x256xf32> to vector<1x256xf32>
    %5 = vector.shape_cast %4 : vector<1x256xf32> to vector<1x256xf32>
    %6 = vector.broadcast %5 : vector<1x256xf32> to vector<32x256xf32>
    %c0_7 = arith.constant 0 : index
    %c0_8 = arith.constant 0 : index
    %7 = vector.load %arg6[%c0_7, %c0_8] : memref<64x4xf32, #tpu.memory_space<vmem>>, vector<64x4xf32>
    %c0_9 = arith.constant 0 : index
    %c0_10 = arith.constant 0 : index
    %8 = vector.load %arg8[%c0_9, %c0_10] : memref<64x4xf32, #tpu.memory_space<vmem>>, vector<64x4xf32>
    %cst = arith.constant 0.000000e+00 : f32
    %9 = vector.broadcast %cst : f32 to vector<32x256xf32>
    %c0_11 = arith.constant 0 : index
    %c0_12 = arith.constant 0 : index
    %10 = vector.load %arg4[%c0_11, %c0_12] : memref<256x16xbf16, #tpu.memory_space<vmem>>, vector<256x16xbf16>
    %c0_13 = arith.constant 0 : index
    %c0_14 = arith.constant 0 : index
    %c0_15 = arith.constant 0 : index
    %11 = vector.load %arg3[%c0_13, %c0_14, %c0_15] : memref<1x16x256xbf16, #tpu.memory_space<vmem>>, vector<1x16x256xbf16>
    %12 = vector.shape_cast %11 : vector<1x16x256xbf16> to vector<16x256xbf16>
    %cst_16 = arith.constant dense<0.000000e+00> : vector<256x256xf32>
    %13 = tpu.matmul %10, %12, %cst_16 {dimension_numbers = #tpu.dot_dimension_numbers<[1], [0], [0], [1], [0, 0, 1, 1], [], []>} : vector<256x16xbf16>, vector<16x256xbf16>, vector<256x256xf32> -> vector<256x256xf32>
    %c0_17 = arith.constant 0 : index
    %c0_18 = arith.constant 0 : index
    %14 = vector.load %arg10[%c0_17, %c0_18] : memref<32x512xf32, #tpu.memory_space<vmem>>, vector<32x512xf32>
    %15 = vector.extract_strided_slice %14 {offsets = [0, 127], sizes = [32, 256], strides = [1, 1]} : vector<32x512xf32> to vector<32x256xf32>
    %16 = vector.extract_strided_slice %14 {offsets = [0, 128], sizes = [32, 256], strides = [1, 1]} : vector<32x512xf32> to vector<32x256xf32>
    %17 = vector.extract_strided_slice %14 {offsets = [0, 129], sizes = [32, 256], strides = [1, 1]} : vector<32x512xf32> to vector<32x256xf32>
    %18 = tpu.concatenate %15, %16, %17 in 0 : vector<32x256xf32>, vector<32x256xf32>, vector<32x256xf32> -> vector<96x256xf32>
    %19 = arith.truncf %18 : vector<96x256xf32> to vector<96x256xbf16>
    %c0_19 = arith.constant 0 : index
    %c0_20 = arith.constant 0 : index
    %c0_21 = arith.constant 0 : index
    %20 = vector.load %arg5[%c0_19, %c0_20, %c0_21] : memref<4x64x96xbf16, #tpu.memory_space<vmem>>, vector<1x64x96xbf16>
    %21 = vector.shape_cast %20 : vector<1x64x96xbf16> to vector<64x96xbf16>
    %cst_22 = arith.constant dense<0.000000e+00> : vector<64x256xf32>
    %22 = tpu.matmul %21, %19, %cst_22 {dimension_numbers = #tpu.dot_dimension_numbers<[1], [0], [0], [1], [0, 0, 1, 1], [], []>} : vector<64x96xbf16>, vector<96x256xbf16>, vector<64x256xf32> -> vector<64x256xf32>
    %23 = vector.extract_strided_slice %7 {offsets = [0, 0], sizes = [64, 1], strides = [1, 1]} : vector<64x4xf32> to vector<64x1xf32>
    %24 = vector.broadcast %23 : vector<64x1xf32> to vector<64x256xf32>
    %25 = arith.addf %22, %24 : vector<64x256xf32>
    %26 = vector.extract_strided_slice %13 {offsets = [0, 0], sizes = [64, 256], strides = [1, 1]} : vector<256x256xf32> to vector<64x256xf32>
    %27 = arith.addf %25, %26 : vector<64x256xf32>
    %28 = vector.extract_strided_slice %27 {offsets = [0, 0], sizes = [32, 256], strides = [1, 1]} : vector<64x256xf32> to vector<32x256xf32>
    %29 = math.tanh %28 : vector<32x256xf32>
    %30 = vector.extract_strided_slice %27 {offsets = [32, 0], sizes = [32, 256], strides = [1, 1]} : vector<64x256xf32> to vector<32x256xf32>
    %31 = arith.negf %30 : vector<32x256xf32>
    %32 = math.exp %31 : vector<32x256xf32>
    %cst_23 = arith.constant 1.000000e+00 : f32
    %33 = vector.broadcast %cst_23 : f32 to vector<32x256xf32>
    %34 = arith.addf %33, %32 : vector<32x256xf32>
    %35 = arith.divf %33, %34 : vector<32x256xf32>
    %36 = arith.mulf %29, %35 : vector<32x256xf32>
    %c0_24 = arith.constant 0 : index
    %c0_25 = arith.constant 0 : index
    %c0_26 = arith.constant 0 : index
    %37 = vector.load %arg7[%c0_24, %c0_25, %c0_26] : memref<4x64x32xbf16, #tpu.memory_space<vmem>>, vector<1x64x32xbf16>
    %38 = vector.shape_cast %37 : vector<1x64x32xbf16> to vector<64x32xbf16>
    %39 = arith.truncf %36 : vector<32x256xf32> to vector<32x256xbf16>
    %cst_27 = arith.constant dense<0.000000e+00> : vector<64x256xf32>
    %40 = tpu.matmul %38, %39, %cst_27 {dimension_numbers = #tpu.dot_dimension_numbers<[1], [0], [0], [1], [0, 0, 1, 1], [], []>} : vector<64x32xbf16>, vector<32x256xbf16>, vector<64x256xf32> -> vector<64x256xf32>
    %41 = vector.extract_strided_slice %8 {offsets = [0, 0], sizes = [64, 1], strides = [1, 1]} : vector<64x4xf32> to vector<64x1xf32>
    %42 = vector.broadcast %41 : vector<64x1xf32> to vector<64x256xf32>
    %43 = arith.addf %40, %42 : vector<64x256xf32>
    %44 = vector.extract_strided_slice %43 {offsets = [32, 0], sizes = [32, 256], strides = [1, 1]} : vector<64x256xf32> to vector<32x256xf32>
    %45 = arith.addf %9, %44 : vector<32x256xf32>
    %46 = vector.extract_strided_slice %43 {offsets = [0, 0], sizes = [32, 256], strides = [1, 1]} : vector<64x256xf32> to vector<32x256xf32>
    %47 = arith.addf %16, %46 : vector<32x256xf32>
    %48 = arith.mulf %47, %6 : vector<32x256xf32>
    %c0_28 = arith.constant 0 : index
    %c128 = arith.constant 128 : index
    %49 = vector.load %arg10[%c0_28, %c128] : memref<32x512xf32, #tpu.memory_space<vmem>>, vector<32x256xf32>
    tpu.vector_store %arg10[%c0_28, %c128], %48 {strides = array<i32>} : memref<32x512xf32, #tpu.memory_space<vmem>>, vector<32x256xf32>,
    %c0_29 = arith.constant 0 : index
    %c0_30 = arith.constant 0 : index
    %50 = vector.load %arg10[%c0_29, %c0_30] : memref<32x512xf32, #tpu.memory_space<vmem>>, vector<32x512xf32>
    %51 = vector.extract_strided_slice %50 {offsets = [0, 126], sizes = [32, 256], strides = [1, 1]} : vector<32x512xf32> to vector<32x256xf32>
    %52 = vector.extract_strided_slice %50 {offsets = [0, 128], sizes = [32, 256], strides = [1, 1]} : vector<32x512xf32> to vector<32x256xf32>
    %53 = vector.extract_strided_slice %50 {offsets = [0, 130], sizes = [32, 256], strides = [1, 1]} : vector<32x512xf32> to vector<32x256xf32>
    %54 = tpu.concatenate %51, %52, %53 in 0 : vector<32x256xf32>, vector<32x256xf32>, vector<32x256xf32> -> vector<96x256xf32>
    %55 = arith.truncf %54 : vector<96x256xf32> to vector<96x256xbf16>
    %c1 = arith.constant 1 : index
    %c0_31 = arith.constant 0 : index
    %c0_32 = arith.constant 0 : index
    %56 = vector.load %arg5[%c1, %c0_31, %c0_32] : memref<4x64x96xbf16, #tpu.memory_space<vmem>>, vector<1x64x96xbf16>
    %57 = vector.shape_cast %56 : vector<1x64x96xbf16> to vector<64x96xbf16>
    %cst_33 = arith.constant dense<0.000000e+00> : vector<64x256xf32>
    %58 = tpu.matmul %57, %55, %cst_33 {dimension_numbers = #tpu.dot_dimension_numbers<[1], [0], [0], [1], [0, 0, 1, 1], [], []>} : vector<64x96xbf16>, vector<96x256xbf16>, vector<64x256xf32> -> vector<64x256xf32>
    %59 = vector.extract_strided_slice %7 {offsets = [0, 1], sizes = [64, 1], strides = [1, 1]} : vector<64x4xf32> to vector<64x1xf32>
    %60 = vector.broadcast %59 : vector<64x1xf32> to vector<64x256xf32>
    %61 = arith.addf %58, %60 : vector<64x256xf32>
    %62 = vector.extract_strided_slice %13 {offsets = [64, 0], sizes = [64, 256], strides = [1, 1]} : vector<256x256xf32> to vector<64x256xf32>
    %63 = arith.addf %61, %62 : vector<64x256xf32>
    %64 = vector.extract_strided_slice %63 {offsets = [0, 0], sizes = [32, 256], strides = [1, 1]} : vector<64x256xf32> to vector<32x256xf32>
    %65 = math.tanh %64 : vector<32x256xf32>
    %66 = vector.extract_strided_slice %63 {offsets = [32, 0], sizes = [32, 256], strides = [1, 1]} : vector<64x256xf32> to vector<32x256xf32>
    %67 = arith.negf %66 : vector<32x256xf32>
    %68 = math.exp %67 : vector<32x256xf32>
    %cst_34 = arith.constant 1.000000e+00 : f32
    %69 = vector.broadcast %cst_34 : f32 to vector<32x256xf32>
    %70 = arith.addf %69, %68 : vector<32x256xf32>
    %71 = arith.divf %69, %70 : vector<32x256xf32>
    %72 = arith.mulf %65, %71 : vector<32x256xf32>
    %c1_35 = arith.constant 1 : index
    %c0_36 = arith.constant 0 : index
    %c0_37 = arith.constant 0 : index
    %73 = vector.load %arg7[%c1_35, %c0_36, %c0_37] : memref<4x64x32xbf16, #tpu.memory_space<vmem>>, vector<1x64x32xbf16>
    %74 = vector.shape_cast %73 : vector<1x64x32xbf16> to vector<64x32xbf16>
    %75 = arith.truncf %72 : vector<32x256xf32> to vector<32x256xbf16>
    %cst_38 = arith.constant dense<0.000000e+00> : vector<64x256xf32>
    %76 = tpu.matmul %74, %75, %cst_38 {dimension_numbers = #tpu.dot_dimension_numbers<[1], [0], [0], [1], [0, 0, 1, 1], [], []>} : vector<64x32xbf16>, vector<32x256xbf16>, vector<64x256xf32> -> vector<64x256xf32>
    %77 = vector.extract_strided_slice %8 {offsets = [0, 1], sizes = [64, 1], strides = [1, 1]} : vector<64x4xf32> to vector<64x1xf32>
    %78 = vector.broadcast %77 : vector<64x1xf32> to vector<64x256xf32>
    %79 = arith.addf %76, %78 : vector<64x256xf32>
    %80 = vector.extract_strided_slice %79 {offsets = [32, 0], sizes = [32, 256], strides = [1, 1]} : vector<64x256xf32> to vector<32x256xf32>
    %81 = arith.addf %45, %80 : vector<32x256xf32>
    %82 = vector.extract_strided_slice %79 {offsets = [0, 0], sizes = [32, 256], strides = [1, 1]} : vector<64x256xf32> to vector<32x256xf32>
    %83 = arith.addf %52, %82 : vector<32x256xf32>
    %84 = arith.mulf %83, %6 : vector<32x256xf32>
    %c0_39 = arith.constant 0 : index
    %c128_40 = arith.constant 128 : index
    %85 = vector.load %arg10[%c0_39, %c128_40] : memref<32x512xf32, #tpu.memory_space<vmem>>, vector<32x256xf32>
    tpu.vector_store %arg10[%c0_39, %c128_40], %84 {strides = array<i32>} : memref<32x512xf32, #tpu.memory_space<vmem>>, vector<32x256xf32>,
    %c0_41 = arith.constant 0 : index
    %c0_42 = arith.constant 0 : index
    %86 = vector.load %arg10[%c0_41, %c0_42] : memref<32x512xf32, #tpu.memory_space<vmem>>, vector<32x512xf32>
    %87 = vector.extract_strided_slice %86 {offsets = [0, 124], sizes = [32, 256], strides = [1, 1]} : vector<32x512xf32> to vector<32x256xf32>
    %88 = vector.extract_strided_slice %86 {offsets = [0, 128], sizes = [32, 256], strides = [1, 1]} : vector<32x512xf32> to vector<32x256xf32>
    %89 = vector.extract_strided_slice %86 {offsets = [0, 132], sizes = [32, 256], strides = [1, 1]} : vector<32x512xf32> to vector<32x256xf32>
    %90 = tpu.concatenate %87, %88, %89 in 0 : vector<32x256xf32>, vector<32x256xf32>, vector<32x256xf32> -> vector<96x256xf32>
    %91 = arith.truncf %90 : vector<96x256xf32> to vector<96x256xbf16>
    %c2 = arith.constant 2 : index
    %c0_43 = arith.constant 0 : index
    %c0_44 = arith.constant 0 : index
    %92 = vector.load %arg5[%c2, %c0_43, %c0_44] : memref<4x64x96xbf16, #tpu.memory_space<vmem>>, vector<1x64x96xbf16>
    %93 = vector.shape_cast %92 : vector<1x64x96xbf16> to vector<64x96xbf16>
    %cst_45 = arith.constant dense<0.000000e+00> : vector<64x256xf32>
    %94 = tpu.matmul %93, %91, %cst_45 {dimension_numbers = #tpu.dot_dimension_numbers<[1], [0], [0], [1], [0, 0, 1, 1], [], []>} : vector<64x96xbf16>, vector<96x256xbf16>, vector<64x256xf32> -> vector<64x256xf32>
    %95 = vector.extract_strided_slice %7 {offsets = [0, 2], sizes = [64, 1], strides = [1, 1]} : vector<64x4xf32> to vector<64x1xf32>
    %96 = vector.broadcast %95 : vector<64x1xf32> to vector<64x256xf32>
    %97 = arith.addf %94, %96 : vector<64x256xf32>
    %98 = vector.extract_strided_slice %13 {offsets = [128, 0], sizes = [64, 256], strides = [1, 1]} : vector<256x256xf32> to vector<64x256xf32>
    %99 = arith.addf %97, %98 : vector<64x256xf32>
    %100 = vector.extract_strided_slice %99 {offsets = [0, 0], sizes = [32, 256], strides = [1, 1]} : vector<64x256xf32> to vector<32x256xf32>
    %101 = math.tanh %100 : vector<32x256xf32>
    %102 = vector.extract_strided_slice %99 {offsets = [32, 0], sizes = [32, 256], strides = [1, 1]} : vector<64x256xf32> to vector<32x256xf32>
    %103 = arith.negf %102 : vector<32x256xf32>
    %104 = math.exp %103 : vector<32x256xf32>
    %cst_46 = arith.constant 1.000000e+00 : f32
    %105 = vector.broadcast %cst_46 : f32 to vector<32x256xf32>
    %106 = arith.addf %105, %104 : vector<32x256xf32>
    %107 = arith.divf %105, %106 : vector<32x256xf32>
    %108 = arith.mulf %101, %107 : vector<32x256xf32>
    %c2_47 = arith.constant 2 : index
    %c0_48 = arith.constant 0 : index
    %c0_49 = arith.constant 0 : index
    %109 = vector.load %arg7[%c2_47, %c0_48, %c0_49] : memref<4x64x32xbf16, #tpu.memory_space<vmem>>, vector<1x64x32xbf16>
    %110 = vector.shape_cast %109 : vector<1x64x32xbf16> to vector<64x32xbf16>
    %111 = arith.truncf %108 : vector<32x256xf32> to vector<32x256xbf16>
    %cst_50 = arith.constant dense<0.000000e+00> : vector<64x256xf32>
    %112 = tpu.matmul %110, %111, %cst_50 {dimension_numbers = #tpu.dot_dimension_numbers<[1], [0], [0], [1], [0, 0, 1, 1], [], []>} : vector<64x32xbf16>, vector<32x256xbf16>, vector<64x256xf32> -> vector<64x256xf32>
    %113 = vector.extract_strided_slice %8 {offsets = [0, 2], sizes = [64, 1], strides = [1, 1]} : vector<64x4xf32> to vector<64x1xf32>
    %114 = vector.broadcast %113 : vector<64x1xf32> to vector<64x256xf32>
    %115 = arith.addf %112, %114 : vector<64x256xf32>
    %116 = vector.extract_strided_slice %115 {offsets = [32, 0], sizes = [32, 256], strides = [1, 1]} : vector<64x256xf32> to vector<32x256xf32>
    %117 = arith.addf %81, %116 : vector<32x256xf32>
    %118 = vector.extract_strided_slice %115 {offsets = [0, 0], sizes = [32, 256], strides = [1, 1]} : vector<64x256xf32> to vector<32x256xf32>
    %119 = arith.addf %88, %118 : vector<32x256xf32>
    %120 = arith.mulf %119, %6 : vector<32x256xf32>
    %c0_51 = arith.constant 0 : index
    %c128_52 = arith.constant 128 : index
    %121 = vector.load %arg10[%c0_51, %c128_52] : memref<32x512xf32, #tpu.memory_space<vmem>>, vector<32x256xf32>
    tpu.vector_store %arg10[%c0_51, %c128_52], %120 {strides = array<i32>} : memref<32x512xf32, #tpu.memory_space<vmem>>, vector<32x256xf32>,
    %c0_53 = arith.constant 0 : index
    %c0_54 = arith.constant 0 : index
    %122 = vector.load %arg10[%c0_53, %c0_54] : memref<32x512xf32, #tpu.memory_space<vmem>>, vector<32x512xf32>
    %123 = vector.extract_strided_slice %122 {offsets = [0, 120], sizes = [32, 256], strides = [1, 1]} : vector<32x512xf32> to vector<32x256xf32>
    %124 = vector.extract_strided_slice %122 {offsets = [0, 128], sizes = [32, 256], strides = [1, 1]} : vector<32x512xf32> to vector<32x256xf32>
    %125 = vector.extract_strided_slice %122 {offsets = [0, 136], sizes = [32, 256], strides = [1, 1]} : vector<32x512xf32> to vector<32x256xf32>
    %126 = tpu.concatenate %123, %124, %125 in 0 : vector<32x256xf32>, vector<32x256xf32>, vector<32x256xf32> -> vector<96x256xf32>
    %127 = arith.truncf %126 : vector<96x256xf32> to vector<96x256xbf16>
    %c3 = arith.constant 3 : index
    %c0_55 = arith.constant 0 : index
    %c0_56 = arith.constant 0 : index
    %128 = vector.load %arg5[%c3, %c0_55, %c0_56] : memref<4x64x96xbf16, #tpu.memory_space<vmem>>, vector<1x64x96xbf16>
    %129 = vector.shape_cast %128 : vector<1x64x96xbf16> to vector<64x96xbf16>
    %cst_57 = arith.constant dense<0.000000e+00> : vector<64x256xf32>
    %130 = tpu.matmul %129, %127, %cst_57 {dimension_numbers = #tpu.dot_dimension_numbers<[1], [0], [0], [1], [0, 0, 1, 1], [], []>} : vector<64x96xbf16>, vector<96x256xbf16>, vector<64x256xf32> -> vector<64x256xf32>
    %131 = vector.extract_strided_slice %7 {offsets = [0, 3], sizes = [64, 1], strides = [1, 1]} : vector<64x4xf32> to vector<64x1xf32>
    %132 = vector.broadcast %131 : vector<64x1xf32> to vector<64x256xf32>
    %133 = arith.addf %130, %132 : vector<64x256xf32>
    %134 = vector.extract_strided_slice %13 {offsets = [192, 0], sizes = [64, 256], strides = [1, 1]} : vector<256x256xf32> to vector<64x256xf32>
    %135 = arith.addf %133, %134 : vector<64x256xf32>
    %136 = vector.extract_strided_slice %135 {offsets = [0, 0], sizes = [32, 256], strides = [1, 1]} : vector<64x256xf32> to vector<32x256xf32>
    %137 = math.tanh %136 : vector<32x256xf32>
    %138 = vector.extract_strided_slice %135 {offsets = [32, 0], sizes = [32, 256], strides = [1, 1]} : vector<64x256xf32> to vector<32x256xf32>
    %139 = arith.negf %138 : vector<32x256xf32>
    %140 = math.exp %139 : vector<32x256xf32>
    %cst_58 = arith.constant 1.000000e+00 : f32
    %141 = vector.broadcast %cst_58 : f32 to vector<32x256xf32>
    %142 = arith.addf %141, %140 : vector<32x256xf32>
    %143 = arith.divf %141, %142 : vector<32x256xf32>
    %144 = arith.mulf %137, %143 : vector<32x256xf32>
    %c3_59 = arith.constant 3 : index
    %c0_60 = arith.constant 0 : index
    %c0_61 = arith.constant 0 : index
    %145 = vector.load %arg7[%c3_59, %c0_60, %c0_61] : memref<4x64x32xbf16, #tpu.memory_space<vmem>>, vector<1x64x32xbf16>
    %146 = vector.shape_cast %145 : vector<1x64x32xbf16> to vector<64x32xbf16>
    %147 = arith.truncf %144 : vector<32x256xf32> to vector<32x256xbf16>
    %cst_62 = arith.constant dense<0.000000e+00> : vector<64x256xf32>
    %148 = tpu.matmul %146, %147, %cst_62 {dimension_numbers = #tpu.dot_dimension_numbers<[1], [0], [0], [1], [0, 0, 1, 1], [], []>} : vector<64x32xbf16>, vector<32x256xbf16>, vector<64x256xf32> -> vector<64x256xf32>
    %149 = vector.extract_strided_slice %8 {offsets = [0, 3], sizes = [64, 1], strides = [1, 1]} : vector<64x4xf32> to vector<64x1xf32>
    %150 = vector.broadcast %149 : vector<64x1xf32> to vector<64x256xf32>
    %151 = arith.addf %148, %150 : vector<64x256xf32>
    %152 = vector.extract_strided_slice %151 {offsets = [32, 0], sizes = [32, 256], strides = [1, 1]} : vector<64x256xf32> to vector<32x256xf32>
    %153 = arith.addf %117, %152 : vector<32x256xf32>
    %154 = arith.mulf %153, %6 : vector<32x256xf32>
    %c0_63 = arith.constant 0 : index
    %c0_64 = arith.constant 0 : index
    %c0_65 = arith.constant 0 : index
    %155 = vector.load %arg9[%c0_63, %c0_64, %c0_65] : memref<1x32x256xf32, #tpu.memory_space<vmem>>, vector<1x32x256xf32>
    %156 = vector.shape_cast %155 : vector<1x32x256xf32> to vector<32x256xf32>
    %157 = vector.shape_cast %154 : vector<32x256xf32> to vector<1x32x256xf32>
    tpu.vector_store %arg9[%c0_63, %c0_64, %c0_65], %157 {strides = array<i32>} : memref<1x32x256xf32, #tpu.memory_space<vmem>>, vector<1x32x256xf32>,
    return
  }
  func.func @transform_0(%arg0: i32) -> (i32, i32, i32) {
    %c0_i32 = arith.constant 0 : i32
    %c0_i32_0 = arith.constant 0 : i32
    %c0_i32_1 = arith.constant 0 : i32
    return %arg0, %c0_i32, %c0_i32_0 : i32, i32, i32
  }
  func.func @transform_1(%arg0: i32) -> (i32, i32, i32) {
    %c0_i32 = arith.constant 0 : i32
    %c0_i32_0 = arith.constant 0 : i32
    %c0_i32_1 = arith.constant 0 : i32
    return %arg0, %c0_i32, %c0_i32_0 : i32, i32, i32
  }
  func.func @transform_2(%arg0: i32) -> (i32, i32, i32) {
    %c0_i32 = arith.constant 0 : i32
    %c0_i32_0 = arith.constant 0 : i32
    %c0_i32_1 = arith.constant 0 : i32
    return %arg0, %c0_i32, %c0_i32_0 : i32, i32, i32
  }
  func.func @transform_3(%arg0: i32) -> (i32, i32) {
    %c0_i32 = arith.constant 0 : i32
    %c0_i32_0 = arith.constant 0 : i32
    %c0_i32_1 = arith.constant 0 : i32
    return %c0_i32, %c0_i32_0 : i32, i32
  }
  func.func @transform_4(%arg0: i32) -> (i32, i32, i32) {
    %c0_i32 = arith.constant 0 : i32
    %c0_i32_0 = arith.constant 0 : i32
    %c0_i32_1 = arith.constant 0 : i32
    %c0_i32_2 = arith.constant 0 : i32
    return %c0_i32, %c0_i32_0, %c0_i32_1 : i32, i32, i32
  }
  func.func @transform_5(%arg0: i32) -> (i32, i32) {
    %c0_i32 = arith.constant 0 : i32
    %c0_i32_0 = arith.constant 0 : i32
    %c0_i32_1 = arith.constant 0 : i32
    return %c0_i32, %c0_i32_0 : i32, i32
  }
  func.func @transform_6(%arg0: i32) -> (i32, i32, i32) {
    %c0_i32 = arith.constant 0 : i32
    %c0_i32_0 = arith.constant 0 : i32
    %c0_i32_1 = arith.constant 0 : i32
    %c0_i32_2 = arith.constant 0 : i32
    return %c0_i32, %c0_i32_0, %c0_i32_1 : i32, i32, i32
  }
  func.func @transform_7(%arg0: i32) -> (i32, i32) {
    %c0_i32 = arith.constant 0 : i32
    %c0_i32_0 = arith.constant 0 : i32
    %c0_i32_1 = arith.constant 0 : i32
    return %c0_i32, %c0_i32_0 : i32, i32
  }
  func.func @transform_8(%arg0: i32) -> (i32, i32, i32) {
    %c0_i32 = arith.constant 0 : i32
    %c0_i32_0 = arith.constant 0 : i32
    %c0_i32_1 = arith.constant 0 : i32
    return %arg0, %c0_i32, %c0_i32_0 : i32, i32, i32
  }
}

module attributes {stable_mosaic.version = 11 : i64} {
  func.func @_wn_fused_kernel(%arg0: i32, %arg1: memref<1x32x512xf32, #tpu.memory_space<vmem>>, %arg2: memref<1x1x256xf32, #tpu.memory_space<vmem>>, %arg3: memref<1x16x256xbf16, #tpu.memory_space<vmem>>, %arg4: memref<256x16xbf16, #tpu.memory_space<vmem>>, %arg5: memref<4x64x96xbf16, #tpu.memory_space<vmem>>, %arg6: memref<64x4xf32, #tpu.memory_space<vmem>>, %arg7: memref<4x64x32xbf16, #tpu.memory_space<vmem>>, %arg8: memref<64x4xf32, #tpu.memory_space<vmem>>, %arg9: memref<1x32x256xf32, #tpu.memory_space<vmem>>, %arg10: memref<32x512xf32, #tpu.memory_space<vmem>>) attributes {dimension_semantics = [#tpu.dimension_semantics<parallel>], iteration_bounds = array<i64: 2>, scalar_prefetch = 0 : i64, scratch_operands = 1 : i64, tpu.core_type = #tpu.core_type<tc>, window_params = [{transform_indices = @transform_0, window_bounds = array<i64: 1, 32, 512>}, {transform_indices = @transform_1, window_bounds = array<i64: 1, 1, 256>}, {transform_indices = @transform_2, window_bounds = array<i64: 1, 16, 256>}, {pipeline_mode = #tpu.pipeline_mode<synchronous>, transform_indices = @transform_3, window_bounds = array<i64: 256, 16>}, {pipeline_mode = #tpu.pipeline_mode<synchronous>, transform_indices = @transform_4, window_bounds = array<i64: 4, 64, 96>}, {pipeline_mode = #tpu.pipeline_mode<synchronous>, transform_indices = @transform_5, window_bounds = array<i64: 64, 4>}, {pipeline_mode = #tpu.pipeline_mode<synchronous>, transform_indices = @transform_6, window_bounds = array<i64: 4, 64, 32>}, {pipeline_mode = #tpu.pipeline_mode<synchronous>, transform_indices = @transform_7, window_bounds = array<i64: 64, 4>}, {transform_indices = @transform_8, window_bounds = array<i64: 1, 32, 256>}]} {
    %c0 = arith.constant 0 : index
    %c0_0 = arith.constant 0 : index
    %c0_1 = arith.constant 0 : index
    %0 = vector.load %arg1[%c0, %c0_0, %c0_1] : memref<1x32x512xf32, #tpu.memory_space<vmem>>, vector<1x32x512xf32>
    %1 = vector.shape_cast %0 : vector<1x32x512xf32> to vector<32x512xf32>
    %c0_2 = arith.constant 0 : index
    %c0_3 = arith.constant 0 : index
    %2 = vector.load %arg10[%c0_2, %c0_3] : memref<32x512xf32, #tpu.memory_space<vmem>>, vector<32x512xf32>
    tpu.vector_store %arg10[%c0_2, %c0_3], %1 {strides = array<i32>} : memref<32x512xf32, #tpu.memory_space<vmem>>, vector<32x512xf32>,
    %c0_4 = arith.constant 0 : index
    %c0_5 = arith.constant 0 : index
    %c0_6 = arith.constant 0 : index
    %3 = vector.load %arg2[%c0_4, %c0_5, %c0_6] : memref<1x1x256xf32, #tpu.memory_space<vmem>>, vector<1x1x256xf32>
    %4 = vector.shape_cast %3 : vector<1x1x256xf32> to vector<1x256xf32>
    %5 = vector.shape_cast %4 : vector<1x256xf32> to vector<1x256xf32>
    %6 = vector.broadcast %5 : vector<1x256xf32> to vector<32x256xf32>
    %c0_7 = arith.constant 0 : index
    %c0_8 = arith.constant 0 : index
    %7 = vector.load %arg6[%c0_7, %c0_8] : memref<64x4xf32, #tpu.memory_space<vmem>>, vector<64x4xf32>
    %c0_9 = arith.constant 0 : index
    %c0_10 = arith.constant 0 : index
    %8 = vector.load %arg8[%c0_9, %c0_10] : memref<64x4xf32, #tpu.memory_space<vmem>>, vector<64x4xf32>
    %cst = arith.constant 0.000000e+00 : f32
    %9 = vector.broadcast %cst : f32 to vector<32x256xf32>
    %c0_11 = arith.constant 0 : index
    %c0_12 = arith.constant 0 : index
    %10 = vector.load %arg4[%c0_11, %c0_12] : memref<256x16xbf16, #tpu.memory_space<vmem>>, vector<256x16xbf16>
    %c0_13 = arith.constant 0 : index
    %c0_14 = arith.constant 0 : index
    %c0_15 = arith.constant 0 : index
    %11 = vector.load %arg3[%c0_13, %c0_14, %c0_15] : memref<1x16x256xbf16, #tpu.memory_space<vmem>>, vector<1x16x256xbf16>
    %12 = vector.shape_cast %11 : vector<1x16x256xbf16> to vector<16x256xbf16>
    %cst_16 = arith.constant dense<0.000000e+00> : vector<256x256xf32>
    %13 = tpu.matmul %10, %12, %cst_16 {dimension_numbers = #tpu.dot_dimension_numbers<[1], [0], [0], [1], [0, 0, 1, 1], [], []>} : vector<256x16xbf16>, vector<16x256xbf16>, vector<256x256xf32> -> vector<256x256xf32>
    %c0_17 = arith.constant 0 : index
    %c0_18 = arith.constant 0 : index
    %14 = vector.load %arg10[%c0_17, %c0_18] : memref<32x512xf32, #tpu.memory_space<vmem>>, vector<32x512xf32>
    %15 = vector.extract_strided_slice %14 {offsets = [0, 127], sizes = [32, 256], strides = [1, 1]} : vector<32x512xf32> to vector<32x256xf32>
    %16 = vector.extract_strided_slice %14 {offsets = [0, 128], sizes = [32, 256], strides = [1, 1]} : vector<32x512xf32> to vector<32x256xf32>
    %17 = vector.extract_strided_slice %14 {offsets = [0, 129], sizes = [32, 256], strides = [1, 1]} : vector<32x512xf32> to vector<32x256xf32>
    %18 = tpu.concatenate %15, %16, %17 in 0 : vector<32x256xf32>, vector<32x256xf32>, vector<32x256xf32> -> vector<96x256xf32>
    %19 = arith.truncf %18 : vector<96x256xf32> to vector<96x256xbf16>
    %c0_19 = arith.constant 0 : index
    %c0_20 = arith.constant 0 : index
    %c0_21 = arith.constant 0 : index
    %20 = vector.load %arg5[%c0_19, %c0_20, %c0_21] : memref<4x64x96xbf16, #tpu.memory_space<vmem>>, vector<1x64x96xbf16>
    %21 = vector.shape_cast %20 : vector<1x64x96xbf16> to vector<64x96xbf16>
    %cst_22 = arith.constant dense<0.000000e+00> : vector<64x256xf32>
    %22 = tpu.matmul %21, %19, %cst_22 {dimension_numbers = #tpu.dot_dimension_numbers<[1], [0], [0], [1], [0, 0, 1, 1], [], []>} : vector<64x96xbf16>, vector<96x256xbf16>, vector<64x256xf32> -> vector<64x256xf32>
    %23 = vector.extract_strided_slice %7 {offsets = [0, 0], sizes = [64, 1], strides = [1, 1]} : vector<64x4xf32> to vector<64x1xf32>
    %24 = vector.broadcast %23 : vector<64x1xf32> to vector<64x256xf32>
    %25 = arith.addf %22, %24 : vector<64x256xf32>
    %26 = vector.extract_strided_slice %13 {offsets = [0, 0], sizes = [64, 256], strides = [1, 1]} : vector<256x256xf32> to vector<64x256xf32>
    %27 = arith.addf %25, %26 : vector<64x256xf32>
    %28 = vector.extract_strided_slice %27 {offsets = [0, 0], sizes = [32, 256], strides = [1, 1]} : vector<64x256xf32> to vector<32x256xf32>
    %29 = math.tanh %28 : vector<32x256xf32>
    %30 = vector.extract_strided_slice %27 {offsets = [32, 0], sizes = [32, 256], strides = [1, 1]} : vector<64x256xf32> to vector<32x256xf32>
    %31 = arith.negf %30 : vector<32x256xf32>
    %32 = math.exp %31 : vector<32x256xf32>
    %cst_23 = arith.constant 1.000000e+00 : f32
    %33 = vector.broadcast %cst_23 : f32 to vector<32x256xf32>
    %34 = arith.addf %33, %32 : vector<32x256xf32>
    %35 = arith.divf %33, %34 : vector<32x256xf32>
    %36 = arith.mulf %29, %35 : vector<32x256xf32>
    %c0_24 = arith.constant 0 : index
    %c0_25 = arith.constant 0 : index
    %c0_26 = arith.constant 0 : index
    %37 = vector.load %arg7[%c0_24, %c0_25, %c0_26] : memref<4x64x32xbf16, #tpu.memory_space<vmem>>, vector<1x64x32xbf16>
    %38 = vector.shape_cast %37 : vector<1x64x32xbf16> to vector<64x32xbf16>
    %39 = arith.truncf %36 : vector<32x256xf32> to vector<32x256xbf16>
    %cst_27 = arith.constant dense<0.000000e+00> : vector<64x256xf32>
    %40 = tpu.matmul %38, %39, %cst_27 {dimension_numbers = #tpu.dot_dimension_numbers<[1], [0], [0], [1], [0, 0, 1, 1], [], []>} : vector<64x32xbf16>, vector<32x256xbf16>, vector<64x256xf32> -> vector<64x256xf32>
    %41 = vector.extract_strided_slice %8 {offsets = [0, 0], sizes = [64, 1], strides = [1, 1]} : vector<64x4xf32> to vector<64x1xf32>
    %42 = vector.broadcast %41 : vector<64x1xf32> to vector<64x256xf32>
    %43 = arith.addf %40, %42 : vector<64x256xf32>
    %44 = vector.extract_strided_slice %43 {offsets = [32, 0], sizes = [32, 256], strides = [1, 1]} : vector<64x256xf32> to vector<32x256xf32>
    %45 = arith.addf %9, %44 : vector<32x256xf32>
    %46 = vector.extract_strided_slice %43 {offsets = [0, 0], sizes = [32, 256], strides = [1, 1]} : vector<64x256xf32> to vector<32x256xf32>
    %47 = arith.addf %16, %46 : vector<32x256xf32>
    %48 = arith.mulf %47, %6 : vector<32x256xf32>
    %c0_28 = arith.constant 0 : index
    %c128 = arith.constant 128 : index
    %49 = vector.load %arg10[%c0_28, %c128] : memref<32x512xf32, #tpu.memory_space<vmem>>, vector<32x256xf32>
    tpu.vector_store %arg10[%c0_28, %c128], %48 {strides = array<i32>} : memref<32x512xf32, #tpu.memory_space<vmem>>, vector<32x256xf32>,
    %c0_29 = arith.constant 0 : index
    %c0_30 = arith.constant 0 : index
    %50 = vector.load %arg10[%c0_29, %c0_30] : memref<32x512xf32, #tpu.memory_space<vmem>>, vector<32x512xf32>
    %51 = vector.extract_strided_slice %50 {offsets = [0, 126], sizes = [32, 256], strides = [1, 1]} : vector<32x512xf32> to vector<32x256xf32>
    %52 = vector.extract_strided_slice %50 {offsets = [0, 128], sizes = [32, 256], strides = [1, 1]} : vector<32x512xf32> to vector<32x256xf32>
    %53 = vector.extract_strided_slice %50 {offsets = [0, 130], sizes = [32, 256], strides = [1, 1]} : vector<32x512xf32> to vector<32x256xf32>
    %54 = tpu.concatenate %51, %52, %53 in 0 : vector<32x256xf32>, vector<32x256xf32>, vector<32x256xf32> -> vector<96x256xf32>
    %55 = arith.truncf %54 : vector<96x256xf32> to vector<96x256xbf16>
    %c1 = arith.constant 1 : index
    %c0_31 = arith.constant 0 : index
    %c0_32 = arith.constant 0 : index
    %56 = vector.load %arg5[%c1, %c0_31, %c0_32] : memref<4x64x96xbf16, #tpu.memory_space<vmem>>, vector<1x64x96xbf16>
    %57 = vector.shape_cast %56 : vector<1x64x96xbf16> to vector<64x96xbf16>
    %cst_33 = arith.constant dense<0.000000e+00> : vector<64x256xf32>
    %58 = tpu.matmul %57, %55, %cst_33 {dimension_numbers = #tpu.dot_dimension_numbers<[1], [0], [0], [1], [0, 0, 1, 1], [], []>} : vector<64x96xbf16>, vector<96x256xbf16>, vector<64x256xf32> -> vector<64x256xf32>
    %59 = vector.extract_strided_slice %7 {offsets = [0, 1], sizes = [64, 1], strides = [1, 1]} : vector<64x4xf32> to vector<64x1xf32>
    %60 = vector.broadcast %59 : vector<64x1xf32> to vector<64x256xf32>
    %61 = arith.addf %58, %60 : vector<64x256xf32>
    %62 = vector.extract_strided_slice %13 {offsets = [64, 0], sizes = [64, 256], strides = [1, 1]} : vector<256x256xf32> to vector<64x256xf32>
    %63 = arith.addf %61, %62 : vector<64x256xf32>
    %64 = vector.extract_strided_slice %63 {offsets = [0, 0], sizes = [32, 256], strides = [1, 1]} : vector<64x256xf32> to vector<32x256xf32>
    %65 = math.tanh %64 : vector<32x256xf32>
    %66 = vector.extract_strided_slice %63 {offsets = [32, 0], sizes = [32, 256], strides = [1, 1]} : vector<64x256xf32> to vector<32x256xf32>
    %67 = arith.negf %66 : vector<32x256xf32>
    %68 = math.exp %67 : vector<32x256xf32>
    %cst_34 = arith.constant 1.000000e+00 : f32
    %69 = vector.broadcast %cst_34 : f32 to vector<32x256xf32>
    %70 = arith.addf %69, %68 : vector<32x256xf32>
    %71 = arith.divf %69, %70 : vector<32x256xf32>
    %72 = arith.mulf %65, %71 : vector<32x256xf32>
    %c1_35 = arith.constant 1 : index
    %c0_36 = arith.constant 0 : index
    %c0_37 = arith.constant 0 : index
    %73 = vector.load %arg7[%c1_35, %c0_36, %c0_37] : memref<4x64x32xbf16, #tpu.memory_space<vmem>>, vector<1x64x32xbf16>
    %74 = vector.shape_cast %73 : vector<1x64x32xbf16> to vector<64x32xbf16>
    %75 = arith.truncf %72 : vector<32x256xf32> to vector<32x256xbf16>
    %cst_38 = arith.constant dense<0.000000e+00> : vector<64x256xf32>
    %76 = tpu.matmul %74, %75, %cst_38 {dimension_numbers = #tpu.dot_dimension_numbers<[1], [0], [0], [1], [0, 0, 1, 1], [], []>} : vector<64x32xbf16>, vector<32x256xbf16>, vector<64x256xf32> -> vector<64x256xf32>
    %77 = vector.extract_strided_slice %8 {offsets = [0, 1], sizes = [64, 1], strides = [1, 1]} : vector<64x4xf32> to vector<64x1xf32>
    %78 = vector.broadcast %77 : vector<64x1xf32> to vector<64x256xf32>
    %79 = arith.addf %76, %78 : vector<64x256xf32>
    %80 = vector.extract_strided_slice %79 {offsets = [32, 0], sizes = [32, 256], strides = [1, 1]} : vector<64x256xf32> to vector<32x256xf32>
    %81 = arith.addf %45, %80 : vector<32x256xf32>
    %82 = vector.extract_strided_slice %79 {offsets = [0, 0], sizes = [32, 256], strides = [1, 1]} : vector<64x256xf32> to vector<32x256xf32>
    %83 = arith.addf %52, %82 : vector<32x256xf32>
    %84 = arith.mulf %83, %6 : vector<32x256xf32>
    %c0_39 = arith.constant 0 : index
    %c128_40 = arith.constant 128 : index
    %85 = vector.load %arg10[%c0_39, %c128_40] : memref<32x512xf32, #tpu.memory_space<vmem>>, vector<32x256xf32>
    tpu.vector_store %arg10[%c0_39, %c128_40], %84 {strides = array<i32>} : memref<32x512xf32, #tpu.memory_space<vmem>>, vector<32x256xf32>,
    %c0_41 = arith.constant 0 : index
    %c0_42 = arith.constant 0 : index
    %86 = vector.load %arg10[%c0_41, %c0_42] : memref<32x512xf32, #tpu.memory_space<vmem>>, vector<32x512xf32>
    %87 = vector.extract_strided_slice %86 {offsets = [0, 124], sizes = [32, 256], strides = [1, 1]} : vector<32x512xf32> to vector<32x256xf32>
    %88 = vector.extract_strided_slice %86 {offsets = [0, 128], sizes = [32, 256], strides = [1, 1]} : vector<32x512xf32> to vector<32x256xf32>
    %89 = vector.extract_strided_slice %86 {offsets = [0, 132], sizes = [32, 256], strides = [1, 1]} : vector<32x512xf32> to vector<32x256xf32>
    %90 = tpu.concatenate %87, %88, %89 in 0 : vector<32x256xf32>, vector<32x256xf32>, vector<32x256xf32> -> vector<96x256xf32>
    %91 = arith.truncf %90 : vector<96x256xf32> to vector<96x256xbf16>
    %c2 = arith.constant 2 : index
    %c0_43 = arith.constant 0 : index
    %c0_44 = arith.constant 0 : index
    %92 = vector.load %arg5[%c2, %c0_43, %c0_44] : memref<4x64x96xbf16, #tpu.memory_space<vmem>>, vector<1x64x96xbf16>
    %93 = vector.shape_cast %92 : vector<1x64x96xbf16> to vector<64x96xbf16>
    %cst_45 = arith.constant dense<0.000000e+00> : vector<64x256xf32>
    %94 = tpu.matmul %93, %91, %cst_45 {dimension_numbers = #tpu.dot_dimension_numbers<[1], [0], [0], [1], [0, 0, 1, 1], [], []>} : vector<64x96xbf16>, vector<96x256xbf16>, vector<64x256xf32> -> vector<64x256xf32>
    %95 = vector.extract_strided_slice %7 {offsets = [0, 2], sizes = [64, 1], strides = [1, 1]} : vector<64x4xf32> to vector<64x1xf32>
    %96 = vector.broadcast %95 : vector<64x1xf32> to vector<64x256xf32>
    %97 = arith.addf %94, %96 : vector<64x256xf32>
    %98 = vector.extract_strided_slice %13 {offsets = [128, 0], sizes = [64, 256], strides = [1, 1]} : vector<256x256xf32> to vector<64x256xf32>
    %99 = arith.addf %97, %98 : vector<64x256xf32>
    %100 = vector.extract_strided_slice %99 {offsets = [0, 0], sizes = [32, 256], strides = [1, 1]} : vector<64x256xf32> to vector<32x256xf32>
    %101 = math.tanh %100 : vector<32x256xf32>
    %102 = vector.extract_strided_slice %99 {offsets = [32, 0], sizes = [32, 256], strides = [1, 1]} : vector<64x256xf32> to vector<32x256xf32>
    %103 = arith.negf %102 : vector<32x256xf32>
    %104 = math.exp %103 : vector<32x256xf32>
    %cst_46 = arith.constant 1.000000e+00 : f32
    %105 = vector.broadcast %cst_46 : f32 to vector<32x256xf32>
    %106 = arith.addf %105, %104 : vector<32x256xf32>
    %107 = arith.divf %105, %106 : vector<32x256xf32>
    %108 = arith.mulf %101, %107 : vector<32x256xf32>
    %c2_47 = arith.constant 2 : index
    %c0_48 = arith.constant 0 : index
    %c0_49 = arith.constant 0 : index
    %109 = vector.load %arg7[%c2_47, %c0_48, %c0_49] : memref<4x64x32xbf16, #tpu.memory_space<vmem>>, vector<1x64x32xbf16>
    %110 = vector.shape_cast %109 : vector<1x64x32xbf16> to vector<64x32xbf16>
    %111 = arith.truncf %108 : vector<32x256xf32> to vector<32x256xbf16>
    %cst_50 = arith.constant dense<0.000000e+00> : vector<64x256xf32>
    %112 = tpu.matmul %110, %111, %cst_50 {dimension_numbers = #tpu.dot_dimension_numbers<[1], [0], [0], [1], [0, 0, 1, 1], [], []>} : vector<64x32xbf16>, vector<32x256xbf16>, vector<64x256xf32> -> vector<64x256xf32>
    %113 = vector.extract_strided_slice %8 {offsets = [0, 2], sizes = [64, 1], strides = [1, 1]} : vector<64x4xf32> to vector<64x1xf32>
    %114 = vector.broadcast %113 : vector<64x1xf32> to vector<64x256xf32>
    %115 = arith.addf %112, %114 : vector<64x256xf32>
    %116 = vector.extract_strided_slice %115 {offsets = [32, 0], sizes = [32, 256], strides = [1, 1]} : vector<64x256xf32> to vector<32x256xf32>
    %117 = arith.addf %81, %116 : vector<32x256xf32>
    %118 = vector.extract_strided_slice %115 {offsets = [0, 0], sizes = [32, 256], strides = [1, 1]} : vector<64x256xf32> to vector<32x256xf32>
    %119 = arith.addf %88, %118 : vector<32x256xf32>
    %120 = arith.mulf %119, %6 : vector<32x256xf32>
    %c0_51 = arith.constant 0 : index
    %c128_52 = arith.constant 128 : index
    %121 = vector.load %arg10[%c0_51, %c128_52] : memref<32x512xf32, #tpu.memory_space<vmem>>, vector<32x256xf32>
    tpu.vector_store %arg10[%c0_51, %c128_52], %120 {strides = array<i32>} : memref<32x512xf32, #tpu.memory_space<vmem>>, vector<32x256xf32>,
    %c0_53 = arith.constant 0 : index
    %c0_54 = arith.constant 0 : index
    %122 = vector.load %arg10[%c0_53, %c0_54] : memref<32x512xf32, #tpu.memory_space<vmem>>, vector<32x512xf32>
    %123 = vector.extract_strided_slice %122 {offsets = [0, 120], sizes = [32, 256], strides = [1, 1]} : vector<32x512xf32> to vector<32x256xf32>
    %124 = vector.extract_strided_slice %122 {offsets = [0, 128], sizes = [32, 256], strides = [1, 1]} : vector<32x512xf32> to vector<32x256xf32>
    %125 = vector.extract_strided_slice %122 {offsets = [0, 136], sizes = [32, 256], strides = [1, 1]} : vector<32x512xf32> to vector<32x256xf32>
    %126 = tpu.concatenate %123, %124, %125 in 0 : vector<32x256xf32>, vector<32x256xf32>, vector<32x256xf32> -> vector<96x256xf32>
    %127 = arith.truncf %126 : vector<96x256xf32> to vector<96x256xbf16>
    %c3 = arith.constant 3 : index
    %c0_55 = arith.constant 0 : index
    %c0_56 = arith.constant 0 : index
    %128 = vector.load %arg5[%c3, %c0_55, %c0_56] : memref<4x64x96xbf16, #tpu.memory_space<vmem>>, vector<1x64x96xbf16>
    %129 = vector.shape_cast %128 : vector<1x64x96xbf16> to vector<64x96xbf16>
    %cst_57 = arith.constant dense<0.000000e+00> : vector<64x256xf32>
    %130 = tpu.matmul %129, %127, %cst_57 {dimension_numbers = #tpu.dot_dimension_numbers<[1], [0], [0], [1], [0, 0, 1, 1], [], []>} : vector<64x96xbf16>, vector<96x256xbf16>, vector<64x256xf32> -> vector<64x256xf32>
    %131 = vector.extract_strided_slice %7 {offsets = [0, 3], sizes = [64, 1], strides = [1, 1]} : vector<64x4xf32> to vector<64x1xf32>
    %132 = vector.broadcast %131 : vector<64x1xf32> to vector<64x256xf32>
    %133 = arith.addf %130, %132 : vector<64x256xf32>
    %134 = vector.extract_strided_slice %13 {offsets = [192, 0], sizes = [64, 256], strides = [1, 1]} : vector<256x256xf32> to vector<64x256xf32>
    %135 = arith.addf %133, %134 : vector<64x256xf32>
    %136 = vector.extract_strided_slice %135 {offsets = [0, 0], sizes = [32, 256], strides = [1, 1]} : vector<64x256xf32> to vector<32x256xf32>
    %137 = math.tanh %136 : vector<32x256xf32>
    %138 = vector.extract_strided_slice %135 {offsets = [32, 0], sizes = [32, 256], strides = [1, 1]} : vector<64x256xf32> to vector<32x256xf32>
    %139 = arith.negf %138 : vector<32x256xf32>
    %140 = math.exp %139 : vector<32x256xf32>
    %cst_58 = arith.constant 1.000000e+00 : f32
    %141 = vector.broadcast %cst_58 : f32 to vector<32x256xf32>
    %142 = arith.addf %141, %140 : vector<32x256xf32>
    %143 = arith.divf %141, %142 : vector<32x256xf32>
    %144 = arith.mulf %137, %143 : vector<32x256xf32>
    %c3_59 = arith.constant 3 : index
    %c0_60 = arith.constant 0 : index
    %c0_61 = arith.constant 0 : index
    %145 = vector.load %arg7[%c3_59, %c0_60, %c0_61] : memref<4x64x32xbf16, #tpu.memory_space<vmem>>, vector<1x64x32xbf16>
    %146 = vector.shape_cast %145 : vector<1x64x32xbf16> to vector<64x32xbf16>
    %147 = arith.truncf %144 : vector<32x256xf32> to vector<32x256xbf16>
    %cst_62 = arith.constant dense<0.000000e+00> : vector<64x256xf32>
    %148 = tpu.matmul %146, %147, %cst_62 {dimension_numbers = #tpu.dot_dimension_numbers<[1], [0], [0], [1], [0, 0, 1, 1], [], []>} : vector<64x32xbf16>, vector<32x256xbf16>, vector<64x256xf32> -> vector<64x256xf32>
    %149 = vector.extract_strided_slice %8 {offsets = [0, 3], sizes = [64, 1], strides = [1, 1]} : vector<64x4xf32> to vector<64x1xf32>
    %150 = vector.broadcast %149 : vector<64x1xf32> to vector<64x256xf32>
    %151 = arith.addf %148, %150 : vector<64x256xf32>
    %152 = vector.extract_strided_slice %151 {offsets = [32, 0], sizes = [32, 256], strides = [1, 1]} : vector<64x256xf32> to vector<32x256xf32>
    %153 = arith.addf %117, %152 : vector<32x256xf32>
    %154 = arith.mulf %153, %6 : vector<32x256xf32>
    %c0_63 = arith.constant 0 : index
    %c0_64 = arith.constant 0 : index
    %c0_65 = arith.constant 0 : index
    %155 = vector.load %arg9[%c0_63, %c0_64, %c0_65] : memref<1x32x256xf32, #tpu.memory_space<vmem>>, vector<1x32x256xf32>
    %156 = vector.shape_cast %155 : vector<1x32x256xf32> to vector<32x256xf32>
    %157 = vector.shape_cast %154 : vector<32x256xf32> to vector<1x32x256xf32>
    tpu.vector_store %arg9[%c0_63, %c0_64, %c0_65], %157 {strides = array<i32>} : memref<1x32x256xf32, #tpu.memory_space<vmem>>, vector<1x32x256xf32>,
    return
  }
  func.func @transform_0(%arg0: i32) -> (i32, i32, i32) {
    %c0_i32 = arith.constant 0 : i32
    %c0_i32_0 = arith.constant 0 : i32
    %c0_i32_1 = arith.constant 0 : i32
    return %arg0, %c0_i32, %c0_i32_0 : i32, i32, i32
  }
  func.func @transform_1(%arg0: i32) -> (i32, i32, i32) {
    %c0_i32 = arith.constant 0 : i32
    %c0_i32_0 = arith.constant 0 : i32
    %c0_i32_1 = arith.constant 0 : i32
    return %arg0, %c0_i32, %c0_i32_0 : i32, i32, i32
  }
  func.func @transform_2(%arg0: i32) -> (i32, i32, i32) {
    %c0_i32 = arith.constant 0 : i32
    %c0_i32_0 = arith.constant 0 : i32
    %c0_i32_1 = arith.constant 0 : i32
    return %arg0, %c0_i32, %c0_i32_0 : i32, i32, i32
  }
  func.func @transform_3(%arg0: i32) -> (i32, i32) {
    %c0_i32 = arith.constant 0 : i32
    %c0_i32_0 = arith.constant 0 : i32
    %c0_i32_1 = arith.constant 0 : i32
    return %c0_i32, %c0_i32_0 : i32, i32
  }
  func.func @transform_4(%arg0: i32) -> (i32, i32, i32) {
    %c0_i32 = arith.constant 0 : i32
    %c0_i32_0 = arith.constant 0 : i32
    %c0_i32_1 = arith.constant 0 : i32
    %c0_i32_2 = arith.constant 0 : i32
    return %c0_i32, %c0_i32_0, %c0_i32_1 : i32, i32, i32
  }
  func.func @transform_5(%arg0: i32) -> (i32, i32) {
    %c0_i32 = arith.constant 0 : i32
    %c0_i32_0 = arith.constant 0 : i32
    %c0_i32_1 = arith.constant 0 : i32
    return %c0_i32, %c0_i32_0 : i32, i32
  }
  func.func @transform_6(%arg0: i32) -> (i32, i32, i32) {
    %c0_i32 = arith.constant 0 : i32
    %c0_i32_0 = arith.constant 0 : i32
    %c0_i32_1 = arith.constant 0 : i32
    %c0_i32_2 = arith.constant 0 : i32
    return %c0_i32, %c0_i32_0, %c0_i32_1 : i32, i32, i32
  }
  func.func @transform_7(%arg0: i32) -> (i32, i32) {
    %c0_i32 = arith.constant 0 : i32
    %c0_i32_0 = arith.constant 0 : i32
    %c0_i32_1 = arith.constant 0 : i32
    return %c0_i32, %c0_i32_0 : i32, i32
  }
  func.func @transform_8(%arg0: i32) -> (i32, i32, i32) {
    %c0_i32 = arith.constant 0 : i32
    %c0_i32_0 = arith.constant 0 : i32
    %c0_i32_1 = arith.constant 0 : i32
    return %arg0, %c0_i32, %c0_i32_0 : i32, i32, i32
  }
}

</mosaic_0001>

<bundles_post_ra>
// kernel: tpu_custom_call.1
= control target key start
LH: loop header
LB: loop body
LE: loop exit
PB: predicated region body
PF: predicated region fallthrough
CT: control target
= control target key end

     0   :  { %6 = vsyncpa [#allocation3], 0  ;;  %s128_s0 = inlined_call_operand.hbm [shape: f32[8,128], index: 0, kind: input, shape index: {}]   ;;  %s129_s1 = inlined_call_operand.hbm [shape: f32[8,128], index: 1, kind: output, shape index: {}]  }
   0x1   :  { %7 = vsyncpa [#allocation4], 0  ;;  %s91_s6 = smov [#allocation2]   ;;  %s43_s10 = scalar_lea.hbm %s128_s0, 128 }
   0x2   :  { %s14_s7 = sshll.u32 %s91_s6, 4  ;;  %p44_p0 = scmp.ne.s32.totalorder %s128_s0, %s43_s10  ;;  %s15_s7 = int_to_ptr.vmem [resolvable:$true] %s14_s7 }
   0x3   :  { %p47_p1 = scmp.lt.u32.totalorder %s43_s10, %s128_s0 }
   0x5   :  { %p49_p2 = pnand %p47_p1, %p44_p0 }
   0x7   :  { %52 = shalt.err (!%p49_p2)
}
   0x8   :  { %s53_s15 = scalar_lea.vmem %s15_s7, 128  ;;  %p58_p4 = scmp.lt.s32.totalorder %s15_s7, %s15_s7 }
   0x9   :  { %p54_p3 = scmp.ne.s32.totalorder %s15_s7, %s53_s15  ;;  %p59_p5 = scmp.lt.s32.totalorder %s53_s15, %s53_s15 }
   0xb   :  { %p60_p6 = por %p59_p5, %p58_p4 }
   0xd   :  { %p61_p7 = pnand %p60_p6, %p54_p3 }
   0xf   :  { %64 = shalt.err (!%p61_p7)
}
  0x10   :  { %17 = dma.hbm_to_vmem [thread:$0]  %s128_s0, 128, %s15_s7, [#allocation3]  }
  0x11   :  { %87 = dma.done.wait [#allocation3], 128  }
  0x12   :  { %88 = vsyncadd [#allocation3], 4294967168  ;;  %v21_v0 = vld [vmem:[#allocation2] sm:$0xff]  ;;  %s92_s18 = smov 1   ;;  %s93_s19 = smov [#allocation5]  }
  0x13   :  { %22 = vrot.lane.b32.xlu0 %v21_v0, %s92_s18  ;;  %s31_s20 = sshll.u32 %s93_s19, 4  ;;  %s32_s20 = int_to_ptr.vmem [resolvable:$true] %s31_s20 }
  0x14   :  { %s65_s21 = scalar_lea.vmem %s32_s20, 128  ;;  %p70_p9 = scmp.lt.s32.totalorder %s32_s20, %s32_s20 }
  0x15   :  { %p66_p8 = scmp.ne.s32.totalorder %s32_s20, %s65_s21  ;;  %p71_p10 = scmp.lt.s32.totalorder %s65_s21, %s65_s21 }
  0x17   :  { %p72_p11 = por %p71_p10, %p70_p9 }
  0x19   :  { %p73_p12 = pnand %p72_p11, %p66_p8 }
  0x85   :  { %v23_v1 = vpop.permute.xlu0 %22 }
  0x86   :  { %24 = vst [vmem:[#allocation5] sm:$0xff] %v23_v1 }
  0x87   :  { %76 = shalt.err (!%p73_p12)
}
  0x88   :  { %s77_s0 = scalar_lea.hbm %s129_s1, 128 }
  0x89   :  { %p78_p13 = scmp.ne.s32.totalorder %s129_s1, %s77_s0  ;;  %p81_p0 = scmp.lt.u32.totalorder %s77_s0, %s129_s1 }
  0x8b   :  { %p83_p1 = pnand %p81_p0, %p78_p13 }
  0x8d   :  { %86 = shalt.err (!%p83_p1)
}
  0x8e   :  { %34 = dma.vmem_to_hbm [thread:$0]  %s32_s20, 128, %s129_s1, [#allocation4]  }
  0x8f   :  { %89 = dma.done.wait [#allocation4], 128  }
  0x90   :  { %90 = vsyncadd [#allocation4], 4294967168 }
  0x91   :  { %38 = vsyncpa [#allocation3], 1 }
  0x92   :  { %39 = vsyncpa [#allocation4], 1 }

// kernel: tpu_custom_call.1
= control target key start
LH: loop header
LB: loop body
LE: loop exit
PB: predicated region body
PF: predicated region fallthrough
CT: control target
= control target key end

     0   :  { %13 = vsyncpa [#allocation4], 0  ;;  %s5553_s0 = inlined_call_operand.vmem [shape: f32[2,32,512], index: 0, kind: input, shape index: {}]   ;;  %s5554_s1 = inlined_call_operand.vmem [shape: f32[2,1,256], index: 1, kind: input, shape index: {}]   ;;  %s5555_s2 = inlined_call_operand.hbm [shape: bf16[2,16,256], index: 2, kind: input, shape index: {}]   ;;  %s5556_s3 = inlined_call_operand.vmem [shape: bf16[256,16], index: 3, kind: input, shape index: {}]   ;;  %s5557_s4 = inlined_call_operand.vmem [shape: bf16[4,64,96], index: 4, kind: input, shape index: {}]   ;;  %s5558_s5 = inlined_call_operand.vmem [shape: f32[64,4], index: 5, kind: input, shape index: {}]   ;;  %s5559_s6 = inlined_call_operand.vmem [shape: bf16[4,64,32], index: 6, kind: input, shape index: {}]   ;;  %s5560_s7 = inlined_call_operand.vmem [shape: f32[64,4], index: 7, kind: input, shape index: {}]   ;;  %s5561_s8 = inlined_call_operand.hbm [shape: f32[2,32,256], index: 8, kind: output, shape index: {}]  }
   0x1   :  { %15 = vsyncpa [#allocation4 + $0x1], 0 }
   0x2   :  { %16 = vsyncpa [#allocation5], 0 }
   0x3   :  { %18 = vsyncpa [#allocation5 + $0x1], 0  ;;  %s4432_s27 = smov 0   ;;  %s4434_s28 = smov 0  }
   0x4   :  { %s4436_s29 = smov 0   ;;  %s4438_s30 = smov 0  }
   0x5 LB: > { %s4453_s9 = sadd.s32 4294967295, %s4366_s30   ;;  %s3336_s10 = sadd.s32 4294967294, %s4366_s30   ;;  %s4366_s30 = sphi %s4438_s30, %s5621_s30   ;;  %s4362_s29 = sphi %s4436_s29, %s5620_s29   ;;  %s4358_s28 = sphi %s4434_s28, %s5619_s28   ;;  %s4354_s27 = sphi %s4432_s27, %s5618_s27  }
   0x6   : > { %s4457_s11 = sadd.s32 1, %s4366_s30   ;;  %s83_s12 = sadd.s32 1, %s4362_s29 }
   0x7   : > { %s80_s13 = ssub.s32 %s4366_s30, %s4457_s11  ;;  %p90_p0 = scmp.ne.s32.totalorder %s4362_s29, %s4358_s28 }
   0x8   : > { %p81_p1 = scmp.eq.s32.totalorder %s80_s13, 0  ;;  %p91_p2 = scmp.eq.s32.totalorder %s4366_s30, 0 }
   0x9   : > { %p96_p3 = scmp.ne.s32.totalorder %s4358_s28, %s4354_s27  ;;  %p97_p4 = scmp.eq.s32.totalorder %s4453_s9, 0 }
   0xa   : > { %s4469_s14 = scalar_select %p81_p1, %s4362_s29, %s83_s12  }
   0xb   : > { %p4471_p5 = por %p91_p2, %p90_p0  ;;  %p4475_p6 = por %p97_p4, %p96_p3 }
   0xc   : > { %p225_p7 = scmp.eq.s32.totalorder %s4453_s9, 1  ;;  %p231_p8 = scmp.eq.s32.totalorder %s3336_s10, 1 }
   0xd   : > { %p3732_p10 = scmp.lt.s32.totalorder %s4366_s30, 2  ;;  %s281_s19 = sand.u32 1, %s4362_s29  }
   0xe   : > { %p4482_p11 = por %p225_p7, %p90_p0  ;;  %p4486_p12 = por %p231_p8, %p96_p3 }
   0xf   : > { %s3531_s20 = sshll.u32 %s4366_s30, 8  ;;  %s3339_s21 = sshll.u32 %s281_s19, 4 }
  0x10   : > { %s5567_s17 = scalar_select %p4482_p11, 1, 0 }
  0x11   : > { %s5568_s18 = scalar_select %p4486_p12, 1, 0 }
  0x12   : > { %s4495_s24 = scalar_lea.hbm %s5555_s2, %s3531_s20  ;;  %s285_s25 = scalar_lea.vmem [#allocation3], %s3339_s21 }
  0x13   : > { %s292_s26 = sshll.u32 %s285_s25, 4  ;;  %p4499_p13 = pnand %p3732_p10, %p4471_p5  ;;  %s4503_s26 = int_to_ptr.vmem [resolvable:$true] %s292_s26 }
  0x14   : > { %s4505_s12 = scalar_lea.sflag [#allocation4], %s281_s19  ;;  %s4270_s13 = scalar_lea.hbm %s4495_s24, 256 }
  0x15   : > { %p4271_p0 = scmp.ne.s32.totalorder %s4495_s24, %s4270_s13  ;;  %p4272_p1 = pneg %p4499_p13 }
  0x16   : > { %s4275_s21 = scalar_lea.hbm %s5555_s2, 512  ;;  %p4276_p4 = scmp.lt.u32.totalorder %s4495_s24, %s5555_s2 }
  0x17   : > { %p4273_p2 = pnand %p4272_p1, %p4271_p0  ;;  %p4277_p5 = scmp.lt.u32.totalorder %s4275_s21, %s4270_s13 }
  0x18   : > { %p4279_p8 = scmp.lt.u32.totalorder %s4270_s13, %s4495_s24 }
  0x19   : > { %p4274_p3 = pneg %p4273_p2  ;;  %p4278_p7 = por %p4277_p5, %p4276_p4 }
  0x1b   : > { %p4280_p10 = por %p4279_p8, %p4278_p7 }
  0x1d   : > { %p4281_p9 = pnand %p4280_p10, %p4274_p3 }
  0x1f   : > { %4284 = shalt.err (!%p4281_p9)
}
  0x20   : > { %s4285_s19 = scalar_lea.vmem %s4503_s26, 256  ;;  %s4368_s25 = smov [#allocation3]  }
  0x21   : > { %p4286_p0 = scmp.ne.s32.totalorder %s4503_s26, %s4285_s19  ;;  %s4290_s20 = sshll.u32 %s4368_s25, 4  ;;  %s4291_s20 = int_to_ptr.vmem [resolvable:$false] %s4290_s20 }
  0x22   : > { %s4292_s15 = scalar_lea.vmem %s4291_s20, 512  ;;  %p4293_p11 = scmp.lt.s32.totalorder %s4503_s26, %s4291_s20 }
  0x23   : > { %p4288_p2 = pnand %p4286_p0, %p4272_p1  ;;  %p4294_p4 = scmp.lt.s32.totalorder %s4292_s15, %s4285_s19 }
  0x25   : > { %p4289_p12 = pneg %p4288_p2  ;;  %p4295_p5 = por %p4294_p4, %p4293_p11 }
  0x27   : > { %p4296_p7 = pnand %p4295_p5, %p4289_p12 }
  0x29   : > { %4299 = shalt.err (!%p4296_p7)
}
  0x2a   : > { %s4369_s13 = smov 128   ;;  %s4370_s21 = smov 8  }
  0x2b   : > { %3727 = dma.hbm_to_vmem [thread:$0]  (!%p4499_p13), %s4495_s24, 256, %s4503_s26, %s4505_s12, %s4369_s13, %s4369_s13, %s4370_s21  }
  0x2c   : > { %p3342_p9 = scmp.ge.s32.totalorder %s4366_s30, 1  ;;  %p300_p1 = scmp.lt.s32.totalorder %s4366_s30, 3 }
  0x2e   : > { %p301_p3 = pnand %p3342_p9, %p300_p1 }
  0x30   : > { %304 = sbr.rel (%p301_p3) target bundleno = 3145 (0xc49), region = 52 }
  0x37   : > { %s4536_s22 = sand.u32 1, %s4358_s28  }
  0x38   : > { %s3343_s23 = sshll.u32 %s4536_s22, 4  ;;  %s307_s19 = scalar_lea.sflag [#allocation4], %s4536_s22 }
  0x39   : > { %s4540_s25 = scalar_lea.vmem [#allocation3], %s3343_s23 }
  0x3a   : > { %4345 = dma.done.wait (%p4475_p6), %s307_s19, 256  }
  0x3b   : > { %4347 = vsyncadd (%p4475_p6), %s307_s19, 4294967040  ;;  %p352_p11 = scmp.lt.s32.totalorder %s4453_s9, 1  ;;  %s4371_s16 = smov 127   ;;  %v3999_v21 = vld [vmem:[%s4540_s25 + $0x4] ss:$8 sps:$4 sm:$0xff]   ;;  %v5563_v26 = vmov 0  }
  0x3c   : > { %s4372_s15 = smov 126   ;;  %v4001_v22 = vld [vmem:[%s4540_s25] ss:$8 sps:$4 sm:$0xff]   ;;  %627 = vmatprep.mubr.bf16.mxu0 %v5563_v26  ;;  %595 = vmatprep.subr.bf16.mxu0 %v3999_v21  ;;  %vm546_vm0 = vcmask 130048   ;;  %s4374_s23 = smov 1   ;;  %vm828_vm1 = vcmask 1039360  }
  0x3d   : > { %s4548_s24 = scalar_select %p352_p11, %s4453_s9, 1  ;;  %v4002_v27 = vld [vmem:[%s5556_s3] sm:$0xff]   ;;  %3834 = vset.pattern.permute.xlu1 %v5563_v26  ;;  %596 = vmatpush1.bf16.msra.mxu0 %v4001_v22  ;;  %v4003_v33 = vld [vmem:[%s5556_s3 + $0x8] sm:$0xff]   ;;  %v4004_v35 = vld [vmem:[%s5556_s3 + $0x10] sm:$0xff]   ;;  %vm873_vm2 = vcmask 1031168   ;;  %vm1034_vm3 = vcmask 7168  }
  0x3e   : > { %3833 = vset.pattern.permute.xlu0 %v5563_v26  ;;  %3534 = vmatprep.subr.bf16.mxu1 %v3999_v21  ;;  %v4005_v36 = vld [vmem:[%s5556_s3 + $0x18] sm:$0xff]   ;;  %v4006_v37 = vld [vmem:[%s5556_s3 + $0x20] sm:$0xff]   ;;  %v4007_v38 = vld [vmem:[%s5556_s3 + $0x28] sm:$0xff]   ;;  %vm1059_vm4 = vcmask 785408   ;;  %vm1297_vm5 = vcmask 261120   ;;  %vm1499_vm6 = vcmask 1014784  }
  0x3f   : > { %s3532_s26 = sshll.u32 %s4548_s24, 7  ;;  %3535 = vmatpush1.bf16.msra.mxu1 %v4001_v22  ;;  %707 = vmatprep.mubr.bf16.mxu1 %v5563_v26  ;;  %v4008_v42 = vld [vmem:[%s5556_s3 + $0x30] sm:$0xff]   ;;  %v4009_v61 = vld [vmem:[%s5556_s3 + $0x38] sm:$0xff]   ;;  %s3347_s12 = sshll.u32 %s4548_s24, 1  ;;  %vm1653_vm7 = vcmask 15360   ;;  %vm2109_vm8 = vcmask 982016  }
  0x40   : > { %s4554_s20 = scalar_lea.vmem %s5553_s0, %s3532_s26  ;;  %3366 = vmatmul.mubr.msk.bf16.vlgmr.msra.gmra.mrb[0].mxu0 %vm546_vm0, %v4002_v27  ;;  %s360_s21 = scalar_lea.vmem %s5554_s1, %s3347_s12  ;;  %vm2263_vm9 = vcmask 31744   ;;  %vm2719_vm10 = vcmask 916480   ;;  %vm2873_vm11 = vcmask 64512  }
  0x41   : > { %v371_v0 = vld [vmem:[%s4554_s20 + $0x48] sm:$0xff]  ;;  %v4558_v1 = vld [vmem:[%s4554_s20 + $0x50] sm:$0xff]  ;;  %v365_v12 = vld [vmem:[%s4554_s20 + $0x18] sm:$0xff]  ;;  %637 = vmatprep.mubr.bf16.mxu0 %v5563_v26  ;;  %s4375_s24 = smov 124   ;;  %s4381_s13 = smov 112  }
  0x42   : > { %v3793_v2 = vpack.i.bf16 %v4558_v1, %v371_v0  ;;  %v363_v3 = vld [vmem:[%s4554_s20 + $0x8] sm:$0xff]  ;;  %v364_v4 = vld [vmem:[%s4554_s20 + $0x10] sm:$0xff]  ;;  %v369_v14 = vld [vmem:[%s4554_s20 + $0x38] sm:$0xff]  ;;  %s3344_s25 = sshll.u32 %s4536_s22, 6  ;;  %s3533_s10 = sshll.u32 %s4453_s9, 10 }
  0x43   : > { %v375_v5 = vld [vmem:[%s4554_s20 + $0x68] sm:$0xff]  ;;  %v3783_v6 = vpack.i.bf16 %v364_v4, %v363_v3  ;;  %v376_v7 = vld [vmem:[%s4554_s20 + $0x70] sm:$0xff]  ;;  %v377_v15 = vld [vmem:[%s4554_s20 + $0x78] sm:$0xff]  ;;  %s351_s26 = scalar_lea.vmem [#allocation6], %s3344_s25  ;;  %s5508_s9 = scalar_lea.hbm %s5561_s8, %s3533_s10 }
  0x44   : > { %v367_v8 = vld [vmem:[%s4554_s20 + $0x28] sm:$0xff]  ;;  %v368_v9 = vld [vmem:[%s4554_s20 + $0x30] sm:$0xff]  ;;  %3794 = vrot.lane.b32.xlu1 %v3793_v2, %s4371_s16  ;;  %v3798_v10 = vpack.i.bf16 %v376_v7, %v375_v5  ;;  %v373_v16 = vld [vmem:[%s4554_s20 + $0x58] sm:$0xff]  ;;  %v3828_v18 = vpack.i.bf16 %v377_v15, %v376_v7  ;;  %v898_v30 = vpack.c.bf16 %v375_v5, %v371_v0  ;;  %v899_v34 = vpack.c.bf16 %v376_v7, %v4558_v1  ;;  %p5615_p12 = scmp.ne.s32.totalorder %s5567_s17, 0 }
  0x45   : > { %3784 = vrot.lane.b32.xlu0 %v3783_v6, %s4371_s16  ;;  %v3788_v11 = vpack.i.bf16 %v368_v9, %v367_v8  ;;  %v3808_v13 = vpack.i.bf16 %v367_v8, %v365_v12  ;;  %v3813_v17 = vpack.i.bf16 %v369_v14, %v368_v9  ;;  %v3823_v19 = vpack.i.bf16 %v375_v5, %v373_v16  ;;  %v362_v24 = vld [vmem:[%s4554_s20] sm:$0xff] }
  0x46   : > { %v896_v20 = vpack.c.bf16 %v368_v9, %v364_v4  ;;  %v895_v23 = vpack.c.bf16 %v367_v8, %v363_v3  ;;  %v366_v25 = vld [vmem:[%s4554_s20 + $0x20] sm:$0xff] }
  0x47   : > { %v370_v28 = vld [vmem:[%s4554_s20 + $0x40] sm:$0xff]  ;;  %v4591_v31 = vpack.c.bf16 %v366_v25, %v362_v24 }
  0x48   : > { %3799 = vrot.lane.b32.xlu1 %v3798_v10, %s4371_s16  ;;  %v374_v29 = vld [vmem:[%s4554_s20 + $0x60] sm:$0xff]  ;;  %3367 = vmatmul.mubr.msk.bf16.gmra.mrb[4].mxu0 %vm546_vm0, %v4003_v33 }
  0x49   : > { %3789 = vrot.lane.b32.xlu0 %v3788_v11, %s4371_s16  ;;  %v4597_v32 = vpack.c.bf16 %v374_v29, %v370_v28  ;;  %647 = vmatprep.mubr.bf16.mxu0 %v5563_v26  ;;  %s4378_s16 = smov 120  }
  0x4c   : > { %3809 = vrot.lane.b32.xlu1 %v3808_v13, %s4372_s15 }
  0x4d   : > { %3804 = vrot.lane.b32.xlu0 %v3783_v6, %s4372_s15 }
  0x50   : > { %3819 = vrot.lane.b32.xlu1 %v3793_v2, %s4372_s15  ;;  %3368 = vmatmul.mubr.msk.bf16.gmra.mrb[8].mxu0 %vm546_vm0, %v4004_v35 }
  0x51   : > { %3814 = vrot.lane.b32.xlu0 %v3813_v17, %s4372_s15  ;;  %657 = vmatprep.mubr.bf16.mxu0 %v5563_v26 }
  0x54   : > { %3829 = vrot.lane.b32.xlu1 %v3828_v18, %s4372_s15 }
  0x55   : > { %3824 = vrot.lane.b32.xlu0 %v3823_v19, %s4372_s15 }
  0x58   : > { %1002 = vrot.lane.b32.xlu1 %v896_v20, %s4374_s23  ;;  %3369 = vmatmul.mubr.msk.bf16.gmra.mrb[12].mxu0 %vm546_vm0, %v4005_v36 }
  0x59   : > { %1000 = vrot.lane.b32.xlu0 %v895_v23, %s4374_s23  ;;  %667 = vmatprep.mubr.bf16.mxu0 %v5563_v26 }
  0x5c   : > { %1006 = vrot.lane.b32.xlu1 %v898_v30, %s4374_s23 }
  0x5d   : > { %998 = vrot.lane.b32.xlu0 %v4591_v31, %s4374_s23 }
  0x60   : > { %1004 = vrot.lane.b32.xlu1 %v4597_v32, %s4374_s23  ;;  %3370 = vmatmul.mubr.msk.bf16.gmra.mrb[16].mxu0 %vm546_vm0, %v4006_v37 }
  0x61   : > { %1008 = vrot.lane.b32.xlu0 %v899_v34, %s4374_s23  ;;  %677 = vmatprep.mubr.bf16.mxu0 %v5563_v26 }
  0x68   : > { %3371 = vmatmul.mubr.msk.bf16.gmra.mrb[20].mxu0 %vm546_vm0, %v4007_v38 }
  0x69   : > { %687 = vmatprep.mubr.bf16.mxu0 %v5563_v26 }
  0x70   : > { %3372 = vmatmul.mubr.msk.bf16.gmra.mrb[24].mxu0 %vm546_vm0, %v4008_v42 }
  0x71   : > { %697 = vmatprep.mubr.bf16.mxu0 %v5563_v26 }
  0x78   : > { %3373 = vmatmul.mubr.msk.bf16.gmra.mrb[28].mxu0 %vm546_vm0, %v4009_v61 }
  0x79   : > { %1104 = vmatprep.mubr.bf16.mxu0 %v5563_v26 }
  0xb6   : > { %v3795_v39 = vpop.permute.xlu1 %3794 }
  0xb7   : > { %v3785_v40 = vpop.permute.xlu0 %3784  ;;  %v3797_v48 = vunpack.i.h.bf16 %v3795_v39  ;;  %v3796_v49 = vunpack.i.l.bf16 %v3795_v39 }
  0xb8   : > { %v3787_v44 = vunpack.i.h.bf16 %v3785_v40  ;;  %v3786_v45 = vunpack.i.l.bf16 %v3785_v40 }
  0xb9   : > { %v831_v59 = vsel %vm828_vm1, %v3796_v49, %v3797_v48 }
  0xba   : > { %v3800_v41 = vpop.permute.xlu1 %3799  ;;  %v829_v6 = vsel %vm828_vm1, %v3786_v45, %v3787_v44 }
  0xbb   : > { %v3790_v43 = vpop.permute.xlu0 %3789  ;;  %v3802_v50 = vunpack.i.h.bf16 %v3800_v41  ;;  %v3801_v51 = vunpack.i.l.bf16 %v3800_v41 }
  0xbc   : > { %v3792_v46 = vunpack.i.h.bf16 %v3790_v43  ;;  %v3791_v47 = vunpack.i.l.bf16 %v3790_v43 }
  0xbd   : > { %v903_v57 = vpack.c.bf16 %v3801_v51, %v3796_v49  ;;  %v905_v58 = vpack.c.bf16 %v3802_v50, %v3797_v48  ;;  %v832_v60 = vsel %vm828_vm1, %v3801_v51, %v3802_v50  ;;  %v4014_v48 = vld [vmem:[%s5556_s3 + $0x40] sm:$0xff]   ;;  %v4703_v50 = vld [vmem:[%s5558_s5 + $0x8] sm:$0xff]  ;;  %v4712_v51 = vld [vmem:[%s5558_s5 + $0x10] sm:$0xff] }
  0xbe   : > { %v3810_v52 = vpop.permute.xlu1 %3809  ;;  %v902_v53 = vpack.c.bf16 %v3792_v46, %v3787_v44  ;;  %v900_v54 = vpack.c.bf16 %v3791_v47, %v3786_v45  ;;  %v830_v1 = vsel %vm828_vm1, %v3791_v47, %v3792_v46  ;;  %v904_v5 = vpack.c.bf16 %v832_v60, %v831_v59  ;;  %v4671_v44 = vld [vmem:[%s5558_s5 + $0x28] sm:$0xff]  ;;  %v4676_v45 = vld [vmem:[%s5558_s5 + $0x20] sm:$0xff]  ;;  %v4683_v46 = vld [vmem:[%s5558_s5 + $0x30] sm:$0xff]  ;;  %3374 = vmatmul.mubr.msk.bf16.vlgmr.msra.gmra.mrb[0].mxu1 %vm546_vm0, %v4014_v48 }
  0xbf   : > { %v3805_v55 = vpop.permute.xlu0 %3804  ;;  %v3811_v62 = vunpack.i.l.bf16 %v3810_v52  ;;  %v3812_v4 = vunpack.i.h.bf16 %v3810_v52  ;;  %v901_v11 = vpack.c.bf16 %v830_v1, %v829_v6  ;;  %v4688_v47 = vld [vmem:[%s5558_s5 + $0x38] sm:$0xff]  ;;  %v4698_v49 = vld [vmem:[%s5558_s5] sm:$0xff]  ;;  %717 = vmatprep.mubr.bf16.mxu1 %v5563_v26 }
  0xc0   : > { %1014 = vrot.lane.b32.xlu1 %v902_v53, %s4374_s23  ;;  %1010 = vrot.lane.b32.xlu0 %v900_v54, %s4374_s23  ;;  %v3807_v63 = vunpack.i.h.bf16 %v3805_v55  ;;  %v3806_v7 = vunpack.i.l.bf16 %v3805_v55  ;;  %v4717_v52 = vld [vmem:[%s5558_s5 + $0x18] sm:$0xff]  ;;  %v4724_v53 = vld [vmem:[%s5560_s7] sm:$0xff] }
  0xc1   : > { %v4729_v54 = vld [vmem:[%s5560_s7 + $0x8] sm:$0xff]  ;;  %v4736_v55 = vld [vmem:[%s5560_s7 + $0x10] sm:$0xff] }
  0xc2   : > { %v3820_v56 = vpop.permute.xlu1 %3819  ;;  %v875_v14 = vsel %vm873_vm2, %v3807_v63, %v3811_v62  ;;  %v906_v18 = vpack.c.bf16 %v3812_v4, %v3806_v7  ;;  %v874_v20 = vsel %vm873_vm2, %v3806_v7, %v3807_v63 }
  0xc3   : > { %v3815_v0 = vpop.permute.xlu0 %3814  ;;  %v3822_v8 = vunpack.i.h.bf16 %v3820_v56  ;;  %v3821_v9 = vunpack.i.l.bf16 %v3820_v56  ;;  %v4741_v56 = vld [vmem:[%s5560_s7 + $0x18] sm:$0xff] }
  0xc4   : > { %v3817_v2 = vunpack.i.h.bf16 %v3815_v0  ;;  %v3816_v3 = vunpack.i.l.bf16 %v3815_v0  ;;  %1016 = vrot.lane.b32.xlu1 %v903_v57, %s4374_s23  ;;  %1020 = vrot.lane.b32.xlu0 %v905_v58, %s4374_s23 }
  0xc5   : > { %v878_v19 = vsel %vm873_vm2, %v3821_v9, %v3822_v8 }
  0xc6   : > { %v3830_v10 = vpop.permute.xlu1 %3829  ;;  %v877_v15 = vsel %vm873_vm2, %v3816_v3, %v3817_v2  ;;  %v876_v25 = vsel %vm873_vm2, %v3812_v4, %v3816_v3 }
  0xc7   : > { %v3831_v12 = vunpack.i.l.bf16 %v3830_v10  ;;  %v3825_v13 = vpop.permute.xlu0 %3824  ;;  %v908_v17 = vpack.c.bf16 %v877_v15, %v875_v14  ;;  %v3832_v22 = vunpack.i.h.bf16 %v3830_v10  ;;  %v907_v30 = vpack.c.bf16 %v876_v25, %v874_v20  ;;  %v4011_v14 = vld [vmem:[%s5557_s4 + $0x8] sm:$0xff]   ;;  %v4012_v15 = vld [vmem:[%s5557_s4 + $0x10] sm:$0xff]   ;;  %v4018_v20 = vld [vmem:[%s5556_s3 + $0x60] sm:$0xff]  }
  0xc8   : > { %v3827_v16 = vunpack.i.h.bf16 %v3825_v13  ;;  %1018 = vrot.lane.b32.xlu1 %v904_v5, %s4374_s23  ;;  %1012 = vrot.lane.b32.xlu0 %v901_v11, %s4374_s23  ;;  %v3826_v23 = vunpack.i.l.bf16 %v3825_v13  ;;  %v4010_v13 = vld [vmem:[%s5557_s4] sm:$0xff]  }
  0xc9   : > { %v881_v35 = vsel %vm873_vm2, %v3831_v12, %v3832_v22  ;;  %v4020_v22 = vld [vmem:[%s5556_s3 + $0x70] sm:$0xff]  }
  0xca   : > { %v1003_v21 = vpop.permute.xlu1 %1002  ;;  %v880_v24 = vsel %vm873_vm2, %v3827_v16, %v3831_v12  ;;  %v879_v34 = vsel %vm873_vm2, %v3822_v8, %v3826_v23  ;;  %v909_v38 = vpack.c.bf16 %v3827_v16, %v3821_v9  ;;  %v4013_v16 = vld [vmem:[%s5557_s4 + $0x18] sm:$0xff]  }
  0xcb   : > { %v1001_v27 = vpop.permute.xlu0 %1000  ;;  %v910_v29 = vpack.c.bf16 %v880_v24, %v878_v19  ;;  %v911_v39 = vpack.c.bf16 %v881_v35, %v879_v34  ;;  %v4017_v19 = vld [vmem:[%s5556_s3 + $0x58] sm:$0xff]  }
  0xcc   : > { %1026 = vrot.lane.b32.xlu1 %v908_v17, %s4374_s23  ;;  %1022 = vrot.lane.b32.xlu0 %v906_v18, %s4374_s23  ;;  %v1036_v28 = vsel %vm1034_vm3, %v1001_v27, %v1003_v21  ;;  %v4015_v17 = vld [vmem:[%s5556_s3 + $0x48] sm:$0xff]   ;;  %v4016_v18 = vld [vmem:[%s5556_s3 + $0x50] sm:$0xff]  }
  0xcd   : > { %1072 = vmatprep.subr.bf16.mxu0 %v1036_v28  ;;  %3375 = vmatmul.mubr.msk.bf16.gmra.mrb[4].mxu1 %vm546_vm0, %v4015_v17  ;;  %v4019_v21 = vld [vmem:[%s5556_s3 + $0x68] sm:$0xff]   ;;  %v4021_v23 = vld [vmem:[%s5556_s3 + $0x78] sm:$0xff]  }
  0xce   : > { %v1007_v33 = vpop.permute.xlu1 %1006  ;;  %727 = vmatprep.mubr.bf16.mxu1 %v5563_v26 }
  0xcf   : > { %v999_v36 = vpop.permute.xlu0 %998 }
  0xd0   : > { %1030 = vrot.lane.b32.xlu1 %v910_v29, %s4374_s23  ;;  %1024 = vrot.lane.b32.xlu0 %v907_v30, %s4374_s23  ;;  %v1035_v37 = vsel %vm1034_vm3, %v999_v36, %v1001_v27 }
  0xd1   : > { %1073 = vmatpush1.bf16.msra.mxu0 %v1035_v37 }
  0xd2   : > { %v1005_v40 = vpop.permute.xlu1 %1004 }
  0xd3   : > { %v1009_v41 = vpop.permute.xlu0 %1008  ;;  %v1037_v42 = vsel %vm1034_vm3, %v1005_v40, %v1007_v33 }
  0xd4   : > { %1028 = vrot.lane.b32.xlu1 %v909_v38, %s4374_s23  ;;  %1032 = vrot.lane.b32.xlu0 %v911_v39, %s4374_s23  ;;  %v1038_v43 = vsel %vm1034_vm3, %v1007_v33, %v1009_v41  ;;  %s3239_s23 = sshll.u32 %s351_s26, 4  ;;  %s5501_s23 = int_to_ptr.vmem [resolvable:$true] %s3239_s23 }
  0xd5   : > { %1074 = vmatprep.subr.bf16.mxu0 %v1038_v43  ;;  %3376 = vmatmul.mubr.msk.bf16.gmra.mrb[8].mxu1 %vm546_vm0, %v4016_v18 }
  0xd6   : > { %1075 = vmatpush1.bf16.msra.mxu0 %v1037_v42  ;;  %737 = vmatprep.mubr.bf16.mxu1 %v5563_v26 }
  0xd8   : > { %947 = vperm.xlu1 %3834, %v4671_v44   ;;  %942 = vperm.xlu0 %3833, %v4676_v45  }
  0xdc   : > { %952 = vperm.xlu1 %3834, %v4683_v46   ;;  %957 = vperm.xlu0 %3833, %v4688_v47  }
  0xdd   : > { %3377 = vmatmul.mubr.msk.bf16.gmra.mrb[12].mxu1 %vm546_vm0, %v4017_v19 }
  0xde   : > { %747 = vmatprep.mubr.bf16.mxu1 %v5563_v26 }
  0xe0   : > { %922 = vperm.xlu1 %3834, %v4698_v49   ;;  %927 = vperm.xlu0 %3833, %v4703_v50  }
  0xe4   : > { %932 = vperm.xlu1 %3834, %v4712_v51   ;;  %937 = vperm.xlu0 %3833, %v4717_v52  }
  0xe5   : > { %3378 = vmatmul.mubr.msk.bf16.gmra.mrb[16].mxu1 %vm546_vm0, %v4018_v20 }
  0xe6   : > { %757 = vmatprep.mubr.bf16.mxu1 %v5563_v26 }
  0xe8   : > { %1239 = vperm.xlu1 %3834, %v4724_v53   ;;  %1244 = vperm.xlu0 %3833, %v4729_v54  }
  0xec   : > { %1249 = vperm.xlu1 %3834, %v4736_v55   ;;  %1254 = vperm.xlu0 %3833, %v4741_v56  }
  0xed   : > { %3379 = vmatmul.mubr.msk.bf16.gmra.mrb[20].mxu1 %vm546_vm0, %v4019_v21 }
  0xee   : > { %767 = vmatprep.mubr.bf16.mxu1 %v5563_v26 }
  0xf5   : > { %3380 = vmatmul.mubr.msk.bf16.gmra.mrb[24].mxu1 %vm546_vm0, %v4020_v22 }
  0xf6   : > { %777 = vmatprep.mubr.bf16.mxu1 %v5563_v26 }
  0xfd   : > { %3381 = vmatmul.mubr.msk.bf16.gmra.mrb[28].mxu1 %vm546_vm0, %v4021_v23 }
  0xfe   : > { %1342 = vmatprep.mubr.bf16.mxu1 %v5563_v26 }
 0x132   : > { %v1015_v57 = vpop.permute.xlu1 %1014  ;;  %v1011_v58 = vpop.permute.xlu0 %1010 }
 0x136   : > { %v1017_v59 = vpop.permute.xlu1 %1016  ;;  %v1021_v60 = vpop.permute.xlu0 %1020 }
 0x13a   : > { %v1019_v61 = vpop.permute.xlu1 %1018  ;;  %v1013_v62 = vpop.permute.xlu0 %1012 }
 0x13b   : > { %v1040_v63 = vsel %vm1034_vm3, %v1013_v62, %v1015_v57  ;;  %v1039_v0 = vsel %vm1034_vm3, %v1011_v58, %v1013_v62  ;;  %v1042_v1 = vsel %vm1034_vm3, %v1019_v61, %v1021_v60  ;;  %v1041_v4 = vsel %vm1034_vm3, %v1017_v59, %v1019_v61 }
 0x13c   : > { %1076 = vmatprep.subr.bf16.mxu0 %v1040_v63 }
 0x13d   : > { %1077 = vmatpush1.bf16.msra.mxu0 %v1039_v0 }
 0x13e   : > { %v1027_v2 = vpop.permute.xlu1 %1026  ;;  %1078 = vmatprep.subr.bf16.mxu0 %v1042_v1  ;;  %v1023_v3 = vpop.permute.xlu0 %1022 }
 0x141   : > { %1079 = vmatpush1.bf16.msra.mxu0 %v1041_v4 }
 0x142   : > { %v1031_v5 = vpop.permute.xlu1 %1030  ;;  %v1025_v6 = vpop.permute.xlu0 %1024 }
 0x143   : > { %v1044_v7 = vsel %vm1034_vm3, %v1025_v6, %v1027_v2  ;;  %v1043_v8 = vsel %vm1034_vm3, %v1023_v3, %v1025_v6 }
 0x144   : > { %1080 = vmatprep.subr.bf16.mxu0 %v1044_v7 }
 0x145   : > { %1081 = vmatpush1.bf16.msra.mxu0 %v1043_v8 }
 0x146   : > { %v1029_v9 = vpop.permute.xlu1 %1028  ;;  %v1033_v10 = vpop.permute.xlu0 %1032 }
 0x147   : > { %v1045_v11 = vsel %vm1034_vm3, %v1029_v9, %v1031_v5  ;;  %v1046_v12 = vsel %vm1034_vm3, %v1031_v5, %v1033_v10 }
 0x148   : > { %1082 = vmatprep.subr.bf16.mxu0 %v1046_v12 }
 0x149   : > { %1083 = vmatpush1.bf16.msra.mxu0 %v1045_v11 }
 0x14c   : > { %3386 = vmatmul.mubr.msk.bf16.vlgmr.msra.gmra.mrb[0].mxu0 %vm1059_vm4, %v4010_v13 }
 0x14d   : > { %1114 = vmatprep.mubr.bf16.mxu0 %v5563_v26 }
 0x154   : > { %3387 = vmatmul.mubr.msk.bf16.gmra.mrb[4].mxu0 %vm1059_vm4, %v4011_v14 }
 0x155   : > { %1124 = vmatprep.mubr.bf16.mxu0 %v5563_v26 }
 0x157   : > { %v948_v35 = vpop.permute.xlu1 %947  ;;  %v943_v37 = vpop.permute.xlu0 %942 }
 0x15b   : > { %v953_v41 = vpop.permute.xlu1 %952  ;;  %v958_v42 = vpop.permute.xlu0 %957 }
 0x15c   : > { %3388 = vmatmul.mubr.msk.bf16.gmra.mrb[8].mxu0 %vm1059_vm4, %v4012_v15 }
 0x15d   : > { %1134 = vmatprep.mubr.bf16.mxu0 %v5563_v26 }
 0x15f   : > { %v923_v60 = vpop.permute.xlu1 %922  ;;  %v928_v2 = vpop.permute.xlu0 %927 }
 0x163   : > { %v933_v22 = vpop.permute.xlu1 %932 }
 0x164   : > { %3389 = vmatmul.mubr.msk.bf16.gmra.mrb[12].mxu0 %vm1059_vm4, %v4013_v16 }
 0x165   : > { %1722 = vmatprep.mubr.bf16.mxu0 %v5563_v26 }
 0x191   : > { %v4808_v24 = vpop.f32.mrb[0].mxu1 }
 0x192   : > { %v4810_v25 = vpop.f32.mrb[1].mxu1 }
 0x193   : > { %v4812_v27 = vpop.f32.mrb[2].mxu1 }
 0x194   : > { %v4814_v28 = vpop.f32.mrb[3].mxu1 }
 0x21f   : > { %v1106_v29 = vpop.f32.mrb[0].mxu0 }
 0x220   : > { %v1108_v30 = vpop.f32.mrb[1].mxu0  ;;  %v1107_v4 = vadd.f32 %v1106_v29, %v923_v60 }
 0x221   : > { %v1110_v33 = vpop.f32.mrb[2].mxu0  ;;  %v1109_v6 = vadd.f32 %v1108_v30, %v923_v60 }
 0x222   : > { %v1112_v34 = vpop.f32.mrb[3].mxu0  ;;  %v1111_v7 = vadd.f32 %v1110_v33, %v928_v2  ;;  %v938_v33 = vpop.permute.xlu0 %937 }
 0x223   : > { %v1113_v18 = vadd.f32 %v1112_v34, %v928_v2 }
 0x227   : > { %v1116_v36 = vpop.f32.mrb[4].mxu0 }
 0x228   : > { %v1118_v38 = vpop.f32.mrb[5].mxu0 }
 0x229   : > { %v1120_v39 = vpop.f32.mrb[6].mxu0 }
 0x22a   : > { %v4816_v40 = vpop.f32.mrb[7].mxu0 }
 0x22f   : > { %v1126_v43 = vpop.f32.mrb[8].mxu0 }
 0x230   : > { %v1127_v48 = vadd.f32 %v1126_v43, %v943_v37  ;;  %v1128_v57 = vpop.f32.mrb[9].mxu0 }
 0x231   : > { %v1129_v58 = vadd.f32 %v1128_v57, %v943_v37  ;;  %v1130_v59 = vpop.f32.mrb[10].mxu0  ;;  %v1121_v57 = vadd.f32 %v1120_v39, %v938_v33 }
 0x232   : > { %v3390_v61 = vmul.f32 -1.442695, %v1127_v48  ;;  %v1131_v62 = vadd.f32 %v1130_v59, %v948_v35  ;;  %v1132_v63 = vpop.f32.mrb[11].mxu0  ;;  %v1123_v59 = vadd.f32 %v4816_v40, %v938_v33  ;;  %v4022_v33 = vld [vmem:[%s5559_s6] sm:$0xff]  }
 0x233   : > { %v3391_v0 = vmul.f32 -1.442695, %v1129_v58  ;;  %v1133_v1 = vadd.f32 %v1132_v63, %v948_v35 }
 0x234   : > { %4050 = vpow2.f32 %v3390_v61  ;;  %v3392_v3 = vmul.f32 -1.442695, %v1131_v62 }
 0x235   : > { %4052 = vpow2.f32 %v3391_v0  ;;  %v3393_v5 = vmul.f32 -1.442695, %v1133_v1 }
 0x236   : > { %4054 = vpow2.f32 %v3392_v3 }
 0x237   : > { %4056 = vpow2.f32 %v3393_v5  ;;  %v1136_v8 = vpop.f32.mrb[12].mxu0 }
 0x238   : > { %v1137_v9 = vadd.f32 %v1136_v8, %v953_v41  ;;  %v1138_v10 = vpop.f32.mrb[13].mxu0  ;;  %4058 = vtanh.f32 %v1107_v4 }
 0x239   : > { %v1139_v11 = vadd.f32 %v1138_v10, %v953_v41  ;;  %v1140_v12 = vpop.f32.mrb[14].mxu0  ;;  %4060 = vtanh.f32 %v1109_v6  ;;  %v1117_v41 = vadd.f32 %v1116_v36, %v933_v22 }
 0x23a   : > { %v3394_v13 = vmul.f32 -1.442695, %v1137_v9  ;;  %v1141_v14 = vadd.f32 %v1140_v12, %v958_v42  ;;  %v1142_v15 = vpop.f32.mrb[15].mxu0  ;;  %4062 = vtanh.f32 %v1111_v7 }
 0x23b   : > { %v3395_v16 = vmul.f32 -1.442695, %v1139_v11  ;;  %v1143_v17 = vadd.f32 %v1142_v15, %v958_v42  ;;  %v1119_v42 = vadd.f32 %v1118_v38, %v933_v22 }
 0x23c   : > { %4064 = vpow2.f32 %v3394_v13  ;;  %v3396_v19 = vmul.f32 -1.442695, %v1141_v14 }
 0x23d   : > { %4066 = vpow2.f32 %v3395_v16  ;;  %v3397_v20 = vmul.f32 -1.442695, %v1143_v17 }
 0x23e   : > { %v4051_v21 = vpop.eup %4050  ;;  %4068 = vpow2.f32 %v3396_v19 }
 0x23f   : > { %v4053_v23 = vpop.eup %4052  ;;  %v1193_v29 = vadd.f32 1.0, %v4051_v21  ;;  %4070 = vpow2.f32 %v3397_v20 }
 0x240   : > { %v4055_v30 = vpop.eup %4054  ;;  %4072 = vtanh.f32 %v1113_v18  ;;  %v1194_v35 = vadd.f32 1.0, %v4053_v23 }
 0x241   : > { %v4057_v37 = vpop.eup %4056  ;;  %4074 = vrcp.f32 %v1193_v29  ;;  %v1195_v43 = vadd.f32 1.0, %v4055_v30 }
 0x242   : > { %4076 = vrcp.f32 %v1194_v35  ;;  %v1196_v34 = vadd.f32 1.0, %v4057_v37  ;;  %v4059_v48 = vpop.eup %4058  ;;  %v4023_v35 = vld [vmem:[%s5559_s6 + $0x8] sm:$0xff]   ;;  %v4829_v37 = vpop.f32.mrb[4].mxu1 }
 0x243   : > { %4078 = vrcp.f32 %v1195_v43  ;;  %v4061_v58 = vpop.eup %4060 }
 0x244   : > { %4080 = vrcp.f32 %v1196_v34  ;;  %v4063_v60 = vpop.eup %4062 }
 0x245   : > { %4082 = vtanh.f32 %v1117_v41  ;;  %v4831_v41 = vpop.f32.mrb[5].mxu1 }
 0x246   : > { %v4065_v61 = vpop.eup %4064  ;;  %4084 = vtanh.f32 %v1119_v42  ;;  %v4833_v43 = vpop.f32.mrb[6].mxu1 }
 0x247   : > { %v4067_v62 = vpop.eup %4066  ;;  %4086 = vtanh.f32 %v1121_v57  ;;  %v1197_v63 = vadd.f32 1.0, %v4065_v61  ;;  %v4835_v42 = vpop.f32.mrb[7].mxu1 }
 0x248   : > { %v4069_v36 = vpop.eup %4068  ;;  %4088 = vtanh.f32 %v1123_v59  ;;  %v1198_v0 = vadd.f32 1.0, %v4067_v62  ;;  %v4837_v34 = vpop.f32.mrb[8].mxu1 }
 0x249   : > { %v4071_v38 = vpop.eup %4070  ;;  %4090 = vrcp.f32 %v1197_v63  ;;  %v1199_v1 = vadd.f32 1.0, %v4069_v36 }
 0x24a   : > { %v4073_v2 = vpop.eup %4072  ;;  %4092 = vrcp.f32 %v1198_v0  ;;  %v1200_v39 = vadd.f32 1.0, %v4071_v38 }
 0x24b   : > { %v4075_v3 = vpop.eup %4074  ;;  %4094 = vrcp.f32 %v1199_v1 }
 0x24c   : > { %v4077_v40 = vpop.eup %4076  ;;  %4096 = vrcp.f32 %v1200_v39  ;;  %v1217_v4 = vmul.f32 %v4075_v3, %v4059_v48  ;;  %v4839_v48 = vpop.f32.mrb[9].mxu1 }
 0x24d   : > { %v4079_v5 = vpop.eup %4078  ;;  %v1218_v6 = vmul.f32 %v4077_v40, %v4061_v58  ;;  %v4841_v57 = vpop.f32.mrb[10].mxu1 }
 0x24e   : > { %v4081_v7 = vpop.eup %4080  ;;  %v1219_v8 = vmul.f32 %v4079_v5, %v4063_v60  ;;  %5570 = vst [vmem:[#allocation9_spill] sm:$0xff] %v4841_v57  ;;  %v4843_v58 = vpop.f32.mrb[11].mxu1 }
 0x24f   : > { %v4083_v9 = vpop.eup %4082  ;;  %v1220_v10 = vmul.f32 %v4081_v7, %v4073_v2  ;;  %5571 = vst [vmem:[#allocation10_spill] sm:$0xff] %v4843_v58  ;;  %v4845_v59 = vpop.f32.mrb[12].mxu1 }
 0x250   : > { %v4085_v11 = vpop.eup %4084  ;;  %v1233_v12 = vpack.c.bf16 %v1219_v8, %v1217_v4  ;;  %5572 = vst [vmem:[#allocation11_spill] sm:$0xff] %v4845_v59  ;;  %v4847_v60 = vpop.f32.mrb[13].mxu1 }
 0x251   : > { %v4087_v13 = vpop.eup %4086  ;;  %v1234_v14 = vpack.c.bf16 %v1220_v10, %v1218_v6  ;;  %5573 = vst [vmem:[#allocation12_spill] sm:$0xff] %v4847_v60  ;;  %v4849_v61 = vpop.f32.mrb[14].mxu1 }
 0x252   : > { %v4089_v15 = vpop.eup %4088  ;;  %5574 = vst [vmem:[#allocation13_spill] sm:$0xff] %v4849_v61  ;;  %v4851_v62 = vpop.f32.mrb[15].mxu1 }
 0x253   : > { %v4091_v16 = vpop.eup %4090  ;;  %1310 = vmatprep.subr.bf16.mxu1 %v1234_v14  ;;  %5575 = vst [vmem:[#allocation14_spill] sm:$0xff] %v4851_v62  ;;  %v4853_v63 = vpop.f32.mrb[16].mxu1  ;;  %v394_v14 = vld [vmem:[%s360_s21] sm:$0x3]  ;;  %s4383_s21 = smov 8  }
 0x254   : > { %v4093_v17 = vpop.eup %4092  ;;  %1311 = vmatpush1.bf16.msra.mxu1 %v1233_v12  ;;  %v1221_v18 = vmul.f32 %v4091_v16, %v4083_v9  ;;  %5576 = vst [vmem:[#allocation15_spill] sm:$0xff] %v4853_v63  ;;  %v4855_v36 = vpop.f32.mrb[17].mxu1 }
 0x255   : > { %v4095_v19 = vpop.eup %4094  ;;  %v1222_v20 = vmul.f32 %v4093_v17, %v4085_v11  ;;  %5577 = vst [vmem:[#allocation16_spill] sm:$0xff] %v4855_v36  ;;  %v4857_v0 = vpop.f32.mrb[18].mxu1  ;;  %v396_v11 = vlaneseq }
 0x256   : > { %v4097_v21 = vpop.eup %4096  ;;  %v1223_v22 = vmul.f32 %v4095_v19, %v4087_v13  ;;  %5578 = vst [vmem:[#allocation17_spill] sm:$0xff] %v4857_v0  ;;  %v4859_v38 = vpop.f32.mrb[19].mxu1 }
 0x257   : > { %v1224_v23 = vmul.f32 %v4097_v21, %v4089_v15  ;;  %5579 = vst [vmem:[#allocation18_spill] sm:$0xff] %v4859_v38  ;;  %v4861_v1 = vpop.f32.mrb[20].mxu1  ;;  %v397_v12 = vshrl.u32 %v396_v11, 7  ;;  %v1240_v16 = vpop.permute.xlu1 %1239 }
 0x258   : > { %v1235_v29 = vpack.c.bf16 %v1223_v22, %v1221_v18  ;;  %5580 = vst [vmem:[#allocation19_spill] sm:$0xff] %v4861_v1  ;;  %v4863_v2 = vpop.f32.mrb[21].mxu1  ;;  %v1245_v22 = vpop.permute.xlu0 %1244 }
 0x259   : > { %v1236_v30 = vpack.c.bf16 %v1224_v23, %v1222_v20  ;;  %5581 = vst [vmem:[#allocation20_spill] sm:$0xff] %v4863_v2  ;;  %v4865_v39 = vpop.f32.mrb[22].mxu1  ;;  %v398_v13 = vsub.s32 0, %v397_v12  ;;  %v402_v15 = vsub.s32 1, %v397_v12 }
 0x25a   : > { %5582 = vst [vmem:[#allocation21_spill] sm:$0xff] %v4865_v39  ;;  %v4867_v3 = vpop.f32.mrb[23].mxu1 }
 0x25b   : > { %1312 = vmatprep.subr.bf16.mxu1 %v1236_v30  ;;  %5583 = vst [vmem:[#allocation22_spill] sm:$0xff] %v4867_v3  ;;  %v4869_v40 = vpop.f32.mrb[24].mxu1  ;;  %v4889_v18 = vrot.slane %v394_v14, %v398_v13  ;;  %v4891_v21 = vrot.slane %v394_v14, %v402_v15  ;;  %v4242_v30 = vld [vmem:[%s4554_s20 + $0x8] sm:$0xff]  ;;  %v4245_v14 = vld [vmem:[%s4554_s20 + $0x30] sm:$0xff] }
 0x25c   : > { %1313 = vmatpush1.bf16.msra.mxu1 %v1235_v29  ;;  %5584 = vst [vmem:[#allocation23_spill] sm:$0xff] %v4869_v40  ;;  %v4871_v4 = vpop.f32.mrb[25].mxu1  ;;  %v4244_v13 = vld [vmem:[%s4554_s20 + $0x28] sm:$0xff] }
 0x25d   : > { %5585 = vst [vmem:[#allocation24_spill] sm:$0xff] %v4871_v4  ;;  %v4873_v5 = vpop.f32.mrb[26].mxu1 }
 0x25e   : > { %5586 = vst [vmem:[#allocation25_spill] sm:$0xff] %v4873_v5  ;;  %v4875_v6 = vpop.f32.mrb[27].mxu1  ;;  %v4249_v5 = vld [vmem:[%s4554_s20 + $0x68] sm:$0xff] }
 0x25f   : > { %3402 = vmatmul.mubr.msk.bf16.vlgmr.msra.gmra.mrb[32].mxu1 %vm1297_vm5, %v4022_v33  ;;  %5587 = vst [vmem:[#allocation26_spill] sm:$0xff] %v4875_v6  ;;  %v4877_v7 = vpop.f32.mrb[28].mxu1 }
 0x260   : > { %1352 = vmatprep.mubr.bf16.mxu1 %v5563_v26  ;;  %5588 = vst [vmem:[#allocation27_spill] sm:$0xff] %v4877_v7  ;;  %v4879_v8 = vpop.f32.mrb[29].mxu1 }
 0x261   : > { %5589 = vst [vmem:[#allocation28_spill] sm:$0xff] %v4879_v8  ;;  %v4881_v9 = vpop.f32.mrb[30].mxu1 }
 0x262   : > { %5590 = vst [vmem:[#allocation29_spill] sm:$0xff] %v4881_v9  ;;  %v4883_v10 = vpop.f32.mrb[31].mxu1 }
 0x263   : > { %5591 = vst [vmem:[#allocation30_spill] sm:$0xff] %v4883_v10 }
 0x267   : > { %3403 = vmatmul.mubr.msk.bf16.gmra.mrb[36].mxu1 %vm1297_vm5, %v4023_v35 }
 0x268   : > { %1362 = vmatprep.mubr.bf16.mxu1 %v5563_v26  ;;  %v4243_v26 = vld [vmem:[%s4554_s20 + $0x10] sm:$0xff] }
 0x332   : > { %v1344_v17 = vpop.f32.mrb[32].mxu1 }
 0x333   : > { %v1345_v19 = vadd.f32 %v1344_v17, %v1240_v16  ;;  %v1346_v20 = vpop.f32.mrb[33].mxu1 }
 0x334   : > { %v1347_v23 = vadd.f32 %v1346_v20, %v1240_v16  ;;  %v1348_v29 = vpop.f32.mrb[34].mxu1 }
 0x335   : > { %v1391_v33 = vadd.f32 %v4242_v30, %v1345_v19  ;;  %v1349_v35 = vadd.f32 %v1348_v29, %v1245_v22  ;;  %v1350_v11 = vpop.f32.mrb[35].mxu1  ;;  %v1250_v19 = vpop.permute.xlu1 %1249  ;;  %v4912_v30 = vld [vmem:[%s4554_s20 + $0x18] sm:$0xff] }
 0x336   : > { %v1392_v12 = vadd.f32 %v4243_v26, %v1347_v23  ;;  %v1351_v10 = vadd.f32 %v1350_v11, %v1245_v22 }
 0x337   : > { %v4896_v9 = vmul.f32 %v1391_v33, %v4889_v18  ;;  %v1393_v17 = vadd.f32 %v4244_v13, %v1349_v35  ;;  %v1255_v33 = vpop.permute.xlu0 %1254 }
 0x338   : > { %v4900_v8 = vmul.f32 %v1392_v12, %v4891_v21  ;;  %v1394_v15 = vadd.f32 %v4245_v14, %v1351_v10  ;;  %v4247_v12 = vld [vmem:[%s4554_s20 + $0x48] sm:$0xff] }
 0x339   : > { %v4904_v16 = vmul.f32 %v1393_v17, %v4889_v18 }
 0x33a   : > { %v1354_v20 = vpop.f32.mrb[36].mxu1  ;;  %v3835_v26 = vpack.i.bf16 %v4900_v8, %v4896_v9  ;;  %v4909_v22 = vmul.f32 %v1394_v15, %v4891_v21  ;;  %v4248_v15 = vld [vmem:[%s4554_s20 + $0x50] sm:$0xff] }
 0x33b   : > { %v1355_v23 = vadd.f32 %v1354_v20, %v1250_v19  ;;  %v1356_v29 = vpop.f32.mrb[37].mxu1  ;;  %v3845_v10 = vpack.i.bf16 %v4904_v16, %v4912_v30 }
 0x33c   : > { %v1357_v35 = vadd.f32 %v1356_v29, %v1250_v19  ;;  %v1358_v11 = vpop.f32.mrb[38].mxu1  ;;  %3836 = vrot.lane.b32.xlu1 %v3835_v26, %s4372_s15  ;;  %v3850_v29 = vpack.i.bf16 %v4909_v22, %v4904_v16 }
 0x33d   : > { %v1395_v13 = vadd.f32 %v4247_v12, %v1355_v23  ;;  %v1359_v17 = vadd.f32 %v1358_v11, %v1255_v33  ;;  %v1360_v14 = vpop.f32.mrb[39].mxu1  ;;  %3846 = vrot.lane.b32.xlu0 %v3845_v10, %s4375_s24  ;;  %v4250_v11 = vld [vmem:[%s4554_s20 + $0x70] sm:$0xff] }
 0x33e   : > { %v1396_v20 = vadd.f32 %v4248_v15, %v1357_v35  ;;  %v1361_v7 = vadd.f32 %v1360_v14, %v1255_v33  ;;  %v4958_v14 = vld [vmem:[%s4554_s20 + $0x78] sm:$0xff] }
 0x33f   : > { %v4921_v6 = vmul.f32 %v1395_v13, %v4889_v18  ;;  %v1397_v19 = vadd.f32 %v4249_v5, %v1359_v17  ;;  %v4952_v13 = vld [vmem:[%s4554_s20 + $0x58] sm:$0xff] }
 0x340   : > { %v4927_v23 = vmul.f32 %v1396_v20, %v4891_v21  ;;  %v1398_v12 = vadd.f32 %v4250_v11, %v1361_v7  ;;  %3841 = vrot.lane.b32.xlu1 %v3835_v26, %s4375_s24  ;;  %v4945_v7 = vld [vmem:[%s4554_s20 + $0x38] sm:$0xff]  ;;  %v1521_v20 = vpack.c.bf16 %v4904_v16, %v4896_v9 }
 0x341   : > { %v4932_v10 = vmul.f32 %v1397_v19, %v4889_v18  ;;  %3851 = vrot.lane.b32.xlu0 %v3850_v29, %s4372_s15  ;;  %v3860_v26 = vpack.i.bf16 %v4945_v7, %v4909_v22  ;;  %v1522_v19 = vpack.c.bf16 %v4909_v22, %v4900_v8 }
 0x342   : > { %v4936_v33 = vmul.f32 %v1398_v12, %v4891_v21  ;;  %v3855_v5 = vpack.i.bf16 %v4927_v23, %v4921_v6 }
 0x343   : > { %v3875_v17 = vpack.i.bf16 %v4932_v10, %v4952_v13  ;;  %v1524_v11 = vpack.c.bf16 %v4932_v10, %v4921_v6 }
 0x344   : > { %3856 = vrot.lane.b32.xlu1 %v3855_v5, %s4372_s15  ;;  %v3865_v35 = vpack.i.bf16 %v4936_v33, %v4932_v10  ;;  %v3880_v15 = vpack.i.bf16 %v4958_v14, %v4936_v33  ;;  %v1525_v29 = vpack.c.bf16 %v4936_v33, %v4927_v23 }
 0x346   : > { %3866 = vrot.lane.b32.xlu0 %v3865_v35, %s4372_s15  ;;  %s4376_s15 = smov 2  }
 0x348   : > { %3861 = vrot.lane.b32.xlu1 %v3860_v26, %s4375_s24 }
 0x34a   : > { %3871 = vrot.lane.b32.xlu0 %v3855_v5, %s4375_s24 }
 0x34c   : > { %3876 = vrot.lane.b32.xlu1 %v3875_v17, %s4375_s24 }
 0x34e   : > { %3881 = vrot.lane.b32.xlu0 %v3880_v15, %s4375_s24 }
 0x350   : > { %1619 = vrot.lane.b32.xlu1 %v1521_v20, %s4376_s15 }
 0x352   : > { %1621 = vrot.lane.b32.xlu0 %v1522_v19, %s4376_s15 }
 0x354   : > { %1617 = vrot.lane.b32.xlu1 %v4591_v31, %s4376_s15 }
 0x356   : > { %1623 = vrot.lane.b32.xlu0 %v4597_v32, %s4376_s15 }
 0x358   : > { %1627 = vrot.lane.b32.xlu1 %v1525_v29, %s4376_s15 }
 0x35a   : > { %1625 = vrot.lane.b32.xlu0 %v1524_v11, %s4376_s15 }
 0x3ae   : > { %v3837_v12 = vpop.permute.xlu1 %3836 }
 0x3af   : > { %v3847_v5 = vpop.permute.xlu0 %3846  ;;  %v3839_v17 = vunpack.i.h.bf16 %v3837_v12  ;;  %v3838_v15 = vunpack.i.l.bf16 %v3837_v12 }
 0x3b0   : > { %v3849_v62 = vunpack.i.h.bf16 %v3847_v5 }
 0x3b1   : > { %v1455_v11 = vsel %vm873_vm2, %v3838_v15, %v3839_v17 }
 0x3b2   : > { %v3842_v35 = vpop.permute.xlu1 %3841 }
 0x3b3   : > { %v3852_v26 = vpop.permute.xlu0 %3851  ;;  %v3844_v2 = vunpack.i.h.bf16 %v3842_v35  ;;  %v3843_v1 = vunpack.i.l.bf16 %v3842_v35 }
 0x3b4   : > { %v3854_v20 = vunpack.i.h.bf16 %v3852_v26  ;;  %v3853_v19 = vunpack.i.l.bf16 %v3852_v26 }
 0x3b6   : > { %v3857_v4 = vpop.permute.xlu1 %3856  ;;  %v1528_v40 = vpack.c.bf16 %v3854_v20, %v3839_v17  ;;  %v1526_v3 = vpack.c.bf16 %v3853_v19, %v3838_v15  ;;  %v1456_v39 = vsel %vm873_vm2, %v3853_v19, %v3854_v20  ;;  %v3848_v15 = vunpack.i.l.bf16 %v3847_v5 }
 0x3b7   : > { %v3858_v38 = vunpack.i.l.bf16 %v3857_v4  ;;  %v3859_v12 = vunpack.i.h.bf16 %v3857_v4  ;;  %v1527_v26 = vpack.c.bf16 %v1456_v39, %v1455_v11 }
 0x3b8   : > { %v3867_v29 = vpop.permute.xlu0 %3866  ;;  %1633 = vrot.lane.b32.xlu0 %v1528_v40, %s4376_s15  ;;  %1629 = vrot.lane.b32.xlu1 %v1526_v3, %s4376_s15  ;;  %v1500_v3 = vsel %vm1499_vm6, %v3843_v1, %v3844_v2 }
 0x3b9   : > { %v3869_v0 = vunpack.i.h.bf16 %v3867_v29  ;;  %v3868_v36 = vunpack.i.l.bf16 %v3867_v29  ;;  %v1457_v39 = vsel %vm873_vm2, %v3858_v38, %v3859_v12 }
 0x3ba   : > { %v3862_v63 = vpop.permute.xlu1 %3861 }
 0x3bb   : > { %v3863_v61 = vunpack.i.l.bf16 %v3862_v63  ;;  %v1529_v60 = vpack.c.bf16 %v3868_v36, %v3858_v38  ;;  %v3864_v20 = vunpack.i.h.bf16 %v3862_v63  ;;  %v1458_v40 = vsel %vm873_vm2, %v3868_v36, %v3869_v0 }
 0x3bc   : > { %v3872_v19 = vpop.permute.xlu0 %3871  ;;  %1631 = vrot.lane.b32.xlu1 %v1527_v26, %s4376_s15  ;;  %v1530_v29 = vpack.c.bf16 %v1458_v40, %v1457_v39 }
 0x3bd   : > { %1635 = vrot.lane.b32.xlu0 %v1529_v60, %s4376_s15  ;;  %v1502_v35 = vsel %vm1499_vm6, %v3849_v62, %v3863_v61  ;;  %v1503_v63 = vsel %vm1499_vm6, %v3863_v61, %v3864_v20  ;;  %v1501_v60 = vsel %vm1499_vm6, %v3844_v2, %v3848_v15  ;;  %v3874_v36 = vunpack.i.h.bf16 %v3872_v19 }
 0x3be   : > { %v3877_v17 = vpop.permute.xlu1 %3876  ;;  %v1533_v4 = vpack.c.bf16 %v1502_v35, %v1500_v3  ;;  %v3873_v59 = vunpack.i.l.bf16 %v3872_v19  ;;  %v1531_v3 = vpack.c.bf16 %v3869_v0, %v3859_v12  ;;  %v1534_v38 = vpack.c.bf16 %v1503_v63, %v1501_v60 }
 0x3bf   : > { %v3879_v58 = vunpack.i.h.bf16 %v3877_v17  ;;  %v1532_v2 = vpack.c.bf16 %v3849_v62, %v3843_v1  ;;  %v4377_v1 = vmov 1  }
 0x3c0   : > { %v3882_v11 = vpop.permute.xlu0 %3881  ;;  %1643 = vrot.lane.b32.xlu1 %v1533_v4, %s4376_s15  ;;  %v3878_v4 = vunpack.i.l.bf16 %v3877_v17  ;;  %v1504_v19 = vsel %vm1499_vm6, %v3873_v59, %v3874_v36  ;;  %3886 = vset.pattern.permute.xlu0 %v4377_v1 }
 0x3c1   : > { %v3883_v26 = vunpack.i.l.bf16 %v3882_v11  ;;  %1637 = vrot.lane.b32.xlu0 %v1530_v29, %s4376_s15  ;;  %v3884_v35 = vunpack.i.h.bf16 %v3882_v11  ;;  %v1535_v11 = vpack.c.bf16 %v3879_v58, %v3873_v59  ;;  %3885 = vset.pattern.permute.xlu1 %v4377_v1 }
 0x3c2   : > { %v1620_v57 = vpop.permute.xlu1 %1619  ;;  %v1505_v17 = vsel %vm1499_vm6, %v3874_v36, %v3878_v4  ;;  %v5592_v4 = vmov 0  }
 0x3c3   : > { %v1506_v40 = vsel %vm1499_vm6, %v3879_v58, %v3883_v26  ;;  %v1507_v12 = vsel %vm1499_vm6, %v3883_v26, %v3884_v35 }
 0x3c4   : > { %v1622_v5 = vpop.permute.xlu0 %1621  ;;  %1639 = vrot.lane.b32.xlu1 %v1531_v3, %s4376_s15  ;;  %v1536_v0 = vpack.c.bf16 %v1506_v40, %v1504_v19  ;;  %v1537_v29 = vpack.c.bf16 %v1507_v12, %v1505_v17  ;;  %v4024_v40 = vld [vmem:[%s5557_s4 + $0x20] sm:$0xff]   ;;  %v4028_v19 = vld [vmem:[%s5559_s6 + $0x10] sm:$0xff]  }
 0x3c5   : > { %1645 = vrot.lane.b32.xlu0 %v1534_v38, %s4376_s15  ;;  %v1655_v61 = vsel %vm1653_vm7, %v1620_v57, %v1622_v5  ;;  %3404 = vmatmul.mubr.msk.bf16.gmra.mrb[40].mxu1 %vm1297_vm5, %v4028_v19 }
 0x3c6   : > { %v1618_v20 = vpop.permute.xlu1 %1617  ;;  %1690 = vmatprep.subr.bf16.mxu0 %v1655_v61  ;;  %v4025_v61 = vld [vmem:[%s5557_s4 + $0x28] sm:$0xff]   ;;  %1372 = vmatprep.mubr.bf16.mxu1 %v5592_v4 }
 0x3c7   : > { %v1654_v39 = vsel %vm1653_vm7, %v1618_v20, %v1620_v57  ;;  %v4026_v20 = vld [vmem:[%s5557_s4 + $0x30] sm:$0xff]  }
 0x3c8   : > { %1691 = vmatpush1.bf16.msra.mxu0 %v1654_v39  ;;  %v1624_v15 = vpop.permute.xlu0 %1623  ;;  %1641 = vrot.lane.b32.xlu1 %v1532_v2, %s4376_s15  ;;  %v4027_v2 = vld [vmem:[%s5557_s4 + $0x38] sm:$0xff]  }
 0x3c9   : > { %1649 = vrot.lane.b32.xlu0 %v1536_v0, %s4376_s15  ;;  %v4029_v39 = vld [vmem:[%s5559_s6 + $0x18] sm:$0xff]  }
 0x3ca   : > { %v1628_v63 = vpop.permute.xlu1 %1627 }
 0x3cc   : > { %v1626_v60 = vpop.permute.xlu0 %1625  ;;  %1651 = vrot.lane.b32.xlu1 %v1537_v29, %s4376_s15 }
 0x3cd   : > { %1647 = vrot.lane.b32.xlu0 %v1535_v11, %s4376_s15  ;;  %v1657_v57 = vsel %vm1653_vm7, %v1626_v60, %v1628_v63  ;;  %v1656_v62 = vsel %vm1653_vm7, %v1624_v15, %v1626_v60  ;;  %3405 = vmatmul.mubr.msk.bf16.gmra.mrb[44].mxu1 %vm1297_vm5, %v4029_v39 }
 0x3ce   : > { %1692 = vmatprep.subr.bf16.mxu0 %v1657_v57  ;;  %1952 = vmatprep.mubr.bf16.mxu1 %v5592_v4 }
 0x3cf   : > { %1693 = vmatpush1.bf16.msra.mxu0 %v1656_v62 }
 0x3d0   : > { %1564 = vperm.xlu1 %3885, %v4676_v45  }
 0x3d1   : > { %1568 = vperm.xlu0 %3886, %v4671_v44  }
 0x3d4   : > { %1572 = vperm.xlu1 %3885, %v4683_v46  }
 0x3d5   : > { %1548 = vperm.xlu0 %3886, %v4698_v49  }
 0x3d8   : > { %1576 = vperm.xlu1 %3885, %v4688_v47  }
 0x3d9   : > { %1556 = vperm.xlu0 %3886, %v4712_v51  }
 0x3dc   : > { %1552 = vperm.xlu1 %3885, %v4703_v50  }
 0x3dd   : > { %1857 = vperm.xlu0 %3886, %v4724_v53  }
 0x3e0   : > { %1560 = vperm.xlu1 %3885, %v4717_v52  }
 0x3e1   : > { %1865 = vperm.xlu0 %3886, %v4736_v55  }
 0x3e4   : > { %1861 = vperm.xlu1 %3885, %v4729_v54  }
 0x3e8   : > { %1869 = vperm.xlu1 %3885, %v4741_v56  }
 0x42a   : > { %v1634_v44 = vpop.permute.xlu0 %1633  ;;  %v1630_v45 = vpop.permute.xlu1 %1629 }
 0x42e   : > { %v1632_v46 = vpop.permute.xlu1 %1631 }
 0x42f   : > { %v1636_v49 = vpop.permute.xlu0 %1635  ;;  %v1659_v47 = vsel %vm1653_vm7, %v1632_v46, %v1634_v44  ;;  %v1658_v51 = vsel %vm1653_vm7, %v1630_v45, %v1632_v46 }
 0x430   : > { %1694 = vmatprep.subr.bf16.mxu0 %v1659_v47 }
 0x431   : > { %1695 = vmatpush1.bf16.msra.mxu0 %v1658_v51 }
 0x432   : > { %v1644_v50 = vpop.permute.xlu1 %1643 }
 0x433   : > { %v1638_v53 = vpop.permute.xlu0 %1637 }
 0x434   : > { %v1660_v54 = vsel %vm1653_vm7, %v1636_v49, %v1638_v53 }
 0x436   : > { %v1640_v58 = vpop.permute.xlu1 %1639 }
 0x437   : > { %v1646_v52 = vpop.permute.xlu0 %1645  ;;  %v1661_v55 = vsel %vm1653_vm7, %v1638_v53, %v1640_v58 }
 0x438   : > { %1696 = vmatprep.subr.bf16.mxu0 %v1661_v55  ;;  %v1663_v56 = vsel %vm1653_vm7, %v1644_v50, %v1646_v52 }
 0x439   : > { %1697 = vmatpush1.bf16.msra.mxu0 %v1660_v54 }
 0x43a   : > { %v1642_v59 = vpop.permute.xlu1 %1641  ;;  %1698 = vmatprep.subr.bf16.mxu0 %v1663_v56 }
 0x43b   : > { %v1662_v26 = vsel %vm1653_vm7, %v1642_v59, %v1644_v50  ;;  %v1650_v36 = vpop.permute.xlu0 %1649 }
 0x43d   : > { %1699 = vmatpush1.bf16.msra.mxu0 %v1662_v26 }
 0x43e   : > { %v1652_v3 = vpop.permute.xlu1 %1651 }
 0x43f   : > { %v1648_v35 = vpop.permute.xlu0 %1647  ;;  %v1665_v38 = vsel %vm1653_vm7, %v1650_v36, %v1652_v3 }
 0x440   : > { %v1664_v5 = vsel %vm1653_vm7, %v1648_v35, %v1650_v36  ;;  %1700 = vmatprep.subr.bf16.mxu0 %v1665_v38 }
 0x441   : > { %1701 = vmatpush1.bf16.msra.mxu0 %v1664_v5 }
 0x444   : > { %3418 = vmatmul.mubr.msk.bf16.vlgmr.msra.gmra.mrb[16].mxu0 %vm1059_vm4, %v4024_v40 }
 0x445   : > { %1732 = vmatprep.mubr.bf16.mxu0 %v5592_v4 }
 0x44c   : > { %3419 = vmatmul.mubr.msk.bf16.gmra.mrb[20].mxu0 %vm1059_vm4, %v4025_v61 }
 0x44d   : > { %1742 = vmatprep.mubr.bf16.mxu0 %v5592_v4 }
 0x44f   : > { %v1565_v17 = vpop.permute.xlu1 %1564 }
 0x450   : > { %v1569_v44 = vpop.permute.xlu0 %1568 }
 0x453   : > { %v1573_v63 = vpop.permute.xlu1 %1572 }
 0x454   : > { %3420 = vmatmul.mubr.msk.bf16.gmra.mrb[24].mxu0 %vm1059_vm4, %v4026_v20  ;;  %v1549_v53 = vpop.permute.xlu0 %1548 }
 0x455   : > { %1752 = vmatprep.mubr.bf16.mxu0 %v5592_v4 }
 0x457   : > { %v1577_v45 = vpop.permute.xlu1 %1576 }
 0x45b   : > { %v1553_v59 = vpop.permute.xlu1 %1552 }
 0x45c   : > { %3421 = vmatmul.mubr.msk.bf16.gmra.mrb[28].mxu0 %vm1059_vm4, %v4027_v2 }
 0x45d   : > { %2332 = vmatprep.mubr.bf16.mxu0 %v5592_v4 }
 0x517   : > { %v1724_v0 = vpop.f32.mrb[16].mxu0 }
 0x518   : > { %v1726_v12 = vpop.f32.mrb[17].mxu0  ;;  %v1725_v36 = vadd.f32 %v1724_v0, %v1549_v53 }
 0x519   : > { %v1728_v15 = vpop.f32.mrb[18].mxu0  ;;  %v1727_v35 = vadd.f32 %v1726_v12, %v1549_v53  ;;  %v1561_v53 = vpop.permute.xlu1 %1560 }
 0x51a   : > { %v1730_v29 = vpop.f32.mrb[19].mxu0  ;;  %v1729_v38 = vadd.f32 %v1728_v15, %v1553_v59 }
 0x51b   : > { %v1731_v0 = vadd.f32 %v1730_v29, %v1553_v59 }
 0x51f   : > { %v1734_v11 = vpop.f32.mrb[20].mxu0 }
 0x520   : > { %v1736_v60 = vpop.f32.mrb[21].mxu0 }
 0x521   : > { %v1738_v57 = vpop.f32.mrb[22].mxu0 }
 0x522   : > { %v5059_v62 = vpop.f32.mrb[23].mxu0  ;;  %v1739_v59 = vadd.f32 %v1738_v57, %v1561_v53 }
 0x527   : > { %v1744_v46 = vpop.f32.mrb[24].mxu0 }
 0x528   : > { %v1745_v49 = vadd.f32 %v1744_v46, %v1565_v17  ;;  %v1746_v47 = vpop.f32.mrb[25].mxu0 }
 0x529   : > { %v1747_v51 = vadd.f32 %v1746_v47, %v1565_v17  ;;  %v1748_v50 = vpop.f32.mrb[26].mxu0  ;;  %v1557_v47 = vpop.permute.xlu0 %1556 }
 0x52a   : > { %v3422_v58 = vmul.f32 -1.442695, %v1745_v49  ;;  %v1749_v52 = vadd.f32 %v1748_v50, %v1569_v44  ;;  %v1750_v55 = vpop.f32.mrb[27].mxu0 }
 0x52b   : > { %v3423_v54 = vmul.f32 -1.442695, %v1747_v51  ;;  %v1751_v56 = vadd.f32 %v1750_v55, %v1569_v44  ;;  %v1735_v55 = vadd.f32 %v1734_v11, %v1557_v47 }
 0x52c   : > { %4098 = vpow2.f32 %v3422_v58  ;;  %v3424_v26 = vmul.f32 -1.442695, %v1749_v52 }
 0x52d   : > { %4100 = vpow2.f32 %v3423_v54  ;;  %v3425_v3 = vmul.f32 -1.442695, %v1751_v56 }
 0x52e   : > { %4102 = vpow2.f32 %v3424_v26 }
 0x52f   : > { %4104 = vpow2.f32 %v3425_v3  ;;  %v1754_v5 = vpop.f32.mrb[28].mxu0 }
 0x530   : > { %v1755_v40 = vadd.f32 %v1754_v5, %v1573_v63  ;;  %v1756_v61 = vpop.f32.mrb[29].mxu0  ;;  %4106 = vtanh.f32 %v1725_v36  ;;  %v1741_v36 = vadd.f32 %v5059_v62, %v1561_v53 }
 0x531   : > { %v1757_v20 = vadd.f32 %v1756_v61, %v1573_v63  ;;  %v1758_v2 = vpop.f32.mrb[30].mxu0  ;;  %4108 = vtanh.f32 %v1727_v35 }
 0x532   : > { %v3426_v19 = vmul.f32 -1.442695, %v1755_v40  ;;  %v1759_v39 = vadd.f32 %v1758_v2, %v1577_v45  ;;  %v1760_v17 = vpop.f32.mrb[31].mxu0  ;;  %4110 = vtanh.f32 %v1729_v38 }
 0x533   : > { %v3427_v44 = vmul.f32 -1.442695, %v1757_v20  ;;  %v1761_v46 = vadd.f32 %v1760_v17, %v1577_v45  ;;  %v1737_v45 = vadd.f32 %v1736_v60, %v1557_v47 }
 0x534   : > { %4112 = vpow2.f32 %v3426_v19  ;;  %v3428_v49 = vmul.f32 -1.442695, %v1759_v39 }
 0x535   : > { %4114 = vpow2.f32 %v3427_v44  ;;  %v3429_v12 = vmul.f32 -1.442695, %v1761_v46 }
 0x536   : > { %v4099_v15 = vpop.eup %4098  ;;  %4116 = vpow2.f32 %v3428_v49 }
 0x537   : > { %v4101_v51 = vpop.eup %4100  ;;  %v1811_v50 = vadd.f32 1.0, %v4099_v15  ;;  %4118 = vpow2.f32 %v3429_v12 }
 0x538   : > { %v4103_v63 = vpop.eup %4102  ;;  %4120 = vtanh.f32 %v1731_v0  ;;  %v1812_v58 = vadd.f32 1.0, %v4101_v51 }
 0x539   : > { %v4105_v52 = vpop.eup %4104  ;;  %4122 = vrcp.f32 %v1811_v50  ;;  %v1813_v54 = vadd.f32 1.0, %v4103_v63 }
 0x53a   : > { %4124 = vrcp.f32 %v1812_v58  ;;  %v1814_v29 = vadd.f32 1.0, %v4105_v52  ;;  %v4107_v56 = vpop.eup %4106 }
 0x53b   : > { %4126 = vrcp.f32 %v1813_v54  ;;  %v4109_v26 = vpop.eup %4108 }
 0x53c   : > { %4128 = vrcp.f32 %v1814_v29  ;;  %v4111_v3 = vpop.eup %4110 }
 0x53d   : > { %4130 = vtanh.f32 %v1735_v55 }
 0x53e   : > { %v4113_v35 = vpop.eup %4112  ;;  %4132 = vtanh.f32 %v1737_v45 }
 0x53f   : > { %v4115_v38 = vpop.eup %4114  ;;  %4134 = vtanh.f32 %v1739_v59  ;;  %v1815_v5 = vadd.f32 1.0, %v4113_v35 }
 0x540   : > { %v4117_v11 = vpop.eup %4116  ;;  %4136 = vtanh.f32 %v1741_v36  ;;  %v1816_v40 = vadd.f32 1.0, %v4115_v38  ;;  %v4031_v36 = vld [vmem:[%s5559_s6 + $0x28] sm:$0xff]  }
 0x541   : > { %v4119_v60 = vpop.eup %4118  ;;  %4138 = vrcp.f32 %v1815_v5  ;;  %v1817_v61 = vadd.f32 1.0, %v4117_v11  ;;  %v1862_v11 = vpop.permute.xlu1 %1861 }
 0x542   : > { %v4121_v20 = vpop.eup %4120  ;;  %4140 = vrcp.f32 %v1816_v40  ;;  %v1818_v57 = vadd.f32 1.0, %v4119_v60 }
 0x543   : > { %v4123_v2 = vpop.eup %4122  ;;  %4142 = vrcp.f32 %v1817_v61 }
 0x544   : > { %v4125_v62 = vpop.eup %4124  ;;  %4144 = vrcp.f32 %v1818_v57  ;;  %v1835_v19 = vmul.f32 %v4123_v2, %v4107_v56 }
 0x545   : > { %v4127_v39 = vpop.eup %4126  ;;  %v1836_v17 = vmul.f32 %v4125_v62, %v4109_v26  ;;  %v4030_v26 = vld [vmem:[%s5559_s6 + $0x20] sm:$0xff]  }
 0x546   : > { %v4129_v44 = vpop.eup %4128  ;;  %v1837_v46 = vmul.f32 %v4127_v39, %v4111_v3  ;;  %v1858_v3 = vpop.permute.xlu0 %1857 }
 0x547   : > { %v4131_v0 = vpop.eup %4130  ;;  %v1838_v49 = vmul.f32 %v4129_v44, %v4121_v20 }
 0x548   : > { %v4133_v12 = vpop.eup %4132  ;;  %v1852_v15 = vpack.c.bf16 %v1837_v46, %v1835_v19 }
 0x549   : > { %v4135_v47 = vpop.eup %4134  ;;  %v1853_v51 = vpack.c.bf16 %v1838_v49, %v1836_v17 }
 0x54a   : > { %v4137_v50 = vpop.eup %4136 }
 0x54b   : > { %v4139_v63 = vpop.eup %4138  ;;  %1920 = vmatprep.subr.bf16.mxu1 %v1853_v51 }
 0x54c   : > { %v4141_v53 = vpop.eup %4140  ;;  %1921 = vmatpush1.bf16.msra.mxu1 %v1852_v15  ;;  %v1839_v58 = vmul.f32 %v4139_v63, %v4131_v0  ;;  %v1866_v0 = vpop.permute.xlu0 %1865 }
 0x54d   : > { %v4143_v52 = vpop.eup %4142  ;;  %v1840_v55 = vmul.f32 %v4141_v53, %v4133_v12 }
 0x54e   : > { %v4145_v54 = vpop.eup %4144  ;;  %v1841_v45 = vmul.f32 %v4143_v52, %v4135_v47  ;;  %v1870_v47 = vpop.permute.xlu1 %1869 }
 0x54f   : > { %v1842_v29 = vmul.f32 %v4145_v54, %v4137_v50 }
 0x550   : > { %v1854_v56 = vpack.c.bf16 %v1841_v45, %v1839_v58 }
 0x551   : > { %v1855_v59 = vpack.c.bf16 %v1842_v29, %v1840_v55 }
 0x553   : > { %1922 = vmatprep.subr.bf16.mxu1 %v1855_v59 }
 0x554   : > { %1923 = vmatpush1.bf16.msra.mxu1 %v1854_v56 }
 0x557   : > { %3442 = vmatmul.mubr.msk.bf16.vlgmr.msra.gmra.mrb[48].mxu1 %vm1297_vm5, %v4030_v26 }
 0x558   : > { %1962 = vmatprep.mubr.bf16.mxu1 %v5592_v4 }
 0x55f   : > { %3443 = vmatmul.mubr.msk.bf16.gmra.mrb[52].mxu1 %vm1297_vm5, %v4031_v36 }
 0x560   : > { %1972 = vmatprep.mubr.bf16.mxu1 %v5592_v4 }
 0x62a   : > { %v1954_v35 = vpop.f32.mrb[48].mxu1 }
 0x62b   : > { %v1955_v38 = vadd.f32 %v1954_v35, %v1858_v3  ;;  %v1956_v5 = vpop.f32.mrb[49].mxu1 }
 0x62c   : > { %v1957_v40 = vadd.f32 %v1956_v5, %v1858_v3  ;;  %v1958_v60 = vpop.f32.mrb[50].mxu1  ;;  %v4379_v3 = vmov 2  }
 0x62d   : > { %v2001_v61 = vadd.f32 %v1955_v38, %v4896_v9  ;;  %v1959_v20 = vadd.f32 %v1958_v60, %v1862_v11  ;;  %v1960_v57 = vpop.f32.mrb[51].mxu1  ;;  %3937 = vset.pattern.permute.xlu0 %v4379_v3  ;;  %3938 = vset.pattern.permute.xlu1 %v4379_v3 }
 0x62e   : > { %v2002_v2 = vadd.f32 %v1957_v40, %v4900_v8  ;;  %v1961_v62 = vadd.f32 %v1960_v57, %v1862_v11 }
 0x62f   : > { %v5075_v19 = vmul.f32 %v2001_v61, %v4889_v18  ;;  %v2003_v39 = vadd.f32 %v1959_v20, %v4904_v16 }
 0x630   : > { %v5079_v17 = vmul.f32 %v2002_v2, %v4891_v21  ;;  %v2004_v44 = vadd.f32 %v1961_v62, %v4909_v22 }
 0x631   : > { %v5083_v46 = vmul.f32 %v2003_v39, %v4889_v18 }
 0x632   : > { %v1964_v9 = vpop.f32.mrb[52].mxu1  ;;  %v3887_v49 = vpack.i.bf16 %v5079_v17, %v5075_v19  ;;  %v5088_v8 = vmul.f32 %v2004_v44, %v4891_v21 }
 0x633   : > { %v1965_v12 = vadd.f32 %v1964_v9, %v1866_v0  ;;  %v1966_v15 = vpop.f32.mrb[53].mxu1  ;;  %v3897_v16 = vpack.i.bf16 %v5083_v46, %v4912_v30  ;;  %v2131_v36 = vpack.c.bf16 %v5083_v46, %v5075_v19 }
 0x634   : > { %v1967_v51 = vadd.f32 %v1966_v15, %v1866_v0  ;;  %v1968_v50 = vpop.f32.mrb[54].mxu1  ;;  %3888 = vrot.lane.b32.xlu0 %v3887_v49, %s4375_s24  ;;  %v3902_v54 = vpack.i.bf16 %v5088_v8, %v5083_v46 }
 0x635   : > { %v2005_v22 = vadd.f32 %v1965_v12, %v4921_v6  ;;  %v1969_v63 = vadd.f32 %v1968_v50, %v1870_v47  ;;  %v1970_v53 = vpop.f32.mrb[55].mxu1  ;;  %3898 = vrot.lane.b32.xlu1 %v3897_v16, %s4378_s16 }
 0x636   : > { %v2006_v58 = vadd.f32 %v1967_v51, %v4927_v23  ;;  %v1971_v52 = vadd.f32 %v1970_v53, %v1870_v47 }
 0x637   : > { %v5097_v55 = vmul.f32 %v2005_v22, %v4889_v18  ;;  %v2007_v30 = vadd.f32 %v1969_v63, %v4932_v10 }
 0x638   : > { %v5103_v45 = vmul.f32 %v2006_v58, %v4891_v21  ;;  %v2008_v6 = vadd.f32 %v1971_v52, %v4936_v33  ;;  %3893 = vrot.lane.b32.xlu0 %v3887_v49, %s4378_s16  ;;  %v3912_v33 = vpack.i.bf16 %v4945_v7, %v5088_v8  ;;  %v2132_v7 = vpack.c.bf16 %v5088_v8, %v5079_v17 }
 0x639   : > { %v5108_v29 = vmul.f32 %v2007_v30, %v4889_v18  ;;  %3903 = vrot.lane.b32.xlu1 %v3902_v54, %s4375_s24 }
 0x63a   : > { %v5112_v23 = vmul.f32 %v2008_v6, %v4891_v21  ;;  %v3907_v10 = vpack.i.bf16 %v5103_v45, %v5097_v55 }
 0x63b   : > { %v3927_v59 = vpack.i.bf16 %v5108_v29, %v4952_v13 }
 0x63c   : > { %3908 = vrot.lane.b32.xlu0 %v3907_v10, %s4375_s24  ;;  %v3917_v56 = vpack.i.bf16 %v5112_v23, %v5108_v29  ;;  %v3932_v26 = vpack.i.bf16 %v4958_v14, %v5112_v23  ;;  %v2135_v13 = vpack.c.bf16 %v5112_v23, %v5103_v45  ;;  %v2134_v14 = vpack.c.bf16 %v5108_v29, %v5097_v55 }
 0x63e   : > { %3918 = vrot.lane.b32.xlu1 %v3917_v56, %s4375_s24  ;;  %s4380_s24 = smov 4  }
 0x640   : > { %3913 = vrot.lane.b32.xlu0 %v3912_v33, %s4378_s16 }
 0x642   : > { %3923 = vrot.lane.b32.xlu1 %v3907_v10, %s4378_s16 }
 0x644   : > { %3928 = vrot.lane.b32.xlu0 %v3927_v59, %s4378_s16 }
 0x646   : > { %3933 = vrot.lane.b32.xlu1 %v3932_v26, %s4378_s16 }
 0x648   : > { %2229 = vrot.lane.b32.xlu0 %v2131_v36, %s4380_s24 }
 0x64a   : > { %2231 = vrot.lane.b32.xlu1 %v2132_v7, %s4380_s24 }
 0x64c   : > { %2227 = vrot.lane.b32.xlu0 %v4591_v31, %s4380_s24 }
 0x64e   : > { %2233 = vrot.lane.b32.xlu1 %v4597_v32, %s4380_s24 }
 0x650   : > { %2237 = vrot.lane.b32.xlu0 %v2135_v13, %s4380_s24 }
 0x652   : > { %2235 = vrot.lane.b32.xlu1 %v2134_v14, %s4380_s24 }
 0x6a6   : > { %v3889_v35 = vpop.permute.xlu0 %3888 }
 0x6a7   : > { %v5148_v38 = vpop.permute.xlu1 %3898  ;;  %v3891_v40 = vunpack.i.h.bf16 %v3889_v35  ;;  %v3890_v60 = vunpack.i.l.bf16 %v3889_v35 }
 0x6a8   : > { %v3901_v63 = vunpack.i.h.bf16 %v5148_v38  ;;  %v3900_v26 = vunpack.i.l.bf16 %v5148_v38 }
 0x6a9   : > { %v2065_v12 = vsel %vm1499_vm6, %v3890_v60, %v3891_v40 }
 0x6aa   : > { %v3894_v5 = vpop.permute.xlu0 %3893 }
 0x6ab   : > { %v3904_v11 = vpop.permute.xlu1 %3903  ;;  %v3896_v15 = vunpack.i.h.bf16 %v3894_v5  ;;  %v3895_v16 = vunpack.i.l.bf16 %v3894_v5 }
 0x6ac   : > { %v3906_v61 = vunpack.i.h.bf16 %v3904_v11  ;;  %v3905_v20 = vunpack.i.l.bf16 %v3904_v11 }
 0x6ad   : > { %v2110_v54 = vsel %vm2109_vm8, %v3895_v16, %v3896_v15  ;;  %v2111_v14 = vsel %vm2109_vm8, %v3896_v15, %v3900_v26  ;;  %v4263_v26 = vld [vmem:[%s5560_s7 + $0x8] sm:$0xff] }
 0x6ae   : > { %v2136_v57 = vpack.c.bf16 %v3905_v20, %v3890_v60  ;;  %v2138_v2 = vpack.c.bf16 %v3906_v61, %v3891_v40  ;;  %v3909_v62 = vpop.permute.xlu0 %3908  ;;  %v2066_v39 = vsel %vm1499_vm6, %v3905_v20, %v3906_v61 }
 0x6af   : > { %v3910_v0 = vunpack.i.l.bf16 %v3909_v62  ;;  %v3911_v47 = vunpack.i.h.bf16 %v3909_v62  ;;  %v2137_v50 = vpack.c.bf16 %v2066_v39, %v2065_v12 }
 0x6b0   : > { %v3919_v44 = vpop.permute.xlu1 %3918  ;;  %2243 = vrot.lane.b32.xlu1 %v2138_v2, %s4380_s24  ;;  %2239 = vrot.lane.b32.xlu0 %v2136_v57, %s4380_s24 }
 0x6b1   : > { %v3921_v9 = vunpack.i.h.bf16 %v3919_v44  ;;  %v3920_v49 = vunpack.i.l.bf16 %v3919_v44  ;;  %v2067_v6 = vsel %vm1499_vm6, %v3910_v0, %v3911_v47 }
 0x6b2   : > { %v3914_v51 = vpop.permute.xlu0 %3913 }
 0x6b3   : > { %v2139_v22 = vpack.c.bf16 %v3920_v49, %v3910_v0  ;;  %v2068_v53 = vsel %vm1499_vm6, %v3920_v49, %v3921_v9  ;;  %v3916_v58 = vunpack.i.h.bf16 %v3914_v51  ;;  %v3915_v52 = vunpack.i.l.bf16 %v3914_v51 }
 0x6b4   : > { %v3924_v30 = vpop.permute.xlu1 %3923  ;;  %2241 = vrot.lane.b32.xlu0 %v2137_v50, %s4380_s24  ;;  %v2140_v33 = vpack.c.bf16 %v2068_v53, %v2067_v6  ;;  %v2141_v60 = vpack.c.bf16 %v3921_v9, %v3911_v47  ;;  %v2142_v0 = vpack.c.bf16 %v3901_v63, %v3895_v16  ;;  %v5207_v6 = vld [vmem:[%s5558_s5 + $0x8] sm:$0xff] }
 0x6b5   : > { %2245 = vrot.lane.b32.xlu1 %v2139_v22, %s4380_s24  ;;  %v2112_v10 = vsel %vm2109_vm8, %v3901_v63, %v3915_v52  ;;  %v2113_v36 = vsel %vm2109_vm8, %v3915_v52, %v3916_v58  ;;  %v3926_v35 = vunpack.i.h.bf16 %v3924_v30  ;;  %v3925_v5 = vunpack.i.l.bf16 %v3924_v30  ;;  %v5183_v63 = vld [vmem:[%s5558_s5 + $0x20] sm:$0xff]  ;;  %v5189_v52 = vld [vmem:[%s5558_s5 + $0x28] sm:$0xff]  ;;  %v5195_v30 = vld [vmem:[%s5558_s5 + $0x38] sm:$0xff] }
 0x6b6   : > { %v3929_v56 = vpop.permute.xlu0 %3928  ;;  %v2143_v59 = vpack.c.bf16 %v2112_v10, %v2110_v54  ;;  %v2144_v61 = vpack.c.bf16 %v2113_v36, %v2111_v14  ;;  %v5201_v54 = vld [vmem:[%s5558_s5 + $0x30] sm:$0xff]  ;;  %v5213_v10 = vld [vmem:[%s5558_s5] sm:$0xff] }
 0x6b7   : > { %v3931_v11 = vunpack.i.h.bf16 %v3929_v56  ;;  %v2114_v62 = vsel %vm2109_vm8, %v3925_v5, %v3926_v35  ;;  %v3930_v39 = vunpack.i.l.bf16 %v3929_v56  ;;  %v5219_v56 = vld [vmem:[%s5558_s5 + $0x18] sm:$0xff]  ;;  %v4264_v36 = vld [vmem:[%s5560_s7 + $0x10] sm:$0xff] }
 0x6b8   : > { %v3934_v7 = vpop.permute.xlu1 %3933  ;;  %2253 = vrot.lane.b32.xlu0 %v2143_v59, %s4380_s24  ;;  %v4262_v59 = vld [vmem:[%s5560_s7] sm:$0xff] }
 0x6b9   : > { %v3935_v13 = vunpack.i.l.bf16 %v3934_v7  ;;  %2247 = vrot.lane.b32.xlu1 %v2140_v33, %s4380_s24  ;;  %v3936_v20 = vunpack.i.h.bf16 %v3934_v7  ;;  %v2115_v47 = vsel %vm2109_vm8, %v3926_v35, %v3930_v39  ;;  %v2145_v51 = vpack.c.bf16 %v3931_v11, %v3925_v5  ;;  %v5225_v33 = vld [vmem:[%s5558_s5 + $0x10] sm:$0xff]  ;;  %v4265_v7 = vld [vmem:[%s5560_s7 + $0x18] sm:$0xff] }
 0x6ba   : > { %v2230_v40 = vpop.permute.xlu0 %2229 }
 0x6bb   : > { %v2116_v38 = vsel %vm2109_vm8, %v3931_v11, %v3935_v13  ;;  %v2117_v12 = vsel %vm2109_vm8, %v3935_v13, %v3936_v20 }
 0x6bc   : > { %v2232_v57 = vpop.permute.xlu1 %2231  ;;  %2249 = vrot.lane.b32.xlu0 %v2141_v60, %s4380_s24  ;;  %v2146_v49 = vpack.c.bf16 %v2116_v38, %v2114_v62  ;;  %v2147_v50 = vpack.c.bf16 %v2117_v12, %v2115_v47  ;;  %v4032_v47 = vld [vmem:[%s5557_s4 + $0x40] sm:$0xff]  }
 0x6bd   : > { %2255 = vrot.lane.b32.xlu1 %v2144_v61, %s4380_s24  ;;  %v2265_v2 = vsel %vm2263_vm9, %v2230_v40, %v2232_v57 }
 0x6be   : > { %2300 = vmatprep.subr.bf16.mxu0 %v2265_v2  ;;  %v2228_v44 = vpop.permute.xlu0 %2227 }
 0x6bf   : > { %v2264_v9 = vsel %vm2263_vm9, %v2228_v44, %v2230_v40 }
 0x6c0   : > { %v2234_v15 = vpop.permute.xlu1 %2233  ;;  %2301 = vmatpush1.bf16.msra.mxu0 %v2264_v9  ;;  %2251 = vrot.lane.b32.xlu0 %v2142_v0, %s4380_s24 }
 0x6c1   : > { %2259 = vrot.lane.b32.xlu1 %v2146_v49, %s4380_s24 }
 0x6c2   : > { %v2238_v22 = vpop.permute.xlu0 %2237 }
 0x6c4   : > { %v2236_v53 = vpop.permute.xlu1 %2235  ;;  %2261 = vrot.lane.b32.xlu0 %v2147_v50, %s4380_s24  ;;  %v4034_v50 = vld [vmem:[%s5557_s4 + $0x50] sm:$0xff]  }
 0x6c5   : > { %v2266_v58 = vsel %vm2263_vm9, %v2234_v15, %v2236_v53  ;;  %2257 = vrot.lane.b32.xlu1 %v2145_v51, %s4380_s24  ;;  %v2267_v16 = vsel %vm2263_vm9, %v2236_v53, %v2238_v22  ;;  %v4033_v51 = vld [vmem:[%s5557_s4 + $0x48] sm:$0xff]   ;;  %v4035_v22 = vld [vmem:[%s5557_s4 + $0x58] sm:$0xff]   ;;  %v4036_v53 = vld [vmem:[%s5559_s6 + $0x30] sm:$0xff]  }
 0x6c6   : > { %2302 = vmatprep.subr.bf16.mxu0 %v2267_v16  ;;  %3444 = vmatmul.mubr.msk.bf16.gmra.mrb[40].mxu1 %vm1297_vm5, %v4036_v53  ;;  %v5593_v53 = vld [vmem:[#allocation9_spill] sm:$0xff] }
 0x6c7   : > { %2303 = vmatpush1.bf16.msra.mxu0 %v2266_v58  ;;  %1982 = vmatprep.mubr.bf16.mxu1 %v5592_v4  ;;  %v4037_v58 = vld [vmem:[%s5559_s6 + $0x38] sm:$0xff]  }
 0x6c8   : > { %2174 = vperm.xlu0 %3937, %v5183_v63  }
 0x6c9   : > { %2178 = vperm.xlu1 %3938, %v5189_v52  }
 0x6cc   : > { %2186 = vperm.xlu0 %3937, %v5195_v30  }
 0x6cd   : > { %2182 = vperm.xlu1 %3938, %v5201_v54  }
 0x6ce   : > { %3445 = vmatmul.mubr.msk.bf16.gmra.mrb[44].mxu1 %vm1297_vm5, %v4037_v58 }
 0x6cf   : > { %2562 = vmatprep.mubr.bf16.mxu1 %v5592_v4 }
 0x6d0   : > { %2162 = vperm.xlu0 %3937, %v5207_v6  }
 0x6d1   : > { %2158 = vperm.xlu1 %3938, %v5213_v10  }
 0x6d4   : > { %2170 = vperm.xlu0 %3937, %v5219_v56  }
 0x6d5   : > { %2166 = vperm.xlu1 %3938, %v5225_v33  }
 0x6d8   : > { %2471 = vperm.xlu0 %3937, %v4263_v26  }
 0x6d9   : > { %2467 = vperm.xlu1 %3938, %v4262_v59  }
 0x6dc   : > { %2479 = vperm.xlu0 %3937, %v4265_v7  }
 0x6dd   : > { %2475 = vperm.xlu1 %3938, %v4264_v36  }
 0x722   : > { %v2244_v13 = vpop.permute.xlu1 %2243  ;;  %v2240_v14 = vpop.permute.xlu0 %2239 }
 0x726   : > { %v2242_v35 = vpop.permute.xlu0 %2241 }
 0x727   : > { %v2268_v5 = vsel %vm2263_vm9, %v2240_v14, %v2242_v35  ;;  %v2246_v11 = vpop.permute.xlu1 %2245  ;;  %v2269_v40 = vsel %vm2263_vm9, %v2242_v35, %v2244_v13 }
 0x728   : > { %2304 = vmatprep.subr.bf16.mxu0 %v2269_v40 }
 0x729   : > { %2305 = vmatpush1.bf16.msra.mxu0 %v2268_v5 }
 0x72a   : > { %v2254_v60 = vpop.permute.xlu0 %2253 }
 0x72b   : > { %v2248_v61 = vpop.permute.xlu1 %2247 }
 0x72c   : > { %v2270_v62 = vsel %vm2263_vm9, %v2246_v11, %v2248_v61 }
 0x72e   : > { %v2250_v20 = vpop.permute.xlu0 %2249 }
 0x72f   : > { %v2256_v38 = vpop.permute.xlu1 %2255  ;;  %v2271_v57 = vsel %vm2263_vm9, %v2248_v61, %v2250_v20 }
 0x730   : > { %v2273_v2 = vsel %vm2263_vm9, %v2254_v60, %v2256_v38  ;;  %2306 = vmatprep.subr.bf16.mxu0 %v2271_v57 }
 0x731   : > { %2307 = vmatpush1.bf16.msra.mxu0 %v2270_v62 }
 0x732   : > { %2308 = vmatprep.subr.bf16.mxu0 %v2273_v2  ;;  %v2252_v39 = vpop.permute.xlu0 %2251 }
 0x733   : > { %v2260_v44 = vpop.permute.xlu1 %2259  ;;  %v2272_v0 = vsel %vm2263_vm9, %v2252_v39, %v2254_v60 }
 0x735   : > { %2309 = vmatpush1.bf16.msra.mxu0 %v2272_v0 }
 0x736   : > { %v2262_v49 = vpop.permute.xlu0 %2261 }
 0x737   : > { %v2258_v9 = vpop.permute.xlu1 %2257  ;;  %v2275_v15 = vsel %vm2263_vm9, %v2260_v44, %v2262_v49 }
 0x738   : > { %v2274_v12 = vsel %vm2263_vm9, %v2258_v9, %v2260_v44  ;;  %2310 = vmatprep.subr.bf16.mxu0 %v2275_v15 }
 0x739   : > { %2311 = vmatpush1.bf16.msra.mxu0 %v2274_v12 }
 0x73c   : > { %3458 = vmatmul.mubr.msk.bf16.vlgmr.msra.gmra.mrb[32].mxu0 %vm1059_vm4, %v4032_v47 }
 0x73d   : > { %2342 = vmatprep.mubr.bf16.mxu0 %v5592_v4 }
 0x744   : > { %3459 = vmatmul.mubr.msk.bf16.gmra.mrb[36].mxu0 %vm1059_vm4, %v4033_v51 }
 0x745   : > { %2352 = vmatprep.mubr.bf16.mxu0 %v5592_v4 }
 0x747   : > { %v2175_v59 = vpop.permute.xlu0 %2174 }
 0x748   : > { %v2179_v16 = vpop.permute.xlu1 %2178 }
 0x74b   : > { %v2187_v36 = vpop.permute.xlu0 %2186 }
 0x74c   : > { %3460 = vmatmul.mubr.msk.bf16.gmra.mrb[40].mxu0 %vm1059_vm4, %v4034_v50  ;;  %v2183_v26 = vpop.permute.xlu1 %2182 }
 0x74d   : > { %2362 = vmatprep.mubr.bf16.mxu0 %v5592_v4 }
 0x74f   : > { %v2163_v13 = vpop.permute.xlu0 %2162 }
 0x750   : > { %v2159_v7 = vpop.permute.xlu1 %2158  ;;  %v3572_v11 = vadd.f32 %v2163_v13, %v4812_v27  ;;  %v3574_v61 = vadd.f32 %v2163_v13, %v4814_v28  ;;  %v5594_v13 = vld [vmem:[#allocation10_spill] sm:$0xff] }
 0x751   : > { %v3568_v14 = vadd.f32 %v2159_v7, %v4808_v24  ;;  %v3570_v35 = vadd.f32 %v2159_v7, %v4810_v25 }
 0x753   : > { %v2171_v44 = vpop.permute.xlu0 %2170 }
 0x754   : > { %3461 = vmatmul.mubr.msk.bf16.gmra.mrb[44].mxu0 %vm1059_vm4, %v4035_v22  ;;  %v2167_v62 = vpop.permute.xlu1 %2166  ;;  %v3580_v25 = vadd.f32 %v2171_v44, %v4833_v43  ;;  %v3582_v12 = vadd.f32 %v2171_v44, %v4835_v42  ;;  %v3588_v43 = vadd.f32 %v2179_v16, %v5593_v53 }
 0x755   : > { %2942 = vmatprep.mubr.bf16.mxu0 %v5592_v4  ;;  %v3576_v0 = vadd.f32 %v2167_v62, %v4829_v37  ;;  %v3578_v24 = vadd.f32 %v2167_v62, %v4831_v41  ;;  %v3584_v37 = vadd.f32 %v2175_v59, %v4837_v34  ;;  %v3586_v41 = vadd.f32 %v2175_v59, %v4839_v48  ;;  %v5595_v62 = vld [vmem:[#allocation11_spill] sm:$0xff]  ;;  %v5596_v59 = vld [vmem:[#allocation12_spill] sm:$0xff] }
 0x756   : > { %v3592_v48 = vadd.f32 %v2183_v26, %v5595_v62  ;;  %v3594_v44 = vadd.f32 %v2183_v26, %v5596_v59 }
 0x80f   : > { %v2334_v5 = vpop.f32.mrb[32].mxu0 }
 0x810   : > { %v3569_v40 = vadd.f32 %v3568_v14, %v2334_v5  ;;  %v2336_v60 = vpop.f32.mrb[33].mxu0  ;;  %v3590_v14 = vadd.f32 %v2179_v16, %v5594_v13 }
 0x811   : > { %v3571_v20 = vadd.f32 %v3570_v35, %v2336_v60  ;;  %v2338_v38 = vpop.f32.mrb[34].mxu0 }
 0x812   : > { %v3573_v57 = vadd.f32 %v3572_v11, %v2338_v38  ;;  %v2340_v2 = vpop.f32.mrb[35].mxu0 }
 0x813   : > { %v3575_v39 = vadd.f32 %v3574_v61, %v2340_v2 }
 0x817   : > { %v2344_v49 = vpop.f32.mrb[36].mxu0 }
 0x818   : > { %v5285_v9 = vadd.f32 %v3576_v0, %v2344_v49  ;;  %v2346_v27 = vpop.f32.mrb[37].mxu0 }
 0x819   : > { %v5288_v28 = vadd.f32 %v3578_v24, %v2346_v27  ;;  %v2348_v15 = vpop.f32.mrb[38].mxu0  ;;  %v5597_v24 = vld [vmem:[#allocation13_spill] sm:$0xff]  ;;  %v5598_v27 = vld [vmem:[#allocation14_spill] sm:$0xff] }
 0x81a   : > { %v5290_v47 = vadd.f32 %v3580_v25, %v2348_v15  ;;  %v2350_v51 = vpop.f32.mrb[39].mxu0  ;;  %v3596_v16 = vadd.f32 %v2187_v36, %v5597_v24 }
 0x81b   : > { %v5292_v50 = vadd.f32 %v3582_v12, %v2350_v51  ;;  %v3598_v12 = vadd.f32 %v2187_v36, %v5598_v27 }
 0x81f   : > { %v2354_v22 = vpop.f32.mrb[40].mxu0 }
 0x820   : > { %v3585_v58 = vadd.f32 %v3584_v37, %v2354_v22  ;;  %v2356_v7 = vpop.f32.mrb[41].mxu0 }
 0x821   : > { %v3587_v42 = vadd.f32 %v3586_v41, %v2356_v7  ;;  %v2358_v35 = vpop.f32.mrb[42].mxu0 }
 0x822   : > { %v3462_v5 = vmul.f32 -1.442695, %v3585_v58  ;;  %v3589_v11 = vadd.f32 %v3588_v43, %v2358_v35  ;;  %v2360_v60 = vpop.f32.mrb[43].mxu0 }
 0x823   : > { %v3463_v61 = vmul.f32 -1.442695, %v3587_v42  ;;  %v3591_v38 = vadd.f32 %v3590_v14, %v2360_v60 }
 0x824   : > { %4146 = vpow2.f32 %v3462_v5  ;;  %v3464_v2 = vmul.f32 -1.442695, %v3589_v11 }
 0x825   : > { %4148 = vpow2.f32 %v3463_v61  ;;  %v3465_v34 = vmul.f32 -1.442695, %v3591_v38 }
 0x826   : > { %4150 = vpow2.f32 %v3464_v2 }
 0x827   : > { %4152 = vpow2.f32 %v3465_v34  ;;  %v2364_v0 = vpop.f32.mrb[44].mxu0 }
 0x828   : > { %v3593_v49 = vadd.f32 %v3592_v48, %v2364_v0  ;;  %v2366_v25 = vpop.f32.mrb[45].mxu0  ;;  %4154 = vtanh.f32 %v3569_v40 }
 0x829   : > { %v3595_v15 = vadd.f32 %v3594_v44, %v2366_v25  ;;  %v2368_v51 = vpop.f32.mrb[46].mxu0  ;;  %4156 = vtanh.f32 %v3571_v20 }
 0x82a   : > { %v3466_v37 = vmul.f32 -1.442695, %v3593_v49  ;;  %v3597_v41 = vadd.f32 %v3596_v16, %v2368_v51  ;;  %v2370_v22 = vpop.f32.mrb[47].mxu0  ;;  %4158 = vtanh.f32 %v3573_v57 }
 0x82b   : > { %v3467_v53 = vmul.f32 -1.442695, %v3595_v15  ;;  %v3599_v43 = vadd.f32 %v3598_v12, %v2370_v22 }
 0x82c   : > { %4160 = vpow2.f32 %v3466_v37  ;;  %v3468_v26 = vmul.f32 -1.442695, %v3597_v41 }
 0x82d   : > { %4162 = vpow2.f32 %v3467_v53  ;;  %v3469_v58 = vmul.f32 -1.442695, %v3599_v43 }
 0x82e   : > { %v4147_v7 = vpop.eup %4146  ;;  %4164 = vpow2.f32 %v3468_v26 }
 0x82f   : > { %v4149_v13 = vpop.eup %4148  ;;  %v2421_v14 = vadd.f32 1.0, %v4147_v7  ;;  %4166 = vpow2.f32 %v3469_v58 }
 0x830   : > { %v4151_v36 = vpop.eup %4150  ;;  %4168 = vtanh.f32 %v3575_v39  ;;  %v2422_v40 = vadd.f32 1.0, %v4149_v13 }
 0x831   : > { %v4153_v42 = vpop.eup %4152  ;;  %4170 = vrcp.f32 %v2421_v14  ;;  %v2423_v20 = vadd.f32 1.0, %v4151_v36  ;;  %v4038_v36 = vld [vmem:[%s5559_s6 + $0x40] sm:$0xff]  }
 0x832   : > { %4172 = vrcp.f32 %v2422_v40  ;;  %v2424_v35 = vadd.f32 1.0, %v4153_v42  ;;  %v4155_v57 = vpop.eup %4154  ;;  %v4039_v40 = vld [vmem:[%s5559_s6 + $0x48] sm:$0xff]   ;;  %v2468_v42 = vpop.permute.xlu1 %2467 }
 0x833   : > { %4174 = vrcp.f32 %v2423_v20  ;;  %v4157_v5 = vpop.eup %4156 }
 0x834   : > { %4176 = vrcp.f32 %v2424_v35  ;;  %v4159_v11 = vpop.eup %4158 }
 0x835   : > { %4178 = vtanh.f32 %v5285_v9 }
 0x836   : > { %v4161_v60 = vpop.eup %4160  ;;  %4180 = vtanh.f32 %v5288_v28 }
 0x837   : > { %v4163_v61 = vpop.eup %4162  ;;  %4182 = vtanh.f32 %v5290_v47  ;;  %v2425_v39 = vadd.f32 1.0, %v4161_v60 }
 0x838   : > { %v4165_v38 = vpop.eup %4164  ;;  %4184 = vtanh.f32 %v5292_v50  ;;  %v2426_v2 = vadd.f32 1.0, %v4163_v61 }
 0x839   : > { %v4167_v34 = vpop.eup %4166  ;;  %4186 = vrcp.f32 %v2425_v39  ;;  %v2427_v62 = vadd.f32 1.0, %v4165_v38 }
 0x83a   : > { %v4169_v48 = vpop.eup %4168  ;;  %4188 = vrcp.f32 %v2426_v2  ;;  %v2428_v59 = vadd.f32 1.0, %v4167_v34 }
 0x83b   : > { %v4171_v44 = vpop.eup %4170  ;;  %4190 = vrcp.f32 %v2427_v62 }
 0x83c   : > { %v4173_v9 = vpop.eup %4172  ;;  %4192 = vrcp.f32 %v2428_v59  ;;  %v2445_v0 = vmul.f32 %v4171_v44, %v4155_v57 }
 0x83d   : > { %v4175_v28 = vpop.eup %4174  ;;  %v2446_v24 = vmul.f32 %v4173_v9, %v4157_v5  ;;  %v2472_v5 = vpop.permute.xlu0 %2471 }
 0x83e   : > { %v4177_v16 = vpop.eup %4176  ;;  %v2447_v47 = vmul.f32 %v4175_v28, %v4159_v11 }
 0x83f   : > { %v4179_v49 = vpop.eup %4178  ;;  %v2448_v25 = vmul.f32 %v4177_v16, %v4169_v48 }
 0x840   : > { %v4181_v27 = vpop.eup %4180  ;;  %v2462_v50 = vpack.c.bf16 %v2447_v47, %v2445_v0  ;;  %v2476_v0 = vpop.permute.xlu1 %2475 }
 0x841   : > { %v4183_v12 = vpop.eup %4182  ;;  %v2463_v15 = vpack.c.bf16 %v2448_v25, %v2446_v24 }
 0x842   : > { %v4185_v51 = vpop.eup %4184 }
 0x843   : > { %v4187_v37 = vpop.eup %4186  ;;  %2530 = vmatprep.subr.bf16.mxu1 %v2463_v15 }
 0x844   : > { %v4189_v41 = vpop.eup %4188  ;;  %2531 = vmatpush1.bf16.msra.mxu1 %v2462_v50  ;;  %v2449_v22 = vmul.f32 %v4187_v37, %v4179_v49  ;;  %v4266_v49 = vld [vmem:[%s4554_s20 + $0x18] sm:$0xff] }
 0x845   : > { %v4191_v53 = vpop.eup %4190  ;;  %v2450_v43 = vmul.f32 %v4189_v41, %v4181_v27  ;;  %v2480_v27 = vpop.permute.xlu0 %2479 }
 0x846   : > { %v4193_v26 = vpop.eup %4192  ;;  %v2451_v58 = vmul.f32 %v4191_v53, %v4183_v12 }
 0x847   : > { %v2452_v7 = vmul.f32 %v4193_v26, %v4185_v51 }
 0x848   : > { %v2464_v13 = vpack.c.bf16 %v2451_v58, %v2449_v22 }
 0x849   : > { %v2465_v14 = vpack.c.bf16 %v2452_v7, %v2450_v43 }
 0x84b   : > { %2532 = vmatprep.subr.bf16.mxu1 %v2465_v14 }
 0x84c   : > { %2533 = vmatpush1.bf16.msra.mxu1 %v2464_v13 }
 0x84f   : > { %3482 = vmatmul.mubr.msk.bf16.vlgmr.msra.gmra.mrb[56].mxu1 %vm1297_vm5, %v4038_v36 }
 0x850   : > { %2572 = vmatprep.mubr.bf16.mxu1 %v5592_v4 }
 0x857   : > { %3483 = vmatmul.mubr.msk.bf16.gmra.mrb[60].mxu1 %vm1297_vm5, %v4039_v40 }
 0x858   : > { %2582 = vmatprep.mubr.bf16.mxu1 %v5592_v4 }
 0x922   : > { %v2564_v20 = vpop.f32.mrb[56].mxu1 }
 0x923   : > { %v2565_v35 = vadd.f32 %v2564_v20, %v2468_v42  ;;  %v2566_v57 = vpop.f32.mrb[57].mxu1  ;;  %v4269_v20 = vld [vmem:[%s4554_s20 + $0x78] sm:$0xff] }
 0x924   : > { %v2567_v11 = vadd.f32 %v2566_v57, %v2468_v42  ;;  %v2568_v60 = vpop.f32.mrb[58].mxu1  ;;  %v4382_v57 = vmov 3  }
 0x925   : > { %v2611_v61 = vadd.f32 %v2565_v35, %v5075_v19  ;;  %v2569_v39 = vadd.f32 %v2568_v60, %v2472_v5  ;;  %v2570_v38 = vpop.f32.mrb[59].mxu1  ;;  %3989 = vset.pattern.permute.xlu1 %v4382_v57  ;;  %3990 = vset.pattern.permute.xlu0 %v4382_v57 }
 0x926   : > { %v2612_v2 = vadd.f32 %v2567_v11, %v5079_v17  ;;  %v2571_v34 = vadd.f32 %v2570_v38, %v2472_v5 }
 0x927   : > { %v2619_v62 = vmul.f32 %v2611_v61, %v4889_v18  ;;  %v2613_v48 = vadd.f32 %v2569_v39, %v5083_v46 }
 0x928   : > { %v2620_v59 = vmul.f32 %v2612_v2, %v4891_v21  ;;  %v2614_v44 = vadd.f32 %v2571_v34, %v5088_v8 }
 0x929   : > { %v2621_v9 = vmul.f32 %v2613_v48, %v4889_v18 }
 0x92a   : > { %v2622_v28 = vmul.f32 %v2614_v44, %v4891_v21  ;;  %v2574_v19 = vpop.f32.mrb[60].mxu1  ;;  %v3939_v24 = vpack.i.bf16 %v2620_v59, %v2619_v62 }
 0x92b   : > { %v2575_v16 = vadd.f32 %v2574_v19, %v2476_v0  ;;  %v2576_v47 = vpop.f32.mrb[61].mxu1  ;;  %v3949_v17 = vpack.i.bf16 %v2621_v9, %v4266_v49  ;;  %v2741_v25 = vpack.c.bf16 %v2621_v9, %v2619_v62 }
 0x92c   : > { %v2577_v50 = vadd.f32 %v2576_v47, %v2476_v0  ;;  %v2578_v12 = vpop.f32.mrb[62].mxu1  ;;  %3940 = vrot.lane.b32.xlu1 %v3939_v24, %s4378_s16  ;;  %v3954_v46 = vpack.i.bf16 %v2622_v28, %v2621_v9  ;;  %v2742_v15 = vpack.c.bf16 %v2622_v28, %v2620_v59 }
 0x92d   : > { %v2615_v8 = vadd.f32 %v2575_v16, %v5097_v55  ;;  %v2579_v51 = vadd.f32 %v2578_v12, %v2480_v27  ;;  %v2580_v37 = vpop.f32.mrb[63].mxu1  ;;  %3950 = vrot.lane.b32.xlu0 %v3949_v17, %s4381_s13 }
 0x92e   : > { %v2616_v41 = vadd.f32 %v2577_v50, %v5103_v45  ;;  %v2581_v22 = vadd.f32 %v2580_v37, %v2480_v27 }
 0x92f   : > { %v2623_v53 = vmul.f32 %v2615_v8, %v4889_v18  ;;  %v2617_v43 = vadd.f32 %v2579_v51, %v5108_v29  ;;  %v4267_v29 = vld [vmem:[%s4554_s20 + $0x38] sm:$0xff] }
 0x930   : > { %v2624_v26 = vmul.f32 %v2616_v41, %v4891_v21  ;;  %v2618_v58 = vadd.f32 %v2581_v22, %v5112_v23  ;;  %3945 = vrot.lane.b32.xlu1 %v3939_v24, %s4381_s13  ;;  %v3964_v40 = vpack.i.bf16 %v4267_v29, %v2622_v28  ;;  %v4268_v23 = vld [vmem:[%s4554_s20 + $0x58] sm:$0xff]  ;;  %s4384_s20 = smov [#allocation6]  }
 0x931   : > { %v2625_v55 = vmul.f32 %v2617_v43, %v4889_v18  ;;  %3955 = vrot.lane.b32.xlu0 %v3954_v46, %s4378_s16 }
 0x932   : > { %v2626_v7 = vmul.f32 %v2618_v58, %v4891_v21  ;;  %v3959_v45 = vpack.i.bf16 %v2624_v26, %v2623_v53 }
 0x933   : > { %v2744_v13 = vpack.c.bf16 %v2625_v55, %v2623_v53  ;;  %v3979_v42 = vpack.i.bf16 %v2625_v55, %v4268_v23 }
 0x934   : > { %3960 = vrot.lane.b32.xlu1 %v3959_v45, %s4378_s16  ;;  %v3969_v14 = vpack.i.bf16 %v2626_v7, %v2625_v55  ;;  %v2745_v36 = vpack.c.bf16 %v2626_v7, %v2624_v26  ;;  %v3984_v35 = vpack.i.bf16 %v4269_v20, %v2626_v7 }
 0x936   : > { %3970 = vrot.lane.b32.xlu0 %v3969_v14, %s4378_s16  ;;  %s4304_s16 = sshll.u32 %s4384_s20, 4  ;;  %s4305_s16 = int_to_ptr.vmem [resolvable:$false] %s4304_s16 }
 0x937   : > { %s4306_s15 = scalar_lea.vmem %s4305_s16, 2048  ;;  %p4307_p10 = scmp.lt.s32.totalorder %s5501_s23, %s4305_s16 }
 0x938   : > { %3965 = vrot.lane.b32.xlu1 %v3964_v40, %s4381_s13 }
 0x93a   : > { %3975 = vrot.lane.b32.xlu0 %v3959_v45, %s4381_s13 }
 0x93c   : > { %3980 = vrot.lane.b32.xlu1 %v3979_v42, %s4381_s13 }
 0x93e   : > { %3985 = vrot.lane.b32.xlu0 %v3984_v35, %s4381_s13  ;;  %s3226_s13 = scalar_lea.sflag [#allocation5], %s4536_s22 }
 0x940   : > { %2839 = vrot.lane.b32.xlu1 %v2741_v25, %s4383_s21 }
 0x942   : > { %2841 = vrot.lane.b32.xlu0 %v2742_v15, %s4383_s21 }
 0x944   : > { %2837 = vrot.lane.b32.xlu1 %v4591_v31, %s4383_s21 }
 0x946   : > { %2843 = vrot.lane.b32.xlu0 %v4597_v32, %s4383_s21 }
 0x948   : > { %2847 = vrot.lane.b32.xlu1 %v2745_v36, %s4383_s21 }
 0x94a   : > { %2845 = vrot.lane.b32.xlu0 %v2744_v13, %s4383_s21 }
 0x99e   : > { %v3941_v5 = vpop.permute.xlu1 %3940 }
 0x99f   : > { %v5350_v11 = vpop.permute.xlu0 %3950  ;;  %v3943_v39 = vunpack.i.h.bf16 %v3941_v5  ;;  %v3942_v38 = vunpack.i.l.bf16 %v3941_v5 }
 0x9a0   : > { %v3953_v25 = vunpack.i.h.bf16 %v5350_v11  ;;  %v3952_v53 = vunpack.i.l.bf16 %v5350_v11 }
 0x9a1   : > { %v2675_v32 = vsel %vm2109_vm8, %v3942_v38, %v3943_v39 }
 0x9a2   : > { %v3946_v60 = vpop.permute.xlu1 %3945 }
 0x9a3   : > { %v3956_v61 = vpop.permute.xlu0 %3955  ;;  %v3948_v19 = vunpack.i.h.bf16 %v3946_v60  ;;  %v3947_v24 = vunpack.i.l.bf16 %v3946_v60 }
 0x9a4   : > { %v3958_v2 = vunpack.i.h.bf16 %v3956_v61  ;;  %v3957_v34 = vunpack.i.l.bf16 %v3956_v61 }
 0x9a5   : > { %v2720_v15 = vsel %vm2719_vm10, %v3947_v24, %v3948_v19  ;;  %v2721_v55 = vsel %vm2719_vm10, %v3948_v19, %v3952_v53  ;;  %v2752_v60 = vpack.c.bf16 %v3953_v25, %v3947_v24  ;;  %v420_v53 = vld [vmem:[%s5560_s7 + $0x30] sm:$0xff] }
 0x9a6   : > { %v2748_v62 = vpack.c.bf16 %v3958_v2, %v3943_v39  ;;  %v2746_v48 = vpack.c.bf16 %v3957_v34, %v3942_v38  ;;  %v3961_v59 = vpop.permute.xlu1 %3960  ;;  %v2676_v31 = vsel %vm2109_vm8, %v3957_v34, %v3958_v2 }
 0x9a7   : > { %v3962_v9 = vunpack.i.l.bf16 %v3961_v59  ;;  %v2747_v16 = vpack.c.bf16 %v2676_v31, %v2675_v32  ;;  %v3963_v47 = vunpack.i.h.bf16 %v3961_v59 }
 0x9a8   : > { %v3971_v44 = vpop.permute.xlu0 %3970  ;;  %2853 = vrot.lane.b32.xlu0 %v2748_v62, %s4383_s21  ;;  %2849 = vrot.lane.b32.xlu1 %v2746_v48, %s4383_s21 }
 0x9a9   : > { %v3973_v0 = vunpack.i.h.bf16 %v3971_v44  ;;  %v3972_v28 = vunpack.i.l.bf16 %v3971_v44  ;;  %v2677_v8 = vsel %vm2109_vm8, %v3962_v9, %v3963_v47 }
 0x9aa   : > { %v3966_v49 = vpop.permute.xlu1 %3965 }
 0x9ab   : > { %v2749_v17 = vpack.c.bf16 %v3972_v28, %v3962_v9  ;;  %v2678_v27 = vsel %vm2109_vm8, %v3972_v28, %v3973_v0  ;;  %v3968_v50 = vunpack.i.h.bf16 %v3966_v49  ;;  %v3967_v12 = vunpack.i.l.bf16 %v3966_v49 }
 0x9ac   : > { %v3976_v46 = vpop.permute.xlu0 %3975  ;;  %2851 = vrot.lane.b32.xlu1 %v2747_v16, %s4383_s21  ;;  %v2750_v41 = vpack.c.bf16 %v2678_v27, %v2677_v8  ;;  %v2751_v36 = vpack.c.bf16 %v3973_v0, %v3963_v47  ;;  %v4043_v8 = vld [vmem:[%s5557_s4 + $0x78] sm:$0xff]  }
 0x9ad   : > { %2855 = vrot.lane.b32.xlu0 %v2749_v17, %s4383_s21  ;;  %v2722_v51 = vsel %vm2719_vm10, %v3953_v25, %v3967_v12  ;;  %v2723_v43 = vsel %vm2719_vm10, %v3967_v12, %v3968_v50  ;;  %v3978_v7 = vunpack.i.h.bf16 %v3976_v46  ;;  %v3977_v45 = vunpack.i.l.bf16 %v3976_v46  ;;  %v4040_v12 = vld [vmem:[%s5557_s4 + $0x60] sm:$0xff]   ;;  %v4041_v46 = vld [vmem:[%s5557_s4 + $0x68] sm:$0xff]  }
 0x9ae   : > { %v3981_v37 = vpop.permute.xlu1 %3980  ;;  %v2753_v22 = vpack.c.bf16 %v2722_v51, %v2720_v15  ;;  %v2754_v29 = vpack.c.bf16 %v2723_v43, %v2721_v55  ;;  %v4042_v15 = vld [vmem:[%s5557_s4 + $0x70] sm:$0xff]   ;;  %v421_v43 = vld [vmem:[%s5560_s7 + $0x38] sm:$0xff] }
 0x9af   : > { %v3983_v13 = vunpack.i.h.bf16 %v3981_v37  ;;  %v2724_v35 = vsel %vm2719_vm10, %v3977_v45, %v3978_v7  ;;  %v3982_v5 = vunpack.i.l.bf16 %v3981_v37  ;;  %v4044_v51 = vld [vmem:[%s5559_s6 + $0x50] sm:$0xff]   ;;  %v4045_v37 = vld [vmem:[%s5559_s6 + $0x58] sm:$0xff]  }
 0x9b0   : > { %v3986_v26 = vpop.permute.xlu0 %3985  ;;  %2863 = vrot.lane.b32.xlu1 %v2753_v22, %s4383_s21  ;;  %3484 = vmatmul.mubr.msk.bf16.gmra.mrb[40].mxu1 %vm1297_vm5, %v4044_v51  ;;  %v418_v22 = vld [vmem:[%s5560_s7 + $0x20] sm:$0xff] }
 0x9b1   : > { %v3987_v58 = vunpack.i.l.bf16 %v3986_v26  ;;  %2857 = vrot.lane.b32.xlu0 %v2750_v41, %s4383_s21  ;;  %v3988_v40 = vunpack.i.h.bf16 %v3986_v26  ;;  %v2725_v34 = vsel %vm2719_vm10, %v3978_v7, %v3982_v5  ;;  %v2755_v62 = vpack.c.bf16 %v3983_v13, %v3977_v45  ;;  %2592 = vmatprep.mubr.bf16.mxu1 %v5592_v4  ;;  %v419_v41 = vld [vmem:[%s5560_s7 + $0x28] sm:$0xff] }
 0x9b2   : > { %v2840_v14 = vpop.permute.xlu1 %2839 }
 0x9b3   : > { %v2726_v23 = vsel %vm2719_vm10, %v3983_v13, %v3987_v58  ;;  %v2727_v38 = vsel %vm2719_vm10, %v3987_v58, %v3988_v40  ;;  %v5599_v13 = vld [vmem:[#allocation15_spill] sm:$0xff] }
 0x9b4   : > { %v2842_v42 = vpop.permute.xlu0 %2841  ;;  %2859 = vrot.lane.b32.xlu1 %v2751_v36, %s4383_s21  ;;  %v2756_v61 = vpack.c.bf16 %v2726_v23, %v2724_v35  ;;  %v2757_v48 = vpack.c.bf16 %v2727_v38, %v2725_v34  ;;  %v5600_v36 = vld [vmem:[#allocation16_spill] sm:$0xff]  ;;  %v5602_v35 = vld [vmem:[#allocation18_spill] sm:$0xff]  ;;  %v5603_v34 = vld [vmem:[#allocation19_spill] sm:$0xff] }
 0x9b5   : > { %2865 = vrot.lane.b32.xlu0 %v2754_v29, %s4383_s21  ;;  %v2875_v20 = vsel %vm2873_vm11, %v2840_v14, %v2842_v42 }
 0x9b6   : > { %v2838_v11 = vpop.permute.xlu1 %2837  ;;  %2910 = vmatprep.subr.bf16.mxu0 %v2875_v20 }
 0x9b7   : > { %v2874_v39 = vsel %vm2873_vm11, %v2838_v11, %v2840_v14 }
 0x9b8   : > { %2911 = vmatpush1.bf16.msra.mxu0 %v2874_v39  ;;  %v2844_v2 = vpop.permute.xlu0 %2843  ;;  %2861 = vrot.lane.b32.xlu1 %v2752_v60, %s4383_s21 }
 0x9b9   : > { %2869 = vrot.lane.b32.xlu0 %v2756_v61, %s4383_s21  ;;  %3485 = vmatmul.mubr.msk.bf16.gmra.mrb[44].mxu1 %vm1297_vm5, %v4045_v37 }
 0x9ba   : > { %v2848_v59 = vpop.permute.xlu1 %2847  ;;  %3168 = vmatprep.mubr.bf16.mxu1 %v5592_v4 }
 0x9bc   : > { %v2846_v31 = vpop.permute.xlu0 %2845  ;;  %2871 = vrot.lane.b32.xlu1 %v2757_v48, %s4383_s21  ;;  %v5604_v48 = vld [vmem:[#allocation20_spill] sm:$0xff] }
 0x9bd   : > { %v2876_v44 = vsel %vm2873_vm11, %v2844_v2, %v2846_v31  ;;  %2867 = vrot.lane.b32.xlu0 %v2755_v62, %s4383_s21  ;;  %v2877_v32 = vsel %vm2873_vm11, %v2846_v31, %v2848_v59  ;;  %s4300_s21 = scalar_lea.vmem %s5501_s23, 1024 }
 0x9be   : > { %2912 = vmatprep.subr.bf16.mxu0 %v2877_v32  ;;  %p4301_p6 = scmp.ne.s32.totalorder %s5501_s23, %s4300_s21  ;;  %p4308_p0 = scmp.lt.s32.totalorder %s4306_s15, %s4300_s21 }
 0x9bf   : > { %2913 = vmatpush1.bf16.msra.mxu0 %v2876_v44  ;;  %v5605_v44 = vld [vmem:[#allocation21_spill] sm:$0xff] }
 0x9c0   : > { %2784 = vperm.xlu1 %3989, %v5183_v63   ;;  %p4302_p13 = pnand %p4301_p6, %p5615_p12  ;;  %p4309_p2 = por %p4308_p0, %p4307_p10 }
 0x9c1   : > { %2788 = vperm.xlu0 %3990, %v5189_v52  }
 0x9c2   : > { %p4303_p8 = pneg %p4302_p13 }
 0x9c4   : > { %2792 = vperm.xlu1 %3989, %v5201_v54   ;;  %p4310_p4 = pnand %p4309_p2, %p4303_p8 }
 0x9c5   : > { %2768 = vperm.xlu0 %3990, %v5213_v10  }
 0x9c8   : > { %2796 = vperm.xlu1 %3989, %v5195_v30  }
 0x9c9   : > { %2776 = vperm.xlu0 %3990, %v5225_v33  }
 0x9cc   : > { %2772 = vperm.xlu1 %3989, %v5207_v6  }
 0x9cd   : > { %3991 = vset.pattern.permute.xlu0 %v5592_v4 }
 0x9ce   : > { %1259 = vperm.xlu0 %3991, %v418_v22  }
 0x9d0   : > { %2780 = vperm.xlu1 %3989, %v5219_v56  }
 0x9d2   : > { %1274 = vperm.xlu0 %3991, %v421_v43  }
 0x9d4   : > { %3992 = vset.pattern.permute.xlu1 %v5592_v4 }
 0x9d5   : > { %1264 = vperm.xlu1 %3992, %v419_v41  }
 0x9d6   : > { %3994 = vset.pattern.permute.xlu0 %v4377_v1 }
 0x9d7   : > { %1877 = vperm.xlu0 %3994, %v419_v41  }
 0x9d9   : > { %1269 = vperm.xlu1 %3992, %v420_v53  }
 0x9db   : > { %3995 = vset.pattern.permute.xlu0 %v4379_v3 }
 0x9dc   : > { %2483 = vperm.xlu0 %3995, %v418_v22  }
 0x9dd   : > { %3993 = vset.pattern.permute.xlu1 %v4377_v1 }
 0x9de   : > { %1873 = vperm.xlu1 %3993, %v418_v22  }
 0x9e0   : > { %2495 = vperm.xlu0 %3995, %v421_v43  }
 0x9e2   : > { %1881 = vperm.xlu1 %3993, %v420_v53  }
 0x9e4   : > { %3998 = vset.pattern.permute.xlu0 %v4382_v57 }
 0x9e5   : > { %3093 = vperm.xlu0 %3998, %v419_v41  }
 0x9e6   : > { %1885 = vperm.xlu1 %3993, %v421_v43  }
 0x9ea   : > { %3996 = vset.pattern.permute.xlu1 %v4379_v3  ;;  %v5601_v3 = vld [vmem:[#allocation17_spill] sm:$0xff] }
 0x9eb   : > { %2487 = vperm.xlu1 %3996, %v419_v41  }
 0x9ef   : > { %2491 = vperm.xlu1 %3996, %v420_v53  }
 0x9f3   : > { %3997 = vset.pattern.permute.xlu1 %v4382_v57 }
 0x9f4   : > { %3089 = vperm.xlu1 %3997, %v418_v22  }
 0x9f8   : > { %3097 = vperm.xlu1 %3997, %v420_v53  }
 0x9fc   : > { %3101 = vperm.xlu1 %3997, %v421_v43   ;;  %v5611_v43 = vld [vmem:[#allocation27_spill] sm:$0xff] }
 0xa1a   : > { %v2854_v9 = vpop.permute.xlu0 %2853  ;;  %v2850_v63 = vpop.permute.xlu1 %2849 }
 0xa1e   : > { %v2852_v0 = vpop.permute.xlu1 %2851 }
 0xa1f   : > { %v2878_v52 = vsel %vm2873_vm11, %v2850_v63, %v2852_v0  ;;  %v2856_v54 = vpop.permute.xlu0 %2855  ;;  %v2879_v10 = vsel %vm2873_vm11, %v2852_v0, %v2854_v9  ;;  %v5606_v0 = vld [vmem:[#allocation22_spill] sm:$0xff] }
 0xa20   : > { %2914 = vmatprep.subr.bf16.mxu0 %v2879_v10 }
 0xa21   : > { %2915 = vmatpush1.bf16.msra.mxu0 %v2878_v52 }
 0xa22   : > { %v2864_v30 = vpop.permute.xlu1 %2863 }
 0xa23   : > { %v2858_v33 = vpop.permute.xlu0 %2857 }
 0xa24   : > { %v2880_v24 = vsel %vm2873_vm11, %v2856_v54, %v2858_v33 }
 0xa26   : > { %v2860_v28 = vpop.permute.xlu1 %2859 }
 0xa27   : > { %v2866_v6 = vpop.permute.xlu0 %2865  ;;  %v2881_v19 = vsel %vm2873_vm11, %v2858_v33, %v2860_v28 }
 0xa28   : > { %v2883_v56 = vsel %vm2873_vm11, %v2864_v30, %v2866_v6  ;;  %2916 = vmatprep.subr.bf16.mxu0 %v2881_v19  ;;  %v5607_v6 = vld [vmem:[#allocation23_spill] sm:$0xff] }
 0xa29   : > { %2917 = vmatpush1.bf16.msra.mxu0 %v2880_v24 }
 0xa2a   : > { %v2862_v16 = vpop.permute.xlu1 %2861  ;;  %2918 = vmatprep.subr.bf16.mxu0 %v2883_v56  ;;  %v5608_v56 = vld [vmem:[#allocation24_spill] sm:$0xff] }
 0xa2b   : > { %v2870_v47 = vpop.permute.xlu0 %2869  ;;  %v2882_v49 = vsel %vm2873_vm11, %v2862_v16, %v2864_v30 }
 0xa2d   : > { %2919 = vmatpush1.bf16.msra.mxu0 %v2882_v49 }
 0xa2e   : > { %v2872_v17 = vpop.permute.xlu1 %2871 }
 0xa2f   : > { %v2868_v25 = vpop.permute.xlu0 %2867  ;;  %v2885_v50 = vsel %vm2873_vm11, %v2870_v47, %v2872_v17 }
 0xa30   : > { %v2884_v27 = vsel %vm2873_vm11, %v2868_v25, %v2870_v47  ;;  %2920 = vmatprep.subr.bf16.mxu0 %v2885_v50  ;;  %v5609_v47 = vld [vmem:[#allocation25_spill] sm:$0xff] }
 0xa31   : > { %2921 = vmatpush1.bf16.msra.mxu0 %v2884_v27  ;;  %v5610_v27 = vld [vmem:[#allocation26_spill] sm:$0xff] }
 0xa34   : > { %3498 = vmatmul.mubr.msk.bf16.vlgmr.msra.gmra.mrb[48].mxu0 %vm1059_vm4, %v4040_v12 }
 0xa35   : > { %2952 = vmatprep.mubr.bf16.mxu0 %v5592_v4 }
 0xa3c   : > { %3499 = vmatmul.mubr.msk.bf16.gmra.mrb[52].mxu0 %vm1059_vm4, %v4041_v46 }
 0xa3d   : > { %2962 = vmatprep.mubr.bf16.mxu0 %v5592_v4 }
 0xa3f   : > { %v2785_v26 = vpop.permute.xlu1 %2784 }
 0xa40   : > { %v2789_v55 = vpop.permute.xlu0 %2788  ;;  %v3616_v19 = vadd.f32 %v2785_v26, %v5607_v6  ;;  %v3618_v24 = vadd.f32 %v2785_v26, %v5608_v56 }
 0xa41   : > { %v3620_v49 = vadd.f32 %v2789_v55, %v5609_v47  ;;  %v3622_v50 = vadd.f32 %v2789_v55, %v5610_v27 }
 0xa43   : > { %v2793_v58 = vpop.permute.xlu1 %2792 }
 0xa44   : > { %3500 = vmatmul.mubr.msk.bf16.gmra.mrb[56].mxu0 %vm1059_vm4, %v4042_v15  ;;  %v2769_v7 = vpop.permute.xlu0 %2768  ;;  %v3624_v26 = vadd.f32 %v2793_v58, %v5611_v43 }
 0xa45   : > { %2972 = vmatprep.mubr.bf16.mxu0 %v5592_v4  ;;  %v3600_v14 = vadd.f32 %v2769_v7, %v5599_v13  ;;  %v3602_v29 = vadd.f32 %v2769_v7, %v5600_v36  ;;  %v5612_v7 = vld [vmem:[#allocation28_spill] sm:$0xff] }
 0xa47   : > { %v2797_v1 = vpop.permute.xlu1 %2796 }
 0xa48   : > { %v2777_v39 = vpop.permute.xlu0 %2776 }
 0xa49   : > { %v3608_v62 = vadd.f32 %v2777_v39, %v5603_v34  ;;  %v3610_v59 = vadd.f32 %v2777_v39, %v5604_v48 }
 0xa4b   : > { %v2773_v45 = vpop.permute.xlu1 %2772 }
 0xa4c   : > { %3501 = vmatmul.mubr.msk.bf16.gmra.mrb[60].mxu0 %vm1059_vm4, %v4043_v8  ;;  %v3604_v23 = vadd.f32 %v2773_v45, %v5601_v3  ;;  %v3606_v5 = vadd.f32 %v2773_v45, %v5602_v35  ;;  %v3626_v45 = vadd.f32 %v2793_v58, %v5612_v7 }
 0xa4f   : > { %v2781_v2 = vpop.permute.xlu1 %2780 }
 0xa50   : > { %v3612_v32 = vadd.f32 %v2781_v2, %v5605_v44  ;;  %v3614_v52 = vadd.f32 %v2781_v2, %v5606_v0 }
 0xb07   : > { %v2944_v40 = vpop.f32.mrb[48].mxu0 }
 0xb08   : > { %v3601_v42 = vadd.f32 %v3600_v14, %v2944_v40  ;;  %v2946_v20 = vpop.f32.mrb[49].mxu0  ;;  %v5613_v14 = vld [vmem:[#allocation29_spill] sm:$0xff]  ;;  %v5614_v40 = vld [vmem:[#allocation30_spill] sm:$0xff] }
 0xb09   : > { %v3603_v11 = vadd.f32 %v3602_v29, %v2946_v20  ;;  %v2948_v60 = vpop.f32.mrb[50].mxu0  ;;  %v3628_v55 = vadd.f32 %v2797_v1, %v5613_v14  ;;  %v3630_v3 = vadd.f32 %v2797_v1, %v5614_v40  ;;  %v4048_v14 = vld [vmem:[%s5559_s6 + $0x70] sm:$0xff]  }
 0xb0a   : > { %v3605_v57 = vadd.f32 %v3604_v23, %v2948_v60  ;;  %v2950_v61 = vpop.f32.mrb[51].mxu0 }
 0xb0b   : > { %v3607_v38 = vadd.f32 %v3606_v5, %v2950_v61 }
 0xb0f   : > { %v2954_v31 = vpop.f32.mrb[52].mxu0 }
 0xb10   : > { %v5454_v9 = vadd.f32 %v3608_v62, %v2954_v31  ;;  %v2956_v63 = vpop.f32.mrb[53].mxu0 }
 0xb11   : > { %v5457_v54 = vadd.f32 %v3610_v59, %v2956_v63  ;;  %v2958_v10 = vpop.f32.mrb[54].mxu0 }
 0xb12   : > { %v5459_v30 = vadd.f32 %v3612_v32, %v2958_v10  ;;  %v2960_v33 = vpop.f32.mrb[55].mxu0 }
 0xb13   : > { %v5461_v28 = vadd.f32 %v3614_v52, %v2960_v33 }
 0xb17   : > { %v2964_v16 = vpop.f32.mrb[56].mxu0 }
 0xb18   : > { %v3617_v17 = vadd.f32 %v3616_v19, %v2964_v16  ;;  %v2966_v25 = vpop.f32.mrb[57].mxu0 }
 0xb19   : > { %v3619_v12 = vadd.f32 %v3618_v24, %v2966_v25  ;;  %v2968_v46 = vpop.f32.mrb[58].mxu0 }
 0xb1a   : > { %v3502_v15 = vmul.f32 -1.442695, %v3617_v17  ;;  %v3621_v8 = vadd.f32 %v3620_v49, %v2968_v46  ;;  %v2970_v51 = vpop.f32.mrb[59].mxu0 }
 0xb1b   : > { %v3503_v37 = vmul.f32 -1.442695, %v3619_v12  ;;  %v3623_v41 = vadd.f32 %v3622_v50, %v2970_v51 }
 0xb1c   : > { %4194 = vpow2.f32 %v3502_v15  ;;  %v3504_v22 = vmul.f32 -1.442695, %v3621_v8 }
 0xb1d   : > { %4196 = vpow2.f32 %v3503_v37  ;;  %v3505_v53 = vmul.f32 -1.442695, %v3623_v41 }
 0xb1e   : > { %4198 = vpow2.f32 %v3504_v22 }
 0xb1f   : > { %4200 = vpow2.f32 %v3505_v53  ;;  %v2974_v13 = vpop.f32.mrb[60].mxu0 }
 0xb20   : > { %v3625_v36 = vadd.f32 %v3624_v26, %v2974_v13  ;;  %v2976_v29 = vpop.f32.mrb[61].mxu0  ;;  %4202 = vtanh.f32 %v3601_v42  ;;  %v4047_v13 = vld [vmem:[%s5559_s6 + $0x68] sm:$0xff]  }
 0xb21   : > { %v3627_v23 = vadd.f32 %v3626_v45, %v2976_v29  ;;  %v2978_v20 = vpop.f32.mrb[62].mxu0  ;;  %4204 = vtanh.f32 %v3603_v11  ;;  %v4046_v45 = vld [vmem:[%s5559_s6 + $0x60] sm:$0xff]  }
 0xb22   : > { %v3506_v35 = vmul.f32 -1.442695, %v3625_v36  ;;  %v3629_v5 = vadd.f32 %v3628_v55, %v2978_v20  ;;  %v2980_v60 = vpop.f32.mrb[63].mxu0  ;;  %4206 = vtanh.f32 %v3605_v57  ;;  %v4049_v55 = vld [vmem:[%s5559_s6 + $0x78] sm:$0xff]   ;;  %v1265_v36 = vpop.permute.xlu1 %1264 }
 0xb23   : > { %v3507_v61 = vmul.f32 -1.442695, %v3627_v23  ;;  %v3631_v39 = vadd.f32 %v3630_v3, %v2980_v60  ;;  %v1260_v3 = vpop.permute.xlu0 %1259 }
 0xb24   : > { %4208 = vpow2.f32 %v3506_v35  ;;  %v3508_v58 = vmul.f32 -1.442695, %v3629_v5 }
 0xb25   : > { %4210 = vpow2.f32 %v3507_v61  ;;  %v3509_v2 = vmul.f32 -1.442695, %v3631_v39 }
 0xb26   : > { %v4195_v34 = vpop.eup %4194  ;;  %4212 = vpow2.f32 %v3508_v58  ;;  %v1270_v29 = vpop.permute.xlu1 %1269 }
 0xb27   : > { %v4197_v62 = vpop.eup %4196  ;;  %v3031_v48 = vadd.f32 1.0, %v4195_v34  ;;  %4214 = vpow2.f32 %v3509_v2  ;;  %v1275_v20 = vpop.permute.xlu0 %1274 }
 0xb28   : > { %v4199_v1 = vpop.eup %4198  ;;  %4216 = vtanh.f32 %v3607_v38  ;;  %v3032_v42 = vadd.f32 1.0, %v4197_v62 }
 0xb29   : > { %v4201_v59 = vpop.eup %4200  ;;  %4218 = vrcp.f32 %v3031_v48  ;;  %v3033_v11 = vadd.f32 1.0, %v4199_v1 }
 0xb2a   : > { %4220 = vrcp.f32 %v3032_v42  ;;  %v3034_v31 = vadd.f32 1.0, %v4201_v59  ;;  %v4203_v57 = vpop.eup %4202  ;;  %v1874_v40 = vpop.permute.xlu1 %1873 }
 0xb2b   : > { %4222 = vrcp.f32 %v3033_v11  ;;  %v4205_v44 = vpop.eup %4204  ;;  %v1878_v5 = vpop.permute.xlu0 %1877  ;;  %v3632_v62 = vadd.f32 %v1874_v40, %v1260_v3 }
 0xb2c   : > { %4224 = vrcp.f32 %v3034_v31  ;;  %v4207_v32 = vpop.eup %4206  ;;  %v3640_v42 = vadd.f32 %v1878_v5, %v1265_v36 }
 0xb2d   : > { %4226 = vtanh.f32 %v5454_v9 }
 0xb2e   : > { %v4209_v63 = vpop.eup %4208  ;;  %4228 = vtanh.f32 %v5457_v54  ;;  %v1882_v23 = vpop.permute.xlu1 %1881 }
 0xb2f   : > { %v4211_v0 = vpop.eup %4210  ;;  %4230 = vtanh.f32 %v5459_v30  ;;  %v3035_v38 = vadd.f32 1.0, %v4209_v63  ;;  %v2484_v58 = vpop.permute.xlu0 %2483 }
 0xb30   : > { %v4213_v52 = vpop.eup %4212  ;;  %4232 = vtanh.f32 %v5461_v28  ;;  %v3036_v10 = vadd.f32 1.0, %v4211_v0  ;;  %v3633_v31 = vadd.f32 %v3632_v62, %v2484_v58  ;;  %v3648_v0 = vadd.f32 %v1882_v23, %v1270_v29 }
 0xb31   : > { %v4215_v33 = vpop.eup %4214  ;;  %4234 = vrcp.f32 %v3035_v38  ;;  %v3037_v6 = vadd.f32 1.0, %v4213_v52 }
 0xb32   : > { %v4217_v19 = vpop.eup %4216  ;;  %4236 = vrcp.f32 %v3036_v10  ;;  %v3038_v56 = vadd.f32 1.0, %v4215_v33  ;;  %v1886_v35 = vpop.permute.xlu1 %1885 }
 0xb33   : > { %v4219_v24 = vpop.eup %4218  ;;  %4238 = vrcp.f32 %v3037_v6  ;;  %v2496_v1 = vpop.permute.xlu0 %2495  ;;  %v3656_v10 = vadd.f32 %v1886_v35, %v1275_v20 }
 0xb34   : > { %v4221_v9 = vpop.eup %4220  ;;  %4240 = vrcp.f32 %v3038_v56  ;;  %v3055_v16 = vmul.f32 %v4219_v24, %v4203_v57 }
 0xb35   : > { %v4223_v54 = vpop.eup %4222  ;;  %v3056_v47 = vmul.f32 %v4221_v9, %v4205_v44 }
 0xb36   : > { %v4225_v49 = vpop.eup %4224  ;;  %v3057_v30 = vmul.f32 %v4223_v54, %v4207_v32  ;;  %v2488_v60 = vpop.permute.xlu1 %2487 }
 0xb37   : > { %v4227_v17 = vpop.eup %4226  ;;  %v3058_v25 = vmul.f32 %v4225_v49, %v4217_v19  ;;  %v3641_v32 = vadd.f32 %v3640_v42, %v2488_v60  ;;  %v3094_v63 = vpop.permute.xlu0 %3093 }
 0xb38   : > { %v4229_v27 = vpop.eup %4228  ;;  %v3072_v28 = vpack.c.bf16 %v3057_v30, %v3055_v16 }
 0xb39   : > { %v4231_v50 = vpop.eup %4230  ;;  %v3073_v12 = vpack.c.bf16 %v3058_v25, %v3056_v47  ;;  %v3642_v6 = vadd.f32 %v3641_v32, %v3094_v63  ;;  %v3657_v25 = vadd.f32 %v3656_v10, %v2496_v1 }
 0xb3a   : > { %v4233_v46 = vpop.eup %4232  ;;  %v2492_v34 = vpop.permute.xlu1 %2491 }
 0xb3b   : > { %v4235_v15 = vpop.eup %4234  ;;  %3136 = vmatprep.subr.bf16.mxu1 %v3073_v12  ;;  %v3649_v16 = vadd.f32 %v3648_v0, %v2492_v34 }
 0xb3c   : > { %v4237_v8 = vpop.eup %4236  ;;  %3137 = vmatpush1.bf16.msra.mxu1 %v3072_v28  ;;  %v3059_v51 = vmul.f32 %v4235_v15, %v4227_v17 }
 0xb3d   : > { %v4239_v37 = vpop.eup %4238  ;;  %v3060_v41 = vmul.f32 %v4237_v8, %v4229_v27 }
 0xb3e   : > { %v4241_v22 = vpop.eup %4240  ;;  %v3061_v53 = vmul.f32 %v4239_v37, %v4231_v50  ;;  %v3090_v44 = vpop.permute.xlu1 %3089 }
 0xb3f   : > { %v3062_v43 = vmul.f32 %v4241_v22, %v4233_v46  ;;  %v3634_v38 = vadd.f32 %v3633_v31, %v3090_v44 }
 0xb40   : > { %v3074_v26 = vpack.c.bf16 %v3061_v53, %v3059_v51 }
 0xb41   : > { %v3075_v7 = vpack.c.bf16 %v3062_v43, %v3060_v41 }
 0xb42   : > { %v3098_v9 = vpop.permute.xlu1 %3097 }
 0xb43   : > { %3138 = vmatprep.subr.bf16.mxu1 %v3075_v7  ;;  %v3650_v12 = vadd.f32 %v3649_v16, %v3098_v9 }
 0xb44   : > { %3139 = vmatpush1.bf16.msra.mxu1 %v3074_v26 }
 0xb46   : > { %v3102_v50 = vpop.permute.xlu1 %3101 }
 0xb47   : > { %3522 = vmatmul.mubr.msk.bf16.vlgmr.msra.gmra.mrb[64].mxu1 %vm1297_vm5, %v4046_v45  ;;  %v3658_v15 = vadd.f32 %v3657_v25, %v3102_v50 }
 0xb48   : > { %3174 = vmatprep.mubr.bf16.mxu1 %v5592_v4 }
 0xb4f   : > { %3523 = vmatmul.mubr.msk.bf16.gmra.mrb[68].mxu1 %vm1297_vm5, %v4047_v13 }
 0xb50   : > { %3180 = vmatprep.mubr.bf16.mxu1 %v5592_v4 }
 0xb57   : > { %3524 = vmatmul.mubr.msk.bf16.gmra.mrb[40].mxu1 %vm1297_vm5, %v4048_v14 }
 0xb58   : > { %3190 = vmatprep.mubr.bf16.mxu1 %v5592_v4 }
 0xb5f   : > { %3525 = vmatmul.mubr.msk.bf16.gmra.mrb[44].mxu1 %vm1297_vm5, %v4049_v55 }
 0xc1a   : > { %v3170_v61 = vpop.f32.mrb[64].mxu1 }
 0xc1b   : > { %v3171_v39 = vpop.f32.mrb[65].mxu1 }
 0xc1c   : > { %v3172_v2 = vpop.f32.mrb[66].mxu1 }
 0xc1d   : > { %v3173_v4 = vpop.f32.mrb[67].mxu1 }
 0xc22   : > { %v3176_v48 = vpop.f32.mrb[68].mxu1 }
 0xc23   : > { %v3177_v59 = vpop.f32.mrb[69].mxu1 }
 0xc24   : > { %v3178_v11 = vpop.f32.mrb[70].mxu1 }
 0xc25   : > { %v3179_v57 = vpop.f32.mrb[71].mxu1 }
 0xc2a   : > { %v3182_v52 = vpop.f32.mrb[40].mxu1 }
 0xc2b   : > { %v3635_v33 = vadd.f32 %v3634_v38, %v3182_v52  ;;  %v3184_v19 = vpop.f32.mrb[41].mxu1 }
 0xc2c   : > { %v3639_v56 = vadd.f32 %v3634_v38, %v3184_v19  ;;  %v3186_v24 = vpop.f32.mrb[42].mxu1 }
 0xc2d   : > { %v3209_v54 = vmul.f32 %v3635_v33, %v4889_v18  ;;  %v3643_v47 = vadd.f32 %v3642_v6, %v3186_v24  ;;  %v3188_v49 = vpop.f32.mrb[43].mxu1 }
 0xc2e   : > { %v3210_v30 = vmul.f32 %v3639_v56, %v4891_v21  ;;  %v3647_v17 = vadd.f32 %v3642_v6, %v3188_v49 }
 0xc2f   : > { %3217 = vst [vmem:[%s351_s26] sm:$0xff] %v3209_v54  ;;  %v3211_v27 = vmul.f32 %v3643_v47, %v4889_v18 }
 0xc30   : > { %3218 = vst [vmem:[%s351_s26 + $0x8] sm:$0xff] %v3210_v30  ;;  %v3212_v28 = vmul.f32 %v3647_v17, %v4891_v21 }
 0xc31   : > { %3219 = vst [vmem:[%s351_s26 + $0x10] sm:$0xff] %v3211_v27 }
 0xc32   : > { %3220 = vst [vmem:[%s351_s26 + $0x18] sm:$0xff] %v3212_v28  ;;  %v3192_v46 = vpop.f32.mrb[44].mxu1 }
 0xc33   : > { %v3651_v8 = vadd.f32 %v3650_v12, %v3192_v46  ;;  %v3194_v51 = vpop.f32.mrb[45].mxu1 }
 0xc34   : > { %v3655_v37 = vadd.f32 %v3650_v12, %v3194_v51  ;;  %v3196_v41 = vpop.f32.mrb[46].mxu1 }
 0xc35   : > { %v3213_v22 = vmul.f32 %v3651_v8, %v4889_v18  ;;  %v3659_v53 = vadd.f32 %v3658_v15, %v3196_v41  ;;  %v3198_v43 = vpop.f32.mrb[47].mxu1 }
 0xc36   : > { %v3214_v26 = vmul.f32 %v3655_v37, %v4891_v21  ;;  %v3663_v7 = vadd.f32 %v3658_v15, %v3198_v43 }
 0xc37   : > { %3221 = vst [vmem:[%s351_s26 + $0x20] sm:$0xff] %v3213_v22  ;;  %v3215_v45 = vmul.f32 %v3659_v53, %v4889_v18 }
 0xc38   : > { %3222 = vst [vmem:[%s351_s26 + $0x28] sm:$0xff] %v3214_v26  ;;  %v3216_v13 = vmul.f32 %v3663_v7, %v4891_v21 }
 0xc39   : > { %3223 = vst [vmem:[%s351_s26 + $0x30] sm:$0xff] %v3215_v45 }
 0xc3a   : > { %3224 = vst [vmem:[%s351_s26 + $0x38] sm:$0xff] %v3216_v13 }
 0xc3b   : > { %4313 = shalt.err (!%p4310_p4)
}
 0xc3c   : > { %s4314_s19 = scalar_lea.hbm %s5508_s9, 1024  ;;  %s4318_s10 = scalar_lea.hbm %s5561_s8, 2048 }
 0xc3d   : > { %p4315_p5 = scmp.ne.s32.totalorder %s5508_s9, %s4314_s19  ;;  %p4319_p1 = scmp.lt.u32.totalorder %s5508_s9, %s5561_s8 }
 0xc3e   : > { %p4320_p3 = scmp.lt.u32.totalorder %s4318_s10, %s4314_s19  ;;  %p4322_p6 = scmp.lt.u32.totalorder %s4314_s19, %s5508_s9 }
 0xc3f   : > { %p4316_p7 = pnand %p4315_p5, %p5615_p12 }
 0xc40   : > { %p4321_p11 = por %p4320_p3, %p4319_p1 }
 0xc41   : > { %p4317_p9 = pneg %p4316_p7 }
 0xc42   : > { %p4323_p13 = por %p4322_p6, %p4321_p11 }
 0xc44   : > { %p4324_p8 = pnand %p4323_p13, %p4317_p9 }
 0xc46   : > { %4327 = shalt.err (!%p4324_p8)
}
 0xc47   : > { %s4385_s21 = smov 256   ;;  %s4386_s20 = smov 16  }
 0xc48   : > { %3722 = dma.vmem_to_hbm [thread:$0]  (%p5615_p12), %s5501_s23, 1024, %s5508_s9, %s3226_s13, %s4385_s21, %s4385_s21, %s4386_s20  }
 0xc49 PF: > { %s3254_s16 = sand.u32 1, %s4354_s27   ;;  %p5616_p10 = scmp.ne.s32.totalorder %s5568_s18, 0 }
 0xc4a   : > { %p5617_p0 = scmp.ge.s32.totalorder %s4366_s30, 2  ;;  %s3255_s15 = scalar_lea.sflag [#allocation5], %s3254_s16 }
 0xc4c   : > { %p3729_p2 = pnand %p5617_p0, %p5616_p10 }
 0xc4e   : > { %4349 = dma.done.wait (!%p3729_p2), %s3255_s15, 1024  }
 0xc4f   : > { %4351 = vsyncadd (!%p3729_p2), %s3255_s15, 4294966272  ;;  %p21_p4 = scmp.ge.s32.totalorder %s4457_s11, 4   ;;  %s5618_s27 = smov %s4358_s28 }
 0xc50   : > { %s5619_s28 = smov %s4362_s29  ;;  %s5620_s29 = smov %s4469_s14 }
 0xc51   : > { %s5621_s30 = smov %s4457_s11  ;;  %23 = sbr.rel (!%p21_p4) target bundleno = 5 (0x5), region = 109 }
 0xc58   :  { %3260 = vsyncpa [#allocation4], 1 }
 0xc59   :  { %3262 = vsyncpa [#allocation4 + $0x1], 1 }
 0xc5a   :  { %3263 = vsyncpa [#allocation5], 1 }
 0xc5b   :  { %3265 = vsyncpa [#allocation5 + $0x1], 1 }

// kernel: tpu_custom_call.1
= control target key start
LH: loop header
LB: loop body
LE: loop exit
PB: predicated region body
PF: predicated region fallthrough
CT: control target
= control target key end

     0   :  { %13 = vsyncpa [#allocation4], 0  ;;  %s5553_s0 = inlined_call_operand.vmem [shape: f32[2,32,512], index: 0, kind: input, shape index: {}]   ;;  %s5554_s1 = inlined_call_operand.vmem [shape: f32[2,1,256], index: 1, kind: input, shape index: {}]   ;;  %s5555_s2 = inlined_call_operand.hbm [shape: bf16[2,16,256], index: 2, kind: input, shape index: {}]   ;;  %s5556_s3 = inlined_call_operand.vmem [shape: bf16[256,16], index: 3, kind: input, shape index: {}]   ;;  %s5557_s4 = inlined_call_operand.vmem [shape: bf16[4,64,96], index: 4, kind: input, shape index: {}]   ;;  %s5558_s5 = inlined_call_operand.vmem [shape: f32[64,4], index: 5, kind: input, shape index: {}]   ;;  %s5559_s6 = inlined_call_operand.vmem [shape: bf16[4,64,32], index: 6, kind: input, shape index: {}]   ;;  %s5560_s7 = inlined_call_operand.vmem [shape: f32[64,4], index: 7, kind: input, shape index: {}]   ;;  %s5561_s8 = inlined_call_operand.hbm [shape: f32[2,32,256], index: 8, kind: output, shape index: {}]  }
   0x1   :  { %15 = vsyncpa [#allocation4 + $0x1], 0 }
   0x2   :  { %16 = vsyncpa [#allocation5], 0 }
   0x3   :  { %18 = vsyncpa [#allocation5 + $0x1], 0  ;;  %s4432_s27 = smov 0   ;;  %s4434_s28 = smov 0  }
   0x4   :  { %s4436_s29 = smov 0   ;;  %s4438_s30 = smov 0  }
   0x5 LB: > { %s4453_s9 = sadd.s32 4294967295, %s4366_s30   ;;  %s3336_s10 = sadd.s32 4294967294, %s4366_s30   ;;  %s4366_s30 = sphi %s4438_s30, %s5621_s30   ;;  %s4362_s29 = sphi %s4436_s29, %s5620_s29   ;;  %s4358_s28 = sphi %s4434_s28, %s5619_s28   ;;  %s4354_s27 = sphi %s4432_s27, %s5618_s27  }
   0x6   : > { %s4457_s11 = sadd.s32 1, %s4366_s30   ;;  %s83_s12 = sadd.s32 1, %s4362_s29 }
   0x7   : > { %s80_s13 = ssub.s32 %s4366_s30, %s4457_s11  ;;  %p90_p0 = scmp.ne.s32.totalorder %s4362_s29, %s4358_s28 }
   0x8   : > { %p81_p1 = scmp.eq.s32.totalorder %s80_s13, 0  ;;  %p91_p2 = scmp.eq.s32.totalorder %s4366_s30, 0 }
   0x9   : > { %p96_p3 = scmp.ne.s32.totalorder %s4358_s28, %s4354_s27  ;;  %p97_p4 = scmp.eq.s32.totalorder %s4453_s9, 0 }
   0xa   : > { %s4469_s14 = scalar_select %p81_p1, %s4362_s29, %s83_s12  }
   0xb   : > { %p4471_p5 = por %p91_p2, %p90_p0  ;;  %p4475_p6 = por %p97_p4, %p96_p3 }
   0xc   : > { %p225_p7 = scmp.eq.s32.totalorder %s4453_s9, 1  ;;  %p231_p8 = scmp.eq.s32.totalorder %s3336_s10, 1 }
   0xd   : > { %p3732_p10 = scmp.lt.s32.totalorder %s4366_s30, 2  ;;  %s281_s19 = sand.u32 1, %s4362_s29  }
   0xe   : > { %p4482_p11 = por %p225_p7, %p90_p0  ;;  %p4486_p12 = por %p231_p8, %p96_p3 }
   0xf   : > { %s3531_s20 = sshll.u32 %s4366_s30, 8  ;;  %s3339_s21 = sshll.u32 %s281_s19, 4 }
  0x10   : > { %s5567_s17 = scalar_select %p4482_p11, 1, 0 }
  0x11   : > { %s5568_s18 = scalar_select %p4486_p12, 1, 0 }
  0x12   : > { %s4495_s24 = scalar_lea.hbm %s5555_s2, %s3531_s20  ;;  %s285_s25 = scalar_lea.vmem [#allocation3], %s3339_s21 }
  0x13   : > { %s292_s26 = sshll.u32 %s285_s25, 4  ;;  %p4499_p13 = pnand %p3732_p10, %p4471_p5  ;;  %s4503_s26 = int_to_ptr.vmem [resolvable:$true] %s292_s26 }
  0x14   : > { %s4505_s12 = scalar_lea.sflag [#allocation4], %s281_s19  ;;  %s4270_s13 = scalar_lea.hbm %s4495_s24, 256 }
  0x15   : > { %p4271_p0 = scmp.ne.s32.totalorder %s4495_s24, %s4270_s13  ;;  %p4272_p1 = pneg %p4499_p13 }
  0x16   : > { %s4275_s21 = scalar_lea.hbm %s5555_s2, 512  ;;  %p4276_p4 = scmp.lt.u32.totalorder %s4495_s24, %s5555_s2 }
  0x17   : > { %p4273_p2 = pnand %p4272_p1, %p4271_p0  ;;  %p4277_p5 = scmp.lt.u32.totalorder %s4275_s21, %s4270_s13 }
  0x18   : > { %p4279_p8 = scmp.lt.u32.totalorder %s4270_s13, %s4495_s24 }
  0x19   : > { %p4274_p3 = pneg %p4273_p2  ;;  %p4278_p7 = por %p4277_p5, %p4276_p4 }
  0x1b   : > { %p4280_p10 = por %p4279_p8, %p4278_p7 }
  0x1d   : > { %p4281_p9 = pnand %p4280_p10, %p4274_p3 }
  0x1f   : > { %4284 = shalt.err (!%p4281_p9)
}
  0x20   : > { %s4285_s19 = scalar_lea.vmem %s4503_s26, 256  ;;  %s4368_s25 = smov [#allocation3]  }
  0x21   : > { %p4286_p0 = scmp.ne.s32.totalorder %s4503_s26, %s4285_s19  ;;  %s4290_s20 = sshll.u32 %s4368_s25, 4  ;;  %s4291_s20 = int_to_ptr.vmem [resolvable:$false] %s4290_s20 }
  0x22   : > { %s4292_s15 = scalar_lea.vmem %s4291_s20, 512  ;;  %p4293_p11 = scmp.lt.s32.totalorder %s4503_s26, %s4291_s20 }
  0x23   : > { %p4288_p2 = pnand %p4286_p0, %p4272_p1  ;;  %p4294_p4 = scmp.lt.s32.totalorder %s4292_s15, %s4285_s19 }
  0x25   : > { %p4289_p12 = pneg %p4288_p2  ;;  %p4295_p5 = por %p4294_p4, %p4293_p11 }
  0x27   : > { %p4296_p7 = pnand %p4295_p5, %p4289_p12 }
  0x29   : > { %4299 = shalt.err (!%p4296_p7)
}
  0x2a   : > { %s4369_s13 = smov 128   ;;  %s4370_s21 = smov 8  }
  0x2b   : > { %3727 = dma.hbm_to_vmem [thread:$0]  (!%p4499_p13), %s4495_s24, 256, %s4503_s26, %s4505_s12, %s4369_s13, %s4369_s13, %s4370_s21  }
  0x2c   : > { %p3342_p9 = scmp.ge.s32.totalorder %s4366_s30, 1  ;;  %p300_p1 = scmp.lt.s32.totalorder %s4366_s30, 3 }
  0x2e   : > { %p301_p3 = pnand %p3342_p9, %p300_p1 }
  0x30   : > { %304 = sbr.rel (%p301_p3) target bundleno = 3145 (0xc49), region = 52 }
  0x37   : > { %s4536_s22 = sand.u32 1, %s4358_s28  }
  0x38   : > { %s3343_s23 = sshll.u32 %s4536_s22, 4  ;;  %s307_s19 = scalar_lea.sflag [#allocation4], %s4536_s22 }
  0x39   : > { %s4540_s25 = scalar_lea.vmem [#allocation3], %s3343_s23 }
  0x3a   : > { %4345 = dma.done.wait (%p4475_p6), %s307_s19, 256  }
  0x3b   : > { %4347 = vsyncadd (%p4475_p6), %s307_s19, 4294967040  ;;  %p352_p11 = scmp.lt.s32.totalorder %s4453_s9, 1  ;;  %s4371_s16 = smov 127   ;;  %v3999_v21 = vld [vmem:[%s4540_s25 + $0x4] ss:$8 sps:$4 sm:$0xff]   ;;  %v5563_v26 = vmov 0  }
  0x3c   : > { %s4372_s15 = smov 126   ;;  %v4001_v22 = vld [vmem:[%s4540_s25] ss:$8 sps:$4 sm:$0xff]   ;;  %627 = vmatprep.mubr.bf16.mxu0 %v5563_v26  ;;  %595 = vmatprep.subr.bf16.mxu0 %v3999_v21  ;;  %vm546_vm0 = vcmask 130048   ;;  %s4374_s23 = smov 1   ;;  %vm828_vm1 = vcmask 1039360  }
  0x3d   : > { %s4548_s24 = scalar_select %p352_p11, %s4453_s9, 1  ;;  %v4002_v27 = vld [vmem:[%s5556_s3] sm:$0xff]   ;;  %3834 = vset.pattern.permute.xlu1 %v5563_v26  ;;  %596 = vmatpush1.bf16.msra.mxu0 %v4001_v22  ;;  %v4003_v33 = vld [vmem:[%s5556_s3 + $0x8] sm:$0xff]   ;;  %v4004_v35 = vld [vmem:[%s5556_s3 + $0x10] sm:$0xff]   ;;  %vm873_vm2 = vcmask 1031168   ;;  %vm1034_vm3 = vcmask 7168  }
  0x3e   : > { %3833 = vset.pattern.permute.xlu0 %v5563_v26  ;;  %3534 = vmatprep.subr.bf16.mxu1 %v3999_v21  ;;  %v4005_v36 = vld [vmem:[%s5556_s3 + $0x18] sm:$0xff]   ;;  %v4006_v37 = vld [vmem:[%s5556_s3 + $0x20] sm:$0xff]   ;;  %v4007_v38 = vld [vmem:[%s5556_s3 + $0x28] sm:$0xff]   ;;  %vm1059_vm4 = vcmask 785408   ;;  %vm1297_vm5 = vcmask 261120   ;;  %vm1499_vm6 = vcmask 1014784  }
  0x3f   : > { %s3532_s26 = sshll.u32 %s4548_s24, 7  ;;  %3535 = vmatpush1.bf16.msra.mxu1 %v4001_v22  ;;  %707 = vmatprep.mubr.bf16.mxu1 %v5563_v26  ;;  %v4008_v42 = vld [vmem:[%s5556_s3 + $0x30] sm:$0xff]   ;;  %v4009_v61 = vld [vmem:[%s5556_s3 + $0x38] sm:$0xff]   ;;  %s3347_s12 = sshll.u32 %s4548_s24, 1  ;;  %vm1653_vm7 = vcmask 15360   ;;  %vm2109_vm8 = vcmask 982016  }
  0x40   : > { %s4554_s20 = scalar_lea.vmem %s5553_s0, %s3532_s26  ;;  %3366 = vmatmul.mubr.msk.bf16.vlgmr.msra.gmra.mrb[0].mxu0 %vm546_vm0, %v4002_v27  ;;  %s360_s21 = scalar_lea.vmem %s5554_s1, %s3347_s12  ;;  %vm2263_vm9 = vcmask 31744   ;;  %vm2719_vm10 = vcmask 916480   ;;  %vm2873_vm11 = vcmask 64512  }
  0x41   : > { %v371_v0 = vld [vmem:[%s4554_s20 + $0x48] sm:$0xff]  ;;  %v4558_v1 = vld [vmem:[%s4554_s20 + $0x50] sm:$0xff]  ;;  %v365_v12 = vld [vmem:[%s4554_s20 + $0x18] sm:$0xff]  ;;  %637 = vmatprep.mubr.bf16.mxu0 %v5563_v26  ;;  %s4375_s24 = smov 124   ;;  %s4381_s13 = smov 112  }
  0x42   : > { %v3793_v2 = vpack.i.bf16 %v4558_v1, %v371_v0  ;;  %v363_v3 = vld [vmem:[%s4554_s20 + $0x8] sm:$0xff]  ;;  %v364_v4 = vld [vmem:[%s4554_s20 + $0x10] sm:$0xff]  ;;  %v369_v14 = vld [vmem:[%s4554_s20 + $0x38] sm:$0xff]  ;;  %s3344_s25 = sshll.u32 %s4536_s22, 6  ;;  %s3533_s10 = sshll.u32 %s4453_s9, 10 }
  0x43   : > { %v375_v5 = vld [vmem:[%s4554_s20 + $0x68] sm:$0xff]  ;;  %v3783_v6 = vpack.i.bf16 %v364_v4, %v363_v3  ;;  %v376_v7 = vld [vmem:[%s4554_s20 + $0x70] sm:$0xff]  ;;  %v377_v15 = vld [vmem:[%s4554_s20 + $0x78] sm:$0xff]  ;;  %s351_s26 = scalar_lea.vmem [#allocation6], %s3344_s25  ;;  %s5508_s9 = scalar_lea.hbm %s5561_s8, %s3533_s10 }
  0x44   : > { %v367_v8 = vld [vmem:[%s4554_s20 + $0x28] sm:$0xff]  ;;  %v368_v9 = vld [vmem:[%s4554_s20 + $0x30] sm:$0xff]  ;;  %3794 = vrot.lane.b32.xlu1 %v3793_v2, %s4371_s16  ;;  %v3798_v10 = vpack.i.bf16 %v376_v7, %v375_v5  ;;  %v373_v16 = vld [vmem:[%s4554_s20 + $0x58] sm:$0xff]  ;;  %v3828_v18 = vpack.i.bf16 %v377_v15, %v376_v7  ;;  %v898_v30 = vpack.c.bf16 %v375_v5, %v371_v0  ;;  %v899_v34 = vpack.c.bf16 %v376_v7, %v4558_v1  ;;  %p5615_p12 = scmp.ne.s32.totalorder %s5567_s17, 0 }
  0x45   : > { %3784 = vrot.lane.b32.xlu0 %v3783_v6, %s4371_s16  ;;  %v3788_v11 = vpack.i.bf16 %v368_v9, %v367_v8  ;;  %v3808_v13 = vpack.i.bf16 %v367_v8, %v365_v12  ;;  %v3813_v17 = vpack.i.bf16 %v369_v14, %v368_v9  ;;  %v3823_v19 = vpack.i.bf16 %v375_v5, %v373_v16  ;;  %v362_v24 = vld [vmem:[%s4554_s20] sm:$0xff] }
  0x46   : > { %v896_v20 = vpack.c.bf16 %v368_v9, %v364_v4  ;;  %v895_v23 = vpack.c.bf16 %v367_v8, %v363_v3  ;;  %v366_v25 = vld [vmem:[%s4554_s20 + $0x20] sm:$0xff] }
  0x47   : > { %v370_v28 = vld [vmem:[%s4554_s20 + $0x40] sm:$0xff]  ;;  %v4591_v31 = vpack.c.bf16 %v366_v25, %v362_v24 }
  0x48   : > { %3799 = vrot.lane.b32.xlu1 %v3798_v10, %s4371_s16  ;;  %v374_v29 = vld [vmem:[%s4554_s20 + $0x60] sm:$0xff]  ;;  %3367 = vmatmul.mubr.msk.bf16.gmra.mrb[4].mxu0 %vm546_vm0, %v4003_v33 }
  0x49   : > { %3789 = vrot.lane.b32.xlu0 %v3788_v11, %s4371_s16  ;;  %v4597_v32 = vpack.c.bf16 %v374_v29, %v370_v28  ;;  %647 = vmatprep.mubr.bf16.mxu0 %v5563_v26  ;;  %s4378_s16 = smov 120  }
  0x4c   : > { %3809 = vrot.lane.b32.xlu1 %v3808_v13, %s4372_s15 }
  0x4d   : > { %3804 = vrot.lane.b32.xlu0 %v3783_v6, %s4372_s15 }
  0x50   : > { %3819 = vrot.lane.b32.xlu1 %v3793_v2, %s4372_s15  ;;  %3368 = vmatmul.mubr.msk.bf16.gmra.mrb[8].mxu0 %vm546_vm0, %v4004_v35 }
  0x51   : > { %3814 = vrot.lane.b32.xlu0 %v3813_v17, %s4372_s15  ;;  %657 = vmatprep.mubr.bf16.mxu0 %v5563_v26 }
  0x54   : > { %3829 = vrot.lane.b32.xlu1 %v3828_v18, %s4372_s15 }
  0x55   : > { %3824 = vrot.lane.b32.xlu0 %v3823_v19, %s4372_s15 }
  0x58   : > { %1002 = vrot.lane.b32.xlu1 %v896_v20, %s4374_s23  ;;  %3369 = vmatmul.mubr.msk.bf16.gmra.mrb[12].mxu0 %vm546_vm0, %v4005_v36 }
  0x59   : > { %1000 = vrot.lane.b32.xlu0 %v895_v23, %s4374_s23  ;;  %667 = vmatprep.mubr.bf16.mxu0 %v5563_v26 }
  0x5c   : > { %1006 = vrot.lane.b32.xlu1 %v898_v30, %s4374_s23 }
  0x5d   : > { %998 = vrot.lane.b32.xlu0 %v4591_v31, %s4374_s23 }
  0x60   : > { %1004 = vrot.lane.b32.xlu1 %v4597_v32, %s4374_s23  ;;  %3370 = vmatmul.mubr.msk.bf16.gmra.mrb[16].mxu0 %vm546_vm0, %v4006_v37 }
  0x61   : > { %1008 = vrot.lane.b32.xlu0 %v899_v34, %s4374_s23  ;;  %677 = vmatprep.mubr.bf16.mxu0 %v5563_v26 }
  0x68   : > { %3371 = vmatmul.mubr.msk.bf16.gmra.mrb[20].mxu0 %vm546_vm0, %v4007_v38 }
  0x69   : > { %687 = vmatprep.mubr.bf16.mxu0 %v5563_v26 }
  0x70   : > { %3372 = vmatmul.mubr.msk.bf16.gmra.mrb[24].mxu0 %vm546_vm0, %v4008_v42 }
  0x71   : > { %697 = vmatprep.mubr.bf16.mxu0 %v5563_v26 }
  0x78   : > { %3373 = vmatmul.mubr.msk.bf16.gmra.mrb[28].mxu0 %vm546_vm0, %v4009_v61 }
  0x79   : > { %1104 = vmatprep.mubr.bf16.mxu0 %v5563_v26 }
  0xb6   : > { %v3795_v39 = vpop.permute.xlu1 %3794 }
  0xb7   : > { %v3785_v40 = vpop.permute.xlu0 %3784  ;;  %v3797_v48 = vunpack.i.h.bf16 %v3795_v39  ;;  %v3796_v49 = vunpack.i.l.bf16 %v3795_v39 }
  0xb8   : > { %v3787_v44 = vunpack.i.h.bf16 %v3785_v40  ;;  %v3786_v45 = vunpack.i.l.bf16 %v3785_v40 }
  0xb9   : > { %v831_v59 = vsel %vm828_vm1, %v3796_v49, %v3797_v48 }
  0xba   : > { %v3800_v41 = vpop.permute.xlu1 %3799  ;;  %v829_v6 = vsel %vm828_vm1, %v3786_v45, %v3787_v44 }
  0xbb   : > { %v3790_v43 = vpop.permute.xlu0 %3789  ;;  %v3802_v50 = vunpack.i.h.bf16 %v3800_v41  ;;  %v3801_v51 = vunpack.i.l.bf16 %v3800_v41 }
  0xbc   : > { %v3792_v46 = vunpack.i.h.bf16 %v3790_v43  ;;  %v3791_v47 = vunpack.i.l.bf16 %v3790_v43 }
  0xbd   : > { %v903_v57 = vpack.c.bf16 %v3801_v51, %v3796_v49  ;;  %v905_v58 = vpack.c.bf16 %v3802_v50, %v3797_v48  ;;  %v832_v60 = vsel %vm828_vm1, %v3801_v51, %v3802_v50  ;;  %v4014_v48 = vld [vmem:[%s5556_s3 + $0x40] sm:$0xff]   ;;  %v4703_v50 = vld [vmem:[%s5558_s5 + $0x8] sm:$0xff]  ;;  %v4712_v51 = vld [vmem:[%s5558_s5 + $0x10] sm:$0xff] }
  0xbe   : > { %v3810_v52 = vpop.permute.xlu1 %3809  ;;  %v902_v53 = vpack.c.bf16 %v3792_v46, %v3787_v44  ;;  %v900_v54 = vpack.c.bf16 %v3791_v47, %v3786_v45  ;;  %v830_v1 = vsel %vm828_vm1, %v3791_v47, %v3792_v46  ;;  %v904_v5 = vpack.c.bf16 %v832_v60, %v831_v59  ;;  %v4671_v44 = vld [vmem:[%s5558_s5 + $0x28] sm:$0xff]  ;;  %v4676_v45 = vld [vmem:[%s5558_s5 + $0x20] sm:$0xff]  ;;  %v4683_v46 = vld [vmem:[%s5558_s5 + $0x30] sm:$0xff]  ;;  %3374 = vmatmul.mubr.msk.bf16.vlgmr.msra.gmra.mrb[0].mxu1 %vm546_vm0, %v4014_v48 }
  0xbf   : > { %v3805_v55 = vpop.permute.xlu0 %3804  ;;  %v3811_v62 = vunpack.i.l.bf16 %v3810_v52  ;;  %v3812_v4 = vunpack.i.h.bf16 %v3810_v52  ;;  %v901_v11 = vpack.c.bf16 %v830_v1, %v829_v6  ;;  %v4688_v47 = vld [vmem:[%s5558_s5 + $0x38] sm:$0xff]  ;;  %v4698_v49 = vld [vmem:[%s5558_s5] sm:$0xff]  ;;  %717 = vmatprep.mubr.bf16.mxu1 %v5563_v26 }
  0xc0   : > { %1014 = vrot.lane.b32.xlu1 %v902_v53, %s4374_s23  ;;  %1010 = vrot.lane.b32.xlu0 %v900_v54, %s4374_s23  ;;  %v3807_v63 = vunpack.i.h.bf16 %v3805_v55  ;;  %v3806_v7 = vunpack.i.l.bf16 %v3805_v55  ;;  %v4717_v52 = vld [vmem:[%s5558_s5 + $0x18] sm:$0xff]  ;;  %v4724_v53 = vld [vmem:[%s5560_s7] sm:$0xff] }
  0xc1   : > { %v4729_v54 = vld [vmem:[%s5560_s7 + $0x8] sm:$0xff]  ;;  %v4736_v55 = vld [vmem:[%s5560_s7 + $0x10] sm:$0xff] }
  0xc2   : > { %v3820_v56 = vpop.permute.xlu1 %3819  ;;  %v875_v14 = vsel %vm873_vm2, %v3807_v63, %v3811_v62  ;;  %v906_v18 = vpack.c.bf16 %v3812_v4, %v3806_v7  ;;  %v874_v20 = vsel %vm873_vm2, %v3806_v7, %v3807_v63 }
  0xc3   : > { %v3815_v0 = vpop.permute.xlu0 %3814  ;;  %v3822_v8 = vunpack.i.h.bf16 %v3820_v56  ;;  %v3821_v9 = vunpack.i.l.bf16 %v3820_v56  ;;  %v4741_v56 = vld [vmem:[%s5560_s7 + $0x18] sm:$0xff] }
  0xc4   : > { %v3817_v2 = vunpack.i.h.bf16 %v3815_v0  ;;  %v3816_v3 = vunpack.i.l.bf16 %v3815_v0  ;;  %1016 = vrot.lane.b32.xlu1 %v903_v57, %s4374_s23  ;;  %1020 = vrot.lane.b32.xlu0 %v905_v58, %s4374_s23 }
  0xc5   : > { %v878_v19 = vsel %vm873_vm2, %v3821_v9, %v3822_v8 }
  0xc6   : > { %v3830_v10 = vpop.permute.xlu1 %3829  ;;  %v877_v15 = vsel %vm873_vm2, %v3816_v3, %v3817_v2  ;;  %v876_v25 = vsel %vm873_vm2, %v3812_v4, %v3816_v3 }
  0xc7   : > { %v3831_v12 = vunpack.i.l.bf16 %v3830_v10  ;;  %v3825_v13 = vpop.permute.xlu0 %3824  ;;  %v908_v17 = vpack.c.bf16 %v877_v15, %v875_v14  ;;  %v3832_v22 = vunpack.i.h.bf16 %v3830_v10  ;;  %v907_v30 = vpack.c.bf16 %v876_v25, %v874_v20  ;;  %v4011_v14 = vld [vmem:[%s5557_s4 + $0x8] sm:$0xff]   ;;  %v4012_v15 = vld [vmem:[%s5557_s4 + $0x10] sm:$0xff]   ;;  %v4018_v20 = vld [vmem:[%s5556_s3 + $0x60] sm:$0xff]  }
  0xc8   : > { %v3827_v16 = vunpack.i.h.bf16 %v3825_v13  ;;  %1018 = vrot.lane.b32.xlu1 %v904_v5, %s4374_s23  ;;  %1012 = vrot.lane.b32.xlu0 %v901_v11, %s4374_s23  ;;  %v3826_v23 = vunpack.i.l.bf16 %v3825_v13  ;;  %v4010_v13 = vld [vmem:[%s5557_s4] sm:$0xff]  }
  0xc9   : > { %v881_v35 = vsel %vm873_vm2, %v3831_v12, %v3832_v22  ;;  %v4020_v22 = vld [vmem:[%s5556_s3 + $0x70] sm:$0xff]  }
  0xca   : > { %v1003_v21 = vpop.permute.xlu1 %1002  ;;  %v880_v24 = vsel %vm873_vm2, %v3827_v16, %v3831_v12  ;;  %v879_v34 = vsel %vm873_vm2, %v3822_v8, %v3826_v23  ;;  %v909_v38 = vpack.c.bf16 %v3827_v16, %v3821_v9  ;;  %v4013_v16 = vld [vmem:[%s5557_s4 + $0x18] sm:$0xff]  }
  0xcb   : > { %v1001_v27 = vpop.permute.xlu0 %1000  ;;  %v910_v29 = vpack.c.bf16 %v880_v24, %v878_v19  ;;  %v911_v39 = vpack.c.bf16 %v881_v35, %v879_v34  ;;  %v4017_v19 = vld [vmem:[%s5556_s3 + $0x58] sm:$0xff]  }
  0xcc   : > { %1026 = vrot.lane.b32.xlu1 %v908_v17, %s4374_s23  ;;  %1022 = vrot.lane.b32.xlu0 %v906_v18, %s4374_s23  ;;  %v1036_v28 = vsel %vm1034_vm3, %v1001_v27, %v1003_v21  ;;  %v4015_v17 = vld [vmem:[%s5556_s3 + $0x48] sm:$0xff]   ;;  %v4016_v18 = vld [vmem:[%s5556_s3 + $0x50] sm:$0xff]  }
  0xcd   : > { %1072 = vmatprep.subr.bf16.mxu0 %v1036_v28  ;;  %3375 = vmatmul.mubr.msk.bf16.gmra.mrb[4].mxu1 %vm546_vm0, %v4015_v17  ;;  %v4019_v21 = vld [vmem:[%s5556_s3 + $0x68] sm:$0xff]   ;;  %v4021_v23 = vld [vmem:[%s5556_s3 + $0x78] sm:$0xff]  }
  0xce   : > { %v1007_v33 = vpop.permute.xlu1 %1006  ;;  %727 = vmatprep.mubr.bf16.mxu1 %v5563_v26 }
  0xcf   : > { %v999_v36 = vpop.permute.xlu0 %998 }
  0xd0   : > { %1030 = vrot.lane.b32.xlu1 %v910_v29, %s4374_s23  ;;  %1024 = vrot.lane.b32.xlu0 %v907_v30, %s4374_s23  ;;  %v1035_v37 = vsel %vm1034_vm3, %v999_v36, %v1001_v27 }
  0xd1   : > { %1073 = vmatpush1.bf16.msra.mxu0 %v1035_v37 }
  0xd2   : > { %v1005_v40 = vpop.permute.xlu1 %1004 }
  0xd3   : > { %v1009_v41 = vpop.permute.xlu0 %1008  ;;  %v1037_v42 = vsel %vm1034_vm3, %v1005_v40, %v1007_v33 }
  0xd4   : > { %1028 = vrot.lane.b32.xlu1 %v909_v38, %s4374_s23  ;;  %1032 = vrot.lane.b32.xlu0 %v911_v39, %s4374_s23  ;;  %v1038_v43 = vsel %vm1034_vm3, %v1007_v33, %v1009_v41  ;;  %s3239_s23 = sshll.u32 %s351_s26, 4  ;;  %s5501_s23 = int_to_ptr.vmem [resolvable:$true] %s3239_s23 }
  0xd5   : > { %1074 = vmatprep.subr.bf16.mxu0 %v1038_v43  ;;  %3376 = vmatmul.mubr.msk.bf16.gmra.mrb[8].mxu1 %vm546_vm0, %v4016_v18 }
  0xd6   : > { %1075 = vmatpush1.bf16.msra.mxu0 %v1037_v42  ;;  %737 = vmatprep.mubr.bf16.mxu1 %v5563_v26 }
  0xd8   : > { %947 = vperm.xlu1 %3834, %v4671_v44   ;;  %942 = vperm.xlu0 %3833, %v4676_v45  }
  0xdc   : > { %952 = vperm.xlu1 %3834, %v4683_v46   ;;  %957 = vperm.xlu0 %3833, %v4688_v47  }
  0xdd   : > { %3377 = vmatmul.mubr.msk.bf16.gmra.mrb[12].mxu1 %vm546_vm0, %v4017_v19 }
  0xde   : > { %747 = vmatprep.mubr.bf16.mxu1 %v5563_v26 }
  0xe0   : > { %922 = vperm.xlu1 %3834, %v4698_v49   ;;  %927 = vperm.xlu0 %3833, %v4703_v50  }
  0xe4   : > { %932 = vperm.xlu1 %3834, %v4712_v51   ;;  %937 = vperm.xlu0 %3833, %v4717_v52  }
  0xe5   : > { %3378 = vmatmul.mubr.msk.bf16.gmra.mrb[16].mxu1 %vm546_vm0, %v4018_v20 }
  0xe6   : > { %757 = vmatprep.mubr.bf16.mxu1 %v5563_v26 }
  0xe8   : > { %1239 = vperm.xlu1 %3834, %v4724_v53   ;;  %1244 = vperm.xlu0 %3833, %v4729_v54  }
  0xec   : > { %1249 = vperm.xlu1 %3834, %v4736_v55   ;;  %1254 = vperm.xlu0 %3833, %v4741_v56  }
  0xed   : > { %3379 = vmatmul.mubr.msk.bf16.gmra.mrb[20].mxu1 %vm546_vm0, %v4019_v21 }
  0xee   : > { %767 = vmatprep.mubr.bf16.mxu1 %v5563_v26 }
  0xf5   : > { %3380 = vmatmul.mubr.msk.bf16.gmra.mrb[24].mxu1 %vm546_vm0, %v4020_v22 }
  0xf6   : > { %777 = vmatprep.mubr.bf16.mxu1 %v5563_v26 }
  0xfd   : > { %3381 = vmatmul.mubr.msk.bf16.gmra.mrb[28].mxu1 %vm546_vm0, %v4021_v23 }
  0xfe   : > { %1342 = vmatprep.mubr.bf16.mxu1 %v5563_v26 }
 0x132   : > { %v1015_v57 = vpop.permute.xlu1 %1014  ;;  %v1011_v58 = vpop.permute.xlu0 %1010 }
 0x136   : > { %v1017_v59 = vpop.permute.xlu1 %1016  ;;  %v1021_v60 = vpop.permute.xlu0 %1020 }
 0x13a   : > { %v1019_v61 = vpop.permute.xlu1 %1018  ;;  %v1013_v62 = vpop.permute.xlu0 %1012 }
 0x13b   : > { %v1040_v63 = vsel %vm1034_vm3, %v1013_v62, %v1015_v57  ;;  %v1039_v0 = vsel %vm1034_vm3, %v1011_v58, %v1013_v62  ;;  %v1042_v1 = vsel %vm1034_vm3, %v1019_v61, %v1021_v60  ;;  %v1041_v4 = vsel %vm1034_vm3, %v1017_v59, %v1019_v61 }
 0x13c   : > { %1076 = vmatprep.subr.bf16.mxu0 %v1040_v63 }
 0x13d   : > { %1077 = vmatpush1.bf16.msra.mxu0 %v1039_v0 }
 0x13e   : > { %v1027_v2 = vpop.permute.xlu1 %1026  ;;  %1078 = vmatprep.subr.bf16.mxu0 %v1042_v1  ;;  %v1023_v3 = vpop.permute.xlu0 %1022 }
 0x141   : > { %1079 = vmatpush1.bf16.msra.mxu0 %v1041_v4 }
 0x142   : > { %v1031_v5 = vpop.permute.xlu1 %1030  ;;  %v1025_v6 = vpop.permute.xlu0 %1024 }
 0x143   : > { %v1044_v7 = vsel %vm1034_vm3, %v1025_v6, %v1027_v2  ;;  %v1043_v8 = vsel %vm1034_vm3, %v1023_v3, %v1025_v6 }
 0x144   : > { %1080 = vmatprep.subr.bf16.mxu0 %v1044_v7 }
 0x145   : > { %1081 = vmatpush1.bf16.msra.mxu0 %v1043_v8 }
 0x146   : > { %v1029_v9 = vpop.permute.xlu1 %1028  ;;  %v1033_v10 = vpop.permute.xlu0 %1032 }
 0x147   : > { %v1045_v11 = vsel %vm1034_vm3, %v1029_v9, %v1031_v5  ;;  %v1046_v12 = vsel %vm1034_vm3, %v1031_v5, %v1033_v10 }
 0x148   : > { %1082 = vmatprep.subr.bf16.mxu0 %v1046_v12 }
 0x149   : > { %1083 = vmatpush1.bf16.msra.mxu0 %v1045_v11 }
 0x14c   : > { %3386 = vmatmul.mubr.msk.bf16.vlgmr.msra.gmra.mrb[0].mxu0 %vm1059_vm4, %v4010_v13 }
 0x14d   : > { %1114 = vmatprep.mubr.bf16.mxu0 %v5563_v26 }
 0x154   : > { %3387 = vmatmul.mubr.msk.bf16.gmra.mrb[4].mxu0 %vm1059_vm4, %v4011_v14 }
 0x155   : > { %1124 = vmatprep.mubr.bf16.mxu0 %v5563_v26 }
 0x157   : > { %v948_v35 = vpop.permute.xlu1 %947  ;;  %v943_v37 = vpop.permute.xlu0 %942 }
 0x15b   : > { %v953_v41 = vpop.permute.xlu1 %952  ;;  %v958_v42 = vpop.permute.xlu0 %957 }
 0x15c   : > { %3388 = vmatmul.mubr.msk.bf16.gmra.mrb[8].mxu0 %vm1059_vm4, %v4012_v15 }
 0x15d   : > { %1134 = vmatprep.mubr.bf16.mxu0 %v5563_v26 }
 0x15f   : > { %v923_v60 = vpop.permute.xlu1 %922  ;;  %v928_v2 = vpop.permute.xlu0 %927 }
 0x163   : > { %v933_v22 = vpop.permute.xlu1 %932 }
 0x164   : > { %3389 = vmatmul.mubr.msk.bf16.gmra.mrb[12].mxu0 %vm1059_vm4, %v4013_v16 }
 0x165   : > { %1722 = vmatprep.mubr.bf16.mxu0 %v5563_v26 }
 0x191   : > { %v4808_v24 = vpop.f32.mrb[0].mxu1 }
 0x192   : > { %v4810_v25 = vpop.f32.mrb[1].mxu1 }
 0x193   : > { %v4812_v27 = vpop.f32.mrb[2].mxu1 }
 0x194   : > { %v4814_v28 = vpop.f32.mrb[3].mxu1 }
 0x21f   : > { %v1106_v29 = vpop.f32.mrb[0].mxu0 }
 0x220   : > { %v1108_v30 = vpop.f32.mrb[1].mxu0  ;;  %v1107_v4 = vadd.f32 %v1106_v29, %v923_v60 }
 0x221   : > { %v1110_v33 = vpop.f32.mrb[2].mxu0  ;;  %v1109_v6 = vadd.f32 %v1108_v30, %v923_v60 }
 0x222   : > { %v1112_v34 = vpop.f32.mrb[3].mxu0  ;;  %v1111_v7 = vadd.f32 %v1110_v33, %v928_v2  ;;  %v938_v33 = vpop.permute.xlu0 %937 }
 0x223   : > { %v1113_v18 = vadd.f32 %v1112_v34, %v928_v2 }
 0x227   : > { %v1116_v36 = vpop.f32.mrb[4].mxu0 }
 0x228   : > { %v1118_v38 = vpop.f32.mrb[5].mxu0 }
 0x229   : > { %v1120_v39 = vpop.f32.mrb[6].mxu0 }
 0x22a   : > { %v4816_v40 = vpop.f32.mrb[7].mxu0 }
 0x22f   : > { %v1126_v43 = vpop.f32.mrb[8].mxu0 }
 0x230   : > { %v1127_v48 = vadd.f32 %v1126_v43, %v943_v37  ;;  %v1128_v57 = vpop.f32.mrb[9].mxu0 }
 0x231   : > { %v1129_v58 = vadd.f32 %v1128_v57, %v943_v37  ;;  %v1130_v59 = vpop.f32.mrb[10].mxu0  ;;  %v1121_v57 = vadd.f32 %v1120_v39, %v938_v33 }
 0x232   : > { %v3390_v61 = vmul.f32 -1.442695, %v1127_v48  ;;  %v1131_v62 = vadd.f32 %v1130_v59, %v948_v35  ;;  %v1132_v63 = vpop.f32.mrb[11].mxu0  ;;  %v1123_v59 = vadd.f32 %v4816_v40, %v938_v33  ;;  %v4022_v33 = vld [vmem:[%s5559_s6] sm:$0xff]  }
 0x233   : > { %v3391_v0 = vmul.f32 -1.442695, %v1129_v58  ;;  %v1133_v1 = vadd.f32 %v1132_v63, %v948_v35 }
 0x234   : > { %4050 = vpow2.f32 %v3390_v61  ;;  %v3392_v3 = vmul.f32 -1.442695, %v1131_v62 }
 0x235   : > { %4052 = vpow2.f32 %v3391_v0  ;;  %v3393_v5 = vmul.f32 -1.442695, %v1133_v1 }
 0x236   : > { %4054 = vpow2.f32 %v3392_v3 }
 0x237   : > { %4056 = vpow2.f32 %v3393_v5  ;;  %v1136_v8 = vpop.f32.mrb[12].mxu0 }
 0x238   : > { %v1137_v9 = vadd.f32 %v1136_v8, %v953_v41  ;;  %v1138_v10 = vpop.f32.mrb[13].mxu0  ;;  %4058 = vtanh.f32 %v1107_v4 }
 0x239   : > { %v1139_v11 = vadd.f32 %v1138_v10, %v953_v41  ;;  %v1140_v12 = vpop.f32.mrb[14].mxu0  ;;  %4060 = vtanh.f32 %v1109_v6  ;;  %v1117_v41 = vadd.f32 %v1116_v36, %v933_v22 }
 0x23a   : > { %v3394_v13 = vmul.f32 -1.442695, %v1137_v9  ;;  %v1141_v14 = vadd.f32 %v1140_v12, %v958_v42  ;;  %v1142_v15 = vpop.f32.mrb[15].mxu0  ;;  %4062 = vtanh.f32 %v1111_v7 }
 0x23b   : > { %v3395_v16 = vmul.f32 -1.442695, %v1139_v11  ;;  %v1143_v17 = vadd.f32 %v1142_v15, %v958_v42  ;;  %v1119_v42 = vadd.f32 %v1118_v38, %v933_v22 }
 0x23c   : > { %4064 = vpow2.f32 %v3394_v13  ;;  %v3396_v19 = vmul.f32 -1.442695, %v1141_v14 }
 0x23d   : > { %4066 = vpow2.f32 %v3395_v16  ;;  %v3397_v20 = vmul.f32 -1.442695, %v1143_v17 }
 0x23e   : > { %v4051_v21 = vpop.eup %4050  ;;  %4068 = vpow2.f32 %v3396_v19 }
 0x23f   : > { %v4053_v23 = vpop.eup %4052  ;;  %v1193_v29 = vadd.f32 1.0, %v4051_v21  ;;  %4070 = vpow2.f32 %v3397_v20 }
 0x240   : > { %v4055_v30 = vpop.eup %4054  ;;  %4072 = vtanh.f32 %v1113_v18  ;;  %v1194_v35 = vadd.f32 1.0, %v4053_v23 }
 0x241   : > { %v4057_v37 = vpop.eup %4056  ;;  %4074 = vrcp.f32 %v1193_v29  ;;  %v1195_v43 = vadd.f32 1.0, %v4055_v30 }
 0x242   : > { %4076 = vrcp.f32 %v1194_v35  ;;  %v1196_v34 = vadd.f32 1.0, %v4057_v37  ;;  %v4059_v48 = vpop.eup %4058  ;;  %v4023_v35 = vld [vmem:[%s5559_s6 + $0x8] sm:$0xff]   ;;  %v4829_v37 = vpop.f32.mrb[4].mxu1 }
 0x243   : > { %4078 = vrcp.f32 %v1195_v43  ;;  %v4061_v58 = vpop.eup %4060 }
 0x244   : > { %4080 = vrcp.f32 %v1196_v34  ;;  %v4063_v60 = vpop.eup %4062 }
 0x245   : > { %4082 = vtanh.f32 %v1117_v41  ;;  %v4831_v41 = vpop.f32.mrb[5].mxu1 }
 0x246   : > { %v4065_v61 = vpop.eup %4064  ;;  %4084 = vtanh.f32 %v1119_v42  ;;  %v4833_v43 = vpop.f32.mrb[6].mxu1 }
 0x247   : > { %v4067_v62 = vpop.eup %4066  ;;  %4086 = vtanh.f32 %v1121_v57  ;;  %v1197_v63 = vadd.f32 1.0, %v4065_v61  ;;  %v4835_v42 = vpop.f32.mrb[7].mxu1 }
 0x248   : > { %v4069_v36 = vpop.eup %4068  ;;  %4088 = vtanh.f32 %v1123_v59  ;;  %v1198_v0 = vadd.f32 1.0, %v4067_v62  ;;  %v4837_v34 = vpop.f32.mrb[8].mxu1 }
 0x249   : > { %v4071_v38 = vpop.eup %4070  ;;  %4090 = vrcp.f32 %v1197_v63  ;;  %v1199_v1 = vadd.f32 1.0, %v4069_v36 }
 0x24a   : > { %v4073_v2 = vpop.eup %4072  ;;  %4092 = vrcp.f32 %v1198_v0  ;;  %v1200_v39 = vadd.f32 1.0, %v4071_v38 }
 0x24b   : > { %v4075_v3 = vpop.eup %4074  ;;  %4094 = vrcp.f32 %v1199_v1 }
 0x24c   : > { %v4077_v40 = vpop.eup %4076  ;;  %4096 = vrcp.f32 %v1200_v39  ;;  %v1217_v4 = vmul.f32 %v4075_v3, %v4059_v48  ;;  %v4839_v48 = vpop.f32.mrb[9].mxu1 }
 0x24d   : > { %v4079_v5 = vpop.eup %4078  ;;  %v1218_v6 = vmul.f32 %v4077_v40, %v4061_v58  ;;  %v4841_v57 = vpop.f32.mrb[10].mxu1 }
 0x24e   : > { %v4081_v7 = vpop.eup %4080  ;;  %v1219_v8 = vmul.f32 %v4079_v5, %v4063_v60  ;;  %5570 = vst [vmem:[#allocation9_spill] sm:$0xff] %v4841_v57  ;;  %v4843_v58 = vpop.f32.mrb[11].mxu1 }
 0x24f   : > { %v4083_v9 = vpop.eup %4082  ;;  %v1220_v10 = vmul.f32 %v4081_v7, %v4073_v2  ;;  %5571 = vst [vmem:[#allocation10_spill] sm:$0xff] %v4843_v58  ;;  %v4845_v59 = vpop.f32.mrb[12].mxu1 }
 0x250   : > { %v4085_v11 = vpop.eup %4084  ;;  %v1233_v12 = vpack.c.bf16 %v1219_v8, %v1217_v4  ;;  %5572 = vst [vmem:[#allocation11_spill] sm:$0xff] %v4845_v59  ;;  %v4847_v60 = vpop.f32.mrb[13].mxu1 }
 0x251   : > { %v4087_v13 = vpop.eup %4086  ;;  %v1234_v14 = vpack.c.bf16 %v1220_v10, %v1218_v6  ;;  %5573 = vst [vmem:[#allocation12_spill] sm:$0xff] %v4847_v60  ;;  %v4849_v61 = vpop.f32.mrb[14].mxu1 }
 0x252   : > { %v4089_v15 = vpop.eup %4088  ;;  %5574 = vst [vmem:[#allocation13_spill] sm:$0xff] %v4849_v61  ;;  %v4851_v62 = vpop.f32.mrb[15].mxu1 }
 0x253   : > { %v4091_v16 = vpop.eup %4090  ;;  %1310 = vmatprep.subr.bf16.mxu1 %v1234_v14  ;;  %5575 = vst [vmem:[#allocation14_spill] sm:$0xff] %v4851_v62  ;;  %v4853_v63 = vpop.f32.mrb[16].mxu1  ;;  %v394_v14 = vld [vmem:[%s360_s21] sm:$0x3]  ;;  %s4383_s21 = smov 8  }
 0x254   : > { %v4093_v17 = vpop.eup %4092  ;;  %1311 = vmatpush1.bf16.msra.mxu1 %v1233_v12  ;;  %v1221_v18 = vmul.f32 %v4091_v16, %v4083_v9  ;;  %5576 = vst [vmem:[#allocation15_spill] sm:$0xff] %v4853_v63  ;;  %v4855_v36 = vpop.f32.mrb[17].mxu1 }
 0x255   : > { %v4095_v19 = vpop.eup %4094  ;;  %v1222_v20 = vmul.f32 %v4093_v17, %v4085_v11  ;;  %5577 = vst [vmem:[#allocation16_spill] sm:$0xff] %v4855_v36  ;;  %v4857_v0 = vpop.f32.mrb[18].mxu1  ;;  %v396_v11 = vlaneseq }
 0x256   : > { %v4097_v21 = vpop.eup %4096  ;;  %v1223_v22 = vmul.f32 %v4095_v19, %v4087_v13  ;;  %5578 = vst [vmem:[#allocation17_spill] sm:$0xff] %v4857_v0  ;;  %v4859_v38 = vpop.f32.mrb[19].mxu1 }
 0x257   : > { %v1224_v23 = vmul.f32 %v4097_v21, %v4089_v15  ;;  %5579 = vst [vmem:[#allocation18_spill] sm:$0xff] %v4859_v38  ;;  %v4861_v1 = vpop.f32.mrb[20].mxu1  ;;  %v397_v12 = vshrl.u32 %v396_v11, 7  ;;  %v1240_v16 = vpop.permute.xlu1 %1239 }
 0x258   : > { %v1235_v29 = vpack.c.bf16 %v1223_v22, %v1221_v18  ;;  %5580 = vst [vmem:[#allocation19_spill] sm:$0xff] %v4861_v1  ;;  %v4863_v2 = vpop.f32.mrb[21].mxu1  ;;  %v1245_v22 = vpop.permute.xlu0 %1244 }
 0x259   : > { %v1236_v30 = vpack.c.bf16 %v1224_v23, %v1222_v20  ;;  %5581 = vst [vmem:[#allocation20_spill] sm:$0xff] %v4863_v2  ;;  %v4865_v39 = vpop.f32.mrb[22].mxu1  ;;  %v398_v13 = vsub.s32 0, %v397_v12  ;;  %v402_v15 = vsub.s32 1, %v397_v12 }
 0x25a   : > { %5582 = vst [vmem:[#allocation21_spill] sm:$0xff] %v4865_v39  ;;  %v4867_v3 = vpop.f32.mrb[23].mxu1 }
 0x25b   : > { %1312 = vmatprep.subr.bf16.mxu1 %v1236_v30  ;;  %5583 = vst [vmem:[#allocation22_spill] sm:$0xff] %v4867_v3  ;;  %v4869_v40 = vpop.f32.mrb[24].mxu1  ;;  %v4889_v18 = vrot.slane %v394_v14, %v398_v13  ;;  %v4891_v21 = vrot.slane %v394_v14, %v402_v15  ;;  %v4242_v30 = vld [vmem:[%s4554_s20 + $0x8] sm:$0xff]  ;;  %v4245_v14 = vld [vmem:[%s4554_s20 + $0x30] sm:$0xff] }
 0x25c   : > { %1313 = vmatpush1.bf16.msra.mxu1 %v1235_v29  ;;  %5584 = vst [vmem:[#allocation23_spill] sm:$0xff] %v4869_v40  ;;  %v4871_v4 = vpop.f32.mrb[25].mxu1  ;;  %v4244_v13 = vld [vmem:[%s4554_s20 + $0x28] sm:$0xff] }
 0x25d   : > { %5585 = vst [vmem:[#allocation24_spill] sm:$0xff] %v4871_v4  ;;  %v4873_v5 = vpop.f32.mrb[26].mxu1 }
 0x25e   : > { %5586 = vst [vmem:[#allocation25_spill] sm:$0xff] %v4873_v5  ;;  %v4875_v6 = vpop.f32.mrb[27].mxu1  ;;  %v4249_v5 = vld [vmem:[%s4554_s20 + $0x68] sm:$0xff] }
 0x25f   : > { %3402 = vmatmul.mubr.msk.bf16.vlgmr.msra.gmra.mrb[32].mxu1 %vm1297_vm5, %v4022_v33  ;;  %5587 = vst [vmem:[#allocation26_spill] sm:$0xff] %v4875_v6  ;;  %v4877_v7 = vpop.f32.mrb[28].mxu1 }
 0x260   : > { %1352 = vmatprep.mubr.bf16.mxu1 %v5563_v26  ;;  %5588 = vst [vmem:[#allocation27_spill] sm:$0xff] %v4877_v7  ;;  %v4879_v8 = vpop.f32.mrb[29].mxu1 }
 0x261   : > { %5589 = vst [vmem:[#allocation28_spill] sm:$0xff] %v4879_v8  ;;  %v4881_v9 = vpop.f32.mrb[30].mxu1 }
 0x262   : > { %5590 = vst [vmem:[#allocation29_spill] sm:$0xff] %v4881_v9  ;;  %v4883_v10 = vpop.f32.mrb[31].mxu1 }
 0x263   : > { %5591 = vst [vmem:[#allocation30_spill] sm:$0xff] %v4883_v10 }
 0x267   : > { %3403 = vmatmul.mubr.msk.bf16.gmra.mrb[36].mxu1 %vm1297_vm5, %v4023_v35 }
 0x268   : > { %1362 = vmatprep.mubr.bf16.mxu1 %v5563_v26  ;;  %v4243_v26 = vld [vmem:[%s4554_s20 + $0x10] sm:$0xff] }
 0x332   : > { %v1344_v17 = vpop.f32.mrb[32].mxu1 }
 0x333   : > { %v1345_v19 = vadd.f32 %v1344_v17, %v1240_v16  ;;  %v1346_v20 = vpop.f32.mrb[33].mxu1 }
 0x334   : > { %v1347_v23 = vadd.f32 %v1346_v20, %v1240_v16  ;;  %v1348_v29 = vpop.f32.mrb[34].mxu1 }
 0x335   : > { %v1391_v33 = vadd.f32 %v4242_v30, %v1345_v19  ;;  %v1349_v35 = vadd.f32 %v1348_v29, %v1245_v22  ;;  %v1350_v11 = vpop.f32.mrb[35].mxu1  ;;  %v1250_v19 = vpop.permute.xlu1 %1249  ;;  %v4912_v30 = vld [vmem:[%s4554_s20 + $0x18] sm:$0xff] }
 0x336   : > { %v1392_v12 = vadd.f32 %v4243_v26, %v1347_v23  ;;  %v1351_v10 = vadd.f32 %v1350_v11, %v1245_v22 }
 0x337   : > { %v4896_v9 = vmul.f32 %v1391_v33, %v4889_v18  ;;  %v1393_v17 = vadd.f32 %v4244_v13, %v1349_v35  ;;  %v1255_v33 = vpop.permute.xlu0 %1254 }
 0x338   : > { %v4900_v8 = vmul.f32 %v1392_v12, %v4891_v21  ;;  %v1394_v15 = vadd.f32 %v4245_v14, %v1351_v10  ;;  %v4247_v12 = vld [vmem:[%s4554_s20 + $0x48] sm:$0xff] }
 0x339   : > { %v4904_v16 = vmul.f32 %v1393_v17, %v4889_v18 }
 0x33a   : > { %v1354_v20 = vpop.f32.mrb[36].mxu1  ;;  %v3835_v26 = vpack.i.bf16 %v4900_v8, %v4896_v9  ;;  %v4909_v22 = vmul.f32 %v1394_v15, %v4891_v21  ;;  %v4248_v15 = vld [vmem:[%s4554_s20 + $0x50] sm:$0xff] }
 0x33b   : > { %v1355_v23 = vadd.f32 %v1354_v20, %v1250_v19  ;;  %v1356_v29 = vpop.f32.mrb[37].mxu1  ;;  %v3845_v10 = vpack.i.bf16 %v4904_v16, %v4912_v30 }
 0x33c   : > { %v1357_v35 = vadd.f32 %v1356_v29, %v1250_v19  ;;  %v1358_v11 = vpop.f32.mrb[38].mxu1  ;;  %3836 = vrot.lane.b32.xlu1 %v3835_v26, %s4372_s15  ;;  %v3850_v29 = vpack.i.bf16 %v4909_v22, %v4904_v16 }
 0x33d   : > { %v1395_v13 = vadd.f32 %v4247_v12, %v1355_v23  ;;  %v1359_v17 = vadd.f32 %v1358_v11, %v1255_v33  ;;  %v1360_v14 = vpop.f32.mrb[39].mxu1  ;;  %3846 = vrot.lane.b32.xlu0 %v3845_v10, %s4375_s24  ;;  %v4250_v11 = vld [vmem:[%s4554_s20 + $0x70] sm:$0xff] }
 0x33e   : > { %v1396_v20 = vadd.f32 %v4248_v15, %v1357_v35  ;;  %v1361_v7 = vadd.f32 %v1360_v14, %v1255_v33  ;;  %v4958_v14 = vld [vmem:[%s4554_s20 + $0x78] sm:$0xff] }
 0x33f   : > { %v4921_v6 = vmul.f32 %v1395_v13, %v4889_v18  ;;  %v1397_v19 = vadd.f32 %v4249_v5, %v1359_v17  ;;  %v4952_v13 = vld [vmem:[%s4554_s20 + $0x58] sm:$0xff] }
 0x340   : > { %v4927_v23 = vmul.f32 %v1396_v20, %v4891_v21  ;;  %v1398_v12 = vadd.f32 %v4250_v11, %v1361_v7  ;;  %3841 = vrot.lane.b32.xlu1 %v3835_v26, %s4375_s24  ;;  %v4945_v7 = vld [vmem:[%s4554_s20 + $0x38] sm:$0xff]  ;;  %v1521_v20 = vpack.c.bf16 %v4904_v16, %v4896_v9 }
 0x341   : > { %v4932_v10 = vmul.f32 %v1397_v19, %v4889_v18  ;;  %3851 = vrot.lane.b32.xlu0 %v3850_v29, %s4372_s15  ;;  %v3860_v26 = vpack.i.bf16 %v4945_v7, %v4909_v22  ;;  %v1522_v19 = vpack.c.bf16 %v4909_v22, %v4900_v8 }
 0x342   : > { %v4936_v33 = vmul.f32 %v1398_v12, %v4891_v21  ;;  %v3855_v5 = vpack.i.bf16 %v4927_v23, %v4921_v6 }
 0x343   : > { %v3875_v17 = vpack.i.bf16 %v4932_v10, %v4952_v13  ;;  %v1524_v11 = vpack.c.bf16 %v4932_v10, %v4921_v6 }
 0x344   : > { %3856 = vrot.lane.b32.xlu1 %v3855_v5, %s4372_s15  ;;  %v3865_v35 = vpack.i.bf16 %v4936_v33, %v4932_v10  ;;  %v3880_v15 = vpack.i.bf16 %v4958_v14, %v4936_v33  ;;  %v1525_v29 = vpack.c.bf16 %v4936_v33, %v4927_v23 }
 0x346   : > { %3866 = vrot.lane.b32.xlu0 %v3865_v35, %s4372_s15  ;;  %s4376_s15 = smov 2  }
 0x348   : > { %3861 = vrot.lane.b32.xlu1 %v3860_v26, %s4375_s24 }
 0x34a   : > { %3871 = vrot.lane.b32.xlu0 %v3855_v5, %s4375_s24 }
 0x34c   : > { %3876 = vrot.lane.b32.xlu1 %v3875_v17, %s4375_s24 }
 0x34e   : > { %3881 = vrot.lane.b32.xlu0 %v3880_v15, %s4375_s24 }
 0x350   : > { %1619 = vrot.lane.b32.xlu1 %v1521_v20, %s4376_s15 }
 0x352   : > { %1621 = vrot.lane.b32.xlu0 %v1522_v19, %s4376_s15 }
 0x354   : > { %1617 = vrot.lane.b32.xlu1 %v4591_v31, %s4376_s15 }
 0x356   : > { %1623 = vrot.lane.b32.xlu0 %v4597_v32, %s4376_s15 }
 0x358   : > { %1627 = vrot.lane.b32.xlu1 %v1525_v29, %s4376_s15 }
 0x35a   : > { %1625 = vrot.lane.b32.xlu0 %v1524_v11, %s4376_s15 }
 0x3ae   : > { %v3837_v12 = vpop.permute.xlu1 %3836 }
 0x3af   : > { %v3847_v5 = vpop.permute.xlu0 %3846  ;;  %v3839_v17 = vunpack.i.h.bf16 %v3837_v12  ;;  %v3838_v15 = vunpack.i.l.bf16 %v3837_v12 }
 0x3b0   : > { %v3849_v62 = vunpack.i.h.bf16 %v3847_v5 }
 0x3b1   : > { %v1455_v11 = vsel %vm873_vm2, %v3838_v15, %v3839_v17 }
 0x3b2   : > { %v3842_v35 = vpop.permute.xlu1 %3841 }
 0x3b3   : > { %v3852_v26 = vpop.permute.xlu0 %3851  ;;  %v3844_v2 = vunpack.i.h.bf16 %v3842_v35  ;;  %v3843_v1 = vunpack.i.l.bf16 %v3842_v35 }
 0x3b4   : > { %v3854_v20 = vunpack.i.h.bf16 %v3852_v26  ;;  %v3853_v19 = vunpack.i.l.bf16 %v3852_v26 }
 0x3b6   : > { %v3857_v4 = vpop.permute.xlu1 %3856  ;;  %v1528_v40 = vpack.c.bf16 %v3854_v20, %v3839_v17  ;;  %v1526_v3 = vpack.c.bf16 %v3853_v19, %v3838_v15  ;;  %v1456_v39 = vsel %vm873_vm2, %v3853_v19, %v3854_v20  ;;  %v3848_v15 = vunpack.i.l.bf16 %v3847_v5 }
 0x3b7   : > { %v3858_v38 = vunpack.i.l.bf16 %v3857_v4  ;;  %v3859_v12 = vunpack.i.h.bf16 %v3857_v4  ;;  %v1527_v26 = vpack.c.bf16 %v1456_v39, %v1455_v11 }
 0x3b8   : > { %v3867_v29 = vpop.permute.xlu0 %3866  ;;  %1633 = vrot.lane.b32.xlu0 %v1528_v40, %s4376_s15  ;;  %1629 = vrot.lane.b32.xlu1 %v1526_v3, %s4376_s15  ;;  %v1500_v3 = vsel %vm1499_vm6, %v3843_v1, %v3844_v2 }
 0x3b9   : > { %v3869_v0 = vunpack.i.h.bf16 %v3867_v29  ;;  %v3868_v36 = vunpack.i.l.bf16 %v3867_v29  ;;  %v1457_v39 = vsel %vm873_vm2, %v3858_v38, %v3859_v12 }
 0x3ba   : > { %v3862_v63 = vpop.permute.xlu1 %3861 }
 0x3bb   : > { %v3863_v61 = vunpack.i.l.bf16 %v3862_v63  ;;  %v1529_v60 = vpack.c.bf16 %v3868_v36, %v3858_v38  ;;  %v3864_v20 = vunpack.i.h.bf16 %v3862_v63  ;;  %v1458_v40 = vsel %vm873_vm2, %v3868_v36, %v3869_v0 }
 0x3bc   : > { %v3872_v19 = vpop.permute.xlu0 %3871  ;;  %1631 = vrot.lane.b32.xlu1 %v1527_v26, %s4376_s15  ;;  %v1530_v29 = vpack.c.bf16 %v1458_v40, %v1457_v39 }
 0x3bd   : > { %1635 = vrot.lane.b32.xlu0 %v1529_v60, %s4376_s15  ;;  %v1502_v35 = vsel %vm1499_vm6, %v3849_v62, %v3863_v61  ;;  %v1503_v63 = vsel %vm1499_vm6, %v3863_v61, %v3864_v20  ;;  %v1501_v60 = vsel %vm1499_vm6, %v3844_v2, %v3848_v15  ;;  %v3874_v36 = vunpack.i.h.bf16 %v3872_v19 }
 0x3be   : > { %v3877_v17 = vpop.permute.xlu1 %3876  ;;  %v1533_v4 = vpack.c.bf16 %v1502_v35, %v1500_v3  ;;  %v3873_v59 = vunpack.i.l.bf16 %v3872_v19  ;;  %v1531_v3 = vpack.c.bf16 %v3869_v0, %v3859_v12  ;;  %v1534_v38 = vpack.c.bf16 %v1503_v63, %v1501_v60 }
 0x3bf   : > { %v3879_v58 = vunpack.i.h.bf16 %v3877_v17  ;;  %v1532_v2 = vpack.c.bf16 %v3849_v62, %v3843_v1  ;;  %v4377_v1 = vmov 1  }
 0x3c0   : > { %v3882_v11 = vpop.permute.xlu0 %3881  ;;  %1643 = vrot.lane.b32.xlu1 %v1533_v4, %s4376_s15  ;;  %v3878_v4 = vunpack.i.l.bf16 %v3877_v17  ;;  %v1504_v19 = vsel %vm1499_vm6, %v3873_v59, %v3874_v36  ;;  %3886 = vset.pattern.permute.xlu0 %v4377_v1 }
 0x3c1   : > { %v3883_v26 = vunpack.i.l.bf16 %v3882_v11  ;;  %1637 = vrot.lane.b32.xlu0 %v1530_v29, %s4376_s15  ;;  %v3884_v35 = vunpack.i.h.bf16 %v3882_v11  ;;  %v1535_v11 = vpack.c.bf16 %v3879_v58, %v3873_v59  ;;  %3885 = vset.pattern.permute.xlu1 %v4377_v1 }
 0x3c2   : > { %v1620_v57 = vpop.permute.xlu1 %1619  ;;  %v1505_v17 = vsel %vm1499_vm6, %v3874_v36, %v3878_v4  ;;  %v5592_v4 = vmov 0  }
 0x3c3   : > { %v1506_v40 = vsel %vm1499_vm6, %v3879_v58, %v3883_v26  ;;  %v1507_v12 = vsel %vm1499_vm6, %v3883_v26, %v3884_v35 }
 0x3c4   : > { %v1622_v5 = vpop.permute.xlu0 %1621  ;;  %1639 = vrot.lane.b32.xlu1 %v1531_v3, %s4376_s15  ;;  %v1536_v0 = vpack.c.bf16 %v1506_v40, %v1504_v19  ;;  %v1537_v29 = vpack.c.bf16 %v1507_v12, %v1505_v17  ;;  %v4024_v40 = vld [vmem:[%s5557_s4 + $0x20] sm:$0xff]   ;;  %v4028_v19 = vld [vmem:[%s5559_s6 + $0x10] sm:$0xff]  }
 0x3c5   : > { %1645 = vrot.lane.b32.xlu0 %v1534_v38, %s4376_s15  ;;  %v1655_v61 = vsel %vm1653_vm7, %v1620_v57, %v1622_v5  ;;  %3404 = vmatmul.mubr.msk.bf16.gmra.mrb[40].mxu1 %vm1297_vm5, %v4028_v19 }
 0x3c6   : > { %v1618_v20 = vpop.permute.xlu1 %1617  ;;  %1690 = vmatprep.subr.bf16.mxu0 %v1655_v61  ;;  %v4025_v61 = vld [vmem:[%s5557_s4 + $0x28] sm:$0xff]   ;;  %1372 = vmatprep.mubr.bf16.mxu1 %v5592_v4 }
 0x3c7   : > { %v1654_v39 = vsel %vm1653_vm7, %v1618_v20, %v1620_v57  ;;  %v4026_v20 = vld [vmem:[%s5557_s4 + $0x30] sm:$0xff]  }
 0x3c8   : > { %1691 = vmatpush1.bf16.msra.mxu0 %v1654_v39  ;;  %v1624_v15 = vpop.permute.xlu0 %1623  ;;  %1641 = vrot.lane.b32.xlu1 %v1532_v2, %s4376_s15  ;;  %v4027_v2 = vld [vmem:[%s5557_s4 + $0x38] sm:$0xff]  }
 0x3c9   : > { %1649 = vrot.lane.b32.xlu0 %v1536_v0, %s4376_s15  ;;  %v4029_v39 = vld [vmem:[%s5559_s6 + $0x18] sm:$0xff]  }
 0x3ca   : > { %v1628_v63 = vpop.permute.xlu1 %1627 }
 0x3cc   : > { %v1626_v60 = vpop.permute.xlu0 %1625  ;;  %1651 = vrot.lane.b32.xlu1 %v1537_v29, %s4376_s15 }
 0x3cd   : > { %1647 = vrot.lane.b32.xlu0 %v1535_v11, %s4376_s15  ;;  %v1657_v57 = vsel %vm1653_vm7, %v1626_v60, %v1628_v63  ;;  %v1656_v62 = vsel %vm1653_vm7, %v1624_v15, %v1626_v60  ;;  %3405 = vmatmul.mubr.msk.bf16.gmra.mrb[44].mxu1 %vm1297_vm5, %v4029_v39 }
 0x3ce   : > { %1692 = vmatprep.subr.bf16.mxu0 %v1657_v57  ;;  %1952 = vmatprep.mubr.bf16.mxu1 %v5592_v4 }
 0x3cf   : > { %1693 = vmatpush1.bf16.msra.mxu0 %v1656_v62 }
 0x3d0   : > { %1564 = vperm.xlu1 %3885, %v4676_v45  }
 0x3d1   : > { %1568 = vperm.xlu0 %3886, %v4671_v44  }
 0x3d4   : > { %1572 = vperm.xlu1 %3885, %v4683_v46  }
 0x3d5   : > { %1548 = vperm.xlu0 %3886, %v4698_v49  }
 0x3d8   : > { %1576 = vperm.xlu1 %3885, %v4688_v47  }
 0x3d9   : > { %1556 = vperm.xlu0 %3886, %v4712_v51  }
 0x3dc   : > { %1552 = vperm.xlu1 %3885, %v4703_v50  }
 0x3dd   : > { %1857 = vperm.xlu0 %3886, %v4724_v53  }
 0x3e0   : > { %1560 = vperm.xlu1 %3885, %v4717_v52  }
 0x3e1   : > { %1865 = vperm.xlu0 %3886, %v4736_v55  }
 0x3e4   : > { %1861 = vperm.xlu1 %3885, %v4729_v54  }
 0x3e8   : > { %1869 = vperm.xlu1 %3885, %v4741_v56  }
 0x42a   : > { %v1634_v44 = vpop.permute.xlu0 %1633  ;;  %v1630_v45 = vpop.permute.xlu1 %1629 }
 0x42e   : > { %v1632_v46 = vpop.permute.xlu1 %1631 }
 0x42f   : > { %v1636_v49 = vpop.permute.xlu0 %1635  ;;  %v1659_v47 = vsel %vm1653_vm7, %v1632_v46, %v1634_v44  ;;  %v1658_v51 = vsel %vm1653_vm7, %v1630_v45, %v1632_v46 }
 0x430   : > { %1694 = vmatprep.subr.bf16.mxu0 %v1659_v47 }
 0x431   : > { %1695 = vmatpush1.bf16.msra.mxu0 %v1658_v51 }
 0x432   : > { %v1644_v50 = vpop.permute.xlu1 %1643 }
 0x433   : > { %v1638_v53 = vpop.permute.xlu0 %1637 }
 0x434   : > { %v1660_v54 = vsel %vm1653_vm7, %v1636_v49, %v1638_v53 }
 0x436   : > { %v1640_v58 = vpop.permute.xlu1 %1639 }
 0x437   : > { %v1646_v52 = vpop.permute.xlu0 %1645  ;;  %v1661_v55 = vsel %vm1653_vm7, %v1638_v53, %v1640_v58 }
 0x438   : > { %1696 = vmatprep.subr.bf16.mxu0 %v1661_v55  ;;  %v1663_v56 = vsel %vm1653_vm7, %v1644_v50, %v1646_v52 }
 0x439   : > { %1697 = vmatpush1.bf16.msra.mxu0 %v1660_v54 }
 0x43a   : > { %v1642_v59 = vpop.permute.xlu1 %1641  ;;  %1698 = vmatprep.subr.bf16.mxu0 %v1663_v56 }
 0x43b   : > { %v1662_v26 = vsel %vm1653_vm7, %v1642_v59, %v1644_v50  ;;  %v1650_v36 = vpop.permute.xlu0 %1649 }
 0x43d   : > { %1699 = vmatpush1.bf16.msra.mxu0 %v1662_v26 }
 0x43e   : > { %v1652_v3 = vpop.permute.xlu1 %1651 }
 0x43f   : > { %v1648_v35 = vpop.permute.xlu0 %1647  ;;  %v1665_v38 = vsel %vm1653_vm7, %v1650_v36, %v1652_v3 }
 0x440   : > { %v1664_v5 = vsel %vm1653_vm7, %v1648_v35, %v1650_v36  ;;  %1700 = vmatprep.subr.bf16.mxu0 %v1665_v38 }
 0x441   : > { %1701 = vmatpush1.bf16.msra.mxu0 %v1664_v5 }
 0x444   : > { %3418 = vmatmul.mubr.msk.bf16.vlgmr.msra.gmra.mrb[16].mxu0 %vm1059_vm4, %v4024_v40 }
 0x445   : > { %1732 = vmatprep.mubr.bf16.mxu0 %v5592_v4 }
 0x44c   : > { %3419 = vmatmul.mubr.msk.bf16.gmra.mrb[20].mxu0 %vm1059_vm4, %v4025_v61 }
 0x44d   : > { %1742 = vmatprep.mubr.bf16.mxu0 %v5592_v4 }
 0x44f   : > { %v1565_v17 = vpop.permute.xlu1 %1564 }
 0x450   : > { %v1569_v44 = vpop.permute.xlu0 %1568 }
 0x453   : > { %v1573_v63 = vpop.permute.xlu1 %1572 }
 0x454   : > { %3420 = vmatmul.mubr.msk.bf16.gmra.mrb[24].mxu0 %vm1059_vm4, %v4026_v20  ;;  %v1549_v53 = vpop.permute.xlu0 %1548 }
 0x455   : > { %1752 = vmatprep.mubr.bf16.mxu0 %v5592_v4 }
 0x457   : > { %v1577_v45 = vpop.permute.xlu1 %1576 }
 0x45b   : > { %v1553_v59 = vpop.permute.xlu1 %1552 }
 0x45c   : > { %3421 = vmatmul.mubr.msk.bf16.gmra.mrb[28].mxu0 %vm1059_vm4, %v4027_v2 }
 0x45d   : > { %2332 = vmatprep.mubr.bf16.mxu0 %v5592_v4 }
 0x517   : > { %v1724_v0 = vpop.f32.mrb[16].mxu0 }
 0x518   : > { %v1726_v12 = vpop.f32.mrb[17].mxu0  ;;  %v1725_v36 = vadd.f32 %v1724_v0, %v1549_v53 }
 0x519   : > { %v1728_v15 = vpop.f32.mrb[18].mxu0  ;;  %v1727_v35 = vadd.f32 %v1726_v12, %v1549_v53  ;;  %v1561_v53 = vpop.permute.xlu1 %1560 }
 0x51a   : > { %v1730_v29 = vpop.f32.mrb[19].mxu0  ;;  %v1729_v38 = vadd.f32 %v1728_v15, %v1553_v59 }
 0x51b   : > { %v1731_v0 = vadd.f32 %v1730_v29, %v1553_v59 }
 0x51f   : > { %v1734_v11 = vpop.f32.mrb[20].mxu0 }
 0x520   : > { %v1736_v60 = vpop.f32.mrb[21].mxu0 }
 0x521   : > { %v1738_v57 = vpop.f32.mrb[22].mxu0 }
 0x522   : > { %v5059_v62 = vpop.f32.mrb[23].mxu0  ;;  %v1739_v59 = vadd.f32 %v1738_v57, %v1561_v53 }
 0x527   : > { %v1744_v46 = vpop.f32.mrb[24].mxu0 }
 0x528   : > { %v1745_v49 = vadd.f32 %v1744_v46, %v1565_v17  ;;  %v1746_v47 = vpop.f32.mrb[25].mxu0 }
 0x529   : > { %v1747_v51 = vadd.f32 %v1746_v47, %v1565_v17  ;;  %v1748_v50 = vpop.f32.mrb[26].mxu0  ;;  %v1557_v47 = vpop.permute.xlu0 %1556 }
 0x52a   : > { %v3422_v58 = vmul.f32 -1.442695, %v1745_v49  ;;  %v1749_v52 = vadd.f32 %v1748_v50, %v1569_v44  ;;  %v1750_v55 = vpop.f32.mrb[27].mxu0 }
 0x52b   : > { %v3423_v54 = vmul.f32 -1.442695, %v1747_v51  ;;  %v1751_v56 = vadd.f32 %v1750_v55, %v1569_v44  ;;  %v1735_v55 = vadd.f32 %v1734_v11, %v1557_v47 }
 0x52c   : > { %4098 = vpow2.f32 %v3422_v58  ;;  %v3424_v26 = vmul.f32 -1.442695, %v1749_v52 }
 0x52d   : > { %4100 = vpow2.f32 %v3423_v54  ;;  %v3425_v3 = vmul.f32 -1.442695, %v1751_v56 }
 0x52e   : > { %4102 = vpow2.f32 %v3424_v26 }
 0x52f   : > { %4104 = vpow2.f32 %v3425_v3  ;;  %v1754_v5 = vpop.f32.mrb[28].mxu0 }
 0x530   : > { %v1755_v40 = vadd.f32 %v1754_v5, %v1573_v63  ;;  %v1756_v61 = vpop.f32.mrb[29].mxu0  ;;  %4106 = vtanh.f32 %v1725_v36  ;;  %v1741_v36 = vadd.f32 %v5059_v62, %v1561_v53 }
 0x531   : > { %v1757_v20 = vadd.f32 %v1756_v61, %v1573_v63  ;;  %v1758_v2 = vpop.f32.mrb[30].mxu0  ;;  %4108 = vtanh.f32 %v1727_v35 }
 0x532   : > { %v3426_v19 = vmul.f32 -1.442695, %v1755_v40  ;;  %v1759_v39 = vadd.f32 %v1758_v2, %v1577_v45  ;;  %v1760_v17 = vpop.f32.mrb[31].mxu0  ;;  %4110 = vtanh.f32 %v1729_v38 }
 0x533   : > { %v3427_v44 = vmul.f32 -1.442695, %v1757_v20  ;;  %v1761_v46 = vadd.f32 %v1760_v17, %v1577_v45  ;;  %v1737_v45 = vadd.f32 %v1736_v60, %v1557_v47 }
 0x534   : > { %4112 = vpow2.f32 %v3426_v19  ;;  %v3428_v49 = vmul.f32 -1.442695, %v1759_v39 }
 0x535   : > { %4114 = vpow2.f32 %v3427_v44  ;;  %v3429_v12 = vmul.f32 -1.442695, %v1761_v46 }
 0x536   : > { %v4099_v15 = vpop.eup %4098  ;;  %4116 = vpow2.f32 %v3428_v49 }
 0x537   : > { %v4101_v51 = vpop.eup %4100  ;;  %v1811_v50 = vadd.f32 1.0, %v4099_v15  ;;  %4118 = vpow2.f32 %v3429_v12 }
 0x538   : > { %v4103_v63 = vpop.eup %4102  ;;  %4120 = vtanh.f32 %v1731_v0  ;;  %v1812_v58 = vadd.f32 1.0, %v4101_v51 }
 0x539   : > { %v4105_v52 = vpop.eup %4104  ;;  %4122 = vrcp.f32 %v1811_v50  ;;  %v1813_v54 = vadd.f32 1.0, %v4103_v63 }
 0x53a   : > { %4124 = vrcp.f32 %v1812_v58  ;;  %v1814_v29 = vadd.f32 1.0, %v4105_v52  ;;  %v4107_v56 = vpop.eup %4106 }
 0x53b   : > { %4126 = vrcp.f32 %v1813_v54  ;;  %v4109_v26 = vpop.eup %4108 }
 0x53c   : > { %4128 = vrcp.f32 %v1814_v29  ;;  %v4111_v3 = vpop.eup %4110 }
 0x53d   : > { %4130 = vtanh.f32 %v1735_v55 }
 0x53e   : > { %v4113_v35 = vpop.eup %4112  ;;  %4132 = vtanh.f32 %v1737_v45 }
 0x53f   : > { %v4115_v38 = vpop.eup %4114  ;;  %4134 = vtanh.f32 %v1739_v59  ;;  %v1815_v5 = vadd.f32 1.0, %v4113_v35 }
 0x540   : > { %v4117_v11 = vpop.eup %4116  ;;  %4136 = vtanh.f32 %v1741_v36  ;;  %v1816_v40 = vadd.f32 1.0, %v4115_v38  ;;  %v4031_v36 = vld [vmem:[%s5559_s6 + $0x28] sm:$0xff]  }
 0x541   : > { %v4119_v60 = vpop.eup %4118  ;;  %4138 = vrcp.f32 %v1815_v5  ;;  %v1817_v61 = vadd.f32 1.0, %v4117_v11  ;;  %v1862_v11 = vpop.permute.xlu1 %1861 }
 0x542   : > { %v4121_v20 = vpop.eup %4120  ;;  %4140 = vrcp.f32 %v1816_v40  ;;  %v1818_v57 = vadd.f32 1.0, %v4119_v60 }
 0x543   : > { %v4123_v2 = vpop.eup %4122  ;;  %4142 = vrcp.f32 %v1817_v61 }
 0x544   : > { %v4125_v62 = vpop.eup %4124  ;;  %4144 = vrcp.f32 %v1818_v57  ;;  %v1835_v19 = vmul.f32 %v4123_v2, %v4107_v56 }
 0x545   : > { %v4127_v39 = vpop.eup %4126  ;;  %v1836_v17 = vmul.f32 %v4125_v62, %v4109_v26  ;;  %v4030_v26 = vld [vmem:[%s5559_s6 + $0x20] sm:$0xff]  }
 0x546   : > { %v4129_v44 = vpop.eup %4128  ;;  %v1837_v46 = vmul.f32 %v4127_v39, %v4111_v3  ;;  %v1858_v3 = vpop.permute.xlu0 %1857 }
 0x547   : > { %v4131_v0 = vpop.eup %4130  ;;  %v1838_v49 = vmul.f32 %v4129_v44, %v4121_v20 }
 0x548   : > { %v4133_v12 = vpop.eup %4132  ;;  %v1852_v15 = vpack.c.bf16 %v1837_v46, %v1835_v19 }
 0x549   : > { %v4135_v47 = vpop.eup %4134  ;;  %v1853_v51 = vpack.c.bf16 %v1838_v49, %v1836_v17 }
 0x54a   : > { %v4137_v50 = vpop.eup %4136 }
 0x54b   : > { %v4139_v63 = vpop.eup %4138  ;;  %1920 = vmatprep.subr.bf16.mxu1 %v1853_v51 }
 0x54c   : > { %v4141_v53 = vpop.eup %4140  ;;  %1921 = vmatpush1.bf16.msra.mxu1 %v1852_v15  ;;  %v1839_v58 = vmul.f32 %v4139_v63, %v4131_v0  ;;  %v1866_v0 = vpop.permute.xlu0 %1865 }
 0x54d   : > { %v4143_v52 = vpop.eup %4142  ;;  %v1840_v55 = vmul.f32 %v4141_v53, %v4133_v12 }
 0x54e   : > { %v4145_v54 = vpop.eup %4144  ;;  %v1841_v45 = vmul.f32 %v4143_v52, %v4135_v47  ;;  %v1870_v47 = vpop.permute.xlu1 %1869 }
 0x54f   : > { %v1842_v29 = vmul.f32 %v4145_v54, %v4137_v50 }
 0x550   : > { %v1854_v56 = vpack.c.bf16 %v1841_v45, %v1839_v58 }
 0x551   : > { %v1855_v59 = vpack.c.bf16 %v1842_v29, %v1840_v55 }
 0x553   : > { %1922 = vmatprep.subr.bf16.mxu1 %v1855_v59 }
 0x554   : > { %1923 = vmatpush1.bf16.msra.mxu1 %v1854_v56 }
 0x557   : > { %3442 = vmatmul.mubr.msk.bf16.vlgmr.msra.gmra.mrb[48].mxu1 %vm1297_vm5, %v4030_v26 }
 0x558   : > { %1962 = vmatprep.mubr.bf16.mxu1 %v5592_v4 }
 0x55f   : > { %3443 = vmatmul.mubr.msk.bf16.gmra.mrb[52].mxu1 %vm1297_vm5, %v4031_v36 }
 0x560   : > { %1972 = vmatprep.mubr.bf16.mxu1 %v5592_v4 }
 0x62a   : > { %v1954_v35 = vpop.f32.mrb[48].mxu1 }
 0x62b   : > { %v1955_v38 = vadd.f32 %v1954_v35, %v1858_v3  ;;  %v1956_v5 = vpop.f32.mrb[49].mxu1 }
 0x62c   : > { %v1957_v40 = vadd.f32 %v1956_v5, %v1858_v3  ;;  %v1958_v60 = vpop.f32.mrb[50].mxu1  ;;  %v4379_v3 = vmov 2  }
 0x62d   : > { %v2001_v61 = vadd.f32 %v1955_v38, %v4896_v9  ;;  %v1959_v20 = vadd.f32 %v1958_v60, %v1862_v11  ;;  %v1960_v57 = vpop.f32.mrb[51].mxu1  ;;  %3937 = vset.pattern.permute.xlu0 %v4379_v3  ;;  %3938 = vset.pattern.permute.xlu1 %v4379_v3 }
 0x62e   : > { %v2002_v2 = vadd.f32 %v1957_v40, %v4900_v8  ;;  %v1961_v62 = vadd.f32 %v1960_v57, %v1862_v11 }
 0x62f   : > { %v5075_v19 = vmul.f32 %v2001_v61, %v4889_v18  ;;  %v2003_v39 = vadd.f32 %v1959_v20, %v4904_v16 }
 0x630   : > { %v5079_v17 = vmul.f32 %v2002_v2, %v4891_v21  ;;  %v2004_v44 = vadd.f32 %v1961_v62, %v4909_v22 }
 0x631   : > { %v5083_v46 = vmul.f32 %v2003_v39, %v4889_v18 }
 0x632   : > { %v1964_v9 = vpop.f32.mrb[52].mxu1  ;;  %v3887_v49 = vpack.i.bf16 %v5079_v17, %v5075_v19  ;;  %v5088_v8 = vmul.f32 %v2004_v44, %v4891_v21 }
 0x633   : > { %v1965_v12 = vadd.f32 %v1964_v9, %v1866_v0  ;;  %v1966_v15 = vpop.f32.mrb[53].mxu1  ;;  %v3897_v16 = vpack.i.bf16 %v5083_v46, %v4912_v30  ;;  %v2131_v36 = vpack.c.bf16 %v5083_v46, %v5075_v19 }
 0x634   : > { %v1967_v51 = vadd.f32 %v1966_v15, %v1866_v0  ;;  %v1968_v50 = vpop.f32.mrb[54].mxu1  ;;  %3888 = vrot.lane.b32.xlu0 %v3887_v49, %s4375_s24  ;;  %v3902_v54 = vpack.i.bf16 %v5088_v8, %v5083_v46 }
 0x635   : > { %v2005_v22 = vadd.f32 %v1965_v12, %v4921_v6  ;;  %v1969_v63 = vadd.f32 %v1968_v50, %v1870_v47  ;;  %v1970_v53 = vpop.f32.mrb[55].mxu1  ;;  %3898 = vrot.lane.b32.xlu1 %v3897_v16, %s4378_s16 }
 0x636   : > { %v2006_v58 = vadd.f32 %v1967_v51, %v4927_v23  ;;  %v1971_v52 = vadd.f32 %v1970_v53, %v1870_v47 }
 0x637   : > { %v5097_v55 = vmul.f32 %v2005_v22, %v4889_v18  ;;  %v2007_v30 = vadd.f32 %v1969_v63, %v4932_v10 }
 0x638   : > { %v5103_v45 = vmul.f32 %v2006_v58, %v4891_v21  ;;  %v2008_v6 = vadd.f32 %v1971_v52, %v4936_v33  ;;  %3893 = vrot.lane.b32.xlu0 %v3887_v49, %s4378_s16  ;;  %v3912_v33 = vpack.i.bf16 %v4945_v7, %v5088_v8  ;;  %v2132_v7 = vpack.c.bf16 %v5088_v8, %v5079_v17 }
 0x639   : > { %v5108_v29 = vmul.f32 %v2007_v30, %v4889_v18  ;;  %3903 = vrot.lane.b32.xlu1 %v3902_v54, %s4375_s24 }
 0x63a   : > { %v5112_v23 = vmul.f32 %v2008_v6, %v4891_v21  ;;  %v3907_v10 = vpack.i.bf16 %v5103_v45, %v5097_v55 }
 0x63b   : > { %v3927_v59 = vpack.i.bf16 %v5108_v29, %v4952_v13 }
 0x63c   : > { %3908 = vrot.lane.b32.xlu0 %v3907_v10, %s4375_s24  ;;  %v3917_v56 = vpack.i.bf16 %v5112_v23, %v5108_v29  ;;  %v3932_v26 = vpack.i.bf16 %v4958_v14, %v5112_v23  ;;  %v2135_v13 = vpack.c.bf16 %v5112_v23, %v5103_v45  ;;  %v2134_v14 = vpack.c.bf16 %v5108_v29, %v5097_v55 }
 0x63e   : > { %3918 = vrot.lane.b32.xlu1 %v3917_v56, %s4375_s24  ;;  %s4380_s24 = smov 4  }
 0x640   : > { %3913 = vrot.lane.b32.xlu0 %v3912_v33, %s4378_s16 }
 0x642   : > { %3923 = vrot.lane.b32.xlu1 %v3907_v10, %s4378_s16 }
 0x644   : > { %3928 = vrot.lane.b32.xlu0 %v3927_v59, %s4378_s16 }
 0x646   : > { %3933 = vrot.lane.b32.xlu1 %v3932_v26, %s4378_s16 }
 0x648   : > { %2229 = vrot.lane.b32.xlu0 %v2131_v36, %s4380_s24 }
 0x64a   : > { %2231 = vrot.lane.b32.xlu1 %v2132_v7, %s4380_s24 }
 0x64c   : > { %2227 = vrot.lane.b32.xlu0 %v4591_v31, %s4380_s24 }
 0x64e   : > { %2233 = vrot.lane.b32.xlu1 %v4597_v32, %s4380_s24 }
 0x650   : > { %2237 = vrot.lane.b32.xlu0 %v2135_v13, %s4380_s24 }
 0x652   : > { %2235 = vrot.lane.b32.xlu1 %v2134_v14, %s4380_s24 }
 0x6a6   : > { %v3889_v35 = vpop.permute.xlu0 %3888 }
 0x6a7   : > { %v5148_v38 = vpop.permute.xlu1 %3898  ;;  %v3891_v40 = vunpack.i.h.bf16 %v3889_v35  ;;  %v3890_v60 = vunpack.i.l.bf16 %v3889_v35 }
 0x6a8   : > { %v3901_v63 = vunpack.i.h.bf16 %v5148_v38  ;;  %v3900_v26 = vunpack.i.l.bf16 %v5148_v38 }
 0x6a9   : > { %v2065_v12 = vsel %vm1499_vm6, %v3890_v60, %v3891_v40 }
 0x6aa   : > { %v3894_v5 = vpop.permute.xlu0 %3893 }
 0x6ab   : > { %v3904_v11 = vpop.permute.xlu1 %3903  ;;  %v3896_v15 = vunpack.i.h.bf16 %v3894_v5  ;;  %v3895_v16 = vunpack.i.l.bf16 %v3894_v5 }
 0x6ac   : > { %v3906_v61 = vunpack.i.h.bf16 %v3904_v11  ;;  %v3905_v20 = vunpack.i.l.bf16 %v3904_v11 }
 0x6ad   : > { %v2110_v54 = vsel %vm2109_vm8, %v3895_v16, %v3896_v15  ;;  %v2111_v14 = vsel %vm2109_vm8, %v3896_v15, %v3900_v26  ;;  %v4263_v26 = vld [vmem:[%s5560_s7 + $0x8] sm:$0xff] }
 0x6ae   : > { %v2136_v57 = vpack.c.bf16 %v3905_v20, %v3890_v60  ;;  %v2138_v2 = vpack.c.bf16 %v3906_v61, %v3891_v40  ;;  %v3909_v62 = vpop.permute.xlu0 %3908  ;;  %v2066_v39 = vsel %vm1499_vm6, %v3905_v20, %v3906_v61 }
 0x6af   : > { %v3910_v0 = vunpack.i.l.bf16 %v3909_v62  ;;  %v3911_v47 = vunpack.i.h.bf16 %v3909_v62  ;;  %v2137_v50 = vpack.c.bf16 %v2066_v39, %v2065_v12 }
 0x6b0   : > { %v3919_v44 = vpop.permute.xlu1 %3918  ;;  %2243 = vrot.lane.b32.xlu1 %v2138_v2, %s4380_s24  ;;  %2239 = vrot.lane.b32.xlu0 %v2136_v57, %s4380_s24 }
 0x6b1   : > { %v3921_v9 = vunpack.i.h.bf16 %v3919_v44  ;;  %v3920_v49 = vunpack.i.l.bf16 %v3919_v44  ;;  %v2067_v6 = vsel %vm1499_vm6, %v3910_v0, %v3911_v47 }
 0x6b2   : > { %v3914_v51 = vpop.permute.xlu0 %3913 }
 0x6b3   : > { %v2139_v22 = vpack.c.bf16 %v3920_v49, %v3910_v0  ;;  %v2068_v53 = vsel %vm1499_vm6, %v3920_v49, %v3921_v9  ;;  %v3916_v58 = vunpack.i.h.bf16 %v3914_v51  ;;  %v3915_v52 = vunpack.i.l.bf16 %v3914_v51 }
 0x6b4   : > { %v3924_v30 = vpop.permute.xlu1 %3923  ;;  %2241 = vrot.lane.b32.xlu0 %v2137_v50, %s4380_s24  ;;  %v2140_v33 = vpack.c.bf16 %v2068_v53, %v2067_v6  ;;  %v2141_v60 = vpack.c.bf16 %v3921_v9, %v3911_v47  ;;  %v2142_v0 = vpack.c.bf16 %v3901_v63, %v3895_v16  ;;  %v5207_v6 = vld [vmem:[%s5558_s5 + $0x8] sm:$0xff] }
 0x6b5   : > { %2245 = vrot.lane.b32.xlu1 %v2139_v22, %s4380_s24  ;;  %v2112_v10 = vsel %vm2109_vm8, %v3901_v63, %v3915_v52  ;;  %v2113_v36 = vsel %vm2109_vm8, %v3915_v52, %v3916_v58  ;;  %v3926_v35 = vunpack.i.h.bf16 %v3924_v30  ;;  %v3925_v5 = vunpack.i.l.bf16 %v3924_v30  ;;  %v5183_v63 = vld [vmem:[%s5558_s5 + $0x20] sm:$0xff]  ;;  %v5189_v52 = vld [vmem:[%s5558_s5 + $0x28] sm:$0xff]  ;;  %v5195_v30 = vld [vmem:[%s5558_s5 + $0x38] sm:$0xff] }
 0x6b6   : > { %v3929_v56 = vpop.permute.xlu0 %3928  ;;  %v2143_v59 = vpack.c.bf16 %v2112_v10, %v2110_v54  ;;  %v2144_v61 = vpack.c.bf16 %v2113_v36, %v2111_v14  ;;  %v5201_v54 = vld [vmem:[%s5558_s5 + $0x30] sm:$0xff]  ;;  %v5213_v10 = vld [vmem:[%s5558_s5] sm:$0xff] }
 0x6b7   : > { %v3931_v11 = vunpack.i.h.bf16 %v3929_v56  ;;  %v2114_v62 = vsel %vm2109_vm8, %v3925_v5, %v3926_v35  ;;  %v3930_v39 = vunpack.i.l.bf16 %v3929_v56  ;;  %v5219_v56 = vld [vmem:[%s5558_s5 + $0x18] sm:$0xff]  ;;  %v4264_v36 = vld [vmem:[%s5560_s7 + $0x10] sm:$0xff] }
 0x6b8   : > { %v3934_v7 = vpop.permute.xlu1 %3933  ;;  %2253 = vrot.lane.b32.xlu0 %v2143_v59, %s4380_s24  ;;  %v4262_v59 = vld [vmem:[%s5560_s7] sm:$0xff] }
 0x6b9   : > { %v3935_v13 = vunpack.i.l.bf16 %v3934_v7  ;;  %2247 = vrot.lane.b32.xlu1 %v2140_v33, %s4380_s24  ;;  %v3936_v20 = vunpack.i.h.bf16 %v3934_v7  ;;  %v2115_v47 = vsel %vm2109_vm8, %v3926_v35, %v3930_v39  ;;  %v2145_v51 = vpack.c.bf16 %v3931_v11, %v3925_v5  ;;  %v5225_v33 = vld [vmem:[%s5558_s5 + $0x10] sm:$0xff]  ;;  %v4265_v7 = vld [vmem:[%s5560_s7 + $0x18] sm:$0xff] }
 0x6ba   : > { %v2230_v40 = vpop.permute.xlu0 %2229 }
 0x6bb   : > { %v2116_v38 = vsel %vm2109_vm8, %v3931_v11, %v3935_v13  ;;  %v2117_v12 = vsel %vm2109_vm8, %v3935_v13, %v3936_v20 }
 0x6bc   : > { %v2232_v57 = vpop.permute.xlu1 %2231  ;;  %2249 = vrot.lane.b32.xlu0 %v2141_v60, %s4380_s24  ;;  %v2146_v49 = vpack.c.bf16 %v2116_v38, %v2114_v62  ;;  %v2147_v50 = vpack.c.bf16 %v2117_v12, %v2115_v47  ;;  %v4032_v47 = vld [vmem:[%s5557_s4 + $0x40] sm:$0xff]  }
 0x6bd   : > { %2255 = vrot.lane.b32.xlu1 %v2144_v61, %s4380_s24  ;;  %v2265_v2 = vsel %vm2263_vm9, %v2230_v40, %v2232_v57 }
 0x6be   : > { %2300 = vmatprep.subr.bf16.mxu0 %v2265_v2  ;;  %v2228_v44 = vpop.permute.xlu0 %2227 }
 0x6bf   : > { %v2264_v9 = vsel %vm2263_vm9, %v2228_v44, %v2230_v40 }
 0x6c0   : > { %v2234_v15 = vpop.permute.xlu1 %2233  ;;  %2301 = vmatpush1.bf16.msra.mxu0 %v2264_v9  ;;  %2251 = vrot.lane.b32.xlu0 %v2142_v0, %s4380_s24 }
 0x6c1   : > { %2259 = vrot.lane.b32.xlu1 %v2146_v49, %s4380_s24 }
 0x6c2   : > { %v2238_v22 = vpop.permute.xlu0 %2237 }
 0x6c4   : > { %v2236_v53 = vpop.permute.xlu1 %2235  ;;  %2261 = vrot.lane.b32.xlu0 %v2147_v50, %s4380_s24  ;;  %v4034_v50 = vld [vmem:[%s5557_s4 + $0x50] sm:$0xff]  }
 0x6c5   : > { %v2266_v58 = vsel %vm2263_vm9, %v2234_v15, %v2236_v53  ;;  %2257 = vrot.lane.b32.xlu1 %v2145_v51, %s4380_s24  ;;  %v2267_v16 = vsel %vm2263_vm9, %v2236_v53, %v2238_v22  ;;  %v4033_v51 = vld [vmem:[%s5557_s4 + $0x48] sm:$0xff]   ;;  %v4035_v22 = vld [vmem:[%s5557_s4 + $0x58] sm:$0xff]   ;;  %v4036_v53 = vld [vmem:[%s5559_s6 + $0x30] sm:$0xff]  }
 0x6c6   : > { %2302 = vmatprep.subr.bf16.mxu0 %v2267_v16  ;;  %3444 = vmatmul.mubr.msk.bf16.gmra.mrb[40].mxu1 %vm1297_vm5, %v4036_v53  ;;  %v5593_v53 = vld [vmem:[#allocation9_spill] sm:$0xff] }
 0x6c7   : > { %2303 = vmatpush1.bf16.msra.mxu0 %v2266_v58  ;;  %1982 = vmatprep.mubr.bf16.mxu1 %v5592_v4  ;;  %v4037_v58 = vld [vmem:[%s5559_s6 + $0x38] sm:$0xff]  }
 0x6c8   : > { %2174 = vperm.xlu0 %3937, %v5183_v63  }
 0x6c9   : > { %2178 = vperm.xlu1 %3938, %v5189_v52  }
 0x6cc   : > { %2186 = vperm.xlu0 %3937, %v5195_v30  }
 0x6cd   : > { %2182 = vperm.xlu1 %3938, %v5201_v54  }
 0x6ce   : > { %3445 = vmatmul.mubr.msk.bf16.gmra.mrb[44].mxu1 %vm1297_vm5, %v4037_v58 }
 0x6cf   : > { %2562 = vmatprep.mubr.bf16.mxu1 %v5592_v4 }
 0x6d0   : > { %2162 = vperm.xlu0 %3937, %v5207_v6  }
 0x6d1   : > { %2158 = vperm.xlu1 %3938, %v5213_v10  }
 0x6d4   : > { %2170 = vperm.xlu0 %3937, %v5219_v56  }
 0x6d5   : > { %2166 = vperm.xlu1 %3938, %v5225_v33  }
 0x6d8   : > { %2471 = vperm.xlu0 %3937, %v4263_v26  }
 0x6d9   : > { %2467 = vperm.xlu1 %3938, %v4262_v59  }
 0x6dc   : > { %2479 = vperm.xlu0 %3937, %v4265_v7  }
 0x6dd   : > { %2475 = vperm.xlu1 %3938, %v4264_v36  }
 0x722   : > { %v2244_v13 = vpop.permute.xlu1 %2243  ;;  %v2240_v14 = vpop.permute.xlu0 %2239 }
 0x726   : > { %v2242_v35 = vpop.permute.xlu0 %2241 }
 0x727   : > { %v2268_v5 = vsel %vm2263_vm9, %v2240_v14, %v2242_v35  ;;  %v2246_v11 = vpop.permute.xlu1 %2245  ;;  %v2269_v40 = vsel %vm2263_vm9, %v2242_v35, %v2244_v13 }
 0x728   : > { %2304 = vmatprep.subr.bf16.mxu0 %v2269_v40 }
 0x729   : > { %2305 = vmatpush1.bf16.msra.mxu0 %v2268_v5 }
 0x72a   : > { %v2254_v60 = vpop.permute.xlu0 %2253 }
 0x72b   : > { %v2248_v61 = vpop.permute.xlu1 %2247 }
 0x72c   : > { %v2270_v62 = vsel %vm2263_vm9, %v2246_v11, %v2248_v61 }
 0x72e   : > { %v2250_v20 = vpop.permute.xlu0 %2249 }
 0x72f   : > { %v2256_v38 = vpop.permute.xlu1 %2255  ;;  %v2271_v57 = vsel %vm2263_vm9, %v2248_v61, %v2250_v20 }
 0x730   : > { %v2273_v2 = vsel %vm2263_vm9, %v2254_v60, %v2256_v38  ;;  %2306 = vmatprep.subr.bf16.mxu0 %v2271_v57 }
 0x731   : > { %2307 = vmatpush1.bf16.msra.mxu0 %v2270_v62 }
 0x732   : > { %2308 = vmatprep.subr.bf16.mxu0 %v2273_v2  ;;  %v2252_v39 = vpop.permute.xlu0 %2251 }
 0x733   : > { %v2260_v44 = vpop.permute.xlu1 %2259  ;;  %v2272_v0 = vsel %vm2263_vm9, %v2252_v39, %v2254_v60 }
 0x735   : > { %2309 = vmatpush1.bf16.msra.mxu0 %v2272_v0 }
 0x736   : > { %v2262_v49 = vpop.permute.xlu0 %2261 }
 0x737   : > { %v2258_v9 = vpop.permute.xlu1 %2257  ;;  %v2275_v15 = vsel %vm2263_vm9, %v2260_v44, %v2262_v49 }
 0x738   : > { %v2274_v12 = vsel %vm2263_vm9, %v2258_v9, %v2260_v44  ;;  %2310 = vmatprep.subr.bf16.mxu0 %v2275_v15 }
 0x739   : > { %2311 = vmatpush1.bf16.msra.mxu0 %v2274_v12 }
 0x73c   : > { %3458 = vmatmul.mubr.msk.bf16.vlgmr.msra.gmra.mrb[32].mxu0 %vm1059_vm4, %v4032_v47 }
 0x73d   : > { %2342 = vmatprep.mubr.bf16.mxu0 %v5592_v4 }
 0x744   : > { %3459 = vmatmul.mubr.msk.bf16.gmra.mrb[36].mxu0 %vm1059_vm4, %v4033_v51 }
 0x745   : > { %2352 = vmatprep.mubr.bf16.mxu0 %v5592_v4 }
 0x747   : > { %v2175_v59 = vpop.permute.xlu0 %2174 }
 0x748   : > { %v2179_v16 = vpop.permute.xlu1 %2178 }
 0x74b   : > { %v2187_v36 = vpop.permute.xlu0 %2186 }
 0x74c   : > { %3460 = vmatmul.mubr.msk.bf16.gmra.mrb[40].mxu0 %vm1059_vm4, %v4034_v50  ;;  %v2183_v26 = vpop.permute.xlu1 %2182 }
 0x74d   : > { %2362 = vmatprep.mubr.bf16.mxu0 %v5592_v4 }
 0x74f   : > { %v2163_v13 = vpop.permute.xlu0 %2162 }
 0x750   : > { %v2159_v7 = vpop.permute.xlu1 %2158  ;;  %v3572_v11 = vadd.f32 %v2163_v13, %v4812_v27  ;;  %v3574_v61 = vadd.f32 %v2163_v13, %v4814_v28  ;;  %v5594_v13 = vld [vmem:[#allocation10_spill] sm:$0xff] }
 0x751   : > { %v3568_v14 = vadd.f32 %v2159_v7, %v4808_v24  ;;  %v3570_v35 = vadd.f32 %v2159_v7, %v4810_v25 }
 0x753   : > { %v2171_v44 = vpop.permute.xlu0 %2170 }
 0x754   : > { %3461 = vmatmul.mubr.msk.bf16.gmra.mrb[44].mxu0 %vm1059_vm4, %v4035_v22  ;;  %v2167_v62 = vpop.permute.xlu1 %2166  ;;  %v3580_v25 = vadd.f32 %v2171_v44, %v4833_v43  ;;  %v3582_v12 = vadd.f32 %v2171_v44, %v4835_v42  ;;  %v3588_v43 = vadd.f32 %v2179_v16, %v5593_v53 }
 0x755   : > { %2942 = vmatprep.mubr.bf16.mxu0 %v5592_v4  ;;  %v3576_v0 = vadd.f32 %v2167_v62, %v4829_v37  ;;  %v3578_v24 = vadd.f32 %v2167_v62, %v4831_v41  ;;  %v3584_v37 = vadd.f32 %v2175_v59, %v4837_v34  ;;  %v3586_v41 = vadd.f32 %v2175_v59, %v4839_v48  ;;  %v5595_v62 = vld [vmem:[#allocation11_spill] sm:$0xff]  ;;  %v5596_v59 = vld [vmem:[#allocation12_spill] sm:$0xff] }
 0x756   : > { %v3592_v48 = vadd.f32 %v2183_v26, %v5595_v62  ;;  %v3594_v44 = vadd.f32 %v2183_v26, %v5596_v59 }
 0x80f   : > { %v2334_v5 = vpop.f32.mrb[32].mxu0 }
 0x810   : > { %v3569_v40 = vadd.f32 %v3568_v14, %v2334_v5  ;;  %v2336_v60 = vpop.f32.mrb[33].mxu0  ;;  %v3590_v14 = vadd.f32 %v2179_v16, %v5594_v13 }
 0x811   : > { %v3571_v20 = vadd.f32 %v3570_v35, %v2336_v60  ;;  %v2338_v38 = vpop.f32.mrb[34].mxu0 }
 0x812   : > { %v3573_v57 = vadd.f32 %v3572_v11, %v2338_v38  ;;  %v2340_v2 = vpop.f32.mrb[35].mxu0 }
 0x813   : > { %v3575_v39 = vadd.f32 %v3574_v61, %v2340_v2 }
 0x817   : > { %v2344_v49 = vpop.f32.mrb[36].mxu0 }
 0x818   : > { %v5285_v9 = vadd.f32 %v3576_v0, %v2344_v49  ;;  %v2346_v27 = vpop.f32.mrb[37].mxu0 }
 0x819   : > { %v5288_v28 = vadd.f32 %v3578_v24, %v2346_v27  ;;  %v2348_v15 = vpop.f32.mrb[38].mxu0  ;;  %v5597_v24 = vld [vmem:[#allocation13_spill] sm:$0xff]  ;;  %v5598_v27 = vld [vmem:[#allocation14_spill] sm:$0xff] }
 0x81a   : > { %v5290_v47 = vadd.f32 %v3580_v25, %v2348_v15  ;;  %v2350_v51 = vpop.f32.mrb[39].mxu0  ;;  %v3596_v16 = vadd.f32 %v2187_v36, %v5597_v24 }
 0x81b   : > { %v5292_v50 = vadd.f32 %v3582_v12, %v2350_v51  ;;  %v3598_v12 = vadd.f32 %v2187_v36, %v5598_v27 }
 0x81f   : > { %v2354_v22 = vpop.f32.mrb[40].mxu0 }
 0x820   : > { %v3585_v58 = vadd.f32 %v3584_v37, %v2354_v22  ;;  %v2356_v7 = vpop.f32.mrb[41].mxu0 }
 0x821   : > { %v3587_v42 = vadd.f32 %v3586_v41, %v2356_v7  ;;  %v2358_v35 = vpop.f32.mrb[42].mxu0 }
 0x822   : > { %v3462_v5 = vmul.f32 -1.442695, %v3585_v58  ;;  %v3589_v11 = vadd.f32 %v3588_v43, %v2358_v35  ;;  %v2360_v60 = vpop.f32.mrb[43].mxu0 }
 0x823   : > { %v3463_v61 = vmul.f32 -1.442695, %v3587_v42  ;;  %v3591_v38 = vadd.f32 %v3590_v14, %v2360_v60 }
 0x824   : > { %4146 = vpow2.f32 %v3462_v5  ;;  %v3464_v2 = vmul.f32 -1.442695, %v3589_v11 }
 0x825   : > { %4148 = vpow2.f32 %v3463_v61  ;;  %v3465_v34 = vmul.f32 -1.442695, %v3591_v38 }
 0x826   : > { %4150 = vpow2.f32 %v3464_v2 }
 0x827   : > { %4152 = vpow2.f32 %v3465_v34  ;;  %v2364_v0 = vpop.f32.mrb[44].mxu0 }
 0x828   : > { %v3593_v49 = vadd.f32 %v3592_v48, %v2364_v0  ;;  %v2366_v25 = vpop.f32.mrb[45].mxu0  ;;  %4154 = vtanh.f32 %v3569_v40 }
 0x829   : > { %v3595_v15 = vadd.f32 %v3594_v44, %v2366_v25  ;;  %v2368_v51 = vpop.f32.mrb[46].mxu0  ;;  %4156 = vtanh.f32 %v3571_v20 }
 0x82a   : > { %v3466_v37 = vmul.f32 -1.442695, %v3593_v49  ;;  %v3597_v41 = vadd.f32 %v3596_v16, %v2368_v51  ;;  %v2370_v22 = vpop.f32.mrb[47].mxu0  ;;  %4158 = vtanh.f32 %v3573_v57 }
 0x82b   : > { %v3467_v53 = vmul.f32 -1.442695, %v3595_v15  ;;  %v3599_v43 = vadd.f32 %v3598_v12, %v2370_v22 }
 0x82c   : > { %4160 = vpow2.f32 %v3466_v37  ;;  %v3468_v26 = vmul.f32 -1.442695, %v3597_v41 }
 0x82d   : > { %4162 = vpow2.f32 %v3467_v53  ;;  %v3469_v58 = vmul.f32 -1.442695, %v3599_v43 }
 0x82e   : > { %v4147_v7 = vpop.eup %4146  ;;  %4164 = vpow2.f32 %v3468_v26 }
 0x82f   : > { %v4149_v13 = vpop.eup %4148  ;;  %v2421_v14 = vadd.f32 1.0, %v4147_v7  ;;  %4166 = vpow2.f32 %v3469_v58 }
 0x830   : > { %v4151_v36 = vpop.eup %4150  ;;  %4168 = vtanh.f32 %v3575_v39  ;;  %v2422_v40 = vadd.f32 1.0, %v4149_v13 }
 0x831   : > { %v4153_v42 = vpop.eup %4152  ;;  %4170 = vrcp.f32 %v2421_v14  ;;  %v2423_v20 = vadd.f32 1.0, %v4151_v36  ;;  %v4038_v36 = vld [vmem:[%s5559_s6 + $0x40] sm:$0xff]  }
 0x832   : > { %4172 = vrcp.f32 %v2422_v40  ;;  %v2424_v35 = vadd.f32 1.0, %v4153_v42  ;;  %v4155_v57 = vpop.eup %4154  ;;  %v4039_v40 = vld [vmem:[%s5559_s6 + $0x48] sm:$0xff]   ;;  %v2468_v42 = vpop.permute.xlu1 %2467 }
 0x833   : > { %4174 = vrcp.f32 %v2423_v20  ;;  %v4157_v5 = vpop.eup %4156 }
 0x834   : > { %4176 = vrcp.f32 %v2424_v35  ;;  %v4159_v11 = vpop.eup %4158 }
 0x835   : > { %4178 = vtanh.f32 %v5285_v9 }
 0x836   : > { %v4161_v60 = vpop.eup %4160  ;;  %4180 = vtanh.f32 %v5288_v28 }
 0x837   : > { %v4163_v61 = vpop.eup %4162  ;;  %4182 = vtanh.f32 %v5290_v47  ;;  %v2425_v39 = vadd.f32 1.0, %v4161_v60 }
 0x838   : > { %v4165_v38 = vpop.eup %4164  ;;  %4184 = vtanh.f32 %v5292_v50  ;;  %v2426_v2 = vadd.f32 1.0, %v4163_v61 }
 0x839   : > { %v4167_v34 = vpop.eup %4166  ;;  %4186 = vrcp.f32 %v2425_v39  ;;  %v2427_v62 = vadd.f32 1.0, %v4165_v38 }
 0x83a   : > { %v4169_v48 = vpop.eup %4168  ;;  %4188 = vrcp.f32 %v2426_v2  ;;  %v2428_v59 = vadd.f32 1.0, %v4167_v34 }
 0x83b   : > { %v4171_v44 = vpop.eup %4170  ;;  %4190 = vrcp.f32 %v2427_v62 }
 0x83c   : > { %v4173_v9 = vpop.eup %4172  ;;  %4192 = vrcp.f32 %v2428_v59  ;;  %v2445_v0 = vmul.f32 %v4171_v44, %v4155_v57 }
 0x83d   : > { %v4175_v28 = vpop.eup %4174  ;;  %v2446_v24 = vmul.f32 %v4173_v9, %v4157_v5  ;;  %v2472_v5 = vpop.permute.xlu0 %2471 }
 0x83e   : > { %v4177_v16 = vpop.eup %4176  ;;  %v2447_v47 = vmul.f32 %v4175_v28, %v4159_v11 }
 0x83f   : > { %v4179_v49 = vpop.eup %4178  ;;  %v2448_v25 = vmul.f32 %v4177_v16, %v4169_v48 }
 0x840   : > { %v4181_v27 = vpop.eup %4180  ;;  %v2462_v50 = vpack.c.bf16 %v2447_v47, %v2445_v0  ;;  %v2476_v0 = vpop.permute.xlu1 %2475 }
 0x841   : > { %v4183_v12 = vpop.eup %4182  ;;  %v2463_v15 = vpack.c.bf16 %v2448_v25, %v2446_v24 }
 0x842   : > { %v4185_v51 = vpop.eup %4184 }
 0x843   : > { %v4187_v37 = vpop.eup %4186  ;;  %2530 = vmatprep.subr.bf16.mxu1 %v2463_v15 }
 0x844   : > { %v4189_v41 = vpop.eup %4188  ;;  %2531 = vmatpush1.bf16.msra.mxu1 %v2462_v50  ;;  %v2449_v22 = vmul.f32 %v4187_v37, %v4179_v49  ;;  %v4266_v49 = vld [vmem:[%s4554_s20 + $0x18] sm:$0xff] }
 0x845   : > { %v4191_v53 = vpop.eup %4190  ;;  %v2450_v43 = vmul.f32 %v4189_v41, %v4181_v27  ;;  %v2480_v27 = vpop.permute.xlu0 %2479 }
 0x846   : > { %v4193_v26 = vpop.eup %4192  ;;  %v2451_v58 = vmul.f32 %v4191_v53, %v4183_v12 }
 0x847   : > { %v2452_v7 = vmul.f32 %v4193_v26, %v4185_v51 }
 0x848   : > { %v2464_v13 = vpack.c.bf16 %v2451_v58, %v2449_v22 }
 0x849   : > { %v2465_v14 = vpack.c.bf16 %v2452_v7, %v2450_v43 }
 0x84b   : > { %2532 = vmatprep.subr.bf16.mxu1 %v2465_v14 }
 0x84c   : > { %2533 = vmatpush1.bf16.msra.mxu1 %v2464_v13 }
 0x84f   : > { %3482 = vmatmul.mubr.msk.bf16.vlgmr.msra.gmra.mrb[56].mxu1 %vm1297_vm5, %v4038_v36 }
 0x850   : > { %2572 = vmatprep.mubr.bf16.mxu1 %v5592_v4 }
 0x857   : > { %3483 = vmatmul.mubr.msk.bf16.gmra.mrb[60].mxu1 %vm1297_vm5, %v4039_v40 }
 0x858   : > { %2582 = vmatprep.mubr.bf16.mxu1 %v5592_v4 }
 0x922   : > { %v2564_v20 = vpop.f32.mrb[56].mxu1 }
 0x923   : > { %v2565_v35 = vadd.f32 %v2564_v20, %v2468_v42  ;;  %v2566_v57 = vpop.f32.mrb[57].mxu1  ;;  %v4269_v20 = vld [vmem:[%s4554_s20 + $0x78] sm:$0xff] }
 0x924   : > { %v2567_v11 = vadd.f32 %v2566_v57, %v2468_v42  ;;  %v2568_v60 = vpop.f32.mrb[58].mxu1  ;;  %v4382_v57 = vmov 3  }
 0x925   : > { %v2611_v61 = vadd.f32 %v2565_v35, %v5075_v19  ;;  %v2569_v39 = vadd.f32 %v2568_v60, %v2472_v5  ;;  %v2570_v38 = vpop.f32.mrb[59].mxu1  ;;  %3989 = vset.pattern.permute.xlu1 %v4382_v57  ;;  %3990 = vset.pattern.permute.xlu0 %v4382_v57 }
 0x926   : > { %v2612_v2 = vadd.f32 %v2567_v11, %v5079_v17  ;;  %v2571_v34 = vadd.f32 %v2570_v38, %v2472_v5 }
 0x927   : > { %v2619_v62 = vmul.f32 %v2611_v61, %v4889_v18  ;;  %v2613_v48 = vadd.f32 %v2569_v39, %v5083_v46 }
 0x928   : > { %v2620_v59 = vmul.f32 %v2612_v2, %v4891_v21  ;;  %v2614_v44 = vadd.f32 %v2571_v34, %v5088_v8 }
 0x929   : > { %v2621_v9 = vmul.f32 %v2613_v48, %v4889_v18 }
 0x92a   : > { %v2622_v28 = vmul.f32 %v2614_v44, %v4891_v21  ;;  %v2574_v19 = vpop.f32.mrb[60].mxu1  ;;  %v3939_v24 = vpack.i.bf16 %v2620_v59, %v2619_v62 }
 0x92b   : > { %v2575_v16 = vadd.f32 %v2574_v19, %v2476_v0  ;;  %v2576_v47 = vpop.f32.mrb[61].mxu1  ;;  %v3949_v17 = vpack.i.bf16 %v2621_v9, %v4266_v49  ;;  %v2741_v25 = vpack.c.bf16 %v2621_v9, %v2619_v62 }
 0x92c   : > { %v2577_v50 = vadd.f32 %v2576_v47, %v2476_v0  ;;  %v2578_v12 = vpop.f32.mrb[62].mxu1  ;;  %3940 = vrot.lane.b32.xlu1 %v3939_v24, %s4378_s16  ;;  %v3954_v46 = vpack.i.bf16 %v2622_v28, %v2621_v9  ;;  %v2742_v15 = vpack.c.bf16 %v2622_v28, %v2620_v59 }
 0x92d   : > { %v2615_v8 = vadd.f32 %v2575_v16, %v5097_v55  ;;  %v2579_v51 = vadd.f32 %v2578_v12, %v2480_v27  ;;  %v2580_v37 = vpop.f32.mrb[63].mxu1  ;;  %3950 = vrot.lane.b32.xlu0 %v3949_v17, %s4381_s13 }
 0x92e   : > { %v2616_v41 = vadd.f32 %v2577_v50, %v5103_v45  ;;  %v2581_v22 = vadd.f32 %v2580_v37, %v2480_v27 }
 0x92f   : > { %v2623_v53 = vmul.f32 %v2615_v8, %v4889_v18  ;;  %v2617_v43 = vadd.f32 %v2579_v51, %v5108_v29  ;;  %v4267_v29 = vld [vmem:[%s4554_s20 + $0x38] sm:$0xff] }
 0x930   : > { %v2624_v26 = vmul.f32 %v2616_v41, %v4891_v21  ;;  %v2618_v58 = vadd.f32 %v2581_v22, %v5112_v23  ;;  %3945 = vrot.lane.b32.xlu1 %v3939_v24, %s4381_s13  ;;  %v3964_v40 = vpack.i.bf16 %v4267_v29, %v2622_v28  ;;  %v4268_v23 = vld [vmem:[%s4554_s20 + $0x58] sm:$0xff]  ;;  %s4384_s20 = smov [#allocation6]  }
 0x931   : > { %v2625_v55 = vmul.f32 %v2617_v43, %v4889_v18  ;;  %3955 = vrot.lane.b32.xlu0 %v3954_v46, %s4378_s16 }
 0x932   : > { %v2626_v7 = vmul.f32 %v2618_v58, %v4891_v21  ;;  %v3959_v45 = vpack.i.bf16 %v2624_v26, %v2623_v53 }
 0x933   : > { %v2744_v13 = vpack.c.bf16 %v2625_v55, %v2623_v53  ;;  %v3979_v42 = vpack.i.bf16 %v2625_v55, %v4268_v23 }
 0x934   : > { %3960 = vrot.lane.b32.xlu1 %v3959_v45, %s4378_s16  ;;  %v3969_v14 = vpack.i.bf16 %v2626_v7, %v2625_v55  ;;  %v2745_v36 = vpack.c.bf16 %v2626_v7, %v2624_v26  ;;  %v3984_v35 = vpack.i.bf16 %v4269_v20, %v2626_v7 }
 0x936   : > { %3970 = vrot.lane.b32.xlu0 %v3969_v14, %s4378_s16  ;;  %s4304_s16 = sshll.u32 %s4384_s20, 4  ;;  %s4305_s16 = int_to_ptr.vmem [resolvable:$false] %s4304_s16 }
 0x937   : > { %s4306_s15 = scalar_lea.vmem %s4305_s16, 2048  ;;  %p4307_p10 = scmp.lt.s32.totalorder %s5501_s23, %s4305_s16 }
 0x938   : > { %3965 = vrot.lane.b32.xlu1 %v3964_v40, %s4381_s13 }
 0x93a   : > { %3975 = vrot.lane.b32.xlu0 %v3959_v45, %s4381_s13 }
 0x93c   : > { %3980 = vrot.lane.b32.xlu1 %v3979_v42, %s4381_s13 }
 0x93e   : > { %3985 = vrot.lane.b32.xlu0 %v3984_v35, %s4381_s13  ;;  %s3226_s13 = scalar_lea.sflag [#allocation5], %s4536_s22 }
 0x940   : > { %2839 = vrot.lane.b32.xlu1 %v2741_v25, %s4383_s21 }
 0x942   : > { %2841 = vrot.lane.b32.xlu0 %v2742_v15, %s4383_s21 }
 0x944   : > { %2837 = vrot.lane.b32.xlu1 %v4591_v31, %s4383_s21 }
 0x946   : > { %2843 = vrot.lane.b32.xlu0 %v4597_v32, %s4383_s21 }
 0x948   : > { %2847 = vrot.lane.b32.xlu1 %v2745_v36, %s4383_s21 }
 0x94a   : > { %2845 = vrot.lane.b32.xlu0 %v2744_v13, %s4383_s21 }
 0x99e   : > { %v3941_v5 = vpop.permute.xlu1 %3940 }
 0x99f   : > { %v5350_v11 = vpop.permute.xlu0 %3950  ;;  %v3943_v39 = vunpack.i.h.bf16 %v3941_v5  ;;  %v3942_v38 = vunpack.i.l.bf16 %v3941_v5 }
 0x9a0   : > { %v3953_v25 = vunpack.i.h.bf16 %v5350_v11  ;;  %v3952_v53 = vunpack.i.l.bf16 %v5350_v11 }
 0x9a1   : > { %v2675_v32 = vsel %vm2109_vm8, %v3942_v38, %v3943_v39 }
 0x9a2   : > { %v3946_v60 = vpop.permute.xlu1 %3945 }
 0x9a3   : > { %v3956_v61 = vpop.permute.xlu0 %3955  ;;  %v3948_v19 = vunpack.i.h.bf16 %v3946_v60  ;;  %v3947_v24 = vunpack.i.l.bf16 %v3946_v60 }
 0x9a4   : > { %v3958_v2 = vunpack.i.h.bf16 %v3956_v61  ;;  %v3957_v34 = vunpack.i.l.bf16 %v3956_v61 }
 0x9a5   : > { %v2720_v15 = vsel %vm2719_vm10, %v3947_v24, %v3948_v19  ;;  %v2721_v55 = vsel %vm2719_vm10, %v3948_v19, %v3952_v53  ;;  %v2752_v60 = vpack.c.bf16 %v3953_v25, %v3947_v24  ;;  %v420_v53 = vld [vmem:[%s5560_s7 + $0x30] sm:$0xff] }
 0x9a6   : > { %v2748_v62 = vpack.c.bf16 %v3958_v2, %v3943_v39  ;;  %v2746_v48 = vpack.c.bf16 %v3957_v34, %v3942_v38  ;;  %v3961_v59 = vpop.permute.xlu1 %3960  ;;  %v2676_v31 = vsel %vm2109_vm8, %v3957_v34, %v3958_v2 }
 0x9a7   : > { %v3962_v9 = vunpack.i.l.bf16 %v3961_v59  ;;  %v2747_v16 = vpack.c.bf16 %v2676_v31, %v2675_v32  ;;  %v3963_v47 = vunpack.i.h.bf16 %v3961_v59 }
 0x9a8   : > { %v3971_v44 = vpop.permute.xlu0 %3970  ;;  %2853 = vrot.lane.b32.xlu0 %v2748_v62, %s4383_s21  ;;  %2849 = vrot.lane.b32.xlu1 %v2746_v48, %s4383_s21 }
 0x9a9   : > { %v3973_v0 = vunpack.i.h.bf16 %v3971_v44  ;;  %v3972_v28 = vunpack.i.l.bf16 %v3971_v44  ;;  %v2677_v8 = vsel %vm2109_vm8, %v3962_v9, %v3963_v47 }
 0x9aa   : > { %v3966_v49 = vpop.permute.xlu1 %3965 }
 0x9ab   : > { %v2749_v17 = vpack.c.bf16 %v3972_v28, %v3962_v9  ;;  %v2678_v27 = vsel %vm2109_vm8, %v3972_v28, %v3973_v0  ;;  %v3968_v50 = vunpack.i.h.bf16 %v3966_v49  ;;  %v3967_v12 = vunpack.i.l.bf16 %v3966_v49 }
 0x9ac   : > { %v3976_v46 = vpop.permute.xlu0 %3975  ;;  %2851 = vrot.lane.b32.xlu1 %v2747_v16, %s4383_s21  ;;  %v2750_v41 = vpack.c.bf16 %v2678_v27, %v2677_v8  ;;  %v2751_v36 = vpack.c.bf16 %v3973_v0, %v3963_v47  ;;  %v4043_v8 = vld [vmem:[%s5557_s4 + $0x78] sm:$0xff]  }
 0x9ad   : > { %2855 = vrot.lane.b32.xlu0 %v2749_v17, %s4383_s21  ;;  %v2722_v51 = vsel %vm2719_vm10, %v3953_v25, %v3967_v12  ;;  %v2723_v43 = vsel %vm2719_vm10, %v3967_v12, %v3968_v50  ;;  %v3978_v7 = vunpack.i.h.bf16 %v3976_v46  ;;  %v3977_v45 = vunpack.i.l.bf16 %v3976_v46  ;;  %v4040_v12 = vld [vmem:[%s5557_s4 + $0x60] sm:$0xff]   ;;  %v4041_v46 = vld [vmem:[%s5557_s4 + $0x68] sm:$0xff]  }
 0x9ae   : > { %v3981_v37 = vpop.permute.xlu1 %3980  ;;  %v2753_v22 = vpack.c.bf16 %v2722_v51, %v2720_v15  ;;  %v2754_v29 = vpack.c.bf16 %v2723_v43, %v2721_v55  ;;  %v4042_v15 = vld [vmem:[%s5557_s4 + $0x70] sm:$0xff]   ;;  %v421_v43 = vld [vmem:[%s5560_s7 + $0x38] sm:$0xff] }
 0x9af   : > { %v3983_v13 = vunpack.i.h.bf16 %v3981_v37  ;;  %v2724_v35 = vsel %vm2719_vm10, %v3977_v45, %v3978_v7  ;;  %v3982_v5 = vunpack.i.l.bf16 %v3981_v37  ;;  %v4044_v51 = vld [vmem:[%s5559_s6 + $0x50] sm:$0xff]   ;;  %v4045_v37 = vld [vmem:[%s5559_s6 + $0x58] sm:$0xff]  }
 0x9b0   : > { %v3986_v26 = vpop.permute.xlu0 %3985  ;;  %2863 = vrot.lane.b32.xlu1 %v2753_v22, %s4383_s21  ;;  %3484 = vmatmul.mubr.msk.bf16.gmra.mrb[40].mxu1 %vm1297_vm5, %v4044_v51  ;;  %v418_v22 = vld [vmem:[%s5560_s7 + $0x20] sm:$0xff] }
 0x9b1   : > { %v3987_v58 = vunpack.i.l.bf16 %v3986_v26  ;;  %2857 = vrot.lane.b32.xlu0 %v2750_v41, %s4383_s21  ;;  %v3988_v40 = vunpack.i.h.bf16 %v3986_v26  ;;  %v2725_v34 = vsel %vm2719_vm10, %v3978_v7, %v3982_v5  ;;  %v2755_v62 = vpack.c.bf16 %v3983_v13, %v3977_v45  ;;  %2592 = vmatprep.mubr.bf16.mxu1 %v5592_v4  ;;  %v419_v41 = vld [vmem:[%s5560_s7 + $0x28] sm:$0xff] }
 0x9b2   : > { %v2840_v14 = vpop.permute.xlu1 %2839 }
 0x9b3   : > { %v2726_v23 = vsel %vm2719_vm10, %v3983_v13, %v3987_v58  ;;  %v2727_v38 = vsel %vm2719_vm10, %v3987_v58, %v3988_v40  ;;  %v5599_v13 = vld [vmem:[#allocation15_spill] sm:$0xff] }
 0x9b4   : > { %v2842_v42 = vpop.permute.xlu0 %2841  ;;  %2859 = vrot.lane.b32.xlu1 %v2751_v36, %s4383_s21  ;;  %v2756_v61 = vpack.c.bf16 %v2726_v23, %v2724_v35  ;;  %v2757_v48 = vpack.c.bf16 %v2727_v38, %v2725_v34  ;;  %v5600_v36 = vld [vmem:[#allocation16_spill] sm:$0xff]  ;;  %v5602_v35 = vld [vmem:[#allocation18_spill] sm:$0xff]  ;;  %v5603_v34 = vld [vmem:[#allocation19_spill] sm:$0xff] }
 0x9b5   : > { %2865 = vrot.lane.b32.xlu0 %v2754_v29, %s4383_s21  ;;  %v2875_v20 = vsel %vm2873_vm11, %v2840_v14, %v2842_v42 }
 0x9b6   : > { %v2838_v11 = vpop.permute.xlu1 %2837  ;;  %2910 = vmatprep.subr.bf16.mxu0 %v2875_v20 }
 0x9b7   : > { %v2874_v39 = vsel %vm2873_vm11, %v2838_v11, %v2840_v14 }
 0x9b8   : > { %2911 = vmatpush1.bf16.msra.mxu0 %v2874_v39  ;;  %v2844_v2 = vpop.permute.xlu0 %2843  ;;  %2861 = vrot.lane.b32.xlu1 %v2752_v60, %s4383_s21 }
 0x9b9   : > { %2869 = vrot.lane.b32.xlu0 %v2756_v61, %s4383_s21  ;;  %3485 = vmatmul.mubr.msk.bf16.gmra.mrb[44].mxu1 %vm1297_vm5, %v4045_v37 }
 0x9ba   : > { %v2848_v59 = vpop.permute.xlu1 %2847  ;;  %3168 = vmatprep.mubr.bf16.mxu1 %v5592_v4 }
 0x9bc   : > { %v2846_v31 = vpop.permute.xlu0 %2845  ;;  %2871 = vrot.lane.b32.xlu1 %v2757_v48, %s4383_s21  ;;  %v5604_v48 = vld [vmem:[#allocation20_spill] sm:$0xff] }
 0x9bd   : > { %v2876_v44 = vsel %vm2873_vm11, %v2844_v2, %v2846_v31  ;;  %2867 = vrot.lane.b32.xlu0 %v2755_v62, %s4383_s21  ;;  %v2877_v32 = vsel %vm2873_vm11, %v2846_v31, %v2848_v59  ;;  %s4300_s21 = scalar_lea.vmem %s5501_s23, 1024 }
 0x9be   : > { %2912 = vmatprep.subr.bf16.mxu0 %v2877_v32  ;;  %p4301_p6 = scmp.ne.s32.totalorder %s5501_s23, %s4300_s21  ;;  %p4308_p0 = scmp.lt.s32.totalorder %s4306_s15, %s4300_s21 }
 0x9bf   : > { %2913 = vmatpush1.bf16.msra.mxu0 %v2876_v44  ;;  %v5605_v44 = vld [vmem:[#allocation21_spill] sm:$0xff] }
 0x9c0   : > { %2784 = vperm.xlu1 %3989, %v5183_v63   ;;  %p4302_p13 = pnand %p4301_p6, %p5615_p12  ;;  %p4309_p2 = por %p4308_p0, %p4307_p10 }
 0x9c1   : > { %2788 = vperm.xlu0 %3990, %v5189_v52  }
 0x9c2   : > { %p4303_p8 = pneg %p4302_p13 }
 0x9c4   : > { %2792 = vperm.xlu1 %3989, %v5201_v54   ;;  %p4310_p4 = pnand %p4309_p2, %p4303_p8 }
 0x9c5   : > { %2768 = vperm.xlu0 %3990, %v5213_v10  }
 0x9c8   : > { %2796 = vperm.xlu1 %3989, %v5195_v30  }
 0x9c9   : > { %2776 = vperm.xlu0 %3990, %v5225_v33  }
 0x9cc   : > { %2772 = vperm.xlu1 %3989, %v5207_v6  }
 0x9cd   : > { %3991 = vset.pattern.permute.xlu0 %v5592_v4 }
 0x9ce   : > { %1259 = vperm.xlu0 %3991, %v418_v22  }
 0x9d0   : > { %2780 = vperm.xlu1 %3989, %v5219_v56  }
 0x9d2   : > { %1274 = vperm.xlu0 %3991, %v421_v43  }
 0x9d4   : > { %3992 = vset.pattern.permute.xlu1 %v5592_v4 }
 0x9d5   : > { %1264 = vperm.xlu1 %3992, %v419_v41  }
 0x9d6   : > { %3994 = vset.pattern.permute.xlu0 %v4377_v1 }
 0x9d7   : > { %1877 = vperm.xlu0 %3994, %v419_v41  }
 0x9d9   : > { %1269 = vperm.xlu1 %3992, %v420_v53  }
 0x9db   : > { %3995 = vset.pattern.permute.xlu0 %v4379_v3 }
 0x9dc   : > { %2483 = vperm.xlu0 %3995, %v418_v22  }
 0x9dd   : > { %3993 = vset.pattern.permute.xlu1 %v4377_v1 }
 0x9de   : > { %1873 = vperm.xlu1 %3993, %v418_v22  }
 0x9e0   : > { %2495 = vperm.xlu0 %3995, %v421_v43  }
 0x9e2   : > { %1881 = vperm.xlu1 %3993, %v420_v53  }
 0x9e4   : > { %3998 = vset.pattern.permute.xlu0 %v4382_v57 }
 0x9e5   : > { %3093 = vperm.xlu0 %3998, %v419_v41  }
 0x9e6   : > { %1885 = vperm.xlu1 %3993, %v421_v43  }
 0x9ea   : > { %3996 = vset.pattern.permute.xlu1 %v4379_v3  ;;  %v5601_v3 = vld [vmem:[#allocation17_spill] sm:$0xff] }
 0x9eb   : > { %2487 = vperm.xlu1 %3996, %v419_v41  }
 0x9ef   : > { %2491 = vperm.xlu1 %3996, %v420_v53  }
 0x9f3   : > { %3997 = vset.pattern.permute.xlu1 %v4382_v57 }
 0x9f4   : > { %3089 = vperm.xlu1 %3997, %v418_v22  }
 0x9f8   : > { %3097 = vperm.xlu1 %3997, %v420_v53  }
 0x9fc   : > { %3101 = vperm.xlu1 %3997, %v421_v43   ;;  %v5611_v43 = vld [vmem:[#allocation27_spill] sm:$0xff] }
 0xa1a   : > { %v2854_v9 = vpop.permute.xlu0 %2853  ;;  %v2850_v63 = vpop.permute.xlu1 %2849 }
 0xa1e   : > { %v2852_v0 = vpop.permute.xlu1 %2851 }
 0xa1f   : > { %v2878_v52 = vsel %vm2873_vm11, %v2850_v63, %v2852_v0  ;;  %v2856_v54 = vpop.permute.xlu0 %2855  ;;  %v2879_v10 = vsel %vm2873_vm11, %v2852_v0, %v2854_v9  ;;  %v5606_v0 = vld [vmem:[#allocation22_spill] sm:$0xff] }
 0xa20   : > { %2914 = vmatprep.subr.bf16.mxu0 %v2879_v10 }
 0xa21   : > { %2915 = vmatpush1.bf16.msra.mxu0 %v2878_v52 }
 0xa22   : > { %v2864_v30 = vpop.permute.xlu1 %2863 }
 0xa23   : > { %v2858_v33 = vpop.permute.xlu0 %2857 }
 0xa24   : > { %v2880_v24 = vsel %vm2873_vm11, %v2856_v54, %v2858_v33 }
 0xa26   : > { %v2860_v28 = vpop.permute.xlu1 %2859 }
 0xa27   : > { %v2866_v6 = vpop.permute.xlu0 %2865  ;;  %v2881_v19 = vsel %vm2873_vm11, %v2858_v33, %v2860_v28 }
 0xa28   : > { %v2883_v56 = vsel %vm2873_vm11, %v2864_v30, %v2866_v6  ;;  %2916 = vmatprep.subr.bf16.mxu0 %v2881_v19  ;;  %v5607_v6 = vld [vmem:[#allocation23_spill] sm:$0xff] }
 0xa29   : > { %2917 = vmatpush1.bf16.msra.mxu0 %v2880_v24 }
 0xa2a   : > { %v2862_v16 = vpop.permute.xlu1 %2861  ;;  %2918 = vmatprep.subr.bf16.mxu0 %v2883_v56  ;;  %v5608_v56 = vld [vmem:[#allocation24_spill] sm:$0xff] }
 0xa2b   : > { %v2870_v47 = vpop.permute.xlu0 %2869  ;;  %v2882_v49 = vsel %vm2873_vm11, %v2862_v16, %v2864_v30 }
 0xa2d   : > { %2919 = vmatpush1.bf16.msra.mxu0 %v2882_v49 }
 0xa2e   : > { %v2872_v17 = vpop.permute.xlu1 %2871 }
 0xa2f   : > { %v2868_v25 = vpop.permute.xlu0 %2867  ;;  %v2885_v50 = vsel %vm2873_vm11, %v2870_v47, %v2872_v17 }
 0xa30   : > { %v2884_v27 = vsel %vm2873_vm11, %v2868_v25, %v2870_v47  ;;  %2920 = vmatprep.subr.bf16.mxu0 %v2885_v50  ;;  %v5609_v47 = vld [vmem:[#allocation25_spill] sm:$0xff] }
 0xa31   : > { %2921 = vmatpush1.bf16.msra.mxu0 %v2884_v27  ;;  %v5610_v27 = vld [vmem:[#allocation26_spill] sm:$0xff] }
 0xa34   : > { %3498 = vmatmul.mubr.msk.bf16.vlgmr.msra.gmra.mrb[48].mxu0 %vm1059_vm4, %v4040_v12 }
 0xa35   : > { %2952 = vmatprep.mubr.bf16.mxu0 %v5592_v4 }
 0xa3c   : > { %3499 = vmatmul.mubr.msk.bf16.gmra.mrb[52].mxu0 %vm1059_vm4, %v4041_v46 }
 0xa3d   : > { %2962 = vmatprep.mubr.bf16.mxu0 %v5592_v4 }
 0xa3f   : > { %v2785_v26 = vpop.permute.xlu1 %2784 }
 0xa40   : > { %v2789_v55 = vpop.permute.xlu0 %2788  ;;  %v3616_v19 = vadd.f32 %v2785_v26, %v5607_v6  ;;  %v3618_v24 = vadd.f32 %v2785_v26, %v5608_v56 }
 0xa41   : > { %v3620_v49 = vadd.f32 %v2789_v55, %v5609_v47  ;;  %v3622_v50 = vadd.f32 %v2789_v55, %v5610_v27 }
 0xa43   : > { %v2793_v58 = vpop.permute.xlu1 %2792 }
 0xa44   : > { %3500 = vmatmul.mubr.msk.bf16.gmra.mrb[56].mxu0 %vm1059_vm4, %v4042_v15  ;;  %v2769_v7 = vpop.permute.xlu0 %2768  ;;  %v3624_v26 = vadd.f32 %v2793_v58, %v5611_v43 }
 0xa45   : > { %2972 = vmatprep.mubr.bf16.mxu0 %v5592_v4  ;;  %v3600_v14 = vadd.f32 %v2769_v7, %v5599_v13  ;;  %v3602_v29 = vadd.f32 %v2769_v7, %v5600_v36  ;;  %v5612_v7 = vld [vmem:[#allocation28_spill] sm:$0xff] }
 0xa47   : > { %v2797_v1 = vpop.permute.xlu1 %2796 }
 0xa48   : > { %v2777_v39 = vpop.permute.xlu0 %2776 }
 0xa49   : > { %v3608_v62 = vadd.f32 %v2777_v39, %v5603_v34  ;;  %v3610_v59 = vadd.f32 %v2777_v39, %v5604_v48 }
 0xa4b   : > { %v2773_v45 = vpop.permute.xlu1 %2772 }
 0xa4c   : > { %3501 = vmatmul.mubr.msk.bf16.gmra.mrb[60].mxu0 %vm1059_vm4, %v4043_v8  ;;  %v3604_v23 = vadd.f32 %v2773_v45, %v5601_v3  ;;  %v3606_v5 = vadd.f32 %v2773_v45, %v5602_v35  ;;  %v3626_v45 = vadd.f32 %v2793_v58, %v5612_v7 }
 0xa4f   : > { %v2781_v2 = vpop.permute.xlu1 %2780 }
 0xa50   : > { %v3612_v32 = vadd.f32 %v2781_v2, %v5605_v44  ;;  %v3614_v52 = vadd.f32 %v2781_v2, %v5606_v0 }
 0xb07   : > { %v2944_v40 = vpop.f32.mrb[48].mxu0 }
 0xb08   : > { %v3601_v42 = vadd.f32 %v3600_v14, %v2944_v40  ;;  %v2946_v20 = vpop.f32.mrb[49].mxu0  ;;  %v5613_v14 = vld [vmem:[#allocation29_spill] sm:$0xff]  ;;  %v5614_v40 = vld [vmem:[#allocation30_spill] sm:$0xff] }
 0xb09   : > { %v3603_v11 = vadd.f32 %v3602_v29, %v2946_v20  ;;  %v2948_v60 = vpop.f32.mrb[50].mxu0  ;;  %v3628_v55 = vadd.f32 %v2797_v1, %v5613_v14  ;;  %v3630_v3 = vadd.f32 %v2797_v1, %v5614_v40  ;;  %v4048_v14 = vld [vmem:[%s5559_s6 + $0x70] sm:$0xff]  }
 0xb0a   : > { %v3605_v57 = vadd.f32 %v3604_v23, %v2948_v60  ;;  %v2950_v61 = vpop.f32.mrb[51].mxu0 }
 0xb0b   : > { %v3607_v38 = vadd.f32 %v3606_v5, %v2950_v61 }
 0xb0f   : > { %v2954_v31 = vpop.f32.mrb[52].mxu0 }
 0xb10   : > { %v5454_v9 = vadd.f32 %v3608_v62, %v2954_v31  ;;  %v2956_v63 = vpop.f32.mrb[53].mxu0 }
 0xb11   : > { %v5457_v54 = vadd.f32 %v3610_v59, %v2956_v63  ;;  %v2958_v10 = vpop.f32.mrb[54].mxu0 }
 0xb12   : > { %v5459_v30 = vadd.f32 %v3612_v32, %v2958_v10  ;;  %v2960_v33 = vpop.f32.mrb[55].mxu0 }
 0xb13   : > { %v5461_v28 = vadd.f32 %v3614_v52, %v2960_v33 }
 0xb17   : > { %v2964_v16 = vpop.f32.mrb[56].mxu0 }
 0xb18   : > { %v3617_v17 = vadd.f32 %v3616_v19, %v2964_v16  ;;  %v2966_v25 = vpop.f32.mrb[57].mxu0 }
 0xb19   : > { %v3619_v12 = vadd.f32 %v3618_v24, %v2966_v25  ;;  %v2968_v46 = vpop.f32.mrb[58].mxu0 }
 0xb1a   : > { %v3502_v15 = vmul.f32 -1.442695, %v3617_v17  ;;  %v3621_v8 = vadd.f32 %v3620_v49, %v2968_v46  ;;  %v2970_v51 = vpop.f32.mrb[59].mxu0 }
 0xb1b   : > { %v3503_v37 = vmul.f32 -1.442695, %v3619_v12  ;;  %v3623_v41 = vadd.f32 %v3622_v50, %v2970_v51 }
 0xb1c   : > { %4194 = vpow2.f32 %v3502_v15  ;;  %v3504_v22 = vmul.f32 -1.442695, %v3621_v8 }
 0xb1d   : > { %4196 = vpow2.f32 %v3503_v37  ;;  %v3505_v53 = vmul.f32 -1.442695, %v3623_v41 }
 0xb1e   : > { %4198 = vpow2.f32 %v3504_v22 }
 0xb1f   : > { %4200 = vpow2.f32 %v3505_v53  ;;  %v2974_v13 = vpop.f32.mrb[60].mxu0 }
 0xb20   : > { %v3625_v36 = vadd.f32 %v3624_v26, %v2974_v13  ;;  %v2976_v29 = vpop.f32.mrb[61].mxu0  ;;  %4202 = vtanh.f32 %v3601_v42  ;;  %v4047_v13 = vld [vmem:[%s5559_s6 + $0x68] sm:$0xff]  }
 0xb21   : > { %v3627_v23 = vadd.f32 %v3626_v45, %v2976_v29  ;;  %v2978_v20 = vpop.f32.mrb[62].mxu0  ;;  %4204 = vtanh.f32 %v3603_v11  ;;  %v4046_v45 = vld [vmem:[%s5559_s6 + $0x60] sm:$0xff]  }
 0xb22   : > { %v3506_v35 = vmul.f32 -1.442695, %v3625_v36  ;;  %v3629_v5 = vadd.f32 %v3628_v55, %v2978_v20  ;;  %v2980_v60 = vpop.f32.mrb[63].mxu0  ;;  %4206 = vtanh.f32 %v3605_v57  ;;  %v4049_v55 = vld [vmem:[%s5559_s6 + $0x78] sm:$0xff]   ;;  %v1265_v36 = vpop.permute.xlu1 %1264 }
 0xb23   : > { %v3507_v61 = vmul.f32 -1.442695, %v3627_v23  ;;  %v3631_v39 = vadd.f32 %v3630_v3, %v2980_v60  ;;  %v1260_v3 = vpop.permute.xlu0 %1259 }
 0xb24   : > { %4208 = vpow2.f32 %v3506_v35  ;;  %v3508_v58 = vmul.f32 -1.442695, %v3629_v5 }
 0xb25   : > { %4210 = vpow2.f32 %v3507_v61  ;;  %v3509_v2 = vmul.f32 -1.442695, %v3631_v39 }
 0xb26   : > { %v4195_v34 = vpop.eup %4194  ;;  %4212 = vpow2.f32 %v3508_v58  ;;  %v1270_v29 = vpop.permute.xlu1 %1269 }
 0xb27   : > { %v4197_v62 = vpop.eup %4196  ;;  %v3031_v48 = vadd.f32 1.0, %v4195_v34  ;;  %4214 = vpow2.f32 %v3509_v2  ;;  %v1275_v20 = vpop.permute.xlu0 %1274 }
 0xb28   : > { %v4199_v1 = vpop.eup %4198  ;;  %4216 = vtanh.f32 %v3607_v38  ;;  %v3032_v42 = vadd.f32 1.0, %v4197_v62 }
 0xb29   : > { %v4201_v59 = vpop.eup %4200  ;;  %4218 = vrcp.f32 %v3031_v48  ;;  %v3033_v11 = vadd.f32 1.0, %v4199_v1 }
 0xb2a   : > { %4220 = vrcp.f32 %v3032_v42  ;;  %v3034_v31 = vadd.f32 1.0, %v4201_v59  ;;  %v4203_v57 = vpop.eup %4202  ;;  %v1874_v40 = vpop.permute.xlu1 %1873 }
 0xb2b   : > { %4222 = vrcp.f32 %v3033_v11  ;;  %v4205_v44 = vpop.eup %4204  ;;  %v1878_v5 = vpop.permute.xlu0 %1877  ;;  %v3632_v62 = vadd.f32 %v1874_v40, %v1260_v3 }
 0xb2c   : > { %4224 = vrcp.f32 %v3034_v31  ;;  %v4207_v32 = vpop.eup %4206  ;;  %v3640_v42 = vadd.f32 %v1878_v5, %v1265_v36 }
 0xb2d   : > { %4226 = vtanh.f32 %v5454_v9 }
 0xb2e   : > { %v4209_v63 = vpop.eup %4208  ;;  %4228 = vtanh.f32 %v5457_v54  ;;  %v1882_v23 = vpop.permute.xlu1 %1881 }
 0xb2f   : > { %v4211_v0 = vpop.eup %4210  ;;  %4230 = vtanh.f32 %v5459_v30  ;;  %v3035_v38 = vadd.f32 1.0, %v4209_v63  ;;  %v2484_v58 = vpop.permute.xlu0 %2483 }
 0xb30   : > { %v4213_v52 = vpop.eup %4212  ;;  %4232 = vtanh.f32 %v5461_v28  ;;  %v3036_v10 = vadd.f32 1.0, %v4211_v0  ;;  %v3633_v31 = vadd.f32 %v3632_v62, %v2484_v58  ;;  %v3648_v0 = vadd.f32 %v1882_v23, %v1270_v29 }
 0xb31   : > { %v4215_v33 = vpop.eup %4214  ;;  %4234 = vrcp.f32 %v3035_v38  ;;  %v3037_v6 = vadd.f32 1.0, %v4213_v52 }
 0xb32   : > { %v4217_v19 = vpop.eup %4216  ;;  %4236 = vrcp.f32 %v3036_v10  ;;  %v3038_v56 = vadd.f32 1.0, %v4215_v33  ;;  %v1886_v35 = vpop.permute.xlu1 %1885 }
 0xb33   : > { %v4219_v24 = vpop.eup %4218  ;;  %4238 = vrcp.f32 %v3037_v6  ;;  %v2496_v1 = vpop.permute.xlu0 %2495  ;;  %v3656_v10 = vadd.f32 %v1886_v35, %v1275_v20 }
 0xb34   : > { %v4221_v9 = vpop.eup %4220  ;;  %4240 = vrcp.f32 %v3038_v56  ;;  %v3055_v16 = vmul.f32 %v4219_v24, %v4203_v57 }
 0xb35   : > { %v4223_v54 = vpop.eup %4222  ;;  %v3056_v47 = vmul.f32 %v4221_v9, %v4205_v44 }
 0xb36   : > { %v4225_v49 = vpop.eup %4224  ;;  %v3057_v30 = vmul.f32 %v4223_v54, %v4207_v32  ;;  %v2488_v60 = vpop.permute.xlu1 %2487 }
 0xb37   : > { %v4227_v17 = vpop.eup %4226  ;;  %v3058_v25 = vmul.f32 %v4225_v49, %v4217_v19  ;;  %v3641_v32 = vadd.f32 %v3640_v42, %v2488_v60  ;;  %v3094_v63 = vpop.permute.xlu0 %3093 }
 0xb38   : > { %v4229_v27 = vpop.eup %4228  ;;  %v3072_v28 = vpack.c.bf16 %v3057_v30, %v3055_v16 }
 0xb39   : > { %v4231_v50 = vpop.eup %4230  ;;  %v3073_v12 = vpack.c.bf16 %v3058_v25, %v3056_v47  ;;  %v3642_v6 = vadd.f32 %v3641_v32, %v3094_v63  ;;  %v3657_v25 = vadd.f32 %v3656_v10, %v2496_v1 }
 0xb3a   : > { %v4233_v46 = vpop.eup %4232  ;;  %v2492_v34 = vpop.permute.xlu1 %2491 }
 0xb3b   : > { %v4235_v15 = vpop.eup %4234  ;;  %3136 = vmatprep.subr.bf16.mxu1 %v3073_v12  ;;  %v3649_v16 = vadd.f32 %v3648_v0, %v2492_v34 }
 0xb3c   : > { %v4237_v8 = vpop.eup %4236  ;;  %3137 = vmatpush1.bf16.msra.mxu1 %v3072_v28  ;;  %v3059_v51 = vmul.f32 %v4235_v15, %v4227_v17 }
 0xb3d   : > { %v4239_v37 = vpop.eup %4238  ;;  %v3060_v41 = vmul.f32 %v4237_v8, %v4229_v27 }
 0xb3e   : > { %v4241_v22 = vpop.eup %4240  ;;  %v3061_v53 = vmul.f32 %v4239_v37, %v4231_v50  ;;  %v3090_v44 = vpop.permute.xlu1 %3089 }
 0xb3f   : > { %v3062_v43 = vmul.f32 %v4241_v22, %v4233_v46  ;;  %v3634_v38 = vadd.f32 %v3633_v31, %v3090_v44 }
 0xb40   : > { %v3074_v26 = vpack.c.bf16 %v3061_v53, %v3059_v51 }
 0xb41   : > { %v3075_v7 = vpack.c.bf16 %v3062_v43, %v3060_v41 }
 0xb42   : > { %v3098_v9 = vpop.permute.xlu1 %3097 }
 0xb43   : > { %3138 = vmatprep.subr.bf16.mxu1 %v3075_v7  ;;  %v3650_v12 = vadd.f32 %v3649_v16, %v3098_v9 }
 0xb44   : > { %3139 = vmatpush1.bf16.msra.mxu1 %v3074_v26 }
 0xb46   : > { %v3102_v50 = vpop.permute.xlu1 %3101 }
 0xb47   : > { %3522 = vmatmul.mubr.msk.bf16.vlgmr.msra.gmra.mrb[64].mxu1 %vm1297_vm5, %v4046_v45  ;;  %v3658_v15 = vadd.f32 %v3657_v25, %v3102_v50 }
 0xb48   : > { %3174 = vmatprep.mubr.bf16.mxu1 %v5592_v4 }
 0xb4f   : > { %3523 = vmatmul.mubr.msk.bf16.gmra.mrb[68].mxu1 %vm1297_vm5, %v4047_v13 }
 0xb50   : > { %3180 = vmatprep.mubr.bf16.mxu1 %v5592_v4 }
 0xb57   : > { %3524 = vmatmul.mubr.msk.bf16.gmra.mrb[40].mxu1 %vm1297_vm5, %v4048_v14 }
 0xb58   : > { %3190 = vmatprep.mubr.bf16.mxu1 %v5592_v4 }
 0xb5f   : > { %3525 = vmatmul.mubr.msk.bf16.gmra.mrb[44].mxu1 %vm1297_vm5, %v4049_v55 }
 0xc1a   : > { %v3170_v61 = vpop.f32.mrb[64].mxu1 }
 0xc1b   : > { %v3171_v39 = vpop.f32.mrb[65].mxu1 }
 0xc1c   : > { %v3172_v2 = vpop.f32.mrb[66].mxu1 }
 0xc1d   : > { %v3173_v4 = vpop.f32.mrb[67].mxu1 }
 0xc22   : > { %v3176_v48 = vpop.f32.mrb[68].mxu1 }
 0xc23   : > { %v3177_v59 = vpop.f32.mrb[69].mxu1 }
 0xc24   : > { %v3178_v11 = vpop.f32.mrb[70].mxu1 }
 0xc25   : > { %v3179_v57 = vpop.f32.mrb[71].mxu1 }
 0xc2a   : > { %v3182_v52 = vpop.f32.mrb[40].mxu1 }
 0xc2b   : > { %v3635_v33 = vadd.f32 %v3634_v38, %v3182_v52  ;;  %v3184_v19 = vpop.f32.mrb[41].mxu1 }
 0xc2c   : > { %v3639_v56 = vadd.f32 %v3634_v38, %v3184_v19  ;;  %v3186_v24 = vpop.f32.mrb[42].mxu1 }
 0xc2d   : > { %v3209_v54 = vmul.f32 %v3635_v33, %v4889_v18  ;;  %v3643_v47 = vadd.f32 %v3642_v6, %v3186_v24  ;;  %v3188_v49 = vpop.f32.mrb[43].mxu1 }
 0xc2e   : > { %v3210_v30 = vmul.f32 %v3639_v56, %v4891_v21  ;;  %v3647_v17 = vadd.f32 %v3642_v6, %v3188_v49 }
 0xc2f   : > { %3217 = vst [vmem:[%s351_s26] sm:$0xff] %v3209_v54  ;;  %v3211_v27 = vmul.f32 %v3643_v47, %v4889_v18 }
 0xc30   : > { %3218 = vst [vmem:[%s351_s26 + $0x8] sm:$0xff] %v3210_v30  ;;  %v3212_v28 = vmul.f32 %v3647_v17, %v4891_v21 }
 0xc31   : > { %3219 = vst [vmem:[%s351_s26 + $0x10] sm:$0xff] %v3211_v27 }
 0xc32   : > { %3220 = vst [vmem:[%s351_s26 + $0x18] sm:$0xff] %v3212_v28  ;;  %v3192_v46 = vpop.f32.mrb[44].mxu1 }
 0xc33   : > { %v3651_v8 = vadd.f32 %v3650_v12, %v3192_v46  ;;  %v3194_v51 = vpop.f32.mrb[45].mxu1 }
 0xc34   : > { %v3655_v37 = vadd.f32 %v3650_v12, %v3194_v51  ;;  %v3196_v41 = vpop.f32.mrb[46].mxu1 }
 0xc35   : > { %v3213_v22 = vmul.f32 %v3651_v8, %v4889_v18  ;;  %v3659_v53 = vadd.f32 %v3658_v15, %v3196_v41  ;;  %v3198_v43 = vpop.f32.mrb[47].mxu1 }
 0xc36   : > { %v3214_v26 = vmul.f32 %v3655_v37, %v4891_v21  ;;  %v3663_v7 = vadd.f32 %v3658_v15, %v3198_v43 }
 0xc37   : > { %3221 = vst [vmem:[%s351_s26 + $0x20] sm:$0xff] %v3213_v22  ;;  %v3215_v45 = vmul.f32 %v3659_v53, %v4889_v18 }
 0xc38   : > { %3222 = vst [vmem:[%s351_s26 + $0x28] sm:$0xff] %v3214_v26  ;;  %v3216_v13 = vmul.f32 %v3663_v7, %v4891_v21 }
 0xc39   : > { %3223 = vst [vmem:[%s351_s26 + $0x30] sm:$0xff] %v3215_v45 }
 0xc3a   : > { %3224 = vst [vmem:[%s351_s26 + $0x38] sm:$0xff] %v3216_v13 }
 0xc3b   : > { %4313 = shalt.err (!%p4310_p4)
}
 0xc3c   : > { %s4314_s19 = scalar_lea.hbm %s5508_s9, 1024  ;;  %s4318_s10 = scalar_lea.hbm %s5561_s8, 2048 }
 0xc3d   : > { %p4315_p5 = scmp.ne.s32.totalorder %s5508_s9, %s4314_s19  ;;  %p4319_p1 = scmp.lt.u32.totalorder %s5508_s9, %s5561_s8 }
 0xc3e   : > { %p4320_p3 = scmp.lt.u32.totalorder %s4318_s10, %s4314_s19  ;;  %p4322_p6 = scmp.lt.u32.totalorder %s4314_s19, %s5508_s9 }
 0xc3f   : > { %p4316_p7 = pnand %p4315_p5, %p5615_p12 }
 0xc40   : > { %p4321_p11 = por %p4320_p3, %p4319_p1 }
 0xc41   : > { %p4317_p9 = pneg %p4316_p7 }
 0xc42   : > { %p4323_p13 = por %p4322_p6, %p4321_p11 }
 0xc44   : > { %p4324_p8 = pnand %p4323_p13, %p4317_p9 }
 0xc46   : > { %4327 = shalt.err (!%p4324_p8)
}
 0xc47   : > { %s4385_s21 = smov 256   ;;  %s4386_s20 = smov 16  }
 0xc48   : > { %3722 = dma.vmem_to_hbm [thread:$0]  (%p5615_p12), %s5501_s23, 1024, %s5508_s9, %s3226_s13, %s4385_s21, %s4385_s21, %s4386_s20  }
 0xc49 PF: > { %s3254_s16 = sand.u32 1, %s4354_s27   ;;  %p5616_p10 = scmp.ne.s32.totalorder %s5568_s18, 0 }
 0xc4a   : > { %p5617_p0 = scmp.ge.s32.totalorder %s4366_s30, 2  ;;  %s3255_s15 = scalar_lea.sflag [#allocation5], %s3254_s16 }
 0xc4c   : > { %p3729_p2 = pnand %p5617_p0, %p5616_p10 }
 0xc4e   : > { %4349 = dma.done.wait (!%p3729_p2), %s3255_s15, 1024  }
 0xc4f   : > { %4351 = vsyncadd (!%p3729_p2), %s3255_s15, 4294966272  ;;  %p21_p4 = scmp.ge.s32.totalorder %s4457_s11, 4   ;;  %s5618_s27 = smov %s4358_s28 }
 0xc50   : > { %s5619_s28 = smov %s4362_s29  ;;  %s5620_s29 = smov %s4469_s14 }
 0xc51   : > { %s5621_s30 = smov %s4457_s11  ;;  %23 = sbr.rel (!%p21_p4) target bundleno = 5 (0x5), region = 109 }
 0xc58   :  { %3260 = vsyncpa [#allocation4], 1 }
 0xc59   :  { %3262 = vsyncpa [#allocation4 + $0x1], 1 }
 0xc5a   :  { %3263 = vsyncpa [#allocation5], 1 }
 0xc5b   :  { %3265 = vsyncpa [#allocation5 + $0x1], 1 }

</bundles_post_ra>
